<compile_context>
chip_gen: v7x
topology: tpu7x:2x2x1
jax: 0.10.0
libtpu: 0.0.40
codegen_flags: <defaults>
</compile_context>

<pallas_src>
import functools
import math

import jax
import jax.numpy as jnp
from jax import lax
from jax.experimental import pallas as pl
from jax.experimental.pallas import tpu as pltpu

_EPS = 1e-5
# Max-pool padding value.  The pool path stays in f32 (this would overflow to
# -inf if the pool were ever switched to bf16 operands — do not narrow it).
_NEG_SENTINEL = -3.0e38


# --------------------------------------------------------------------------- #
# in-kernel helpers (traced inside the single fused Pallas kernel)
# --------------------------------------------------------------------------- #
def _bn_relu(x, gamma, beta):
    """Training-mode BatchNorm1d (biased batch stats over (N, L)) + ReLU.

    x: (N, C, L) f32; gamma/beta broadcastable to (1, C, 1).
    Lane-axis reduction first, then across the batch axis (both in f32).
    """
    n, _, l = x.shape
    inv = 1.0 / float(n * l)
    mean = jnp.sum(jnp.sum(x, axis=2, keepdims=True), axis=0, keepdims=True) * inv
    d = x - mean
    var = jnp.sum(jnp.sum(d * d, axis=2, keepdims=True), axis=0, keepdims=True) * inv
    h = d * lax.rsqrt(var + _EPS) * gamma + beta
    return jnp.maximum(h, 0.0)


def _shift_l(x, d, fill):
    """y[..., l] = x[..., l + d]; positions outside [0, L) get `fill`.

    Pure static slice + lane concat.  Because L is its own (lane) axis there
    are no batch-boundary leaks, hence no validity masks anywhere.
    """
    n, c, l = x.shape
    if d == 0:
        return x
    if abs(d) >= l:
        return jnp.full((n, c, l), fill, x.dtype)
    pad_blk = jnp.full((n, c, abs(d)), fill, x.dtype)
    if d > 0:
        return jnp.concatenate([x[..., d:], pad_blk], axis=-1)
    return jnp.concatenate([pad_blk, x[..., : l + d]], axis=-1)


def _cmul(x, w):
    """Channel contraction: out[n, o, l] = sum_c w[o, c] * x[n, c, l].

    bf16 MXU operands, f32 accumulation; lowers to one canonical batched
    matmul (batch n, contract c) with no operand/output transposes.
    """
    n = x.shape[0]
    wb = jnp.broadcast_to(w.astype(jnp.bfloat16)[None], (n,) + w.shape)
    return jnp.einsum("noc,ncl->nol", wb, x.astype(jnp.bfloat16),
                      preferred_element_type=jnp.float32)


def _conv3(h, w3):
    """1-D conv, kernel=3, stride=1, padding=1, no bias.  w3: (3, Cout, Cin).

    Three K=C dots summed into one f32 accumulator (no im2col lane concat).
    """
    acc = _cmul(_shift_l(h, -1, 0.0), w3[0])
    acc = acc + _cmul(h, w3[1])
    acc = acc + _cmul(_shift_l(h, +1, 0.0), w3[2])
    return acc


def _select_cols(x, sel):
    """Exact column selection along L.  x: (N, C, Lin), sel: (Lin, Lout) 0/1.

    Tiny per-level batched matmul built in-kernel (replaces the previous
    quadratic (N*L, N*L) one-hot HBM operands).  precision=HIGHEST so the
    selection does not round activations through bf16.
    """
    n = x.shape[0]
    selb = jnp.broadcast_to(sel[None], (n,) + sel.shape)
    return jnp.einsum("ncl,nlo->nco", x, selb,
                      preferred_element_type=jnp.float32,
                      precision=lax.Precision.HIGHEST)


def _max_pool(x, ksize, pad):
    """max_pool1d(kernel_size=ksize, stride=2, padding=pad) along L."""
    _, _, l = x.shape
    l_out = (l + 2 * pad - ksize) // 2 + 1
    wmax = None
    for j in range(ksize):
        s = _shift_l(x, j - pad, _NEG_SENTINEL)
        wmax = s if wmax is None else jnp.maximum(wmax, s)
    rows = lax.broadcasted_iota(jnp.int32, (l, l_out), 0)
    cols = lax.broadcasted_iota(jnp.int32, (l, l_out), 1)
    # TODO(synk): the kernel_size == 2*padding corner case (last window fully
    # in padding) is clamped to the last valid position rather than exactly
    # reproducing PyTorch; not hit for (ksize=3, pad=1).
    sel = (rows == jnp.minimum(2 * cols, l - 1)).astype(jnp.float32)
    return _select_cols(wmax, sel)


def _upsample_nearest(x, l_out):
    """F.interpolate(x, size=l_out) (nearest) along L."""
    _, _, l_in = x.shape
    if l_out == l_in:
        return x
    m_i = lax.broadcasted_iota(jnp.int32, (l_in, l_out), 0)
    o_i = lax.broadcasted_iota(jnp.int32, (l_in, l_out), 1)
    # m == floor(o * l_in / l_out)  <=>  m*l_out <= o*l_in < (m+1)*l_out
    sel = jnp.logical_and(m_i * l_out <= o_i * l_in,
                          o_i * l_in < (m_i + 1) * l_out).astype(jnp.float32)
    return _select_cols(x, sel)


# --------------------------------------------------------------------------- #
# the single fused kernel
# --------------------------------------------------------------------------- #
def _attention_kernel(x_ref, bn_ref, w3_ref, w1_ref, sbn_ref, sw_ref, sb_ref,
                      o_ref, *, ksize, pad, uidx):
    def unit(h, u):
        """PreActResidualUnit (stride=1): BN-ReLU-Conv3 x2, + 1x1 shortcut."""
        bnu = bn_ref[u]                 # (4, C, 1): g0, b0, g1, b1
        w3u = w3_ref[u]                 # (6, C, C): two convs x 3 taps (Cout, Cin)
        w1u = w1_ref[u]                 # (C, C) 1x1 shortcut
        r = _bn_relu(h, bnu[0:1], bnu[1:2])
        r = _conv3(r, w3u[0:3])
        r = _bn_relu(r, bnu[2:3], bnu[3:4])
        r = _conv3(r, w3u[3:6])
        return r + _cmul(h, w1u)

    def stack(h, name):
        lo, hi = uidx[name]
        return lax.fori_loop(lo, hi, lambda u, hh: unit(hh, u), h)

    x = stack(x_ref[...], "pre")
    l0 = x.shape[2]

    x_t = stack(x, "trunk")

    x_s = _max_pool(x, ksize, pad)
    x_s = stack(x_s, "rd1")
    l1 = x_s.shape[2]
    shortcut_long = stack(x_s, "scl")

    x_s = _max_pool(x_s, ksize, pad)
    x_s = stack(x_s, "rd2")
    l2 = x_s.shape[2]
    shortcut_short = stack(x_s, "rd3")       # PyTorch forward reuses soft_resdown3

    x_s = _max_pool(x_s, ksize, pad)
    x_s = stack(x_s, "rd3")
    x_s = stack(x_s, "ru2")

    x_s = _upsample_nearest(x_s, l2) + shortcut_short
    x_s = stack(x_s, "ru3")

    x_s = _upsample_nearest(x_s, l1) + shortcut_long
    x_s = stack(x_s, "ru4")

    x_s = _upsample_nearest(x_s, l0)

    # sigmoid gate: BN-ReLU-Conv1x1(+b) - BN-ReLU-Conv1x1(+b) - Sigmoid
    sb0 = sbn_ref[0]                         # (2, C, 1): gamma, beta
    h = _bn_relu(x_s, sb0[0:1], sb0[1:2])
    h = _cmul(h, sw_ref[0]) + sb_ref[0]
    sb1 = sbn_ref[1]
    h = _bn_relu(h, sb1[0:1], sb1[1:2])
    h = _cmul(h, sw_ref[1]) + sb_ref[1]
    gate = jax.nn.sigmoid(h)

    out = (1.0 + gate) * x_t
    out = stack(out, "last")
    o_ref[...] = out.astype(o_ref.dtype)


# --------------------------------------------------------------------------- #
# host-side helpers
# --------------------------------------------------------------------------- #
def _zero_map(nd):
    return lambda i: (0,) * nd


# --------------------------------------------------------------------------- #
# parameter init (deterministic, synthetic), packed per-unit layout
# --------------------------------------------------------------------------- #
def init_attention_params(key, c, p=1, t=2, r=1):
    # Unit order; self.shortcut_short in the PyTorch __init__ is never used in
    # forward (it reuses soft_resdown3), so no params are created for it.
    order = [("pre", p), ("trunk", t), ("rd1", r), ("rd2", r), ("rd3", r),
             ("ru2", r), ("ru3", r), ("ru4", r), ("scl", 1), ("last", p)]
    uidx, n = {}, 0
    for name, cnt in order:
        uidx[name] = (n, n + cnt)
        n += cnt
    nu = n

    ks = jax.random.split(key, 8)
    f = jnp.float32
    s3 = 1.0 / math.sqrt(3 * c)
    s1 = 1.0 / math.sqrt(c)

    gam = 1.0 + 0.1 * jax.random.normal(ks[0], (nu, 2, c, 1), f)
    bet = 0.1 * jax.random.normal(ks[1], (nu, 2, c, 1), f)
    bn = jnp.concatenate([gam[:, 0:1], bet[:, 0:1], gam[:, 1:2], bet[:, 1:2]],
                         axis=1)                                   # (nu, 4, c, 1)

    w3 = s3 * jax.random.normal(ks[2], (nu, 6, c, c), f)   # 2 convs x 3 taps, (Cout, Cin)
    w1 = s1 * jax.random.normal(ks[3], (nu, c, c), f)      # 1x1 shortcut, (Cout, Cin)

    sgam = 1.0 + 0.1 * jax.random.normal(ks[4], (2, 1, c, 1), f)
    sbet = 0.1 * jax.random.normal(ks[5], (2, 1, c, 1), f)
    sbn = jnp.concatenate([sgam, sbet], axis=1)                    # (2, 2, c, 1)
    sw = s1 * jax.random.normal(ks[6], (2, c, c), f)
    sb = s1 * jax.random.normal(ks[7], (2, c, 1), f)

    params = dict(bn=bn, w3=w3, w1=w1, sbn=sbn, sw=sw, sb=sb)
    return params, uidx


# --------------------------------------------------------------------------- #
# full AttentionModule1 forward (single pallas_call, PyTorch NCL layout)
# --------------------------------------------------------------------------- #
def attention_module1_forward(x_ncl, params, *, kernel_size, padding, unit_index):
    """x_ncl: (N, C, L) float32 (PyTorch layout). Returns (N, C, L).

    The kernel works directly in the NCL layout (L on the lane axis), so there
    are no wrapper-side transposes: one HBM read of the inputs, one HBM write
    of the output.
    """
    x = x_ncl.astype(jnp.float32)
    n, c, l0 = x.shape

    args = (x, params["bn"], params["w3"], params["w1"],
            params["sbn"], params["sw"], params["sb"])

    kern = functools.partial(_attention_kernel, ksize=kernel_size,
                             pad=padding, uidx=unit_index)

    return pl.pallas_call(
        kern,
        grid=(1,),
        in_specs=[pl.BlockSpec(a.shape, _zero_map(a.ndim)) for a in args],
        out_specs=pl.BlockSpec((n, c, l0), _zero_map(3)),
        out_shape=jax.ShapeDtypeStruct((n, c, l0), jnp.float32),
        compiler_params=pltpu.CompilerParams(
            dimension_semantics=("arbitrary",),
            # Real footprint at these shapes is << 1 MiB; 32 MiB stays within
            # the scoped-VMEM budget on v5e / v6e / v7x alike.
            vmem_limit_bytes=32 * 1024 * 1024),
    )(*args)


# --------------------------------------------------------------------------- #
if __name__ == "__main__":
    key = jax.random.PRNGKey(0)
    kx, kp = jax.random.split(key)

    N, C, L = 2, 4, 16
    KERNEL_SIZE, PADDING = 3, 1

    x = jax.random.normal(kx, (N, C, L), jnp.float32)          # PyTorch NCL layout
    params, unit_index = init_attention_params(kp, C, p=1, t=2, r=1)

    fwd = jax.jit(functools.partial(
        attention_module1_forward,
        kernel_size=KERNEL_SIZE, padding=PADDING, unit_index=unit_index))

    out = jax.block_until_ready(fwd(x, params))

    assert out.shape == (N, C, L), out.shape
    assert bool(jnp.all(jnp.isfinite(out)))
    print("KERNEL_OK")
</pallas_src>

<mosaic_0001>
module attributes {stable_mosaic.version = 11 : i64} {
  func.func @_attention_kernel(%arg0: i32, %arg1: memref<2x4x16xf32, #tpu.memory_space<vmem>>, %arg2: memref<11x4x4x1xf32, #tpu.memory_space<vmem>>, %arg3: memref<11x6x4x4xf32, #tpu.memory_space<vmem>>, %arg4: memref<11x4x4xf32, #tpu.memory_space<vmem>>, %arg5: memref<2x2x4x1xf32, #tpu.memory_space<vmem>>, %arg6: memref<2x4x4xf32, #tpu.memory_space<vmem>>, %arg7: memref<2x4x1xf32, #tpu.memory_space<vmem>>, %arg8: memref<2x4x16xf32, #tpu.memory_space<vmem>>) attributes {dimension_semantics = [#tpu.dimension_semantics<arbitrary>], iteration_bounds = array<i64: 1>, scalar_prefetch = 0 : i64, scratch_operands = 0 : i64, tpu.core_type = #tpu.core_type<tc>, window_params = [{pipeline_mode = #tpu.pipeline_mode<synchronous>, transform_indices = @transform_0, window_bounds = array<i64: 2, 4, 16>}, {pipeline_mode = #tpu.pipeline_mode<synchronous>, transform_indices = @transform_1, window_bounds = array<i64: 11, 4, 4, 1>}, {pipeline_mode = #tpu.pipeline_mode<synchronous>, transform_indices = @transform_2, window_bounds = array<i64: 11, 6, 4, 4>}, {pipeline_mode = #tpu.pipeline_mode<synchronous>, transform_indices = @transform_3, window_bounds = array<i64: 11, 4, 4>}, {pipeline_mode = #tpu.pipeline_mode<synchronous>, transform_indices = @transform_4, window_bounds = array<i64: 2, 2, 4, 1>}, {pipeline_mode = #tpu.pipeline_mode<synchronous>, transform_indices = @transform_5, window_bounds = array<i64: 2, 4, 4>}, {pipeline_mode = #tpu.pipeline_mode<synchronous>, transform_indices = @transform_6, window_bounds = array<i64: 2, 4, 1>}, {pipeline_mode = #tpu.pipeline_mode<synchronous>, transform_indices = @transform_7, window_bounds = array<i64: 2, 4, 16>}]} {
    %c0 = arith.constant 0 : index
    %c0_0 = arith.constant 0 : index
    %c0_1 = arith.constant 0 : index
    %0 = vector.load %arg1[%c0, %c0_0, %c0_1] : memref<2x4x16xf32, #tpu.memory_space<vmem>>, vector<2x4x16xf32>
    %c0_i32 = arith.constant 0 : i32
    %1 = arith.index_cast %c0_i32 : i32 to index
    %c0_2 = arith.constant 0 : index
    %c0_3 = arith.constant 0 : index
    %c0_4 = arith.constant 0 : index
    %2 = vector.load %arg2[%1, %c0_2, %c0_3, %c0_4] : memref<11x4x4x1xf32, #tpu.memory_space<vmem>>, vector<1x4x4x1xf32>
    %3 = vector.shape_cast %2 : vector<1x4x4x1xf32> to vector<4x4x1xf32>
    %4 = arith.index_cast %c0_i32 : i32 to index
    %c0_5 = arith.constant 0 : index
    %c0_6 = arith.constant 0 : index
    %c0_7 = arith.constant 0 : index
    %5 = vector.load %arg3[%4, %c0_5, %c0_6, %c0_7] : memref<11x6x4x4xf32, #tpu.memory_space<vmem>>, vector<1x6x4x4xf32>
    %6 = vector.shape_cast %5 : vector<1x6x4x4xf32> to vector<6x4x4xf32>
    %7 = arith.index_cast %c0_i32 : i32 to index
    %c0_8 = arith.constant 0 : index
    %c0_9 = arith.constant 0 : index
    %8 = vector.load %arg4[%7, %c0_8, %c0_9] : memref<11x4x4xf32, #tpu.memory_space<vmem>>, vector<1x4x4xf32>
    %9 = vector.shape_cast %8 : vector<1x4x4xf32> to vector<4x4xf32>
    %10 = vector.extract_strided_slice %3 {offsets = [0, 0, 0], sizes = [1, 4, 1], strides = [1, 1, 1]} : vector<4x4x1xf32> to vector<1x4x1xf32>
    %11 = vector.extract_strided_slice %3 {offsets = [1, 0, 0], sizes = [1, 4, 1], strides = [1, 1, 1]} : vector<4x4x1xf32> to vector<1x4x1xf32>
    %cst = arith.constant dense<0.000000e+00> : vector<2x4xf32>
    %12 = vector.multi_reduction <add>, %0, %cst [2] : vector<2x4x16xf32> to vector<2x4xf32>
    %13 = vector.shape_cast %12 : vector<2x4xf32> to vector<2x4x1xf32>
    %cst_10 = arith.constant dense<0.000000e+00> : vector<4x1xf32>
    %14 = vector.multi_reduction <add>, %13, %cst_10 [0] : vector<2x4x1xf32> to vector<4x1xf32>
    %15 = vector.shape_cast %14 : vector<4x1xf32> to vector<1x4x1xf32>
    %cst_11 = arith.constant 3.125000e-02 : f32
    %16 = vector.broadcast %cst_11 : f32 to vector<1x4x1xf32>
    %17 = arith.mulf %15, %16 : vector<1x4x1xf32>
    %18 = vector.broadcast %17 : vector<1x4x1xf32> to vector<2x4x16xf32>
    %19 = arith.subf %0, %18 : vector<2x4x16xf32>
    %20 = arith.mulf %19, %19 : vector<2x4x16xf32>
    %cst_12 = arith.constant dense<0.000000e+00> : vector<2x4xf32>
    %21 = vector.multi_reduction <add>, %20, %cst_12 [2] : vector<2x4x16xf32> to vector<2x4xf32>
    %22 = vector.shape_cast %21 : vector<2x4xf32> to vector<2x4x1xf32>
    %cst_13 = arith.constant dense<0.000000e+00> : vector<4x1xf32>
    %23 = vector.multi_reduction <add>, %22, %cst_13 [0] : vector<2x4x1xf32> to vector<4x1xf32>
    %24 = vector.shape_cast %23 : vector<4x1xf32> to vector<1x4x1xf32>
    %cst_14 = arith.constant 3.125000e-02 : f32
    %25 = vector.broadcast %cst_14 : f32 to vector<1x4x1xf32>
    %26 = arith.mulf %24, %25 : vector<1x4x1xf32>
    %cst_15 = arith.constant 9.99999974E-6 : f32
    %27 = vector.broadcast %cst_15 : f32 to vector<1x4x1xf32>
    %28 = arith.addf %26, %27 : vector<1x4x1xf32>
    %29 = math.rsqrt %28 : vector<1x4x1xf32>
    %30 = vector.broadcast %29 : vector<1x4x1xf32> to vector<2x4x16xf32>
    %31 = arith.mulf %19, %30 : vector<2x4x16xf32>
    %32 = vector.broadcast %10 : vector<1x4x1xf32> to vector<2x4x16xf32>
    %33 = arith.mulf %31, %32 : vector<2x4x16xf32>
    %34 = vector.broadcast %11 : vector<1x4x1xf32> to vector<2x4x16xf32>
    %35 = arith.addf %33, %34 : vector<2x4x16xf32>
    %cst_16 = arith.constant 0.000000e+00 : f32
    %36 = vector.broadcast %cst_16 : f32 to vector<2x4x16xf32>
    %37 = arith.maximumf %35, %36 : vector<2x4x16xf32>
    %38 = vector.extract_strided_slice %6 {offsets = [0, 0, 0], sizes = [3, 4, 4], strides = [1, 1, 1]} : vector<6x4x4xf32> to vector<3x4x4xf32>
    %cst_17 = arith.constant 0.000000e+00 : f32
    %39 = vector.broadcast %cst_17 : f32 to vector<2x4x1xf32>
    %40 = vector.extract_strided_slice %37 {offsets = [0, 0, 0], sizes = [2, 4, 15], strides = [1, 1, 1]} : vector<2x4x16xf32> to vector<2x4x15xf32>
    %41 = tpu.concatenate %39, %40 in 2 : vector<2x4x1xf32>, vector<2x4x15xf32> -> vector<2x4x16xf32>
    %42 = vector.extract_strided_slice %38 {offsets = [0, 0, 0], sizes = [1, 4, 4], strides = [1, 1, 1]} : vector<3x4x4xf32> to vector<1x4x4xf32>
    %43 = vector.shape_cast %42 : vector<1x4x4xf32> to vector<4x4xf32>
    %44 = arith.truncf %43 : vector<4x4xf32> to vector<4x4xbf16>
    %45 = vector.shape_cast %44 : vector<4x4xbf16> to vector<1x4x4xbf16>
    %46 = vector.shape_cast %45 : vector<1x4x4xbf16> to vector<1x4x4xbf16>
    %47 = vector.broadcast %46 : vector<1x4x4xbf16> to vector<2x4x4xbf16>
    %48 = arith.truncf %41 : vector<2x4x16xf32> to vector<2x4x16xbf16>
    "tpu.trace_start"() <{level = 10 : i32, message = "noc,ncl->nol"}> : () -> ()
    %cst_18 = arith.constant dense<0.000000e+00> : vector<2x4x16xf32>
    %49 = tpu.matmul %47, %48, %cst_18 {dimension_numbers = #tpu.dot_dimension_numbers<[2], [1], [1], [2], [0, 0, 0, 1, 1, 2], [0], [0]>} : vector<2x4x4xbf16>, vector<2x4x16xbf16>, vector<2x4x16xf32> -> vector<2x4x16xf32>
    "tpu.trace_stop"() : () -> ()
    %50 = vector.extract_strided_slice %38 {offsets = [1, 0, 0], sizes = [1, 4, 4], strides = [1, 1, 1]} : vector<3x4x4xf32> to vector<1x4x4xf32>
    %51 = vector.shape_cast %50 : vector<1x4x4xf32> to vector<4x4xf32>
    %52 = arith.truncf %51 : vector<4x4xf32> to vector<4x4xbf16>
    %53 = vector.shape_cast %52 : vector<4x4xbf16> to vector<1x4x4xbf16>
    %54 = vector.shape_cast %53 : vector<1x4x4xbf16> to vector<1x4x4xbf16>
    %55 = vector.broadcast %54 : vector<1x4x4xbf16> to vector<2x4x4xbf16>
    %56 = arith.truncf %37 : vector<2x4x16xf32> to vector<2x4x16xbf16>
    "tpu.trace_start"() <{level = 10 : i32, message = "noc,ncl->nol"}> : () -> ()
    %cst_19 = arith.constant dense<0.000000e+00> : vector<2x4x16xf32>
    %57 = tpu.matmul %55, %56, %cst_19 {dimension_numbers = #tpu.dot_dimension_numbers<[2], [1], [1], [2], [0, 0, 0, 1, 1, 2], [0], [0]>} : vector<2x4x4xbf16>, vector<2x4x16xbf16>, vector<2x4x16xf32> -> vector<2x4x16xf32>
    "tpu.trace_stop"() : () -> ()
    %58 = arith.addf %49, %57 : vector<2x4x16xf32>
    %cst_20 = arith.constant 0.000000e+00 : f32
    %59 = vector.broadcast %cst_20 : f32 to vector<2x4x1xf32>
    %60 = vector.extract_strided_slice %37 {offsets = [0, 0, 1], sizes = [2, 4, 15], strides = [1, 1, 1]} : vector<2x4x16xf32> to vector<2x4x15xf32>
    %61 = tpu.concatenate %60, %59 in 2 : vector<2x4x15xf32>, vector<2x4x1xf32> -> vector<2x4x16xf32>
    %62 = vector.extract_strided_slice %38 {offsets = [2, 0, 0], sizes = [1, 4, 4], strides = [1, 1, 1]} : vector<3x4x4xf32> to vector<1x4x4xf32>
    %63 = vector.shape_cast %62 : vector<1x4x4xf32> to vector<4x4xf32>
    %64 = arith.truncf %63 : vector<4x4xf32> to vector<4x4xbf16>
    %65 = vector.shape_cast %64 : vector<4x4xbf16> to vector<1x4x4xbf16>
    %66 = vector.shape_cast %65 : vector<1x4x4xbf16> to vector<1x4x4xbf16>
    %67 = vector.broadcast %66 : vector<1x4x4xbf16> to vector<2x4x4xbf16>
    %68 = arith.truncf %61 : vector<2x4x16xf32> to vector<2x4x16xbf16>
    "tpu.trace_start"() <{level = 10 : i32, message = "noc,ncl->nol"}> : () -> ()
    %cst_21 = arith.constant dense<0.000000e+00> : vector<2x4x16xf32>
    %69 = tpu.matmul %67, %68, %cst_21 {dimension_numbers = #tpu.dot_dimension_numbers<[2], [1], [1], [2], [0, 0, 0, 1, 1, 2], [0], [0]>} : vector<2x4x4xbf16>, vector<2x4x16xbf16>, vector<2x4x16xf32> -> vector<2x4x16xf32>
    "tpu.trace_stop"() : () -> ()
    %70 = arith.addf %58, %69 : vector<2x4x16xf32>
    %71 = vector.extract_strided_slice %3 {offsets = [2, 0, 0], sizes = [1, 4, 1], strides = [1, 1, 1]} : vector<4x4x1xf32> to vector<1x4x1xf32>
    %72 = vector.extract_strided_slice %3 {offsets = [3, 0, 0], sizes = [1, 4, 1], strides = [1, 1, 1]} : vector<4x4x1xf32> to vector<1x4x1xf32>
    %cst_22 = arith.constant dense<0.000000e+00> : vector<2x4xf32>
    %73 = vector.multi_reduction <add>, %70, %cst_22 [2] : vector<2x4x16xf32> to vector<2x4xf32>
    %74 = vector.shape_cast %73 : vector<2x4xf32> to vector<2x4x1xf32>
    %cst_23 = arith.constant dense<0.000000e+00> : vector<4x1xf32>
    %75 = vector.multi_reduction <add>, %74, %cst_23 [0] : vector<2x4x1xf32> to vector<4x1xf32>
    %76 = vector.shape_cast %75 : vector<4x1xf32> to vector<1x4x1xf32>
    %cst_24 = arith.constant 3.125000e-02 : f32
    %77 = vector.broadcast %cst_24 : f32 to vector<1x4x1xf32>
    %78 = arith.mulf %76, %77 : vector<1x4x1xf32>
    %79 = vector.broadcast %78 : vector<1x4x1xf32> to vector<2x4x16xf32>
    %80 = arith.subf %70, %79 : vector<2x4x16xf32>
    %81 = arith.mulf %80, %80 : vector<2x4x16xf32>
    %cst_25 = arith.constant dense<0.000000e+00> : vector<2x4xf32>
    %82 = vector.multi_reduction <add>, %81, %cst_25 [2] : vector<2x4x16xf32> to vector<2x4xf32>
    %83 = vector.shape_cast %82 : vector<2x4xf32> to vector<2x4x1xf32>
    %cst_26 = arith.constant dense<0.000000e+00> : vector<4x1xf32>
    %84 = vector.multi_reduction <add>, %83, %cst_26 [0] : vector<2x4x1xf32> to vector<4x1xf32>
    %85 = vector.shape_cast %84 : vector<4x1xf32> to vector<1x4x1xf32>
    %cst_27 = arith.constant 3.125000e-02 : f32
    %86 = vector.broadcast %cst_27 : f32 to vector<1x4x1xf32>
    %87 = arith.mulf %85, %86 : vector<1x4x1xf32>
    %cst_28 = arith.constant 9.99999974E-6 : f32
    %88 = vector.broadcast %cst_28 : f32 to vector<1x4x1xf32>
    %89 = arith.addf %87, %88 : vector<1x4x1xf32>
    %90 = math.rsqrt %89 : vector<1x4x1xf32>
    %91 = vector.broadcast %90 : vector<1x4x1xf32> to vector<2x4x16xf32>
    %92 = arith.mulf %80, %91 : vector<2x4x16xf32>
    %93 = vector.broadcast %71 : vector<1x4x1xf32> to vector<2x4x16xf32>
    %94 = arith.mulf %92, %93 : vector<2x4x16xf32>
    %95 = vector.broadcast %72 : vector<1x4x1xf32> to vector<2x4x16xf32>
    %96 = arith.addf %94, %95 : vector<2x4x16xf32>
    %cst_29 = arith.constant 0.000000e+00 : f32
    %97 = vector.broadcast %cst_29 : f32 to vector<2x4x16xf32>
    %98 = arith.maximumf %96, %97 : vector<2x4x16xf32>
    %99 = vector.extract_strided_slice %6 {offsets = [3, 0, 0], sizes = [3, 4, 4], strides = [1, 1, 1]} : vector<6x4x4xf32> to vector<3x4x4xf32>
    %cst_30 = arith.constant 0.000000e+00 : f32
    %100 = vector.broadcast %cst_30 : f32 to vector<2x4x1xf32>
    %101 = vector.extract_strided_slice %98 {offsets = [0, 0, 0], sizes = [2, 4, 15], strides = [1, 1, 1]} : vector<2x4x16xf32> to vector<2x4x15xf32>
    %102 = tpu.concatenate %100, %101 in 2 : vector<2x4x1xf32>, vector<2x4x15xf32> -> vector<2x4x16xf32>
    %103 = vector.extract_strided_slice %99 {offsets = [0, 0, 0], sizes = [1, 4, 4], strides = [1, 1, 1]} : vector<3x4x4xf32> to vector<1x4x4xf32>
    %104 = vector.shape_cast %103 : vector<1x4x4xf32> to vector<4x4xf32>
    %105 = arith.truncf %104 : vector<4x4xf32> to vector<4x4xbf16>
    %106 = vector.shape_cast %105 : vector<4x4xbf16> to vector<1x4x4xbf16>
    %107 = vector.shape_cast %106 : vector<1x4x4xbf16> to vector<1x4x4xbf16>
    %108 = vector.broadcast %107 : vector<1x4x4xbf16> to vector<2x4x4xbf16>
    %109 = arith.truncf %102 : vector<2x4x16xf32> to vector<2x4x16xbf16>
    "tpu.trace_start"() <{level = 10 : i32, message = "noc,ncl->nol"}> : () -> ()
    %cst_31 = arith.constant dense<0.000000e+00> : vector<2x4x16xf32>
    %110 = tpu.matmul %108, %109, %cst_31 {dimension_numbers = #tpu.dot_dimension_numbers<[2], [1], [1], [2], [0, 0, 0, 1, 1, 2], [0], [0]>} : vector<2x4x4xbf16>, vector<2x4x16xbf16>, vector<2x4x16xf32> -> vector<2x4x16xf32>
    "tpu.trace_stop"() : () -> ()
    %111 = vector.extract_strided_slice %99 {offsets = [1, 0, 0], sizes = [1, 4, 4], strides = [1, 1, 1]} : vector<3x4x4xf32> to vector<1x4x4xf32>
    %112 = vector.shape_cast %111 : vector<1x4x4xf32> to vector<4x4xf32>
    %113 = arith.truncf %112 : vector<4x4xf32> to vector<4x4xbf16>
    %114 = vector.shape_cast %113 : vector<4x4xbf16> to vector<1x4x4xbf16>
    %115 = vector.shape_cast %114 : vector<1x4x4xbf16> to vector<1x4x4xbf16>
    %116 = vector.broadcast %115 : vector<1x4x4xbf16> to vector<2x4x4xbf16>
    %117 = arith.truncf %98 : vector<2x4x16xf32> to vector<2x4x16xbf16>
    "tpu.trace_start"() <{level = 10 : i32, message = "noc,ncl->nol"}> : () -> ()
    %cst_32 = arith.constant dense<0.000000e+00> : vector<2x4x16xf32>
    %118 = tpu.matmul %116, %117, %cst_32 {dimension_numbers = #tpu.dot_dimension_numbers<[2], [1], [1], [2], [0, 0, 0, 1, 1, 2], [0], [0]>} : vector<2x4x4xbf16>, vector<2x4x16xbf16>, vector<2x4x16xf32> -> vector<2x4x16xf32>
    "tpu.trace_stop"() : () -> ()
    %119 = arith.addf %110, %118 : vector<2x4x16xf32>
    %cst_33 = arith.constant 0.000000e+00 : f32
    %120 = vector.broadcast %cst_33 : f32 to vector<2x4x1xf32>
    %121 = vector.extract_strided_slice %98 {offsets = [0, 0, 1], sizes = [2, 4, 15], strides = [1, 1, 1]} : vector<2x4x16xf32> to vector<2x4x15xf32>
    %122 = tpu.concatenate %121, %120 in 2 : vector<2x4x15xf32>, vector<2x4x1xf32> -> vector<2x4x16xf32>
    %123 = vector.extract_strided_slice %99 {offsets = [2, 0, 0], sizes = [1, 4, 4], strides = [1, 1, 1]} : vector<3x4x4xf32> to vector<1x4x4xf32>
    %124 = vector.shape_cast %123 : vector<1x4x4xf32> to vector<4x4xf32>
    %125 = arith.truncf %124 : vector<4x4xf32> to vector<4x4xbf16>
    %126 = vector.shape_cast %125 : vector<4x4xbf16> to vector<1x4x4xbf16>
    %127 = vector.shape_cast %126 : vector<1x4x4xbf16> to vector<1x4x4xbf16>
    %128 = vector.broadcast %127 : vector<1x4x4xbf16> to vector<2x4x4xbf16>
    %129 = arith.truncf %122 : vector<2x4x16xf32> to vector<2x4x16xbf16>
    "tpu.trace_start"() <{level = 10 : i32, message = "noc,ncl->nol"}> : () -> ()
    %cst_34 = arith.constant dense<0.000000e+00> : vector<2x4x16xf32>
    %130 = tpu.matmul %128, %129, %cst_34 {dimension_numbers = #tpu.dot_dimension_numbers<[2], [1], [1], [2], [0, 0, 0, 1, 1, 2], [0], [0]>} : vector<2x4x4xbf16>, vector<2x4x16xbf16>, vector<2x4x16xf32> -> vector<2x4x16xf32>
    "tpu.trace_stop"() : () -> ()
    %131 = arith.addf %119, %130 : vector<2x4x16xf32>
    %132 = arith.truncf %9 : vector<4x4xf32> to vector<4x4xbf16>
    %133 = vector.shape_cast %132 : vector<4x4xbf16> to vector<1x4x4xbf16>
    %134 = vector.shape_cast %133 : vector<1x4x4xbf16> to vector<1x4x4xbf16>
    %135 = vector.broadcast %134 : vector<1x4x4xbf16> to vector<2x4x4xbf16>
    %136 = arith.truncf %0 : vector<2x4x16xf32> to vector<2x4x16xbf16>
    "tpu.trace_start"() <{level = 10 : i32, message = "noc,ncl->nol"}> : () -> ()
    %cst_35 = arith.constant dense<0.000000e+00> : vector<2x4x16xf32>
    %137 = tpu.matmul %135, %136, %cst_35 {dimension_numbers = #tpu.dot_dimension_numbers<[2], [1], [1], [2], [0, 0, 0, 1, 1, 2], [0], [0]>} : vector<2x4x4xbf16>, vector<2x4x16xbf16>, vector<2x4x16xf32> -> vector<2x4x16xf32>
    "tpu.trace_stop"() : () -> ()
    %138 = arith.addf %131, %137 : vector<2x4x16xf32>
    %c1_i32 = arith.constant 1 : i32
    %c1_i32_36 = arith.constant 1 : i32
    %c2_i32 = arith.constant 2 : i32
    %139 = arith.addi %c1_i32_36, %c2_i32 : i32
    %c1_i32_37 = arith.constant 1 : i32
    %140 = scf.for %arg9 = %c1_i32_36 to %139 step %c1_i32_37 iter_args(%arg10 = %138) -> (vector<2x4x16xf32>)  : i32 {
      %1606 = arith.index_cast %arg9 : i32 to index
      %c0_437 = arith.constant 0 : index
      %c0_438 = arith.constant 0 : index
      %c0_439 = arith.constant 0 : index
      %1607 = vector.load %arg2[%1606, %c0_437, %c0_438, %c0_439] : memref<11x4x4x1xf32, #tpu.memory_space<vmem>>, vector<1x4x4x1xf32>
      %1608 = vector.shape_cast %1607 : vector<1x4x4x1xf32> to vector<4x4x1xf32>
      %1609 = arith.index_cast %arg9 : i32 to index
      %c0_440 = arith.constant 0 : index
      %c0_441 = arith.constant 0 : index
      %c0_442 = arith.constant 0 : index
      %1610 = vector.load %arg3[%1609, %c0_440, %c0_441, %c0_442] : memref<11x6x4x4xf32, #tpu.memory_space<vmem>>, vector<1x6x4x4xf32>
      %1611 = vector.shape_cast %1610 : vector<1x6x4x4xf32> to vector<6x4x4xf32>
      %1612 = arith.index_cast %arg9 : i32 to index
      %c0_443 = arith.constant 0 : index
      %c0_444 = arith.constant 0 : index
      %1613 = vector.load %arg4[%1612, %c0_443, %c0_444] : memref<11x4x4xf32, #tpu.memory_space<vmem>>, vector<1x4x4xf32>
      %1614 = vector.shape_cast %1613 : vector<1x4x4xf32> to vector<4x4xf32>
      %1615 = vector.extract_strided_slice %1608 {offsets = [0, 0, 0], sizes = [1, 4, 1], strides = [1, 1, 1]} : vector<4x4x1xf32> to vector<1x4x1xf32>
      %1616 = vector.extract_strided_slice %1608 {offsets = [1, 0, 0], sizes = [1, 4, 1], strides = [1, 1, 1]} : vector<4x4x1xf32> to vector<1x4x1xf32>
      %cst_445 = arith.constant dense<0.000000e+00> : vector<2x4xf32>
      %1617 = vector.multi_reduction <add>, %arg10, %cst_445 [2] : vector<2x4x16xf32> to vector<2x4xf32>
      %1618 = vector.shape_cast %1617 : vector<2x4xf32> to vector<2x4x1xf32>
      %cst_446 = arith.constant dense<0.000000e+00> : vector<4x1xf32>
      %1619 = vector.multi_reduction <add>, %1618, %cst_446 [0] : vector<2x4x1xf32> to vector<4x1xf32>
      %1620 = vector.shape_cast %1619 : vector<4x1xf32> to vector<1x4x1xf32>
      %cst_447 = arith.constant 3.125000e-02 : f32
      %1621 = vector.broadcast %cst_447 : f32 to vector<1x4x1xf32>
      %1622 = arith.mulf %1620, %1621 : vector<1x4x1xf32>
      %1623 = vector.broadcast %1622 : vector<1x4x1xf32> to vector<2x4x16xf32>
      %1624 = arith.subf %arg10, %1623 : vector<2x4x16xf32>
      %1625 = arith.mulf %1624, %1624 : vector<2x4x16xf32>
      %cst_448 = arith.constant dense<0.000000e+00> : vector<2x4xf32>
      %1626 = vector.multi_reduction <add>, %1625, %cst_448 [2] : vector<2x4x16xf32> to vector<2x4xf32>
      %1627 = vector.shape_cast %1626 : vector<2x4xf32> to vector<2x4x1xf32>
      %cst_449 = arith.constant dense<0.000000e+00> : vector<4x1xf32>
      %1628 = vector.multi_reduction <add>, %1627, %cst_449 [0] : vector<2x4x1xf32> to vector<4x1xf32>
      %1629 = vector.shape_cast %1628 : vector<4x1xf32> to vector<1x4x1xf32>
      %cst_450 = arith.constant 3.125000e-02 : f32
      %1630 = vector.broadcast %cst_450 : f32 to vector<1x4x1xf32>
      %1631 = arith.mulf %1629, %1630 : vector<1x4x1xf32>
      %cst_451 = arith.constant 9.99999974E-6 : f32
      %1632 = vector.broadcast %cst_451 : f32 to vector<1x4x1xf32>
      %1633 = arith.addf %1631, %1632 : vector<1x4x1xf32>
      %1634 = math.rsqrt %1633 : vector<1x4x1xf32>
      %1635 = vector.broadcast %1634 : vector<1x4x1xf32> to vector<2x4x16xf32>
      %1636 = arith.mulf %1624, %1635 : vector<2x4x16xf32>
      %1637 = vector.broadcast %1615 : vector<1x4x1xf32> to vector<2x4x16xf32>
      %1638 = arith.mulf %1636, %1637 : vector<2x4x16xf32>
      %1639 = vector.broadcast %1616 : vector<1x4x1xf32> to vector<2x4x16xf32>
      %1640 = arith.addf %1638, %1639 : vector<2x4x16xf32>
      %cst_452 = arith.constant 0.000000e+00 : f32
      %1641 = vector.broadcast %cst_452 : f32 to vector<2x4x16xf32>
      %1642 = arith.maximumf %1640, %1641 : vector<2x4x16xf32>
      %1643 = vector.extract_strided_slice %1611 {offsets = [0, 0, 0], sizes = [3, 4, 4], strides = [1, 1, 1]} : vector<6x4x4xf32> to vector<3x4x4xf32>
      %cst_453 = arith.constant 0.000000e+00 : f32
      %1644 = vector.broadcast %cst_453 : f32 to vector<2x4x1xf32>
      %1645 = vector.extract_strided_slice %1642 {offsets = [0, 0, 0], sizes = [2, 4, 15], strides = [1, 1, 1]} : vector<2x4x16xf32> to vector<2x4x15xf32>
      %1646 = tpu.concatenate %1644, %1645 in 2 : vector<2x4x1xf32>, vector<2x4x15xf32> -> vector<2x4x16xf32>
      %1647 = vector.extract_strided_slice %1643 {offsets = [0, 0, 0], sizes = [1, 4, 4], strides = [1, 1, 1]} : vector<3x4x4xf32> to vector<1x4x4xf32>
      %1648 = vector.shape_cast %1647 : vector<1x4x4xf32> to vector<4x4xf32>
      %1649 = arith.truncf %1648 : vector<4x4xf32> to vector<4x4xbf16>
      %1650 = vector.shape_cast %1649 : vector<4x4xbf16> to vector<1x4x4xbf16>
      %1651 = vector.shape_cast %1650 : vector<1x4x4xbf16> to vector<1x4x4xbf16>
      %1652 = vector.broadcast %1651 : vector<1x4x4xbf16> to vector<2x4x4xbf16>
      %1653 = arith.truncf %1646 : vector<2x4x16xf32> to vector<2x4x16xbf16>
      "tpu.trace_start"() <{level = 10 : i32, message = "noc,ncl->nol"}> : () -> ()
      %cst_454 = arith.constant dense<0.000000e+00> : vector<2x4x16xf32>
      %1654 = tpu.matmul %1652, %1653, %cst_454 {dimension_numbers = #tpu.dot_dimension_numbers<[2], [1], [1], [2], [0, 0, 0, 1, 1, 2], [0], [0]>} : vector<2x4x4xbf16>, vector<2x4x16xbf16>, vector<2x4x16xf32> -> vector<2x4x16xf32>
      "tpu.trace_stop"() : () -> ()
      %1655 = vector.extract_strided_slice %1643 {offsets = [1, 0, 0], sizes = [1, 4, 4], strides = [1, 1, 1]} : vector<3x4x4xf32> to vector<1x4x4xf32>
      %1656 = vector.shape_cast %1655 : vector<1x4x4xf32> to vector<4x4xf32>
      %1657 = arith.truncf %1656 : vector<4x4xf32> to vector<4x4xbf16>
      %1658 = vector.shape_cast %1657 : vector<4x4xbf16> to vector<1x4x4xbf16>
      %1659 = vector.shape_cast %1658 : vector<1x4x4xbf16> to vector<1x4x4xbf16>
      %1660 = vector.broadcast %1659 : vector<1x4x4xbf16> to vector<2x4x4xbf16>
      %1661 = arith.truncf %1642 : vector<2x4x16xf32> to vector<2x4x16xbf16>
      "tpu.trace_start"() <{level = 10 : i32, message = "noc,ncl->nol"}> : () -> ()
      %cst_455 = arith.constant dense<0.000000e+00> : vector<2x4x16xf32>
      %1662 = tpu.matmul %1660, %1661, %cst_455 {dimension_numbers = #tpu.dot_dimension_numbers<[2], [1], [1], [2], [0, 0, 0, 1, 1, 2], [0], [0]>} : vector<2x4x4xbf16>, vector<2x4x16xbf16>, vector<2x4x16xf32> -> vector<2x4x16xf32>
      "tpu.trace_stop"() : () -> ()
      %1663 = arith.addf %1654, %1662 : vector<2x4x16xf32>
      %cst_456 = arith.constant 0.000000e+00 : f32
      %1664 = vector.broadcast %cst_456 : f32 to vector<2x4x1xf32>
      %1665 = vector.extract_strided_slice %1642 {offsets = [0, 0, 1], sizes = [2, 4, 15], strides = [1, 1, 1]} : vector<2x4x16xf32> to vector<2x4x15xf32>
      %1666 = tpu.concatenate %1665, %1664 in 2 : vector<2x4x15xf32>, vector<2x4x1xf32> -> vector<2x4x16xf32>
      %1667 = vector.extract_strided_slice %1643 {offsets = [2, 0, 0], sizes = [1, 4, 4], strides = [1, 1, 1]} : vector<3x4x4xf32> to vector<1x4x4xf32>
      %1668 = vector.shape_cast %1667 : vector<1x4x4xf32> to vector<4x4xf32>
      %1669 = arith.truncf %1668 : vector<4x4xf32> to vector<4x4xbf16>
      %1670 = vector.shape_cast %1669 : vector<4x4xbf16> to vector<1x4x4xbf16>
      %1671 = vector.shape_cast %1670 : vector<1x4x4xbf16> to vector<1x4x4xbf16>
      %1672 = vector.broadcast %1671 : vector<1x4x4xbf16> to vector<2x4x4xbf16>
      %1673 = arith.truncf %1666 : vector<2x4x16xf32> to vector<2x4x16xbf16>
      "tpu.trace_start"() <{level = 10 : i32, message = "noc,ncl->nol"}> : () -> ()
      %cst_457 = arith.constant dense<0.000000e+00> : vector<2x4x16xf32>
      %1674 = tpu.matmul %1672, %1673, %cst_457 {dimension_numbers = #tpu.dot_dimension_numbers<[2], [1], [1], [2], [0, 0, 0, 1, 1, 2], [0], [0]>} : vector<2x4x4xbf16>, vector<2x4x16xbf16>, vector<2x4x16xf32> -> vector<2x4x16xf32>
      "tpu.trace_stop"() : () -> ()
      %1675 = arith.addf %1663, %1674 : vector<2x4x16xf32>
      %1676 = vector.extract_strided_slice %1608 {offsets = [2, 0, 0], sizes = [1, 4, 1], strides = [1, 1, 1]} : vector<4x4x1xf32> to vector<1x4x1xf32>
      %1677 = vector.extract_strided_slice %1608 {offsets = [3, 0, 0], sizes = [1, 4, 1], strides = [1, 1, 1]} : vector<4x4x1xf32> to vector<1x4x1xf32>
      %cst_458 = arith.constant dense<0.000000e+00> : vector<2x4xf32>
      %1678 = vector.multi_reduction <add>, %1675, %cst_458 [2] : vector<2x4x16xf32> to vector<2x4xf32>
      %1679 = vector.shape_cast %1678 : vector<2x4xf32> to vector<2x4x1xf32>
      %cst_459 = arith.constant dense<0.000000e+00> : vector<4x1xf32>
      %1680 = vector.multi_reduction <add>, %1679, %cst_459 [0] : vector<2x4x1xf32> to vector<4x1xf32>
      %1681 = vector.shape_cast %1680 : vector<4x1xf32> to vector<1x4x1xf32>
      %cst_460 = arith.constant 3.125000e-02 : f32
      %1682 = vector.broadcast %cst_460 : f32 to vector<1x4x1xf32>
      %1683 = arith.mulf %1681, %1682 : vector<1x4x1xf32>
      %1684 = vector.broadcast %1683 : vector<1x4x1xf32> to vector<2x4x16xf32>
      %1685 = arith.subf %1675, %1684 : vector<2x4x16xf32>
      %1686 = arith.mulf %1685, %1685 : vector<2x4x16xf32>
      %cst_461 = arith.constant dense<0.000000e+00> : vector<2x4xf32>
      %1687 = vector.multi_reduction <add>, %1686, %cst_461 [2] : vector<2x4x16xf32> to vector<2x4xf32>
      %1688 = vector.shape_cast %1687 : vector<2x4xf32> to vector<2x4x1xf32>
      %cst_462 = arith.constant dense<0.000000e+00> : vector<4x1xf32>
      %1689 = vector.multi_reduction <add>, %1688, %cst_462 [0] : vector<2x4x1xf32> to vector<4x1xf32>
      %1690 = vector.shape_cast %1689 : vector<4x1xf32> to vector<1x4x1xf32>
      %cst_463 = arith.constant 3.125000e-02 : f32
      %1691 = vector.broadcast %cst_463 : f32 to vector<1x4x1xf32>
      %1692 = arith.mulf %1690, %1691 : vector<1x4x1xf32>
      %cst_464 = arith.constant 9.99999974E-6 : f32
      %1693 = vector.broadcast %cst_464 : f32 to vector<1x4x1xf32>
      %1694 = arith.addf %1692, %1693 : vector<1x4x1xf32>
      %1695 = math.rsqrt %1694 : vector<1x4x1xf32>
      %1696 = vector.broadcast %1695 : vector<1x4x1xf32> to vector<2x4x16xf32>
      %1697 = arith.mulf %1685, %1696 : vector<2x4x16xf32>
      %1698 = vector.broadcast %1676 : vector<1x4x1xf32> to vector<2x4x16xf32>
      %1699 = arith.mulf %1697, %1698 : vector<2x4x16xf32>
      %1700 = vector.broadcast %1677 : vector<1x4x1xf32> to vector<2x4x16xf32>
      %1701 = arith.addf %1699, %1700 : vector<2x4x16xf32>
      %cst_465 = arith.constant 0.000000e+00 : f32
      %1702 = vector.broadcast %cst_465 : f32 to vector<2x4x16xf32>
      %1703 = arith.maximumf %1701, %1702 : vector<2x4x16xf32>
      %1704 = vector.extract_strided_slice %1611 {offsets = [3, 0, 0], sizes = [3, 4, 4], strides = [1, 1, 1]} : vector<6x4x4xf32> to vector<3x4x4xf32>
      %cst_466 = arith.constant 0.000000e+00 : f32
      %1705 = vector.broadcast %cst_466 : f32 to vector<2x4x1xf32>
      %1706 = vector.extract_strided_slice %1703 {offsets = [0, 0, 0], sizes = [2, 4, 15], strides = [1, 1, 1]} : vector<2x4x16xf32> to vector<2x4x15xf32>
      %1707 = tpu.concatenate %1705, %1706 in 2 : vector<2x4x1xf32>, vector<2x4x15xf32> -> vector<2x4x16xf32>
      %1708 = vector.extract_strided_slice %1704 {offsets = [0, 0, 0], sizes = [1, 4, 4], strides = [1, 1, 1]} : vector<3x4x4xf32> to vector<1x4x4xf32>
      %1709 = vector.shape_cast %1708 : vector<1x4x4xf32> to vector<4x4xf32>
      %1710 = arith.truncf %1709 : vector<4x4xf32> to vector<4x4xbf16>
      %1711 = vector.shape_cast %1710 : vector<4x4xbf16> to vector<1x4x4xbf16>
      %1712 = vector.shape_cast %1711 : vector<1x4x4xbf16> to vector<1x4x4xbf16>
      %1713 = vector.broadcast %1712 : vector<1x4x4xbf16> to vector<2x4x4xbf16>
      %1714 = arith.truncf %1707 : vector<2x4x16xf32> to vector<2x4x16xbf16>
      "tpu.trace_start"() <{level = 10 : i32, message = "noc,ncl->nol"}> : () -> ()
      %cst_467 = arith.constant dense<0.000000e+00> : vector<2x4x16xf32>
      %1715 = tpu.matmul %1713, %1714, %cst_467 {dimension_numbers = #tpu.dot_dimension_numbers<[2], [1], [1], [2], [0, 0, 0, 1, 1, 2], [0], [0]>} : vector<2x4x4xbf16>, vector<2x4x16xbf16>, vector<2x4x16xf32> -> vector<2x4x16xf32>
      "tpu.trace_stop"() : () -> ()
      %1716 = vector.extract_strided_slice %1704 {offsets = [1, 0, 0], sizes = [1, 4, 4], strides = [1, 1, 1]} : vector<3x4x4xf32> to vector<1x4x4xf32>
      %1717 = vector.shape_cast %1716 : vector<1x4x4xf32> to vector<4x4xf32>
      %1718 = arith.truncf %1717 : vector<4x4xf32> to vector<4x4xbf16>
      %1719 = vector.shape_cast %1718 : vector<4x4xbf16> to vector<1x4x4xbf16>
      %1720 = vector.shape_cast %1719 : vector<1x4x4xbf16> to vector<1x4x4xbf16>
      %1721 = vector.broadcast %1720 : vector<1x4x4xbf16> to vector<2x4x4xbf16>
      %1722 = arith.truncf %1703 : vector<2x4x16xf32> to vector<2x4x16xbf16>
      "tpu.trace_start"() <{level = 10 : i32, message = "noc,ncl->nol"}> : () -> ()
      %cst_468 = arith.constant dense<0.000000e+00> : vector<2x4x16xf32>
      %1723 = tpu.matmul %1721, %1722, %cst_468 {dimension_numbers = #tpu.dot_dimension_numbers<[2], [1], [1], [2], [0, 0, 0, 1, 1, 2], [0], [0]>} : vector<2x4x4xbf16>, vector<2x4x16xbf16>, vector<2x4x16xf32> -> vector<2x4x16xf32>
      "tpu.trace_stop"() : () -> ()
      %1724 = arith.addf %1715, %1723 : vector<2x4x16xf32>
      %cst_469 = arith.constant 0.000000e+00 : f32
      %1725 = vector.broadcast %cst_469 : f32 to vector<2x4x1xf32>
      %1726 = vector.extract_strided_slice %1703 {offsets = [0, 0, 1], sizes = [2, 4, 15], strides = [1, 1, 1]} : vector<2x4x16xf32> to vector<2x4x15xf32>
      %1727 = tpu.concatenate %1726, %1725 in 2 : vector<2x4x15xf32>, vector<2x4x1xf32> -> vector<2x4x16xf32>
      %1728 = vector.extract_strided_slice %1704 {offsets = [2, 0, 0], sizes = [1, 4, 4], strides = [1, 1, 1]} : vector<3x4x4xf32> to vector<1x4x4xf32>
      %1729 = vector.shape_cast %1728 : vector<1x4x4xf32> to vector<4x4xf32>
      %1730 = arith.truncf %1729 : vector<4x4xf32> to vector<4x4xbf16>
      %1731 = vector.shape_cast %1730 : vector<4x4xbf16> to vector<1x4x4xbf16>
      %1732 = vector.shape_cast %1731 : vector<1x4x4xbf16> to vector<1x4x4xbf16>
      %1733 = vector.broadcast %1732 : vector<1x4x4xbf16> to vector<2x4x4xbf16>
      %1734 = arith.truncf %1727 : vector<2x4x16xf32> to vector<2x4x16xbf16>
      "tpu.trace_start"() <{level = 10 : i32, message = "noc,ncl->nol"}> : () -> ()
      %cst_470 = arith.constant dense<0.000000e+00> : vector<2x4x16xf32>
      %1735 = tpu.matmul %1733, %1734, %cst_470 {dimension_numbers = #tpu.dot_dimension_numbers<[2], [1], [1], [2], [0, 0, 0, 1, 1, 2], [0], [0]>} : vector<2x4x4xbf16>, vector<2x4x16xbf16>, vector<2x4x16xf32> -> vector<2x4x16xf32>
      "tpu.trace_stop"() : () -> ()
      %1736 = arith.addf %1724, %1735 : vector<2x4x16xf32>
      %1737 = arith.truncf %1614 : vector<4x4xf32> to vector<4x4xbf16>
      %1738 = vector.shape_cast %1737 : vector<4x4xbf16> to vector<1x4x4xbf16>
      %1739 = vector.shape_cast %1738 : vector<1x4x4xbf16> to vector<1x4x4xbf16>
      %1740 = vector.broadcast %1739 : vector<1x4x4xbf16> to vector<2x4x4xbf16>
      %1741 = arith.truncf %arg10 : vector<2x4x16xf32> to vector<2x4x16xbf16>
      "tpu.trace_start"() <{level = 10 : i32, message = "noc,ncl->nol"}> : () -> ()
      %cst_471 = arith.constant dense<0.000000e+00> : vector<2x4x16xf32>
      %1742 = tpu.matmul %1740, %1741, %cst_471 {dimension_numbers = #tpu.dot_dimension_numbers<[2], [1], [1], [2], [0, 0, 0, 1, 1, 2], [0], [0]>} : vector<2x4x4xbf16>, vector<2x4x16xbf16>, vector<2x4x16xf32> -> vector<2x4x16xf32>
      "tpu.trace_stop"() : () -> ()
      %1743 = arith.addf %1736, %1742 : vector<2x4x16xf32>
      scf.yield %1743 : vector<2x4x16xf32>
    }
    %c2_i32_38 = arith.constant 2 : i32
    %cst_39 = arith.constant -3.000000e+38 : f32
    %141 = vector.broadcast %cst_39 : f32 to vector<2x4x1xf32>
    %142 = vector.extract_strided_slice %138 {offsets = [0, 0, 0], sizes = [2, 4, 15], strides = [1, 1, 1]} : vector<2x4x16xf32> to vector<2x4x15xf32>
    %143 = tpu.concatenate %141, %142 in 2 : vector<2x4x1xf32>, vector<2x4x15xf32> -> vector<2x4x16xf32>
    %144 = arith.maximumf %143, %138 : vector<2x4x16xf32>
    %cst_40 = arith.constant -3.000000e+38 : f32
    %145 = vector.broadcast %cst_40 : f32 to vector<2x4x1xf32>
    %146 = vector.extract_strided_slice %138 {offsets = [0, 0, 1], sizes = [2, 4, 15], strides = [1, 1, 1]} : vector<2x4x16xf32> to vector<2x4x15xf32>
    %147 = tpu.concatenate %146, %145 in 2 : vector<2x4x15xf32>, vector<2x4x1xf32> -> vector<2x4x16xf32>
    %148 = arith.maximumf %144, %147 : vector<2x4x16xf32>
    %149 = tpu.iota {dimensions = array<i32: 0>} : vector<16x8xi32>
    %150 = tpu.iota {dimensions = array<i32: 1>} : vector<16x8xi32>
    %c2_i32_41 = arith.constant 2 : i32
    %151 = vector.broadcast %c2_i32_41 : i32 to vector<16x8xi32>
    %152 = arith.muli %151, %150 : vector<16x8xi32>
    %c15_i32 = arith.constant 15 : i32
    %153 = vector.broadcast %c15_i32 : i32 to vector<16x8xi32>
    %154 = arith.minsi %152, %153 : vector<16x8xi32>
    %155 = arith.cmpi eq, %149, %154 : vector<16x8xi32>
    %156 = arith.extui %155 : vector<16x8xi1> to vector<16x8xi32>
    %157 = arith.sitofp %156 : vector<16x8xi32> to vector<16x8xf32>
    %158 = vector.shape_cast %157 : vector<16x8xf32> to vector<1x16x8xf32>
    %159 = vector.shape_cast %158 : vector<1x16x8xf32> to vector<1x16x8xf32>
    %160 = vector.broadcast %159 : vector<1x16x8xf32> to vector<2x16x8xf32>
    "tpu.trace_start"() <{level = 10 : i32, message = "ncl,nlo->nco"}> : () -> ()
    %cst_42 = arith.constant dense<0.000000e+00> : vector<2x4x8xf32>
    %161 = tpu.matmul %148, %160, %cst_42 {dimension_numbers = #tpu.dot_dimension_numbers<[2], [1], [1], [2], [0, 0, 0, 1, 1, 2], [0], [0]>, precision = #tpu.contract_precision<fp32>} : vector<2x4x16xf32>, vector<2x16x8xf32>, vector<2x4x8xf32> -> vector<2x4x8xf32>
    "tpu.trace_stop"() : () -> ()
    %c3_i32 = arith.constant 3 : i32
    %162 = arith.index_cast %c3_i32 : i32 to index
    %c0_43 = arith.constant 0 : index
    %c0_44 = arith.constant 0 : index
    %c0_45 = arith.constant 0 : index
    %163 = vector.load %arg2[%162, %c0_43, %c0_44, %c0_45] : memref<11x4x4x1xf32, #tpu.memory_space<vmem>>, vector<1x4x4x1xf32>
    %164 = vector.shape_cast %163 : vector<1x4x4x1xf32> to vector<4x4x1xf32>
    %165 = arith.index_cast %c3_i32 : i32 to index
    %c0_46 = arith.constant 0 : index
    %c0_47 = arith.constant 0 : index
    %c0_48 = arith.constant 0 : index
    %166 = vector.load %arg3[%165, %c0_46, %c0_47, %c0_48] : memref<11x6x4x4xf32, #tpu.memory_space<vmem>>, vector<1x6x4x4xf32>
    %167 = vector.shape_cast %166 : vector<1x6x4x4xf32> to vector<6x4x4xf32>
    %168 = arith.index_cast %c3_i32 : i32 to index
    %c0_49 = arith.constant 0 : index
    %c0_50 = arith.constant 0 : index
    %169 = vector.load %arg4[%168, %c0_49, %c0_50] : memref<11x4x4xf32, #tpu.memory_space<vmem>>, vector<1x4x4xf32>
    %170 = vector.shape_cast %169 : vector<1x4x4xf32> to vector<4x4xf32>
    %171 = vector.extract_strided_slice %164 {offsets = [0, 0, 0], sizes = [1, 4, 1], strides = [1, 1, 1]} : vector<4x4x1xf32> to vector<1x4x1xf32>
    %172 = vector.extract_strided_slice %164 {offsets = [1, 0, 0], sizes = [1, 4, 1], strides = [1, 1, 1]} : vector<4x4x1xf32> to vector<1x4x1xf32>
    %cst_51 = arith.constant dense<0.000000e+00> : vector<2x4xf32>
    %173 = vector.multi_reduction <add>, %161, %cst_51 [2] : vector<2x4x8xf32> to vector<2x4xf32>
    %174 = vector.shape_cast %173 : vector<2x4xf32> to vector<2x4x1xf32>
    %cst_52 = arith.constant dense<0.000000e+00> : vector<4x1xf32>
    %175 = vector.multi_reduction <add>, %174, %cst_52 [0] : vector<2x4x1xf32> to vector<4x1xf32>
    %176 = vector.shape_cast %175 : vector<4x1xf32> to vector<1x4x1xf32>
    %cst_53 = arith.constant 6.250000e-02 : f32
    %177 = vector.broadcast %cst_53 : f32 to vector<1x4x1xf32>
    %178 = arith.mulf %176, %177 : vector<1x4x1xf32>
    %179 = vector.broadcast %178 : vector<1x4x1xf32> to vector<2x4x8xf32>
    %180 = arith.subf %161, %179 : vector<2x4x8xf32>
    %181 = arith.mulf %180, %180 : vector<2x4x8xf32>
    %cst_54 = arith.constant dense<0.000000e+00> : vector<2x4xf32>
    %182 = vector.multi_reduction <add>, %181, %cst_54 [2] : vector<2x4x8xf32> to vector<2x4xf32>
    %183 = vector.shape_cast %182 : vector<2x4xf32> to vector<2x4x1xf32>
    %cst_55 = arith.constant dense<0.000000e+00> : vector<4x1xf32>
    %184 = vector.multi_reduction <add>, %183, %cst_55 [0] : vector<2x4x1xf32> to vector<4x1xf32>
    %185 = vector.shape_cast %184 : vector<4x1xf32> to vector<1x4x1xf32>
    %cst_56 = arith.constant 6.250000e-02 : f32
    %186 = vector.broadcast %cst_56 : f32 to vector<1x4x1xf32>
    %187 = arith.mulf %185, %186 : vector<1x4x1xf32>
    %cst_57 = arith.constant 9.99999974E-6 : f32
    %188 = vector.broadcast %cst_57 : f32 to vector<1x4x1xf32>
    %189 = arith.addf %187, %188 : vector<1x4x1xf32>
    %190 = math.rsqrt %189 : vector<1x4x1xf32>
    %191 = vector.broadcast %190 : vector<1x4x1xf32> to vector<2x4x8xf32>
    %192 = arith.mulf %180, %191 : vector<2x4x8xf32>
    %193 = vector.broadcast %171 : vector<1x4x1xf32> to vector<2x4x8xf32>
    %194 = arith.mulf %192, %193 : vector<2x4x8xf32>
    %195 = vector.broadcast %172 : vector<1x4x1xf32> to vector<2x4x8xf32>
    %196 = arith.addf %194, %195 : vector<2x4x8xf32>
    %cst_58 = arith.constant 0.000000e+00 : f32
    %197 = vector.broadcast %cst_58 : f32 to vector<2x4x8xf32>
    %198 = arith.maximumf %196, %197 : vector<2x4x8xf32>
    %199 = vector.extract_strided_slice %167 {offsets = [0, 0, 0], sizes = [3, 4, 4], strides = [1, 1, 1]} : vector<6x4x4xf32> to vector<3x4x4xf32>
    %cst_59 = arith.constant 0.000000e+00 : f32
    %200 = vector.broadcast %cst_59 : f32 to vector<2x4x1xf32>
    %201 = vector.extract_strided_slice %198 {offsets = [0, 0, 0], sizes = [2, 4, 7], strides = [1, 1, 1]} : vector<2x4x8xf32> to vector<2x4x7xf32>
    %202 = tpu.concatenate %200, %201 in 2 : vector<2x4x1xf32>, vector<2x4x7xf32> -> vector<2x4x8xf32>
    %203 = vector.extract_strided_slice %199 {offsets = [0, 0, 0], sizes = [1, 4, 4], strides = [1, 1, 1]} : vector<3x4x4xf32> to vector<1x4x4xf32>
    %204 = vector.shape_cast %203 : vector<1x4x4xf32> to vector<4x4xf32>
    %205 = arith.truncf %204 : vector<4x4xf32> to vector<4x4xbf16>
    %206 = vector.shape_cast %205 : vector<4x4xbf16> to vector<1x4x4xbf16>
    %207 = vector.shape_cast %206 : vector<1x4x4xbf16> to vector<1x4x4xbf16>
    %208 = vector.broadcast %207 : vector<1x4x4xbf16> to vector<2x4x4xbf16>
    %209 = arith.truncf %202 : vector<2x4x8xf32> to vector<2x4x8xbf16>
    "tpu.trace_start"() <{level = 10 : i32, message = "noc,ncl->nol"}> : () -> ()
    %cst_60 = arith.constant dense<0.000000e+00> : vector<2x4x8xf32>
    %210 = tpu.matmul %208, %209, %cst_60 {dimension_numbers = #tpu.dot_dimension_numbers<[2], [1], [1], [2], [0, 0, 0, 1, 1, 2], [0], [0]>} : vector<2x4x4xbf16>, vector<2x4x8xbf16>, vector<2x4x8xf32> -> vector<2x4x8xf32>
    "tpu.trace_stop"() : () -> ()
    %211 = vector.extract_strided_slice %199 {offsets = [1, 0, 0], sizes = [1, 4, 4], strides = [1, 1, 1]} : vector<3x4x4xf32> to vector<1x4x4xf32>
    %212 = vector.shape_cast %211 : vector<1x4x4xf32> to vector<4x4xf32>
    %213 = arith.truncf %212 : vector<4x4xf32> to vector<4x4xbf16>
    %214 = vector.shape_cast %213 : vector<4x4xbf16> to vector<1x4x4xbf16>
    %215 = vector.shape_cast %214 : vector<1x4x4xbf16> to vector<1x4x4xbf16>
    %216 = vector.broadcast %215 : vector<1x4x4xbf16> to vector<2x4x4xbf16>
    %217 = arith.truncf %198 : vector<2x4x8xf32> to vector<2x4x8xbf16>
    "tpu.trace_start"() <{level = 10 : i32, message = "noc,ncl->nol"}> : () -> ()
    %cst_61 = arith.constant dense<0.000000e+00> : vector<2x4x8xf32>
    %218 = tpu.matmul %216, %217, %cst_61 {dimension_numbers = #tpu.dot_dimension_numbers<[2], [1], [1], [2], [0, 0, 0, 1, 1, 2], [0], [0]>} : vector<2x4x4xbf16>, vector<2x4x8xbf16>, vector<2x4x8xf32> -> vector<2x4x8xf32>
    "tpu.trace_stop"() : () -> ()
    %219 = arith.addf %210, %218 : vector<2x4x8xf32>
    %cst_62 = arith.constant 0.000000e+00 : f32
    %220 = vector.broadcast %cst_62 : f32 to vector<2x4x1xf32>
    %221 = vector.extract_strided_slice %198 {offsets = [0, 0, 1], sizes = [2, 4, 7], strides = [1, 1, 1]} : vector<2x4x8xf32> to vector<2x4x7xf32>
    %222 = tpu.concatenate %221, %220 in 2 : vector<2x4x7xf32>, vector<2x4x1xf32> -> vector<2x4x8xf32>
    %223 = vector.extract_strided_slice %199 {offsets = [2, 0, 0], sizes = [1, 4, 4], strides = [1, 1, 1]} : vector<3x4x4xf32> to vector<1x4x4xf32>
    %224 = vector.shape_cast %223 : vector<1x4x4xf32> to vector<4x4xf32>
    %225 = arith.truncf %224 : vector<4x4xf32> to vector<4x4xbf16>
    %226 = vector.shape_cast %225 : vector<4x4xbf16> to vector<1x4x4xbf16>
    %227 = vector.shape_cast %226 : vector<1x4x4xbf16> to vector<1x4x4xbf16>
    %228 = vector.broadcast %227 : vector<1x4x4xbf16> to vector<2x4x4xbf16>
    %229 = arith.truncf %222 : vector<2x4x8xf32> to vector<2x4x8xbf16>
    "tpu.trace_start"() <{level = 10 : i32, message = "noc,ncl->nol"}> : () -> ()
    %cst_63 = arith.constant dense<0.000000e+00> : vector<2x4x8xf32>
    %230 = tpu.matmul %228, %229, %cst_63 {dimension_numbers = #tpu.dot_dimension_numbers<[2], [1], [1], [2], [0, 0, 0, 1, 1, 2], [0], [0]>} : vector<2x4x4xbf16>, vector<2x4x8xbf16>, vector<2x4x8xf32> -> vector<2x4x8xf32>
    "tpu.trace_stop"() : () -> ()
    %231 = arith.addf %219, %230 : vector<2x4x8xf32>
    %232 = vector.extract_strided_slice %164 {offsets = [2, 0, 0], sizes = [1, 4, 1], strides = [1, 1, 1]} : vector<4x4x1xf32> to vector<1x4x1xf32>
    %233 = vector.extract_strided_slice %164 {offsets = [3, 0, 0], sizes = [1, 4, 1], strides = [1, 1, 1]} : vector<4x4x1xf32> to vector<1x4x1xf32>
    %cst_64 = arith.constant dense<0.000000e+00> : vector<2x4xf32>
    %234 = vector.multi_reduction <add>, %231, %cst_64 [2] : vector<2x4x8xf32> to vector<2x4xf32>
    %235 = vector.shape_cast %234 : vector<2x4xf32> to vector<2x4x1xf32>
    %cst_65 = arith.constant dense<0.000000e+00> : vector<4x1xf32>
    %236 = vector.multi_reduction <add>, %235, %cst_65 [0] : vector<2x4x1xf32> to vector<4x1xf32>
    %237 = vector.shape_cast %236 : vector<4x1xf32> to vector<1x4x1xf32>
    %cst_66 = arith.constant 6.250000e-02 : f32
    %238 = vector.broadcast %cst_66 : f32 to vector<1x4x1xf32>
    %239 = arith.mulf %237, %238 : vector<1x4x1xf32>
    %240 = vector.broadcast %239 : vector<1x4x1xf32> to vector<2x4x8xf32>
    %241 = arith.subf %231, %240 : vector<2x4x8xf32>
    %242 = arith.mulf %241, %241 : vector<2x4x8xf32>
    %cst_67 = arith.constant dense<0.000000e+00> : vector<2x4xf32>
    %243 = vector.multi_reduction <add>, %242, %cst_67 [2] : vector<2x4x8xf32> to vector<2x4xf32>
    %244 = vector.shape_cast %243 : vector<2x4xf32> to vector<2x4x1xf32>
    %cst_68 = arith.constant dense<0.000000e+00> : vector<4x1xf32>
    %245 = vector.multi_reduction <add>, %244, %cst_68 [0] : vector<2x4x1xf32> to vector<4x1xf32>
    %246 = vector.shape_cast %245 : vector<4x1xf32> to vector<1x4x1xf32>
    %cst_69 = arith.constant 6.250000e-02 : f32
    %247 = vector.broadcast %cst_69 : f32 to vector<1x4x1xf32>
    %248 = arith.mulf %246, %247 : vector<1x4x1xf32>
    %cst_70 = arith.constant 9.99999974E-6 : f32
    %249 = vector.broadcast %cst_70 : f32 to vector<1x4x1xf32>
    %250 = arith.addf %248, %249 : vector<1x4x1xf32>
    %251 = math.rsqrt %250 : vector<1x4x1xf32>
    %252 = vector.broadcast %251 : vector<1x4x1xf32> to vector<2x4x8xf32>
    %253 = arith.mulf %241, %252 : vector<2x4x8xf32>
    %254 = vector.broadcast %232 : vector<1x4x1xf32> to vector<2x4x8xf32>
    %255 = arith.mulf %253, %254 : vector<2x4x8xf32>
    %256 = vector.broadcast %233 : vector<1x4x1xf32> to vector<2x4x8xf32>
    %257 = arith.addf %255, %256 : vector<2x4x8xf32>
    %cst_71 = arith.constant 0.000000e+00 : f32
    %258 = vector.broadcast %cst_71 : f32 to vector<2x4x8xf32>
    %259 = arith.maximumf %257, %258 : vector<2x4x8xf32>
    %260 = vector.extract_strided_slice %167 {offsets = [3, 0, 0], sizes = [3, 4, 4], strides = [1, 1, 1]} : vector<6x4x4xf32> to vector<3x4x4xf32>
    %cst_72 = arith.constant 0.000000e+00 : f32
    %261 = vector.broadcast %cst_72 : f32 to vector<2x4x1xf32>
    %262 = vector.extract_strided_slice %259 {offsets = [0, 0, 0], sizes = [2, 4, 7], strides = [1, 1, 1]} : vector<2x4x8xf32> to vector<2x4x7xf32>
    %263 = tpu.concatenate %261, %262 in 2 : vector<2x4x1xf32>, vector<2x4x7xf32> -> vector<2x4x8xf32>
    %264 = vector.extract_strided_slice %260 {offsets = [0, 0, 0], sizes = [1, 4, 4], strides = [1, 1, 1]} : vector<3x4x4xf32> to vector<1x4x4xf32>
    %265 = vector.shape_cast %264 : vector<1x4x4xf32> to vector<4x4xf32>
    %266 = arith.truncf %265 : vector<4x4xf32> to vector<4x4xbf16>
    %267 = vector.shape_cast %266 : vector<4x4xbf16> to vector<1x4x4xbf16>
    %268 = vector.shape_cast %267 : vector<1x4x4xbf16> to vector<1x4x4xbf16>
    %269 = vector.broadcast %268 : vector<1x4x4xbf16> to vector<2x4x4xbf16>
    %270 = arith.truncf %263 : vector<2x4x8xf32> to vector<2x4x8xbf16>
    "tpu.trace_start"() <{level = 10 : i32, message = "noc,ncl->nol"}> : () -> ()
    %cst_73 = arith.constant dense<0.000000e+00> : vector<2x4x8xf32>
    %271 = tpu.matmul %269, %270, %cst_73 {dimension_numbers = #tpu.dot_dimension_numbers<[2], [1], [1], [2], [0, 0, 0, 1, 1, 2], [0], [0]>} : vector<2x4x4xbf16>, vector<2x4x8xbf16>, vector<2x4x8xf32> -> vector<2x4x8xf32>
    "tpu.trace_stop"() : () -> ()
    %272 = vector.extract_strided_slice %260 {offsets = [1, 0, 0], sizes = [1, 4, 4], strides = [1, 1, 1]} : vector<3x4x4xf32> to vector<1x4x4xf32>
    %273 = vector.shape_cast %272 : vector<1x4x4xf32> to vector<4x4xf32>
    %274 = arith.truncf %273 : vector<4x4xf32> to vector<4x4xbf16>
    %275 = vector.shape_cast %274 : vector<4x4xbf16> to vector<1x4x4xbf16>
    %276 = vector.shape_cast %275 : vector<1x4x4xbf16> to vector<1x4x4xbf16>
    %277 = vector.broadcast %276 : vector<1x4x4xbf16> to vector<2x4x4xbf16>
    %278 = arith.truncf %259 : vector<2x4x8xf32> to vector<2x4x8xbf16>
    "tpu.trace_start"() <{level = 10 : i32, message = "noc,ncl->nol"}> : () -> ()
    %cst_74 = arith.constant dense<0.000000e+00> : vector<2x4x8xf32>
    %279 = tpu.matmul %277, %278, %cst_74 {dimension_numbers = #tpu.dot_dimension_numbers<[2], [1], [1], [2], [0, 0, 0, 1, 1, 2], [0], [0]>} : vector<2x4x4xbf16>, vector<2x4x8xbf16>, vector<2x4x8xf32> -> vector<2x4x8xf32>
    "tpu.trace_stop"() : () -> ()
    %280 = arith.addf %271, %279 : vector<2x4x8xf32>
    %cst_75 = arith.constant 0.000000e+00 : f32
    %281 = vector.broadcast %cst_75 : f32 to vector<2x4x1xf32>
    %282 = vector.extract_strided_slice %259 {offsets = [0, 0, 1], sizes = [2, 4, 7], strides = [1, 1, 1]} : vector<2x4x8xf32> to vector<2x4x7xf32>
    %283 = tpu.concatenate %282, %281 in 2 : vector<2x4x7xf32>, vector<2x4x1xf32> -> vector<2x4x8xf32>
    %284 = vector.extract_strided_slice %260 {offsets = [2, 0, 0], sizes = [1, 4, 4], strides = [1, 1, 1]} : vector<3x4x4xf32> to vector<1x4x4xf32>
    %285 = vector.shape_cast %284 : vector<1x4x4xf32> to vector<4x4xf32>
    %286 = arith.truncf %285 : vector<4x4xf32> to vector<4x4xbf16>
    %287 = vector.shape_cast %286 : vector<4x4xbf16> to vector<1x4x4xbf16>
    %288 = vector.shape_cast %287 : vector<1x4x4xbf16> to vector<1x4x4xbf16>
    %289 = vector.broadcast %288 : vector<1x4x4xbf16> to vector<2x4x4xbf16>
    %290 = arith.truncf %283 : vector<2x4x8xf32> to vector<2x4x8xbf16>
    "tpu.trace_start"() <{level = 10 : i32, message = "noc,ncl->nol"}> : () -> ()
    %cst_76 = arith.constant dense<0.000000e+00> : vector<2x4x8xf32>
    %291 = tpu.matmul %289, %290, %cst_76 {dimension_numbers = #tpu.dot_dimension_numbers<[2], [1], [1], [2], [0, 0, 0, 1, 1, 2], [0], [0]>} : vector<2x4x4xbf16>, vector<2x4x8xbf16>, vector<2x4x8xf32> -> vector<2x4x8xf32>
    "tpu.trace_stop"() : () -> ()
    %292 = arith.addf %280, %291 : vector<2x4x8xf32>
    %293 = arith.truncf %170 : vector<4x4xf32> to vector<4x4xbf16>
    %294 = vector.shape_cast %293 : vector<4x4xbf16> to vector<1x4x4xbf16>
    %295 = vector.shape_cast %294 : vector<1x4x4xbf16> to vector<1x4x4xbf16>
    %296 = vector.broadcast %295 : vector<1x4x4xbf16> to vector<2x4x4xbf16>
    %297 = arith.truncf %161 : vector<2x4x8xf32> to vector<2x4x8xbf16>
    "tpu.trace_start"() <{level = 10 : i32, message = "noc,ncl->nol"}> : () -> ()
    %cst_77 = arith.constant dense<0.000000e+00> : vector<2x4x8xf32>
    %298 = tpu.matmul %296, %297, %cst_77 {dimension_numbers = #tpu.dot_dimension_numbers<[2], [1], [1], [2], [0, 0, 0, 1, 1, 2], [0], [0]>} : vector<2x4x4xbf16>, vector<2x4x8xbf16>, vector<2x4x8xf32> -> vector<2x4x8xf32>
    "tpu.trace_stop"() : () -> ()
    %299 = arith.addf %292, %298 : vector<2x4x8xf32>
    %c1_i32_78 = arith.constant 1 : i32
    %c9_i32 = arith.constant 9 : i32
    %300 = arith.index_cast %c9_i32 : i32 to index
    %c0_79 = arith.constant 0 : index
    %c0_80 = arith.constant 0 : index
    %c0_81 = arith.constant 0 : index
    %301 = vector.load %arg2[%300, %c0_79, %c0_80, %c0_81] : memref<11x4x4x1xf32, #tpu.memory_space<vmem>>, vector<1x4x4x1xf32>
    %302 = vector.shape_cast %301 : vector<1x4x4x1xf32> to vector<4x4x1xf32>
    %303 = arith.index_cast %c9_i32 : i32 to index
    %c0_82 = arith.constant 0 : index
    %c0_83 = arith.constant 0 : index
    %c0_84 = arith.constant 0 : index
    %304 = vector.load %arg3[%303, %c0_82, %c0_83, %c0_84] : memref<11x6x4x4xf32, #tpu.memory_space<vmem>>, vector<1x6x4x4xf32>
    %305 = vector.shape_cast %304 : vector<1x6x4x4xf32> to vector<6x4x4xf32>
    %306 = arith.index_cast %c9_i32 : i32 to index
    %c0_85 = arith.constant 0 : index
    %c0_86 = arith.constant 0 : index
    %307 = vector.load %arg4[%306, %c0_85, %c0_86] : memref<11x4x4xf32, #tpu.memory_space<vmem>>, vector<1x4x4xf32>
    %308 = vector.shape_cast %307 : vector<1x4x4xf32> to vector<4x4xf32>
    %309 = vector.extract_strided_slice %302 {offsets = [0, 0, 0], sizes = [1, 4, 1], strides = [1, 1, 1]} : vector<4x4x1xf32> to vector<1x4x1xf32>
    %310 = vector.extract_strided_slice %302 {offsets = [1, 0, 0], sizes = [1, 4, 1], strides = [1, 1, 1]} : vector<4x4x1xf32> to vector<1x4x1xf32>
    %cst_87 = arith.constant dense<0.000000e+00> : vector<2x4xf32>
    %311 = vector.multi_reduction <add>, %299, %cst_87 [2] : vector<2x4x8xf32> to vector<2x4xf32>
    %312 = vector.shape_cast %311 : vector<2x4xf32> to vector<2x4x1xf32>
    %cst_88 = arith.constant dense<0.000000e+00> : vector<4x1xf32>
    %313 = vector.multi_reduction <add>, %312, %cst_88 [0] : vector<2x4x1xf32> to vector<4x1xf32>
    %314 = vector.shape_cast %313 : vector<4x1xf32> to vector<1x4x1xf32>
    %cst_89 = arith.constant 6.250000e-02 : f32
    %315 = vector.broadcast %cst_89 : f32 to vector<1x4x1xf32>
    %316 = arith.mulf %314, %315 : vector<1x4x1xf32>
    %317 = vector.broadcast %316 : vector<1x4x1xf32> to vector<2x4x8xf32>
    %318 = arith.subf %299, %317 : vector<2x4x8xf32>
    %319 = arith.mulf %318, %318 : vector<2x4x8xf32>
    %cst_90 = arith.constant dense<0.000000e+00> : vector<2x4xf32>
    %320 = vector.multi_reduction <add>, %319, %cst_90 [2] : vector<2x4x8xf32> to vector<2x4xf32>
    %321 = vector.shape_cast %320 : vector<2x4xf32> to vector<2x4x1xf32>
    %cst_91 = arith.constant dense<0.000000e+00> : vector<4x1xf32>
    %322 = vector.multi_reduction <add>, %321, %cst_91 [0] : vector<2x4x1xf32> to vector<4x1xf32>
    %323 = vector.shape_cast %322 : vector<4x1xf32> to vector<1x4x1xf32>
    %cst_92 = arith.constant 6.250000e-02 : f32
    %324 = vector.broadcast %cst_92 : f32 to vector<1x4x1xf32>
    %325 = arith.mulf %323, %324 : vector<1x4x1xf32>
    %cst_93 = arith.constant 9.99999974E-6 : f32
    %326 = vector.broadcast %cst_93 : f32 to vector<1x4x1xf32>
    %327 = arith.addf %325, %326 : vector<1x4x1xf32>
    %328 = math.rsqrt %327 : vector<1x4x1xf32>
    %329 = vector.broadcast %328 : vector<1x4x1xf32> to vector<2x4x8xf32>
    %330 = arith.mulf %318, %329 : vector<2x4x8xf32>
    %331 = vector.broadcast %309 : vector<1x4x1xf32> to vector<2x4x8xf32>
    %332 = arith.mulf %330, %331 : vector<2x4x8xf32>
    %333 = vector.broadcast %310 : vector<1x4x1xf32> to vector<2x4x8xf32>
    %334 = arith.addf %332, %333 : vector<2x4x8xf32>
    %cst_94 = arith.constant 0.000000e+00 : f32
    %335 = vector.broadcast %cst_94 : f32 to vector<2x4x8xf32>
    %336 = arith.maximumf %334, %335 : vector<2x4x8xf32>
    %337 = vector.extract_strided_slice %305 {offsets = [0, 0, 0], sizes = [3, 4, 4], strides = [1, 1, 1]} : vector<6x4x4xf32> to vector<3x4x4xf32>
    %cst_95 = arith.constant 0.000000e+00 : f32
    %338 = vector.broadcast %cst_95 : f32 to vector<2x4x1xf32>
    %339 = vector.extract_strided_slice %336 {offsets = [0, 0, 0], sizes = [2, 4, 7], strides = [1, 1, 1]} : vector<2x4x8xf32> to vector<2x4x7xf32>
    %340 = tpu.concatenate %338, %339 in 2 : vector<2x4x1xf32>, vector<2x4x7xf32> -> vector<2x4x8xf32>
    %341 = vector.extract_strided_slice %337 {offsets = [0, 0, 0], sizes = [1, 4, 4], strides = [1, 1, 1]} : vector<3x4x4xf32> to vector<1x4x4xf32>
    %342 = vector.shape_cast %341 : vector<1x4x4xf32> to vector<4x4xf32>
    %343 = arith.truncf %342 : vector<4x4xf32> to vector<4x4xbf16>
    %344 = vector.shape_cast %343 : vector<4x4xbf16> to vector<1x4x4xbf16>
    %345 = vector.shape_cast %344 : vector<1x4x4xbf16> to vector<1x4x4xbf16>
    %346 = vector.broadcast %345 : vector<1x4x4xbf16> to vector<2x4x4xbf16>
    %347 = arith.truncf %340 : vector<2x4x8xf32> to vector<2x4x8xbf16>
    "tpu.trace_start"() <{level = 10 : i32, message = "noc,ncl->nol"}> : () -> ()
    %cst_96 = arith.constant dense<0.000000e+00> : vector<2x4x8xf32>
    %348 = tpu.matmul %346, %347, %cst_96 {dimension_numbers = #tpu.dot_dimension_numbers<[2], [1], [1], [2], [0, 0, 0, 1, 1, 2], [0], [0]>} : vector<2x4x4xbf16>, vector<2x4x8xbf16>, vector<2x4x8xf32> -> vector<2x4x8xf32>
    "tpu.trace_stop"() : () -> ()
    %349 = vector.extract_strided_slice %337 {offsets = [1, 0, 0], sizes = [1, 4, 4], strides = [1, 1, 1]} : vector<3x4x4xf32> to vector<1x4x4xf32>
    %350 = vector.shape_cast %349 : vector<1x4x4xf32> to vector<4x4xf32>
    %351 = arith.truncf %350 : vector<4x4xf32> to vector<4x4xbf16>
    %352 = vector.shape_cast %351 : vector<4x4xbf16> to vector<1x4x4xbf16>
    %353 = vector.shape_cast %352 : vector<1x4x4xbf16> to vector<1x4x4xbf16>
    %354 = vector.broadcast %353 : vector<1x4x4xbf16> to vector<2x4x4xbf16>
    %355 = arith.truncf %336 : vector<2x4x8xf32> to vector<2x4x8xbf16>
    "tpu.trace_start"() <{level = 10 : i32, message = "noc,ncl->nol"}> : () -> ()
    %cst_97 = arith.constant dense<0.000000e+00> : vector<2x4x8xf32>
    %356 = tpu.matmul %354, %355, %cst_97 {dimension_numbers = #tpu.dot_dimension_numbers<[2], [1], [1], [2], [0, 0, 0, 1, 1, 2], [0], [0]>} : vector<2x4x4xbf16>, vector<2x4x8xbf16>, vector<2x4x8xf32> -> vector<2x4x8xf32>
    "tpu.trace_stop"() : () -> ()
    %357 = arith.addf %348, %356 : vector<2x4x8xf32>
    %cst_98 = arith.constant 0.000000e+00 : f32
    %358 = vector.broadcast %cst_98 : f32 to vector<2x4x1xf32>
    %359 = vector.extract_strided_slice %336 {offsets = [0, 0, 1], sizes = [2, 4, 7], strides = [1, 1, 1]} : vector<2x4x8xf32> to vector<2x4x7xf32>
    %360 = tpu.concatenate %359, %358 in 2 : vector<2x4x7xf32>, vector<2x4x1xf32> -> vector<2x4x8xf32>
    %361 = vector.extract_strided_slice %337 {offsets = [2, 0, 0], sizes = [1, 4, 4], strides = [1, 1, 1]} : vector<3x4x4xf32> to vector<1x4x4xf32>
    %362 = vector.shape_cast %361 : vector<1x4x4xf32> to vector<4x4xf32>
    %363 = arith.truncf %362 : vector<4x4xf32> to vector<4x4xbf16>
    %364 = vector.shape_cast %363 : vector<4x4xbf16> to vector<1x4x4xbf16>
    %365 = vector.shape_cast %364 : vector<1x4x4xbf16> to vector<1x4x4xbf16>
    %366 = vector.broadcast %365 : vector<1x4x4xbf16> to vector<2x4x4xbf16>
    %367 = arith.truncf %360 : vector<2x4x8xf32> to vector<2x4x8xbf16>
    "tpu.trace_start"() <{level = 10 : i32, message = "noc,ncl->nol"}> : () -> ()
    %cst_99 = arith.constant dense<0.000000e+00> : vector<2x4x8xf32>
    %368 = tpu.matmul %366, %367, %cst_99 {dimension_numbers = #tpu.dot_dimension_numbers<[2], [1], [1], [2], [0, 0, 0, 1, 1, 2], [0], [0]>} : vector<2x4x4xbf16>, vector<2x4x8xbf16>, vector<2x4x8xf32> -> vector<2x4x8xf32>
    "tpu.trace_stop"() : () -> ()
    %369 = arith.addf %357, %368 : vector<2x4x8xf32>
    %370 = vector.extract_strided_slice %302 {offsets = [2, 0, 0], sizes = [1, 4, 1], strides = [1, 1, 1]} : vector<4x4x1xf32> to vector<1x4x1xf32>
    %371 = vector.extract_strided_slice %302 {offsets = [3, 0, 0], sizes = [1, 4, 1], strides = [1, 1, 1]} : vector<4x4x1xf32> to vector<1x4x1xf32>
    %cst_100 = arith.constant dense<0.000000e+00> : vector<2x4xf32>
    %372 = vector.multi_reduction <add>, %369, %cst_100 [2] : vector<2x4x8xf32> to vector<2x4xf32>
    %373 = vector.shape_cast %372 : vector<2x4xf32> to vector<2x4x1xf32>
    %cst_101 = arith.constant dense<0.000000e+00> : vector<4x1xf32>
    %374 = vector.multi_reduction <add>, %373, %cst_101 [0] : vector<2x4x1xf32> to vector<4x1xf32>
    %375 = vector.shape_cast %374 : vector<4x1xf32> to vector<1x4x1xf32>
    %cst_102 = arith.constant 6.250000e-02 : f32
    %376 = vector.broadcast %cst_102 : f32 to vector<1x4x1xf32>
    %377 = arith.mulf %375, %376 : vector<1x4x1xf32>
    %378 = vector.broadcast %377 : vector<1x4x1xf32> to vector<2x4x8xf32>
    %379 = arith.subf %369, %378 : vector<2x4x8xf32>
    %380 = arith.mulf %379, %379 : vector<2x4x8xf32>
    %cst_103 = arith.constant dense<0.000000e+00> : vector<2x4xf32>
    %381 = vector.multi_reduction <add>, %380, %cst_103 [2] : vector<2x4x8xf32> to vector<2x4xf32>
    %382 = vector.shape_cast %381 : vector<2x4xf32> to vector<2x4x1xf32>
    %cst_104 = arith.constant dense<0.000000e+00> : vector<4x1xf32>
    %383 = vector.multi_reduction <add>, %382, %cst_104 [0] : vector<2x4x1xf32> to vector<4x1xf32>
    %384 = vector.shape_cast %383 : vector<4x1xf32> to vector<1x4x1xf32>
    %cst_105 = arith.constant 6.250000e-02 : f32
    %385 = vector.broadcast %cst_105 : f32 to vector<1x4x1xf32>
    %386 = arith.mulf %384, %385 : vector<1x4x1xf32>
    %cst_106 = arith.constant 9.99999974E-6 : f32
    %387 = vector.broadcast %cst_106 : f32 to vector<1x4x1xf32>
    %388 = arith.addf %386, %387 : vector<1x4x1xf32>
    %389 = math.rsqrt %388 : vector<1x4x1xf32>
    %390 = vector.broadcast %389 : vector<1x4x1xf32> to vector<2x4x8xf32>
    %391 = arith.mulf %379, %390 : vector<2x4x8xf32>
    %392 = vector.broadcast %370 : vector<1x4x1xf32> to vector<2x4x8xf32>
    %393 = arith.mulf %391, %392 : vector<2x4x8xf32>
    %394 = vector.broadcast %371 : vector<1x4x1xf32> to vector<2x4x8xf32>
    %395 = arith.addf %393, %394 : vector<2x4x8xf32>
    %cst_107 = arith.constant 0.000000e+00 : f32
    %396 = vector.broadcast %cst_107 : f32 to vector<2x4x8xf32>
    %397 = arith.maximumf %395, %396 : vector<2x4x8xf32>
    %398 = vector.extract_strided_slice %305 {offsets = [3, 0, 0], sizes = [3, 4, 4], strides = [1, 1, 1]} : vector<6x4x4xf32> to vector<3x4x4xf32>
    %cst_108 = arith.constant 0.000000e+00 : f32
    %399 = vector.broadcast %cst_108 : f32 to vector<2x4x1xf32>
    %400 = vector.extract_strided_slice %397 {offsets = [0, 0, 0], sizes = [2, 4, 7], strides = [1, 1, 1]} : vector<2x4x8xf32> to vector<2x4x7xf32>
    %401 = tpu.concatenate %399, %400 in 2 : vector<2x4x1xf32>, vector<2x4x7xf32> -> vector<2x4x8xf32>
    %402 = vector.extract_strided_slice %398 {offsets = [0, 0, 0], sizes = [1, 4, 4], strides = [1, 1, 1]} : vector<3x4x4xf32> to vector<1x4x4xf32>
    %403 = vector.shape_cast %402 : vector<1x4x4xf32> to vector<4x4xf32>
    %404 = arith.truncf %403 : vector<4x4xf32> to vector<4x4xbf16>
    %405 = vector.shape_cast %404 : vector<4x4xbf16> to vector<1x4x4xbf16>
    %406 = vector.shape_cast %405 : vector<1x4x4xbf16> to vector<1x4x4xbf16>
    %407 = vector.broadcast %406 : vector<1x4x4xbf16> to vector<2x4x4xbf16>
    %408 = arith.truncf %401 : vector<2x4x8xf32> to vector<2x4x8xbf16>
    "tpu.trace_start"() <{level = 10 : i32, message = "noc,ncl->nol"}> : () -> ()
    %cst_109 = arith.constant dense<0.000000e+00> : vector<2x4x8xf32>
    %409 = tpu.matmul %407, %408, %cst_109 {dimension_numbers = #tpu.dot_dimension_numbers<[2], [1], [1], [2], [0, 0, 0, 1, 1, 2], [0], [0]>} : vector<2x4x4xbf16>, vector<2x4x8xbf16>, vector<2x4x8xf32> -> vector<2x4x8xf32>
    "tpu.trace_stop"() : () -> ()
    %410 = vector.extract_strided_slice %398 {offsets = [1, 0, 0], sizes = [1, 4, 4], strides = [1, 1, 1]} : vector<3x4x4xf32> to vector<1x4x4xf32>
    %411 = vector.shape_cast %410 : vector<1x4x4xf32> to vector<4x4xf32>
    %412 = arith.truncf %411 : vector<4x4xf32> to vector<4x4xbf16>
    %413 = vector.shape_cast %412 : vector<4x4xbf16> to vector<1x4x4xbf16>
    %414 = vector.shape_cast %413 : vector<1x4x4xbf16> to vector<1x4x4xbf16>
    %415 = vector.broadcast %414 : vector<1x4x4xbf16> to vector<2x4x4xbf16>
    %416 = arith.truncf %397 : vector<2x4x8xf32> to vector<2x4x8xbf16>
    "tpu.trace_start"() <{level = 10 : i32, message = "noc,ncl->nol"}> : () -> ()
    %cst_110 = arith.constant dense<0.000000e+00> : vector<2x4x8xf32>
    %417 = tpu.matmul %415, %416, %cst_110 {dimension_numbers = #tpu.dot_dimension_numbers<[2], [1], [1], [2], [0, 0, 0, 1, 1, 2], [0], [0]>} : vector<2x4x4xbf16>, vector<2x4x8xbf16>, vector<2x4x8xf32> -> vector<2x4x8xf32>
    "tpu.trace_stop"() : () -> ()
    %418 = arith.addf %409, %417 : vector<2x4x8xf32>
    %cst_111 = arith.constant 0.000000e+00 : f32
    %419 = vector.broadcast %cst_111 : f32 to vector<2x4x1xf32>
    %420 = vector.extract_strided_slice %397 {offsets = [0, 0, 1], sizes = [2, 4, 7], strides = [1, 1, 1]} : vector<2x4x8xf32> to vector<2x4x7xf32>
    %421 = tpu.concatenate %420, %419 in 2 : vector<2x4x7xf32>, vector<2x4x1xf32> -> vector<2x4x8xf32>
    %422 = vector.extract_strided_slice %398 {offsets = [2, 0, 0], sizes = [1, 4, 4], strides = [1, 1, 1]} : vector<3x4x4xf32> to vector<1x4x4xf32>
    %423 = vector.shape_cast %422 : vector<1x4x4xf32> to vector<4x4xf32>
    %424 = arith.truncf %423 : vector<4x4xf32> to vector<4x4xbf16>
    %425 = vector.shape_cast %424 : vector<4x4xbf16> to vector<1x4x4xbf16>
    %426 = vector.shape_cast %425 : vector<1x4x4xbf16> to vector<1x4x4xbf16>
    %427 = vector.broadcast %426 : vector<1x4x4xbf16> to vector<2x4x4xbf16>
    %428 = arith.truncf %421 : vector<2x4x8xf32> to vector<2x4x8xbf16>
    "tpu.trace_start"() <{level = 10 : i32, message = "noc,ncl->nol"}> : () -> ()
    %cst_112 = arith.constant dense<0.000000e+00> : vector<2x4x8xf32>
    %429 = tpu.matmul %427, %428, %cst_112 {dimension_numbers = #tpu.dot_dimension_numbers<[2], [1], [1], [2], [0, 0, 0, 1, 1, 2], [0], [0]>} : vector<2x4x4xbf16>, vector<2x4x8xbf16>, vector<2x4x8xf32> -> vector<2x4x8xf32>
    "tpu.trace_stop"() : () -> ()
    %430 = arith.addf %418, %429 : vector<2x4x8xf32>
    %431 = arith.truncf %308 : vector<4x4xf32> to vector<4x4xbf16>
    %432 = vector.shape_cast %431 : vector<4x4xbf16> to vector<1x4x4xbf16>
    %433 = vector.shape_cast %432 : vector<1x4x4xbf16> to vector<1x4x4xbf16>
    %434 = vector.broadcast %433 : vector<1x4x4xbf16> to vector<2x4x4xbf16>
    %435 = arith.truncf %299 : vector<2x4x8xf32> to vector<2x4x8xbf16>
    "tpu.trace_start"() <{level = 10 : i32, message = "noc,ncl->nol"}> : () -> ()
    %cst_113 = arith.constant dense<0.000000e+00> : vector<2x4x8xf32>
    %436 = tpu.matmul %434, %435, %cst_113 {dimension_numbers = #tpu.dot_dimension_numbers<[2], [1], [1], [2], [0, 0, 0, 1, 1, 2], [0], [0]>} : vector<2x4x4xbf16>, vector<2x4x8xbf16>, vector<2x4x8xf32> -> vector<2x4x8xf32>
    "tpu.trace_stop"() : () -> ()
    %437 = arith.addf %430, %436 : vector<2x4x8xf32>
    %c1_i32_114 = arith.constant 1 : i32
    %cst_115 = arith.constant -3.000000e+38 : f32
    %438 = vector.broadcast %cst_115 : f32 to vector<2x4x1xf32>
    %439 = vector.extract_strided_slice %299 {offsets = [0, 0, 0], sizes = [2, 4, 7], strides = [1, 1, 1]} : vector<2x4x8xf32> to vector<2x4x7xf32>
    %440 = tpu.concatenate %438, %439 in 2 : vector<2x4x1xf32>, vector<2x4x7xf32> -> vector<2x4x8xf32>
    %441 = arith.maximumf %440, %299 : vector<2x4x8xf32>
    %cst_116 = arith.constant -3.000000e+38 : f32
    %442 = vector.broadcast %cst_116 : f32 to vector<2x4x1xf32>
    %443 = vector.extract_strided_slice %299 {offsets = [0, 0, 1], sizes = [2, 4, 7], strides = [1, 1, 1]} : vector<2x4x8xf32> to vector<2x4x7xf32>
    %444 = tpu.concatenate %443, %442 in 2 : vector<2x4x7xf32>, vector<2x4x1xf32> -> vector<2x4x8xf32>
    %445 = arith.maximumf %441, %444 : vector<2x4x8xf32>
    %446 = tpu.iota {dimensions = array<i32: 0>} : vector<8x4xi32>
    %447 = tpu.iota {dimensions = array<i32: 1>} : vector<8x4xi32>
    %c2_i32_117 = arith.constant 2 : i32
    %448 = vector.broadcast %c2_i32_117 : i32 to vector<8x4xi32>
    %449 = arith.muli %448, %447 : vector<8x4xi32>
    %c7_i32 = arith.constant 7 : i32
    %450 = vector.broadcast %c7_i32 : i32 to vector<8x4xi32>
    %451 = arith.minsi %449, %450 : vector<8x4xi32>
    %452 = arith.cmpi eq, %446, %451 : vector<8x4xi32>
    %453 = arith.extui %452 : vector<8x4xi1> to vector<8x4xi32>
    %454 = arith.sitofp %453 : vector<8x4xi32> to vector<8x4xf32>
    %455 = vector.shape_cast %454 : vector<8x4xf32> to vector<1x8x4xf32>
    %456 = vector.shape_cast %455 : vector<1x8x4xf32> to vector<1x8x4xf32>
    %457 = vector.broadcast %456 : vector<1x8x4xf32> to vector<2x8x4xf32>
    "tpu.trace_start"() <{level = 10 : i32, message = "ncl,nlo->nco"}> : () -> ()
    %cst_118 = arith.constant dense<0.000000e+00> : vector<2x4x4xf32>
    %458 = tpu.matmul %445, %457, %cst_118 {dimension_numbers = #tpu.dot_dimension_numbers<[2], [1], [1], [2], [0, 0, 0, 1, 1, 2], [0], [0]>, precision = #tpu.contract_precision<fp32>} : vector<2x4x8xf32>, vector<2x8x4xf32>, vector<2x4x4xf32> -> vector<2x4x4xf32>
    "tpu.trace_stop"() : () -> ()
    %c4_i32 = arith.constant 4 : i32
    %459 = arith.index_cast %c4_i32 : i32 to index
    %c0_119 = arith.constant 0 : index
    %c0_120 = arith.constant 0 : index
    %c0_121 = arith.constant 0 : index
    %460 = vector.load %arg2[%459, %c0_119, %c0_120, %c0_121] : memref<11x4x4x1xf32, #tpu.memory_space<vmem>>, vector<1x4x4x1xf32>
    %461 = vector.shape_cast %460 : vector<1x4x4x1xf32> to vector<4x4x1xf32>
    %462 = arith.index_cast %c4_i32 : i32 to index
    %c0_122 = arith.constant 0 : index
    %c0_123 = arith.constant 0 : index
    %c0_124 = arith.constant 0 : index
    %463 = vector.load %arg3[%462, %c0_122, %c0_123, %c0_124] : memref<11x6x4x4xf32, #tpu.memory_space<vmem>>, vector<1x6x4x4xf32>
    %464 = vector.shape_cast %463 : vector<1x6x4x4xf32> to vector<6x4x4xf32>
    %465 = arith.index_cast %c4_i32 : i32 to index
    %c0_125 = arith.constant 0 : index
    %c0_126 = arith.constant 0 : index
    %466 = vector.load %arg4[%465, %c0_125, %c0_126] : memref<11x4x4xf32, #tpu.memory_space<vmem>>, vector<1x4x4xf32>
    %467 = vector.shape_cast %466 : vector<1x4x4xf32> to vector<4x4xf32>
    %468 = vector.extract_strided_slice %461 {offsets = [0, 0, 0], sizes = [1, 4, 1], strides = [1, 1, 1]} : vector<4x4x1xf32> to vector<1x4x1xf32>
    %469 = vector.extract_strided_slice %461 {offsets = [1, 0, 0], sizes = [1, 4, 1], strides = [1, 1, 1]} : vector<4x4x1xf32> to vector<1x4x1xf32>
    %cst_127 = arith.constant dense<0.000000e+00> : vector<2x4xf32>
    %470 = vector.multi_reduction <add>, %458, %cst_127 [2] : vector<2x4x4xf32> to vector<2x4xf32>
    %471 = vector.shape_cast %470 : vector<2x4xf32> to vector<2x4x1xf32>
    %cst_128 = arith.constant dense<0.000000e+00> : vector<4x1xf32>
    %472 = vector.multi_reduction <add>, %471, %cst_128 [0] : vector<2x4x1xf32> to vector<4x1xf32>
    %473 = vector.shape_cast %472 : vector<4x1xf32> to vector<1x4x1xf32>
    %cst_129 = arith.constant 1.250000e-01 : f32
    %474 = vector.broadcast %cst_129 : f32 to vector<1x4x1xf32>
    %475 = arith.mulf %473, %474 : vector<1x4x1xf32>
    %476 = vector.broadcast %475 : vector<1x4x1xf32> to vector<2x4x4xf32>
    %477 = arith.subf %458, %476 : vector<2x4x4xf32>
    %478 = arith.mulf %477, %477 : vector<2x4x4xf32>
    %cst_130 = arith.constant dense<0.000000e+00> : vector<2x4xf32>
    %479 = vector.multi_reduction <add>, %478, %cst_130 [2] : vector<2x4x4xf32> to vector<2x4xf32>
    %480 = vector.shape_cast %479 : vector<2x4xf32> to vector<2x4x1xf32>
    %cst_131 = arith.constant dense<0.000000e+00> : vector<4x1xf32>
    %481 = vector.multi_reduction <add>, %480, %cst_131 [0] : vector<2x4x1xf32> to vector<4x1xf32>
    %482 = vector.shape_cast %481 : vector<4x1xf32> to vector<1x4x1xf32>
    %cst_132 = arith.constant 1.250000e-01 : f32
    %483 = vector.broadcast %cst_132 : f32 to vector<1x4x1xf32>
    %484 = arith.mulf %482, %483 : vector<1x4x1xf32>
    %cst_133 = arith.constant 9.99999974E-6 : f32
    %485 = vector.broadcast %cst_133 : f32 to vector<1x4x1xf32>
    %486 = arith.addf %484, %485 : vector<1x4x1xf32>
    %487 = math.rsqrt %486 : vector<1x4x1xf32>
    %488 = vector.broadcast %487 : vector<1x4x1xf32> to vector<2x4x4xf32>
    %489 = arith.mulf %477, %488 : vector<2x4x4xf32>
    %490 = vector.broadcast %468 : vector<1x4x1xf32> to vector<2x4x4xf32>
    %491 = arith.mulf %489, %490 : vector<2x4x4xf32>
    %492 = vector.broadcast %469 : vector<1x4x1xf32> to vector<2x4x4xf32>
    %493 = arith.addf %491, %492 : vector<2x4x4xf32>
    %cst_134 = arith.constant 0.000000e+00 : f32
    %494 = vector.broadcast %cst_134 : f32 to vector<2x4x4xf32>
    %495 = arith.maximumf %493, %494 : vector<2x4x4xf32>
    %496 = vector.extract_strided_slice %464 {offsets = [0, 0, 0], sizes = [3, 4, 4], strides = [1, 1, 1]} : vector<6x4x4xf32> to vector<3x4x4xf32>
    %cst_135 = arith.constant 0.000000e+00 : f32
    %497 = vector.broadcast %cst_135 : f32 to vector<2x4x1xf32>
    %498 = vector.extract_strided_slice %495 {offsets = [0, 0, 0], sizes = [2, 4, 3], strides = [1, 1, 1]} : vector<2x4x4xf32> to vector<2x4x3xf32>
    %499 = tpu.concatenate %497, %498 in 2 : vector<2x4x1xf32>, vector<2x4x3xf32> -> vector<2x4x4xf32>
    %500 = vector.extract_strided_slice %496 {offsets = [0, 0, 0], sizes = [1, 4, 4], strides = [1, 1, 1]} : vector<3x4x4xf32> to vector<1x4x4xf32>
    %501 = vector.shape_cast %500 : vector<1x4x4xf32> to vector<4x4xf32>
    %502 = arith.truncf %501 : vector<4x4xf32> to vector<4x4xbf16>
    %503 = vector.shape_cast %502 : vector<4x4xbf16> to vector<1x4x4xbf16>
    %504 = vector.shape_cast %503 : vector<1x4x4xbf16> to vector<1x4x4xbf16>
    %505 = vector.broadcast %504 : vector<1x4x4xbf16> to vector<2x4x4xbf16>
    %506 = arith.truncf %499 : vector<2x4x4xf32> to vector<2x4x4xbf16>
    "tpu.trace_start"() <{level = 10 : i32, message = "noc,ncl->nol"}> : () -> ()
    %cst_136 = arith.constant dense<0.000000e+00> : vector<2x4x4xf32>
    %507 = tpu.matmul %505, %506, %cst_136 {dimension_numbers = #tpu.dot_dimension_numbers<[2], [1], [1], [2], [0, 0, 0, 1, 1, 2], [0], [0]>} : vector<2x4x4xbf16>, vector<2x4x4xbf16>, vector<2x4x4xf32> -> vector<2x4x4xf32>
    "tpu.trace_stop"() : () -> ()
    %508 = vector.extract_strided_slice %496 {offsets = [1, 0, 0], sizes = [1, 4, 4], strides = [1, 1, 1]} : vector<3x4x4xf32> to vector<1x4x4xf32>
    %509 = vector.shape_cast %508 : vector<1x4x4xf32> to vector<4x4xf32>
    %510 = arith.truncf %509 : vector<4x4xf32> to vector<4x4xbf16>
    %511 = vector.shape_cast %510 : vector<4x4xbf16> to vector<1x4x4xbf16>
    %512 = vector.shape_cast %511 : vector<1x4x4xbf16> to vector<1x4x4xbf16>
    %513 = vector.broadcast %512 : vector<1x4x4xbf16> to vector<2x4x4xbf16>
    %514 = arith.truncf %495 : vector<2x4x4xf32> to vector<2x4x4xbf16>
    "tpu.trace_start"() <{level = 10 : i32, message = "noc,ncl->nol"}> : () -> ()
    %cst_137 = arith.constant dense<0.000000e+00> : vector<2x4x4xf32>
    %515 = tpu.matmul %513, %514, %cst_137 {dimension_numbers = #tpu.dot_dimension_numbers<[2], [1], [1], [2], [0, 0, 0, 1, 1, 2], [0], [0]>} : vector<2x4x4xbf16>, vector<2x4x4xbf16>, vector<2x4x4xf32> -> vector<2x4x4xf32>
    "tpu.trace_stop"() : () -> ()
    %516 = arith.addf %507, %515 : vector<2x4x4xf32>
    %cst_138 = arith.constant 0.000000e+00 : f32
    %517 = vector.broadcast %cst_138 : f32 to vector<2x4x1xf32>
    %518 = vector.extract_strided_slice %495 {offsets = [0, 0, 1], sizes = [2, 4, 3], strides = [1, 1, 1]} : vector<2x4x4xf32> to vector<2x4x3xf32>
    %519 = tpu.concatenate %518, %517 in 2 : vector<2x4x3xf32>, vector<2x4x1xf32> -> vector<2x4x4xf32>
    %520 = vector.extract_strided_slice %496 {offsets = [2, 0, 0], sizes = [1, 4, 4], strides = [1, 1, 1]} : vector<3x4x4xf32> to vector<1x4x4xf32>
    %521 = vector.shape_cast %520 : vector<1x4x4xf32> to vector<4x4xf32>
    %522 = arith.truncf %521 : vector<4x4xf32> to vector<4x4xbf16>
    %523 = vector.shape_cast %522 : vector<4x4xbf16> to vector<1x4x4xbf16>
    %524 = vector.shape_cast %523 : vector<1x4x4xbf16> to vector<1x4x4xbf16>
    %525 = vector.broadcast %524 : vector<1x4x4xbf16> to vector<2x4x4xbf16>
    %526 = arith.truncf %519 : vector<2x4x4xf32> to vector<2x4x4xbf16>
    "tpu.trace_start"() <{level = 10 : i32, message = "noc,ncl->nol"}> : () -> ()
    %cst_139 = arith.constant dense<0.000000e+00> : vector<2x4x4xf32>
    %527 = tpu.matmul %525, %526, %cst_139 {dimension_numbers = #tpu.dot_dimension_numbers<[2], [1], [1], [2], [0, 0, 0, 1, 1, 2], [0], [0]>} : vector<2x4x4xbf16>, vector<2x4x4xbf16>, vector<2x4x4xf32> -> vector<2x4x4xf32>
    "tpu.trace_stop"() : () -> ()
    %528 = arith.addf %516, %527 : vector<2x4x4xf32>
    %529 = vector.extract_strided_slice %461 {offsets = [2, 0, 0], sizes = [1, 4, 1], strides = [1, 1, 1]} : vector<4x4x1xf32> to vector<1x4x1xf32>
    %530 = vector.extract_strided_slice %461 {offsets = [3, 0, 0], sizes = [1, 4, 1], strides = [1, 1, 1]} : vector<4x4x1xf32> to vector<1x4x1xf32>
    %cst_140 = arith.constant dense<0.000000e+00> : vector<2x4xf32>
    %531 = vector.multi_reduction <add>, %528, %cst_140 [2] : vector<2x4x4xf32> to vector<2x4xf32>
    %532 = vector.shape_cast %531 : vector<2x4xf32> to vector<2x4x1xf32>
    %cst_141 = arith.constant dense<0.000000e+00> : vector<4x1xf32>
    %533 = vector.multi_reduction <add>, %532, %cst_141 [0] : vector<2x4x1xf32> to vector<4x1xf32>
    %534 = vector.shape_cast %533 : vector<4x1xf32> to vector<1x4x1xf32>
    %cst_142 = arith.constant 1.250000e-01 : f32
    %535 = vector.broadcast %cst_142 : f32 to vector<1x4x1xf32>
    %536 = arith.mulf %534, %535 : vector<1x4x1xf32>
    %537 = vector.broadcast %536 : vector<1x4x1xf32> to vector<2x4x4xf32>
    %538 = arith.subf %528, %537 : vector<2x4x4xf32>
    %539 = arith.mulf %538, %538 : vector<2x4x4xf32>
    %cst_143 = arith.constant dense<0.000000e+00> : vector<2x4xf32>
    %540 = vector.multi_reduction <add>, %539, %cst_143 [2] : vector<2x4x4xf32> to vector<2x4xf32>
    %541 = vector.shape_cast %540 : vector<2x4xf32> to vector<2x4x1xf32>
    %cst_144 = arith.constant dense<0.000000e+00> : vector<4x1xf32>
    %542 = vector.multi_reduction <add>, %541, %cst_144 [0] : vector<2x4x1xf32> to vector<4x1xf32>
    %543 = vector.shape_cast %542 : vector<4x1xf32> to vector<1x4x1xf32>
    %cst_145 = arith.constant 1.250000e-01 : f32
    %544 = vector.broadcast %cst_145 : f32 to vector<1x4x1xf32>
    %545 = arith.mulf %543, %544 : vector<1x4x1xf32>
    %cst_146 = arith.constant 9.99999974E-6 : f32
    %546 = vector.broadcast %cst_146 : f32 to vector<1x4x1xf32>
    %547 = arith.addf %545, %546 : vector<1x4x1xf32>
    %548 = math.rsqrt %547 : vector<1x4x1xf32>
    %549 = vector.broadcast %548 : vector<1x4x1xf32> to vector<2x4x4xf32>
    %550 = arith.mulf %538, %549 : vector<2x4x4xf32>
    %551 = vector.broadcast %529 : vector<1x4x1xf32> to vector<2x4x4xf32>
    %552 = arith.mulf %550, %551 : vector<2x4x4xf32>
    %553 = vector.broadcast %530 : vector<1x4x1xf32> to vector<2x4x4xf32>
    %554 = arith.addf %552, %553 : vector<2x4x4xf32>
    %cst_147 = arith.constant 0.000000e+00 : f32
    %555 = vector.broadcast %cst_147 : f32 to vector<2x4x4xf32>
    %556 = arith.maximumf %554, %555 : vector<2x4x4xf32>
    %557 = vector.extract_strided_slice %464 {offsets = [3, 0, 0], sizes = [3, 4, 4], strides = [1, 1, 1]} : vector<6x4x4xf32> to vector<3x4x4xf32>
    %cst_148 = arith.constant 0.000000e+00 : f32
    %558 = vector.broadcast %cst_148 : f32 to vector<2x4x1xf32>
    %559 = vector.extract_strided_slice %556 {offsets = [0, 0, 0], sizes = [2, 4, 3], strides = [1, 1, 1]} : vector<2x4x4xf32> to vector<2x4x3xf32>
    %560 = tpu.concatenate %558, %559 in 2 : vector<2x4x1xf32>, vector<2x4x3xf32> -> vector<2x4x4xf32>
    %561 = vector.extract_strided_slice %557 {offsets = [0, 0, 0], sizes = [1, 4, 4], strides = [1, 1, 1]} : vector<3x4x4xf32> to vector<1x4x4xf32>
    %562 = vector.shape_cast %561 : vector<1x4x4xf32> to vector<4x4xf32>
    %563 = arith.truncf %562 : vector<4x4xf32> to vector<4x4xbf16>
    %564 = vector.shape_cast %563 : vector<4x4xbf16> to vector<1x4x4xbf16>
    %565 = vector.shape_cast %564 : vector<1x4x4xbf16> to vector<1x4x4xbf16>
    %566 = vector.broadcast %565 : vector<1x4x4xbf16> to vector<2x4x4xbf16>
    %567 = arith.truncf %560 : vector<2x4x4xf32> to vector<2x4x4xbf16>
    "tpu.trace_start"() <{level = 10 : i32, message = "noc,ncl->nol"}> : () -> ()
    %cst_149 = arith.constant dense<0.000000e+00> : vector<2x4x4xf32>
    %568 = tpu.matmul %566, %567, %cst_149 {dimension_numbers = #tpu.dot_dimension_numbers<[2], [1], [1], [2], [0, 0, 0, 1, 1, 2], [0], [0]>} : vector<2x4x4xbf16>, vector<2x4x4xbf16>, vector<2x4x4xf32> -> vector<2x4x4xf32>
    "tpu.trace_stop"() : () -> ()
    %569 = vector.extract_strided_slice %557 {offsets = [1, 0, 0], sizes = [1, 4, 4], strides = [1, 1, 1]} : vector<3x4x4xf32> to vector<1x4x4xf32>
    %570 = vector.shape_cast %569 : vector<1x4x4xf32> to vector<4x4xf32>
    %571 = arith.truncf %570 : vector<4x4xf32> to vector<4x4xbf16>
    %572 = vector.shape_cast %571 : vector<4x4xbf16> to vector<1x4x4xbf16>
    %573 = vector.shape_cast %572 : vector<1x4x4xbf16> to vector<1x4x4xbf16>
    %574 = vector.broadcast %573 : vector<1x4x4xbf16> to vector<2x4x4xbf16>
    %575 = arith.truncf %556 : vector<2x4x4xf32> to vector<2x4x4xbf16>
    "tpu.trace_start"() <{level = 10 : i32, message = "noc,ncl->nol"}> : () -> ()
    %cst_150 = arith.constant dense<0.000000e+00> : vector<2x4x4xf32>
    %576 = tpu.matmul %574, %575, %cst_150 {dimension_numbers = #tpu.dot_dimension_numbers<[2], [1], [1], [2], [0, 0, 0, 1, 1, 2], [0], [0]>} : vector<2x4x4xbf16>, vector<2x4x4xbf16>, vector<2x4x4xf32> -> vector<2x4x4xf32>
    "tpu.trace_stop"() : () -> ()
    %577 = arith.addf %568, %576 : vector<2x4x4xf32>
    %cst_151 = arith.constant 0.000000e+00 : f32
    %578 = vector.broadcast %cst_151 : f32 to vector<2x4x1xf32>
    %579 = vector.extract_strided_slice %556 {offsets = [0, 0, 1], sizes = [2, 4, 3], strides = [1, 1, 1]} : vector<2x4x4xf32> to vector<2x4x3xf32>
    %580 = tpu.concatenate %579, %578 in 2 : vector<2x4x3xf32>, vector<2x4x1xf32> -> vector<2x4x4xf32>
    %581 = vector.extract_strided_slice %557 {offsets = [2, 0, 0], sizes = [1, 4, 4], strides = [1, 1, 1]} : vector<3x4x4xf32> to vector<1x4x4xf32>
    %582 = vector.shape_cast %581 : vector<1x4x4xf32> to vector<4x4xf32>
    %583 = arith.truncf %582 : vector<4x4xf32> to vector<4x4xbf16>
    %584 = vector.shape_cast %583 : vector<4x4xbf16> to vector<1x4x4xbf16>
    %585 = vector.shape_cast %584 : vector<1x4x4xbf16> to vector<1x4x4xbf16>
    %586 = vector.broadcast %585 : vector<1x4x4xbf16> to vector<2x4x4xbf16>
    %587 = arith.truncf %580 : vector<2x4x4xf32> to vector<2x4x4xbf16>
    "tpu.trace_start"() <{level = 10 : i32, message = "noc,ncl->nol"}> : () -> ()
    %cst_152 = arith.constant dense<0.000000e+00> : vector<2x4x4xf32>
    %588 = tpu.matmul %586, %587, %cst_152 {dimension_numbers = #tpu.dot_dimension_numbers<[2], [1], [1], [2], [0, 0, 0, 1, 1, 2], [0], [0]>} : vector<2x4x4xbf16>, vector<2x4x4xbf16>, vector<2x4x4xf32> -> vector<2x4x4xf32>
    "tpu.trace_stop"() : () -> ()
    %589 = arith.addf %577, %588 : vector<2x4x4xf32>
    %590 = arith.truncf %467 : vector<4x4xf32> to vector<4x4xbf16>
    %591 = vector.shape_cast %590 : vector<4x4xbf16> to vector<1x4x4xbf16>
    %592 = vector.shape_cast %591 : vector<1x4x4xbf16> to vector<1x4x4xbf16>
    %593 = vector.broadcast %592 : vector<1x4x4xbf16> to vector<2x4x4xbf16>
    %594 = arith.truncf %458 : vector<2x4x4xf32> to vector<2x4x4xbf16>
    "tpu.trace_start"() <{level = 10 : i32, message = "noc,ncl->nol"}> : () -> ()
    %cst_153 = arith.constant dense<0.000000e+00> : vector<2x4x4xf32>
    %595 = tpu.matmul %593, %594, %cst_153 {dimension_numbers = #tpu.dot_dimension_numbers<[2], [1], [1], [2], [0, 0, 0, 1, 1, 2], [0], [0]>} : vector<2x4x4xbf16>, vector<2x4x4xbf16>, vector<2x4x4xf32> -> vector<2x4x4xf32>
    "tpu.trace_stop"() : () -> ()
    %596 = arith.addf %589, %595 : vector<2x4x4xf32>
    %c1_i32_154 = arith.constant 1 : i32
    %c5_i32 = arith.constant 5 : i32
    %597 = arith.index_cast %c5_i32 : i32 to index
    %c0_155 = arith.constant 0 : index
    %c0_156 = arith.constant 0 : index
    %c0_157 = arith.constant 0 : index
    %598 = vector.load %arg2[%597, %c0_155, %c0_156, %c0_157] : memref<11x4x4x1xf32, #tpu.memory_space<vmem>>, vector<1x4x4x1xf32>
    %599 = vector.shape_cast %598 : vector<1x4x4x1xf32> to vector<4x4x1xf32>
    %600 = arith.index_cast %c5_i32 : i32 to index
    %c0_158 = arith.constant 0 : index
    %c0_159 = arith.constant 0 : index
    %c0_160 = arith.constant 0 : index
    %601 = vector.load %arg3[%600, %c0_158, %c0_159, %c0_160] : memref<11x6x4x4xf32, #tpu.memory_space<vmem>>, vector<1x6x4x4xf32>
    %602 = vector.shape_cast %601 : vector<1x6x4x4xf32> to vector<6x4x4xf32>
    %603 = arith.index_cast %c5_i32 : i32 to index
    %c0_161 = arith.constant 0 : index
    %c0_162 = arith.constant 0 : index
    %604 = vector.load %arg4[%603, %c0_161, %c0_162] : memref<11x4x4xf32, #tpu.memory_space<vmem>>, vector<1x4x4xf32>
    %605 = vector.shape_cast %604 : vector<1x4x4xf32> to vector<4x4xf32>
    %606 = vector.extract_strided_slice %599 {offsets = [0, 0, 0], sizes = [1, 4, 1], strides = [1, 1, 1]} : vector<4x4x1xf32> to vector<1x4x1xf32>
    %607 = vector.extract_strided_slice %599 {offsets = [1, 0, 0], sizes = [1, 4, 1], strides = [1, 1, 1]} : vector<4x4x1xf32> to vector<1x4x1xf32>
    %cst_163 = arith.constant dense<0.000000e+00> : vector<2x4xf32>
    %608 = vector.multi_reduction <add>, %596, %cst_163 [2] : vector<2x4x4xf32> to vector<2x4xf32>
    %609 = vector.shape_cast %608 : vector<2x4xf32> to vector<2x4x1xf32>
    %cst_164 = arith.constant dense<0.000000e+00> : vector<4x1xf32>
    %610 = vector.multi_reduction <add>, %609, %cst_164 [0] : vector<2x4x1xf32> to vector<4x1xf32>
    %611 = vector.shape_cast %610 : vector<4x1xf32> to vector<1x4x1xf32>
    %cst_165 = arith.constant 1.250000e-01 : f32
    %612 = vector.broadcast %cst_165 : f32 to vector<1x4x1xf32>
    %613 = arith.mulf %611, %612 : vector<1x4x1xf32>
    %614 = vector.broadcast %613 : vector<1x4x1xf32> to vector<2x4x4xf32>
    %615 = arith.subf %596, %614 : vector<2x4x4xf32>
    %616 = arith.mulf %615, %615 : vector<2x4x4xf32>
    %cst_166 = arith.constant dense<0.000000e+00> : vector<2x4xf32>
    %617 = vector.multi_reduction <add>, %616, %cst_166 [2] : vector<2x4x4xf32> to vector<2x4xf32>
    %618 = vector.shape_cast %617 : vector<2x4xf32> to vector<2x4x1xf32>
    %cst_167 = arith.constant dense<0.000000e+00> : vector<4x1xf32>
    %619 = vector.multi_reduction <add>, %618, %cst_167 [0] : vector<2x4x1xf32> to vector<4x1xf32>
    %620 = vector.shape_cast %619 : vector<4x1xf32> to vector<1x4x1xf32>
    %cst_168 = arith.constant 1.250000e-01 : f32
    %621 = vector.broadcast %cst_168 : f32 to vector<1x4x1xf32>
    %622 = arith.mulf %620, %621 : vector<1x4x1xf32>
    %cst_169 = arith.constant 9.99999974E-6 : f32
    %623 = vector.broadcast %cst_169 : f32 to vector<1x4x1xf32>
    %624 = arith.addf %622, %623 : vector<1x4x1xf32>
    %625 = math.rsqrt %624 : vector<1x4x1xf32>
    %626 = vector.broadcast %625 : vector<1x4x1xf32> to vector<2x4x4xf32>
    %627 = arith.mulf %615, %626 : vector<2x4x4xf32>
    %628 = vector.broadcast %606 : vector<1x4x1xf32> to vector<2x4x4xf32>
    %629 = arith.mulf %627, %628 : vector<2x4x4xf32>
    %630 = vector.broadcast %607 : vector<1x4x1xf32> to vector<2x4x4xf32>
    %631 = arith.addf %629, %630 : vector<2x4x4xf32>
    %cst_170 = arith.constant 0.000000e+00 : f32
    %632 = vector.broadcast %cst_170 : f32 to vector<2x4x4xf32>
    %633 = arith.maximumf %631, %632 : vector<2x4x4xf32>
    %634 = vector.extract_strided_slice %602 {offsets = [0, 0, 0], sizes = [3, 4, 4], strides = [1, 1, 1]} : vector<6x4x4xf32> to vector<3x4x4xf32>
    %cst_171 = arith.constant 0.000000e+00 : f32
    %635 = vector.broadcast %cst_171 : f32 to vector<2x4x1xf32>
    %636 = vector.extract_strided_slice %633 {offsets = [0, 0, 0], sizes = [2, 4, 3], strides = [1, 1, 1]} : vector<2x4x4xf32> to vector<2x4x3xf32>
    %637 = tpu.concatenate %635, %636 in 2 : vector<2x4x1xf32>, vector<2x4x3xf32> -> vector<2x4x4xf32>
    %638 = vector.extract_strided_slice %634 {offsets = [0, 0, 0], sizes = [1, 4, 4], strides = [1, 1, 1]} : vector<3x4x4xf32> to vector<1x4x4xf32>
    %639 = vector.shape_cast %638 : vector<1x4x4xf32> to vector<4x4xf32>
    %640 = arith.truncf %639 : vector<4x4xf32> to vector<4x4xbf16>
    %641 = vector.shape_cast %640 : vector<4x4xbf16> to vector<1x4x4xbf16>
    %642 = vector.shape_cast %641 : vector<1x4x4xbf16> to vector<1x4x4xbf16>
    %643 = vector.broadcast %642 : vector<1x4x4xbf16> to vector<2x4x4xbf16>
    %644 = arith.truncf %637 : vector<2x4x4xf32> to vector<2x4x4xbf16>
    "tpu.trace_start"() <{level = 10 : i32, message = "noc,ncl->nol"}> : () -> ()
    %cst_172 = arith.constant dense<0.000000e+00> : vector<2x4x4xf32>
    %645 = tpu.matmul %643, %644, %cst_172 {dimension_numbers = #tpu.dot_dimension_numbers<[2], [1], [1], [2], [0, 0, 0, 1, 1, 2], [0], [0]>} : vector<2x4x4xbf16>, vector<2x4x4xbf16>, vector<2x4x4xf32> -> vector<2x4x4xf32>
    "tpu.trace_stop"() : () -> ()
    %646 = vector.extract_strided_slice %634 {offsets = [1, 0, 0], sizes = [1, 4, 4], strides = [1, 1, 1]} : vector<3x4x4xf32> to vector<1x4x4xf32>
    %647 = vector.shape_cast %646 : vector<1x4x4xf32> to vector<4x4xf32>
    %648 = arith.truncf %647 : vector<4x4xf32> to vector<4x4xbf16>
    %649 = vector.shape_cast %648 : vector<4x4xbf16> to vector<1x4x4xbf16>
    %650 = vector.shape_cast %649 : vector<1x4x4xbf16> to vector<1x4x4xbf16>
    %651 = vector.broadcast %650 : vector<1x4x4xbf16> to vector<2x4x4xbf16>
    %652 = arith.truncf %633 : vector<2x4x4xf32> to vector<2x4x4xbf16>
    "tpu.trace_start"() <{level = 10 : i32, message = "noc,ncl->nol"}> : () -> ()
    %cst_173 = arith.constant dense<0.000000e+00> : vector<2x4x4xf32>
    %653 = tpu.matmul %651, %652, %cst_173 {dimension_numbers = #tpu.dot_dimension_numbers<[2], [1], [1], [2], [0, 0, 0, 1, 1, 2], [0], [0]>} : vector<2x4x4xbf16>, vector<2x4x4xbf16>, vector<2x4x4xf32> -> vector<2x4x4xf32>
    "tpu.trace_stop"() : () -> ()
    %654 = arith.addf %645, %653 : vector<2x4x4xf32>
    %cst_174 = arith.constant 0.000000e+00 : f32
    %655 = vector.broadcast %cst_174 : f32 to vector<2x4x1xf32>
    %656 = vector.extract_strided_slice %633 {offsets = [0, 0, 1], sizes = [2, 4, 3], strides = [1, 1, 1]} : vector<2x4x4xf32> to vector<2x4x3xf32>
    %657 = tpu.concatenate %656, %655 in 2 : vector<2x4x3xf32>, vector<2x4x1xf32> -> vector<2x4x4xf32>
    %658 = vector.extract_strided_slice %634 {offsets = [2, 0, 0], sizes = [1, 4, 4], strides = [1, 1, 1]} : vector<3x4x4xf32> to vector<1x4x4xf32>
    %659 = vector.shape_cast %658 : vector<1x4x4xf32> to vector<4x4xf32>
    %660 = arith.truncf %659 : vector<4x4xf32> to vector<4x4xbf16>
    %661 = vector.shape_cast %660 : vector<4x4xbf16> to vector<1x4x4xbf16>
    %662 = vector.shape_cast %661 : vector<1x4x4xbf16> to vector<1x4x4xbf16>
    %663 = vector.broadcast %662 : vector<1x4x4xbf16> to vector<2x4x4xbf16>
    %664 = arith.truncf %657 : vector<2x4x4xf32> to vector<2x4x4xbf16>
    "tpu.trace_start"() <{level = 10 : i32, message = "noc,ncl->nol"}> : () -> ()
    %cst_175 = arith.constant dense<0.000000e+00> : vector<2x4x4xf32>
    %665 = tpu.matmul %663, %664, %cst_175 {dimension_numbers = #tpu.dot_dimension_numbers<[2], [1], [1], [2], [0, 0, 0, 1, 1, 2], [0], [0]>} : vector<2x4x4xbf16>, vector<2x4x4xbf16>, vector<2x4x4xf32> -> vector<2x4x4xf32>
    "tpu.trace_stop"() : () -> ()
    %666 = arith.addf %654, %665 : vector<2x4x4xf32>
    %667 = vector.extract_strided_slice %599 {offsets = [2, 0, 0], sizes = [1, 4, 1], strides = [1, 1, 1]} : vector<4x4x1xf32> to vector<1x4x1xf32>
    %668 = vector.extract_strided_slice %599 {offsets = [3, 0, 0], sizes = [1, 4, 1], strides = [1, 1, 1]} : vector<4x4x1xf32> to vector<1x4x1xf32>
    %cst_176 = arith.constant dense<0.000000e+00> : vector<2x4xf32>
    %669 = vector.multi_reduction <add>, %666, %cst_176 [2] : vector<2x4x4xf32> to vector<2x4xf32>
    %670 = vector.shape_cast %669 : vector<2x4xf32> to vector<2x4x1xf32>
    %cst_177 = arith.constant dense<0.000000e+00> : vector<4x1xf32>
    %671 = vector.multi_reduction <add>, %670, %cst_177 [0] : vector<2x4x1xf32> to vector<4x1xf32>
    %672 = vector.shape_cast %671 : vector<4x1xf32> to vector<1x4x1xf32>
    %cst_178 = arith.constant 1.250000e-01 : f32
    %673 = vector.broadcast %cst_178 : f32 to vector<1x4x1xf32>
    %674 = arith.mulf %672, %673 : vector<1x4x1xf32>
    %675 = vector.broadcast %674 : vector<1x4x1xf32> to vector<2x4x4xf32>
    %676 = arith.subf %666, %675 : vector<2x4x4xf32>
    %677 = arith.mulf %676, %676 : vector<2x4x4xf32>
    %cst_179 = arith.constant dense<0.000000e+00> : vector<2x4xf32>
    %678 = vector.multi_reduction <add>, %677, %cst_179 [2] : vector<2x4x4xf32> to vector<2x4xf32>
    %679 = vector.shape_cast %678 : vector<2x4xf32> to vector<2x4x1xf32>
    %cst_180 = arith.constant dense<0.000000e+00> : vector<4x1xf32>
    %680 = vector.multi_reduction <add>, %679, %cst_180 [0] : vector<2x4x1xf32> to vector<4x1xf32>
    %681 = vector.shape_cast %680 : vector<4x1xf32> to vector<1x4x1xf32>
    %cst_181 = arith.constant 1.250000e-01 : f32
    %682 = vector.broadcast %cst_181 : f32 to vector<1x4x1xf32>
    %683 = arith.mulf %681, %682 : vector<1x4x1xf32>
    %cst_182 = arith.constant 9.99999974E-6 : f32
    %684 = vector.broadcast %cst_182 : f32 to vector<1x4x1xf32>
    %685 = arith.addf %683, %684 : vector<1x4x1xf32>
    %686 = math.rsqrt %685 : vector<1x4x1xf32>
    %687 = vector.broadcast %686 : vector<1x4x1xf32> to vector<2x4x4xf32>
    %688 = arith.mulf %676, %687 : vector<2x4x4xf32>
    %689 = vector.broadcast %667 : vector<1x4x1xf32> to vector<2x4x4xf32>
    %690 = arith.mulf %688, %689 : vector<2x4x4xf32>
    %691 = vector.broadcast %668 : vector<1x4x1xf32> to vector<2x4x4xf32>
    %692 = arith.addf %690, %691 : vector<2x4x4xf32>
    %cst_183 = arith.constant 0.000000e+00 : f32
    %693 = vector.broadcast %cst_183 : f32 to vector<2x4x4xf32>
    %694 = arith.maximumf %692, %693 : vector<2x4x4xf32>
    %695 = vector.extract_strided_slice %602 {offsets = [3, 0, 0], sizes = [3, 4, 4], strides = [1, 1, 1]} : vector<6x4x4xf32> to vector<3x4x4xf32>
    %cst_184 = arith.constant 0.000000e+00 : f32
    %696 = vector.broadcast %cst_184 : f32 to vector<2x4x1xf32>
    %697 = vector.extract_strided_slice %694 {offsets = [0, 0, 0], sizes = [2, 4, 3], strides = [1, 1, 1]} : vector<2x4x4xf32> to vector<2x4x3xf32>
    %698 = tpu.concatenate %696, %697 in 2 : vector<2x4x1xf32>, vector<2x4x3xf32> -> vector<2x4x4xf32>
    %699 = vector.extract_strided_slice %695 {offsets = [0, 0, 0], sizes = [1, 4, 4], strides = [1, 1, 1]} : vector<3x4x4xf32> to vector<1x4x4xf32>
    %700 = vector.shape_cast %699 : vector<1x4x4xf32> to vector<4x4xf32>
    %701 = arith.truncf %700 : vector<4x4xf32> to vector<4x4xbf16>
    %702 = vector.shape_cast %701 : vector<4x4xbf16> to vector<1x4x4xbf16>
    %703 = vector.shape_cast %702 : vector<1x4x4xbf16> to vector<1x4x4xbf16>
    %704 = vector.broadcast %703 : vector<1x4x4xbf16> to vector<2x4x4xbf16>
    %705 = arith.truncf %698 : vector<2x4x4xf32> to vector<2x4x4xbf16>
    "tpu.trace_start"() <{level = 10 : i32, message = "noc,ncl->nol"}> : () -> ()
    %cst_185 = arith.constant dense<0.000000e+00> : vector<2x4x4xf32>
    %706 = tpu.matmul %704, %705, %cst_185 {dimension_numbers = #tpu.dot_dimension_numbers<[2], [1], [1], [2], [0, 0, 0, 1, 1, 2], [0], [0]>} : vector<2x4x4xbf16>, vector<2x4x4xbf16>, vector<2x4x4xf32> -> vector<2x4x4xf32>
    "tpu.trace_stop"() : () -> ()
    %707 = vector.extract_strided_slice %695 {offsets = [1, 0, 0], sizes = [1, 4, 4], strides = [1, 1, 1]} : vector<3x4x4xf32> to vector<1x4x4xf32>
    %708 = vector.shape_cast %707 : vector<1x4x4xf32> to vector<4x4xf32>
    %709 = arith.truncf %708 : vector<4x4xf32> to vector<4x4xbf16>
    %710 = vector.shape_cast %709 : vector<4x4xbf16> to vector<1x4x4xbf16>
    %711 = vector.shape_cast %710 : vector<1x4x4xbf16> to vector<1x4x4xbf16>
    %712 = vector.broadcast %711 : vector<1x4x4xbf16> to vector<2x4x4xbf16>
    %713 = arith.truncf %694 : vector<2x4x4xf32> to vector<2x4x4xbf16>
    "tpu.trace_start"() <{level = 10 : i32, message = "noc,ncl->nol"}> : () -> ()
    %cst_186 = arith.constant dense<0.000000e+00> : vector<2x4x4xf32>
    %714 = tpu.matmul %712, %713, %cst_186 {dimension_numbers = #tpu.dot_dimension_numbers<[2], [1], [1], [2], [0, 0, 0, 1, 1, 2], [0], [0]>} : vector<2x4x4xbf16>, vector<2x4x4xbf16>, vector<2x4x4xf32> -> vector<2x4x4xf32>
    "tpu.trace_stop"() : () -> ()
    %715 = arith.addf %706, %714 : vector<2x4x4xf32>
    %cst_187 = arith.constant 0.000000e+00 : f32
    %716 = vector.broadcast %cst_187 : f32 to vector<2x4x1xf32>
    %717 = vector.extract_strided_slice %694 {offsets = [0, 0, 1], sizes = [2, 4, 3], strides = [1, 1, 1]} : vector<2x4x4xf32> to vector<2x4x3xf32>
    %718 = tpu.concatenate %717, %716 in 2 : vector<2x4x3xf32>, vector<2x4x1xf32> -> vector<2x4x4xf32>
    %719 = vector.extract_strided_slice %695 {offsets = [2, 0, 0], sizes = [1, 4, 4], strides = [1, 1, 1]} : vector<3x4x4xf32> to vector<1x4x4xf32>
    %720 = vector.shape_cast %719 : vector<1x4x4xf32> to vector<4x4xf32>
    %721 = arith.truncf %720 : vector<4x4xf32> to vector<4x4xbf16>
    %722 = vector.shape_cast %721 : vector<4x4xbf16> to vector<1x4x4xbf16>
    %723 = vector.shape_cast %722 : vector<1x4x4xbf16> to vector<1x4x4xbf16>
    %724 = vector.broadcast %723 : vector<1x4x4xbf16> to vector<2x4x4xbf16>
    %725 = arith.truncf %718 : vector<2x4x4xf32> to vector<2x4x4xbf16>
    "tpu.trace_start"() <{level = 10 : i32, message = "noc,ncl->nol"}> : () -> ()
    %cst_188 = arith.constant dense<0.000000e+00> : vector<2x4x4xf32>
    %726 = tpu.matmul %724, %725, %cst_188 {dimension_numbers = #tpu.dot_dimension_numbers<[2], [1], [1], [2], [0, 0, 0, 1, 1, 2], [0], [0]>} : vector<2x4x4xbf16>, vector<2x4x4xbf16>, vector<2x4x4xf32> -> vector<2x4x4xf32>
    "tpu.trace_stop"() : () -> ()
    %727 = arith.addf %715, %726 : vector<2x4x4xf32>
    %728 = arith.truncf %605 : vector<4x4xf32> to vector<4x4xbf16>
    %729 = vector.shape_cast %728 : vector<4x4xbf16> to vector<1x4x4xbf16>
    %730 = vector.shape_cast %729 : vector<1x4x4xbf16> to vector<1x4x4xbf16>
    %731 = vector.broadcast %730 : vector<1x4x4xbf16> to vector<2x4x4xbf16>
    %732 = arith.truncf %596 : vector<2x4x4xf32> to vector<2x4x4xbf16>
    "tpu.trace_start"() <{level = 10 : i32, message = "noc,ncl->nol"}> : () -> ()
    %cst_189 = arith.constant dense<0.000000e+00> : vector<2x4x4xf32>
    %733 = tpu.matmul %731, %732, %cst_189 {dimension_numbers = #tpu.dot_dimension_numbers<[2], [1], [1], [2], [0, 0, 0, 1, 1, 2], [0], [0]>} : vector<2x4x4xbf16>, vector<2x4x4xbf16>, vector<2x4x4xf32> -> vector<2x4x4xf32>
    "tpu.trace_stop"() : () -> ()
    %734 = arith.addf %727, %733 : vector<2x4x4xf32>
    %c1_i32_190 = arith.constant 1 : i32
    %cst_191 = arith.constant -3.000000e+38 : f32
    %735 = vector.broadcast %cst_191 : f32 to vector<2x4x1xf32>
    %736 = vector.extract_strided_slice %596 {offsets = [0, 0, 0], sizes = [2, 4, 3], strides = [1, 1, 1]} : vector<2x4x4xf32> to vector<2x4x3xf32>
    %737 = tpu.concatenate %735, %736 in 2 : vector<2x4x1xf32>, vector<2x4x3xf32> -> vector<2x4x4xf32>
    %738 = arith.maximumf %737, %596 : vector<2x4x4xf32>
    %cst_192 = arith.constant -3.000000e+38 : f32
    %739 = vector.broadcast %cst_192 : f32 to vector<2x4x1xf32>
    %740 = vector.extract_strided_slice %596 {offsets = [0, 0, 1], sizes = [2, 4, 3], strides = [1, 1, 1]} : vector<2x4x4xf32> to vector<2x4x3xf32>
    %741 = tpu.concatenate %740, %739 in 2 : vector<2x4x3xf32>, vector<2x4x1xf32> -> vector<2x4x4xf32>
    %742 = arith.maximumf %738, %741 : vector<2x4x4xf32>
    %743 = tpu.iota {dimensions = array<i32: 0>} : vector<4x2xi32>
    %744 = tpu.iota {dimensions = array<i32: 1>} : vector<4x2xi32>
    %c2_i32_193 = arith.constant 2 : i32
    %745 = vector.broadcast %c2_i32_193 : i32 to vector<4x2xi32>
    %746 = arith.muli %745, %744 : vector<4x2xi32>
    %c3_i32_194 = arith.constant 3 : i32
    %747 = vector.broadcast %c3_i32_194 : i32 to vector<4x2xi32>
    %748 = arith.minsi %746, %747 : vector<4x2xi32>
    %749 = arith.cmpi eq, %743, %748 : vector<4x2xi32>
    %750 = arith.extui %749 : vector<4x2xi1> to vector<4x2xi32>
    %751 = arith.sitofp %750 : vector<4x2xi32> to vector<4x2xf32>
    %752 = vector.shape_cast %751 : vector<4x2xf32> to vector<1x4x2xf32>
    %753 = vector.shape_cast %752 : vector<1x4x2xf32> to vector<1x4x2xf32>
    %754 = vector.broadcast %753 : vector<1x4x2xf32> to vector<2x4x2xf32>
    "tpu.trace_start"() <{level = 10 : i32, message = "ncl,nlo->nco"}> : () -> ()
    %cst_195 = arith.constant dense<0.000000e+00> : vector<2x4x2xf32>
    %755 = tpu.matmul %742, %754, %cst_195 {dimension_numbers = #tpu.dot_dimension_numbers<[2], [1], [1], [2], [0, 0, 0, 1, 1, 2], [0], [0]>, precision = #tpu.contract_precision<fp32>} : vector<2x4x4xf32>, vector<2x4x2xf32>, vector<2x4x2xf32> -> vector<2x4x2xf32>
    "tpu.trace_stop"() : () -> ()
    %c5_i32_196 = arith.constant 5 : i32
    %756 = arith.index_cast %c5_i32_196 : i32 to index
    %c0_197 = arith.constant 0 : index
    %c0_198 = arith.constant 0 : index
    %c0_199 = arith.constant 0 : index
    %757 = vector.load %arg2[%756, %c0_197, %c0_198, %c0_199] : memref<11x4x4x1xf32, #tpu.memory_space<vmem>>, vector<1x4x4x1xf32>
    %758 = vector.shape_cast %757 : vector<1x4x4x1xf32> to vector<4x4x1xf32>
    %759 = arith.index_cast %c5_i32_196 : i32 to index
    %c0_200 = arith.constant 0 : index
    %c0_201 = arith.constant 0 : index
    %c0_202 = arith.constant 0 : index
    %760 = vector.load %arg3[%759, %c0_200, %c0_201, %c0_202] : memref<11x6x4x4xf32, #tpu.memory_space<vmem>>, vector<1x6x4x4xf32>
    %761 = vector.shape_cast %760 : vector<1x6x4x4xf32> to vector<6x4x4xf32>
    %762 = arith.index_cast %c5_i32_196 : i32 to index
    %c0_203 = arith.constant 0 : index
    %c0_204 = arith.constant 0 : index
    %763 = vector.load %arg4[%762, %c0_203, %c0_204] : memref<11x4x4xf32, #tpu.memory_space<vmem>>, vector<1x4x4xf32>
    %764 = vector.shape_cast %763 : vector<1x4x4xf32> to vector<4x4xf32>
    %765 = vector.extract_strided_slice %758 {offsets = [0, 0, 0], sizes = [1, 4, 1], strides = [1, 1, 1]} : vector<4x4x1xf32> to vector<1x4x1xf32>
    %766 = vector.extract_strided_slice %758 {offsets = [1, 0, 0], sizes = [1, 4, 1], strides = [1, 1, 1]} : vector<4x4x1xf32> to vector<1x4x1xf32>
    %cst_205 = arith.constant dense<0.000000e+00> : vector<2x4xf32>
    %767 = vector.multi_reduction <add>, %755, %cst_205 [2] : vector<2x4x2xf32> to vector<2x4xf32>
    %768 = vector.shape_cast %767 : vector<2x4xf32> to vector<2x4x1xf32>
    %cst_206 = arith.constant dense<0.000000e+00> : vector<4x1xf32>
    %769 = vector.multi_reduction <add>, %768, %cst_206 [0] : vector<2x4x1xf32> to vector<4x1xf32>
    %770 = vector.shape_cast %769 : vector<4x1xf32> to vector<1x4x1xf32>
    %cst_207 = arith.constant 2.500000e-01 : f32
    %771 = vector.broadcast %cst_207 : f32 to vector<1x4x1xf32>
    %772 = arith.mulf %770, %771 : vector<1x4x1xf32>
    %773 = vector.broadcast %772 : vector<1x4x1xf32> to vector<2x4x2xf32>
    %774 = arith.subf %755, %773 : vector<2x4x2xf32>
    %775 = arith.mulf %774, %774 : vector<2x4x2xf32>
    %cst_208 = arith.constant dense<0.000000e+00> : vector<2x4xf32>
    %776 = vector.multi_reduction <add>, %775, %cst_208 [2] : vector<2x4x2xf32> to vector<2x4xf32>
    %777 = vector.shape_cast %776 : vector<2x4xf32> to vector<2x4x1xf32>
    %cst_209 = arith.constant dense<0.000000e+00> : vector<4x1xf32>
    %778 = vector.multi_reduction <add>, %777, %cst_209 [0] : vector<2x4x1xf32> to vector<4x1xf32>
    %779 = vector.shape_cast %778 : vector<4x1xf32> to vector<1x4x1xf32>
    %cst_210 = arith.constant 2.500000e-01 : f32
    %780 = vector.broadcast %cst_210 : f32 to vector<1x4x1xf32>
    %781 = arith.mulf %779, %780 : vector<1x4x1xf32>
    %cst_211 = arith.constant 9.99999974E-6 : f32
    %782 = vector.broadcast %cst_211 : f32 to vector<1x4x1xf32>
    %783 = arith.addf %781, %782 : vector<1x4x1xf32>
    %784 = math.rsqrt %783 : vector<1x4x1xf32>
    %785 = vector.broadcast %784 : vector<1x4x1xf32> to vector<2x4x2xf32>
    %786 = arith.mulf %774, %785 : vector<2x4x2xf32>
    %787 = vector.broadcast %765 : vector<1x4x1xf32> to vector<2x4x2xf32>
    %788 = arith.mulf %786, %787 : vector<2x4x2xf32>
    %789 = vector.broadcast %766 : vector<1x4x1xf32> to vector<2x4x2xf32>
    %790 = arith.addf %788, %789 : vector<2x4x2xf32>
    %cst_212 = arith.constant 0.000000e+00 : f32
    %791 = vector.broadcast %cst_212 : f32 to vector<2x4x2xf32>
    %792 = arith.maximumf %790, %791 : vector<2x4x2xf32>
    %793 = vector.extract_strided_slice %761 {offsets = [0, 0, 0], sizes = [3, 4, 4], strides = [1, 1, 1]} : vector<6x4x4xf32> to vector<3x4x4xf32>
    %cst_213 = arith.constant 0.000000e+00 : f32
    %794 = vector.broadcast %cst_213 : f32 to vector<2x4x1xf32>
    %795 = vector.extract_strided_slice %792 {offsets = [0, 0, 0], sizes = [2, 4, 1], strides = [1, 1, 1]} : vector<2x4x2xf32> to vector<2x4x1xf32>
    %796 = tpu.concatenate %794, %795 in 2 : vector<2x4x1xf32>, vector<2x4x1xf32> -> vector<2x4x2xf32>
    %797 = vector.extract_strided_slice %793 {offsets = [0, 0, 0], sizes = [1, 4, 4], strides = [1, 1, 1]} : vector<3x4x4xf32> to vector<1x4x4xf32>
    %798 = vector.shape_cast %797 : vector<1x4x4xf32> to vector<4x4xf32>
    %799 = arith.truncf %798 : vector<4x4xf32> to vector<4x4xbf16>
    %800 = vector.shape_cast %799 : vector<4x4xbf16> to vector<1x4x4xbf16>
    %801 = vector.shape_cast %800 : vector<1x4x4xbf16> to vector<1x4x4xbf16>
    %802 = vector.broadcast %801 : vector<1x4x4xbf16> to vector<2x4x4xbf16>
    %803 = arith.truncf %796 : vector<2x4x2xf32> to vector<2x4x2xbf16>
    "tpu.trace_start"() <{level = 10 : i32, message = "noc,ncl->nol"}> : () -> ()
    %cst_214 = arith.constant dense<0.000000e+00> : vector<2x4x2xf32>
    %804 = tpu.matmul %802, %803, %cst_214 {dimension_numbers = #tpu.dot_dimension_numbers<[2], [1], [1], [2], [0, 0, 0, 1, 1, 2], [0], [0]>} : vector<2x4x4xbf16>, vector<2x4x2xbf16>, vector<2x4x2xf32> -> vector<2x4x2xf32>
    "tpu.trace_stop"() : () -> ()
    %805 = vector.extract_strided_slice %793 {offsets = [1, 0, 0], sizes = [1, 4, 4], strides = [1, 1, 1]} : vector<3x4x4xf32> to vector<1x4x4xf32>
    %806 = vector.shape_cast %805 : vector<1x4x4xf32> to vector<4x4xf32>
    %807 = arith.truncf %806 : vector<4x4xf32> to vector<4x4xbf16>
    %808 = vector.shape_cast %807 : vector<4x4xbf16> to vector<1x4x4xbf16>
    %809 = vector.shape_cast %808 : vector<1x4x4xbf16> to vector<1x4x4xbf16>
    %810 = vector.broadcast %809 : vector<1x4x4xbf16> to vector<2x4x4xbf16>
    %811 = arith.truncf %792 : vector<2x4x2xf32> to vector<2x4x2xbf16>
    "tpu.trace_start"() <{level = 10 : i32, message = "noc,ncl->nol"}> : () -> ()
    %cst_215 = arith.constant dense<0.000000e+00> : vector<2x4x2xf32>
    %812 = tpu.matmul %810, %811, %cst_215 {dimension_numbers = #tpu.dot_dimension_numbers<[2], [1], [1], [2], [0, 0, 0, 1, 1, 2], [0], [0]>} : vector<2x4x4xbf16>, vector<2x4x2xbf16>, vector<2x4x2xf32> -> vector<2x4x2xf32>
    "tpu.trace_stop"() : () -> ()
    %813 = arith.addf %804, %812 : vector<2x4x2xf32>
    %cst_216 = arith.constant 0.000000e+00 : f32
    %814 = vector.broadcast %cst_216 : f32 to vector<2x4x1xf32>
    %815 = vector.extract_strided_slice %792 {offsets = [0, 0, 1], sizes = [2, 4, 1], strides = [1, 1, 1]} : vector<2x4x2xf32> to vector<2x4x1xf32>
    %816 = tpu.concatenate %815, %814 in 2 : vector<2x4x1xf32>, vector<2x4x1xf32> -> vector<2x4x2xf32>
    %817 = vector.extract_strided_slice %793 {offsets = [2, 0, 0], sizes = [1, 4, 4], strides = [1, 1, 1]} : vector<3x4x4xf32> to vector<1x4x4xf32>
    %818 = vector.shape_cast %817 : vector<1x4x4xf32> to vector<4x4xf32>
    %819 = arith.truncf %818 : vector<4x4xf32> to vector<4x4xbf16>
    %820 = vector.shape_cast %819 : vector<4x4xbf16> to vector<1x4x4xbf16>
    %821 = vector.shape_cast %820 : vector<1x4x4xbf16> to vector<1x4x4xbf16>
    %822 = vector.broadcast %821 : vector<1x4x4xbf16> to vector<2x4x4xbf16>
    %823 = arith.truncf %816 : vector<2x4x2xf32> to vector<2x4x2xbf16>
    "tpu.trace_start"() <{level = 10 : i32, message = "noc,ncl->nol"}> : () -> ()
    %cst_217 = arith.constant dense<0.000000e+00> : vector<2x4x2xf32>
    %824 = tpu.matmul %822, %823, %cst_217 {dimension_numbers = #tpu.dot_dimension_numbers<[2], [1], [1], [2], [0, 0, 0, 1, 1, 2], [0], [0]>} : vector<2x4x4xbf16>, vector<2x4x2xbf16>, vector<2x4x2xf32> -> vector<2x4x2xf32>
    "tpu.trace_stop"() : () -> ()
    %825 = arith.addf %813, %824 : vector<2x4x2xf32>
    %826 = vector.extract_strided_slice %758 {offsets = [2, 0, 0], sizes = [1, 4, 1], strides = [1, 1, 1]} : vector<4x4x1xf32> to vector<1x4x1xf32>
    %827 = vector.extract_strided_slice %758 {offsets = [3, 0, 0], sizes = [1, 4, 1], strides = [1, 1, 1]} : vector<4x4x1xf32> to vector<1x4x1xf32>
    %cst_218 = arith.constant dense<0.000000e+00> : vector<2x4xf32>
    %828 = vector.multi_reduction <add>, %825, %cst_218 [2] : vector<2x4x2xf32> to vector<2x4xf32>
    %829 = vector.shape_cast %828 : vector<2x4xf32> to vector<2x4x1xf32>
    %cst_219 = arith.constant dense<0.000000e+00> : vector<4x1xf32>
    %830 = vector.multi_reduction <add>, %829, %cst_219 [0] : vector<2x4x1xf32> to vector<4x1xf32>
    %831 = vector.shape_cast %830 : vector<4x1xf32> to vector<1x4x1xf32>
    %cst_220 = arith.constant 2.500000e-01 : f32
    %832 = vector.broadcast %cst_220 : f32 to vector<1x4x1xf32>
    %833 = arith.mulf %831, %832 : vector<1x4x1xf32>
    %834 = vector.broadcast %833 : vector<1x4x1xf32> to vector<2x4x2xf32>
    %835 = arith.subf %825, %834 : vector<2x4x2xf32>
    %836 = arith.mulf %835, %835 : vector<2x4x2xf32>
    %cst_221 = arith.constant dense<0.000000e+00> : vector<2x4xf32>
    %837 = vector.multi_reduction <add>, %836, %cst_221 [2] : vector<2x4x2xf32> to vector<2x4xf32>
    %838 = vector.shape_cast %837 : vector<2x4xf32> to vector<2x4x1xf32>
    %cst_222 = arith.constant dense<0.000000e+00> : vector<4x1xf32>
    %839 = vector.multi_reduction <add>, %838, %cst_222 [0] : vector<2x4x1xf32> to vector<4x1xf32>
    %840 = vector.shape_cast %839 : vector<4x1xf32> to vector<1x4x1xf32>
    %cst_223 = arith.constant 2.500000e-01 : f32
    %841 = vector.broadcast %cst_223 : f32 to vector<1x4x1xf32>
    %842 = arith.mulf %840, %841 : vector<1x4x1xf32>
    %cst_224 = arith.constant 9.99999974E-6 : f32
    %843 = vector.broadcast %cst_224 : f32 to vector<1x4x1xf32>
    %844 = arith.addf %842, %843 : vector<1x4x1xf32>
    %845 = math.rsqrt %844 : vector<1x4x1xf32>
    %846 = vector.broadcast %845 : vector<1x4x1xf32> to vector<2x4x2xf32>
    %847 = arith.mulf %835, %846 : vector<2x4x2xf32>
    %848 = vector.broadcast %826 : vector<1x4x1xf32> to vector<2x4x2xf32>
    %849 = arith.mulf %847, %848 : vector<2x4x2xf32>
    %850 = vector.broadcast %827 : vector<1x4x1xf32> to vector<2x4x2xf32>
    %851 = arith.addf %849, %850 : vector<2x4x2xf32>
    %cst_225 = arith.constant 0.000000e+00 : f32
    %852 = vector.broadcast %cst_225 : f32 to vector<2x4x2xf32>
    %853 = arith.maximumf %851, %852 : vector<2x4x2xf32>
    %854 = vector.extract_strided_slice %761 {offsets = [3, 0, 0], sizes = [3, 4, 4], strides = [1, 1, 1]} : vector<6x4x4xf32> to vector<3x4x4xf32>
    %cst_226 = arith.constant 0.000000e+00 : f32
    %855 = vector.broadcast %cst_226 : f32 to vector<2x4x1xf32>
    %856 = vector.extract_strided_slice %853 {offsets = [0, 0, 0], sizes = [2, 4, 1], strides = [1, 1, 1]} : vector<2x4x2xf32> to vector<2x4x1xf32>
    %857 = tpu.concatenate %855, %856 in 2 : vector<2x4x1xf32>, vector<2x4x1xf32> -> vector<2x4x2xf32>
    %858 = vector.extract_strided_slice %854 {offsets = [0, 0, 0], sizes = [1, 4, 4], strides = [1, 1, 1]} : vector<3x4x4xf32> to vector<1x4x4xf32>
    %859 = vector.shape_cast %858 : vector<1x4x4xf32> to vector<4x4xf32>
    %860 = arith.truncf %859 : vector<4x4xf32> to vector<4x4xbf16>
    %861 = vector.shape_cast %860 : vector<4x4xbf16> to vector<1x4x4xbf16>
    %862 = vector.shape_cast %861 : vector<1x4x4xbf16> to vector<1x4x4xbf16>
    %863 = vector.broadcast %862 : vector<1x4x4xbf16> to vector<2x4x4xbf16>
    %864 = arith.truncf %857 : vector<2x4x2xf32> to vector<2x4x2xbf16>
    "tpu.trace_start"() <{level = 10 : i32, message = "noc,ncl->nol"}> : () -> ()
    %cst_227 = arith.constant dense<0.000000e+00> : vector<2x4x2xf32>
    %865 = tpu.matmul %863, %864, %cst_227 {dimension_numbers = #tpu.dot_dimension_numbers<[2], [1], [1], [2], [0, 0, 0, 1, 1, 2], [0], [0]>} : vector<2x4x4xbf16>, vector<2x4x2xbf16>, vector<2x4x2xf32> -> vector<2x4x2xf32>
    "tpu.trace_stop"() : () -> ()
    %866 = vector.extract_strided_slice %854 {offsets = [1, 0, 0], sizes = [1, 4, 4], strides = [1, 1, 1]} : vector<3x4x4xf32> to vector<1x4x4xf32>
    %867 = vector.shape_cast %866 : vector<1x4x4xf32> to vector<4x4xf32>
    %868 = arith.truncf %867 : vector<4x4xf32> to vector<4x4xbf16>
    %869 = vector.shape_cast %868 : vector<4x4xbf16> to vector<1x4x4xbf16>
    %870 = vector.shape_cast %869 : vector<1x4x4xbf16> to vector<1x4x4xbf16>
    %871 = vector.broadcast %870 : vector<1x4x4xbf16> to vector<2x4x4xbf16>
    %872 = arith.truncf %853 : vector<2x4x2xf32> to vector<2x4x2xbf16>
    "tpu.trace_start"() <{level = 10 : i32, message = "noc,ncl->nol"}> : () -> ()
    %cst_228 = arith.constant dense<0.000000e+00> : vector<2x4x2xf32>
    %873 = tpu.matmul %871, %872, %cst_228 {dimension_numbers = #tpu.dot_dimension_numbers<[2], [1], [1], [2], [0, 0, 0, 1, 1, 2], [0], [0]>} : vector<2x4x4xbf16>, vector<2x4x2xbf16>, vector<2x4x2xf32> -> vector<2x4x2xf32>
    "tpu.trace_stop"() : () -> ()
    %874 = arith.addf %865, %873 : vector<2x4x2xf32>
    %cst_229 = arith.constant 0.000000e+00 : f32
    %875 = vector.broadcast %cst_229 : f32 to vector<2x4x1xf32>
    %876 = vector.extract_strided_slice %853 {offsets = [0, 0, 1], sizes = [2, 4, 1], strides = [1, 1, 1]} : vector<2x4x2xf32> to vector<2x4x1xf32>
    %877 = tpu.concatenate %876, %875 in 2 : vector<2x4x1xf32>, vector<2x4x1xf32> -> vector<2x4x2xf32>
    %878 = vector.extract_strided_slice %854 {offsets = [2, 0, 0], sizes = [1, 4, 4], strides = [1, 1, 1]} : vector<3x4x4xf32> to vector<1x4x4xf32>
    %879 = vector.shape_cast %878 : vector<1x4x4xf32> to vector<4x4xf32>
    %880 = arith.truncf %879 : vector<4x4xf32> to vector<4x4xbf16>
    %881 = vector.shape_cast %880 : vector<4x4xbf16> to vector<1x4x4xbf16>
    %882 = vector.shape_cast %881 : vector<1x4x4xbf16> to vector<1x4x4xbf16>
    %883 = vector.broadcast %882 : vector<1x4x4xbf16> to vector<2x4x4xbf16>
    %884 = arith.truncf %877 : vector<2x4x2xf32> to vector<2x4x2xbf16>
    "tpu.trace_start"() <{level = 10 : i32, message = "noc,ncl->nol"}> : () -> ()
    %cst_230 = arith.constant dense<0.000000e+00> : vector<2x4x2xf32>
    %885 = tpu.matmul %883, %884, %cst_230 {dimension_numbers = #tpu.dot_dimension_numbers<[2], [1], [1], [2], [0, 0, 0, 1, 1, 2], [0], [0]>} : vector<2x4x4xbf16>, vector<2x4x2xbf16>, vector<2x4x2xf32> -> vector<2x4x2xf32>
    "tpu.trace_stop"() : () -> ()
    %886 = arith.addf %874, %885 : vector<2x4x2xf32>
    %887 = arith.truncf %764 : vector<4x4xf32> to vector<4x4xbf16>
    %888 = vector.shape_cast %887 : vector<4x4xbf16> to vector<1x4x4xbf16>
    %889 = vector.shape_cast %888 : vector<1x4x4xbf16> to vector<1x4x4xbf16>
    %890 = vector.broadcast %889 : vector<1x4x4xbf16> to vector<2x4x4xbf16>
    %891 = arith.truncf %755 : vector<2x4x2xf32> to vector<2x4x2xbf16>
    "tpu.trace_start"() <{level = 10 : i32, message = "noc,ncl->nol"}> : () -> ()
    %cst_231 = arith.constant dense<0.000000e+00> : vector<2x4x2xf32>
    %892 = tpu.matmul %890, %891, %cst_231 {dimension_numbers = #tpu.dot_dimension_numbers<[2], [1], [1], [2], [0, 0, 0, 1, 1, 2], [0], [0]>} : vector<2x4x4xbf16>, vector<2x4x2xbf16>, vector<2x4x2xf32> -> vector<2x4x2xf32>
    "tpu.trace_stop"() : () -> ()
    %893 = arith.addf %886, %892 : vector<2x4x2xf32>
    %c1_i32_232 = arith.constant 1 : i32
    %c6_i32 = arith.constant 6 : i32
    %894 = arith.index_cast %c6_i32 : i32 to index
    %c0_233 = arith.constant 0 : index
    %c0_234 = arith.constant 0 : index
    %c0_235 = arith.constant 0 : index
    %895 = vector.load %arg2[%894, %c0_233, %c0_234, %c0_235] : memref<11x4x4x1xf32, #tpu.memory_space<vmem>>, vector<1x4x4x1xf32>
    %896 = vector.shape_cast %895 : vector<1x4x4x1xf32> to vector<4x4x1xf32>
    %897 = arith.index_cast %c6_i32 : i32 to index
    %c0_236 = arith.constant 0 : index
    %c0_237 = arith.constant 0 : index
    %c0_238 = arith.constant 0 : index
    %898 = vector.load %arg3[%897, %c0_236, %c0_237, %c0_238] : memref<11x6x4x4xf32, #tpu.memory_space<vmem>>, vector<1x6x4x4xf32>
    %899 = vector.shape_cast %898 : vector<1x6x4x4xf32> to vector<6x4x4xf32>
    %900 = arith.index_cast %c6_i32 : i32 to index
    %c0_239 = arith.constant 0 : index
    %c0_240 = arith.constant 0 : index
    %901 = vector.load %arg4[%900, %c0_239, %c0_240] : memref<11x4x4xf32, #tpu.memory_space<vmem>>, vector<1x4x4xf32>
    %902 = vector.shape_cast %901 : vector<1x4x4xf32> to vector<4x4xf32>
    %903 = vector.extract_strided_slice %896 {offsets = [0, 0, 0], sizes = [1, 4, 1], strides = [1, 1, 1]} : vector<4x4x1xf32> to vector<1x4x1xf32>
    %904 = vector.extract_strided_slice %896 {offsets = [1, 0, 0], sizes = [1, 4, 1], strides = [1, 1, 1]} : vector<4x4x1xf32> to vector<1x4x1xf32>
    %cst_241 = arith.constant dense<0.000000e+00> : vector<2x4xf32>
    %905 = vector.multi_reduction <add>, %893, %cst_241 [2] : vector<2x4x2xf32> to vector<2x4xf32>
    %906 = vector.shape_cast %905 : vector<2x4xf32> to vector<2x4x1xf32>
    %cst_242 = arith.constant dense<0.000000e+00> : vector<4x1xf32>
    %907 = vector.multi_reduction <add>, %906, %cst_242 [0] : vector<2x4x1xf32> to vector<4x1xf32>
    %908 = vector.shape_cast %907 : vector<4x1xf32> to vector<1x4x1xf32>
    %cst_243 = arith.constant 2.500000e-01 : f32
    %909 = vector.broadcast %cst_243 : f32 to vector<1x4x1xf32>
    %910 = arith.mulf %908, %909 : vector<1x4x1xf32>
    %911 = vector.broadcast %910 : vector<1x4x1xf32> to vector<2x4x2xf32>
    %912 = arith.subf %893, %911 : vector<2x4x2xf32>
    %913 = arith.mulf %912, %912 : vector<2x4x2xf32>
    %cst_244 = arith.constant dense<0.000000e+00> : vector<2x4xf32>
    %914 = vector.multi_reduction <add>, %913, %cst_244 [2] : vector<2x4x2xf32> to vector<2x4xf32>
    %915 = vector.shape_cast %914 : vector<2x4xf32> to vector<2x4x1xf32>
    %cst_245 = arith.constant dense<0.000000e+00> : vector<4x1xf32>
    %916 = vector.multi_reduction <add>, %915, %cst_245 [0] : vector<2x4x1xf32> to vector<4x1xf32>
    %917 = vector.shape_cast %916 : vector<4x1xf32> to vector<1x4x1xf32>
    %cst_246 = arith.constant 2.500000e-01 : f32
    %918 = vector.broadcast %cst_246 : f32 to vector<1x4x1xf32>
    %919 = arith.mulf %917, %918 : vector<1x4x1xf32>
    %cst_247 = arith.constant 9.99999974E-6 : f32
    %920 = vector.broadcast %cst_247 : f32 to vector<1x4x1xf32>
    %921 = arith.addf %919, %920 : vector<1x4x1xf32>
    %922 = math.rsqrt %921 : vector<1x4x1xf32>
    %923 = vector.broadcast %922 : vector<1x4x1xf32> to vector<2x4x2xf32>
    %924 = arith.mulf %912, %923 : vector<2x4x2xf32>
    %925 = vector.broadcast %903 : vector<1x4x1xf32> to vector<2x4x2xf32>
    %926 = arith.mulf %924, %925 : vector<2x4x2xf32>
    %927 = vector.broadcast %904 : vector<1x4x1xf32> to vector<2x4x2xf32>
    %928 = arith.addf %926, %927 : vector<2x4x2xf32>
    %cst_248 = arith.constant 0.000000e+00 : f32
    %929 = vector.broadcast %cst_248 : f32 to vector<2x4x2xf32>
    %930 = arith.maximumf %928, %929 : vector<2x4x2xf32>
    %931 = vector.extract_strided_slice %899 {offsets = [0, 0, 0], sizes = [3, 4, 4], strides = [1, 1, 1]} : vector<6x4x4xf32> to vector<3x4x4xf32>
    %cst_249 = arith.constant 0.000000e+00 : f32
    %932 = vector.broadcast %cst_249 : f32 to vector<2x4x1xf32>
    %933 = vector.extract_strided_slice %930 {offsets = [0, 0, 0], sizes = [2, 4, 1], strides = [1, 1, 1]} : vector<2x4x2xf32> to vector<2x4x1xf32>
    %934 = tpu.concatenate %932, %933 in 2 : vector<2x4x1xf32>, vector<2x4x1xf32> -> vector<2x4x2xf32>
    %935 = vector.extract_strided_slice %931 {offsets = [0, 0, 0], sizes = [1, 4, 4], strides = [1, 1, 1]} : vector<3x4x4xf32> to vector<1x4x4xf32>
    %936 = vector.shape_cast %935 : vector<1x4x4xf32> to vector<4x4xf32>
    %937 = arith.truncf %936 : vector<4x4xf32> to vector<4x4xbf16>
    %938 = vector.shape_cast %937 : vector<4x4xbf16> to vector<1x4x4xbf16>
    %939 = vector.shape_cast %938 : vector<1x4x4xbf16> to vector<1x4x4xbf16>
    %940 = vector.broadcast %939 : vector<1x4x4xbf16> to vector<2x4x4xbf16>
    %941 = arith.truncf %934 : vector<2x4x2xf32> to vector<2x4x2xbf16>
    "tpu.trace_start"() <{level = 10 : i32, message = "noc,ncl->nol"}> : () -> ()
    %cst_250 = arith.constant dense<0.000000e+00> : vector<2x4x2xf32>
    %942 = tpu.matmul %940, %941, %cst_250 {dimension_numbers = #tpu.dot_dimension_numbers<[2], [1], [1], [2], [0, 0, 0, 1, 1, 2], [0], [0]>} : vector<2x4x4xbf16>, vector<2x4x2xbf16>, vector<2x4x2xf32> -> vector<2x4x2xf32>
    "tpu.trace_stop"() : () -> ()
    %943 = vector.extract_strided_slice %931 {offsets = [1, 0, 0], sizes = [1, 4, 4], strides = [1, 1, 1]} : vector<3x4x4xf32> to vector<1x4x4xf32>
    %944 = vector.shape_cast %943 : vector<1x4x4xf32> to vector<4x4xf32>
    %945 = arith.truncf %944 : vector<4x4xf32> to vector<4x4xbf16>
    %946 = vector.shape_cast %945 : vector<4x4xbf16> to vector<1x4x4xbf16>
    %947 = vector.shape_cast %946 : vector<1x4x4xbf16> to vector<1x4x4xbf16>
    %948 = vector.broadcast %947 : vector<1x4x4xbf16> to vector<2x4x4xbf16>
    %949 = arith.truncf %930 : vector<2x4x2xf32> to vector<2x4x2xbf16>
    "tpu.trace_start"() <{level = 10 : i32, message = "noc,ncl->nol"}> : () -> ()
    %cst_251 = arith.constant dense<0.000000e+00> : vector<2x4x2xf32>
    %950 = tpu.matmul %948, %949, %cst_251 {dimension_numbers = #tpu.dot_dimension_numbers<[2], [1], [1], [2], [0, 0, 0, 1, 1, 2], [0], [0]>} : vector<2x4x4xbf16>, vector<2x4x2xbf16>, vector<2x4x2xf32> -> vector<2x4x2xf32>
    "tpu.trace_stop"() : () -> ()
    %951 = arith.addf %942, %950 : vector<2x4x2xf32>
    %cst_252 = arith.constant 0.000000e+00 : f32
    %952 = vector.broadcast %cst_252 : f32 to vector<2x4x1xf32>
    %953 = vector.extract_strided_slice %930 {offsets = [0, 0, 1], sizes = [2, 4, 1], strides = [1, 1, 1]} : vector<2x4x2xf32> to vector<2x4x1xf32>
    %954 = tpu.concatenate %953, %952 in 2 : vector<2x4x1xf32>, vector<2x4x1xf32> -> vector<2x4x2xf32>
    %955 = vector.extract_strided_slice %931 {offsets = [2, 0, 0], sizes = [1, 4, 4], strides = [1, 1, 1]} : vector<3x4x4xf32> to vector<1x4x4xf32>
    %956 = vector.shape_cast %955 : vector<1x4x4xf32> to vector<4x4xf32>
    %957 = arith.truncf %956 : vector<4x4xf32> to vector<4x4xbf16>
    %958 = vector.shape_cast %957 : vector<4x4xbf16> to vector<1x4x4xbf16>
    %959 = vector.shape_cast %958 : vector<1x4x4xbf16> to vector<1x4x4xbf16>
    %960 = vector.broadcast %959 : vector<1x4x4xbf16> to vector<2x4x4xbf16>
    %961 = arith.truncf %954 : vector<2x4x2xf32> to vector<2x4x2xbf16>
    "tpu.trace_start"() <{level = 10 : i32, message = "noc,ncl->nol"}> : () -> ()
    %cst_253 = arith.constant dense<0.000000e+00> : vector<2x4x2xf32>
    %962 = tpu.matmul %960, %961, %cst_253 {dimension_numbers = #tpu.dot_dimension_numbers<[2], [1], [1], [2], [0, 0, 0, 1, 1, 2], [0], [0]>} : vector<2x4x4xbf16>, vector<2x4x2xbf16>, vector<2x4x2xf32> -> vector<2x4x2xf32>
    "tpu.trace_stop"() : () -> ()
    %963 = arith.addf %951, %962 : vector<2x4x2xf32>
    %964 = vector.extract_strided_slice %896 {offsets = [2, 0, 0], sizes = [1, 4, 1], strides = [1, 1, 1]} : vector<4x4x1xf32> to vector<1x4x1xf32>
    %965 = vector.extract_strided_slice %896 {offsets = [3, 0, 0], sizes = [1, 4, 1], strides = [1, 1, 1]} : vector<4x4x1xf32> to vector<1x4x1xf32>
    %cst_254 = arith.constant dense<0.000000e+00> : vector<2x4xf32>
    %966 = vector.multi_reduction <add>, %963, %cst_254 [2] : vector<2x4x2xf32> to vector<2x4xf32>
    %967 = vector.shape_cast %966 : vector<2x4xf32> to vector<2x4x1xf32>
    %cst_255 = arith.constant dense<0.000000e+00> : vector<4x1xf32>
    %968 = vector.multi_reduction <add>, %967, %cst_255 [0] : vector<2x4x1xf32> to vector<4x1xf32>
    %969 = vector.shape_cast %968 : vector<4x1xf32> to vector<1x4x1xf32>
    %cst_256 = arith.constant 2.500000e-01 : f32
    %970 = vector.broadcast %cst_256 : f32 to vector<1x4x1xf32>
    %971 = arith.mulf %969, %970 : vector<1x4x1xf32>
    %972 = vector.broadcast %971 : vector<1x4x1xf32> to vector<2x4x2xf32>
    %973 = arith.subf %963, %972 : vector<2x4x2xf32>
    %974 = arith.mulf %973, %973 : vector<2x4x2xf32>
    %cst_257 = arith.constant dense<0.000000e+00> : vector<2x4xf32>
    %975 = vector.multi_reduction <add>, %974, %cst_257 [2] : vector<2x4x2xf32> to vector<2x4xf32>
    %976 = vector.shape_cast %975 : vector<2x4xf32> to vector<2x4x1xf32>
    %cst_258 = arith.constant dense<0.000000e+00> : vector<4x1xf32>
    %977 = vector.multi_reduction <add>, %976, %cst_258 [0] : vector<2x4x1xf32> to vector<4x1xf32>
    %978 = vector.shape_cast %977 : vector<4x1xf32> to vector<1x4x1xf32>
    %cst_259 = arith.constant 2.500000e-01 : f32
    %979 = vector.broadcast %cst_259 : f32 to vector<1x4x1xf32>
    %980 = arith.mulf %978, %979 : vector<1x4x1xf32>
    %cst_260 = arith.constant 9.99999974E-6 : f32
    %981 = vector.broadcast %cst_260 : f32 to vector<1x4x1xf32>
    %982 = arith.addf %980, %981 : vector<1x4x1xf32>
    %983 = math.rsqrt %982 : vector<1x4x1xf32>
    %984 = vector.broadcast %983 : vector<1x4x1xf32> to vector<2x4x2xf32>
    %985 = arith.mulf %973, %984 : vector<2x4x2xf32>
    %986 = vector.broadcast %964 : vector<1x4x1xf32> to vector<2x4x2xf32>
    %987 = arith.mulf %985, %986 : vector<2x4x2xf32>
    %988 = vector.broadcast %965 : vector<1x4x1xf32> to vector<2x4x2xf32>
    %989 = arith.addf %987, %988 : vector<2x4x2xf32>
    %cst_261 = arith.constant 0.000000e+00 : f32
    %990 = vector.broadcast %cst_261 : f32 to vector<2x4x2xf32>
    %991 = arith.maximumf %989, %990 : vector<2x4x2xf32>
    %992 = vector.extract_strided_slice %899 {offsets = [3, 0, 0], sizes = [3, 4, 4], strides = [1, 1, 1]} : vector<6x4x4xf32> to vector<3x4x4xf32>
    %cst_262 = arith.constant 0.000000e+00 : f32
    %993 = vector.broadcast %cst_262 : f32 to vector<2x4x1xf32>
    %994 = vector.extract_strided_slice %991 {offsets = [0, 0, 0], sizes = [2, 4, 1], strides = [1, 1, 1]} : vector<2x4x2xf32> to vector<2x4x1xf32>
    %995 = tpu.concatenate %993, %994 in 2 : vector<2x4x1xf32>, vector<2x4x1xf32> -> vector<2x4x2xf32>
    %996 = vector.extract_strided_slice %992 {offsets = [0, 0, 0], sizes = [1, 4, 4], strides = [1, 1, 1]} : vector<3x4x4xf32> to vector<1x4x4xf32>
    %997 = vector.shape_cast %996 : vector<1x4x4xf32> to vector<4x4xf32>
    %998 = arith.truncf %997 : vector<4x4xf32> to vector<4x4xbf16>
    %999 = vector.shape_cast %998 : vector<4x4xbf16> to vector<1x4x4xbf16>
    %1000 = vector.shape_cast %999 : vector<1x4x4xbf16> to vector<1x4x4xbf16>
    %1001 = vector.broadcast %1000 : vector<1x4x4xbf16> to vector<2x4x4xbf16>
    %1002 = arith.truncf %995 : vector<2x4x2xf32> to vector<2x4x2xbf16>
    "tpu.trace_start"() <{level = 10 : i32, message = "noc,ncl->nol"}> : () -> ()
    %cst_263 = arith.constant dense<0.000000e+00> : vector<2x4x2xf32>
    %1003 = tpu.matmul %1001, %1002, %cst_263 {dimension_numbers = #tpu.dot_dimension_numbers<[2], [1], [1], [2], [0, 0, 0, 1, 1, 2], [0], [0]>} : vector<2x4x4xbf16>, vector<2x4x2xbf16>, vector<2x4x2xf32> -> vector<2x4x2xf32>
    "tpu.trace_stop"() : () -> ()
    %1004 = vector.extract_strided_slice %992 {offsets = [1, 0, 0], sizes = [1, 4, 4], strides = [1, 1, 1]} : vector<3x4x4xf32> to vector<1x4x4xf32>
    %1005 = vector.shape_cast %1004 : vector<1x4x4xf32> to vector<4x4xf32>
    %1006 = arith.truncf %1005 : vector<4x4xf32> to vector<4x4xbf16>
    %1007 = vector.shape_cast %1006 : vector<4x4xbf16> to vector<1x4x4xbf16>
    %1008 = vector.shape_cast %1007 : vector<1x4x4xbf16> to vector<1x4x4xbf16>
    %1009 = vector.broadcast %1008 : vector<1x4x4xbf16> to vector<2x4x4xbf16>
    %1010 = arith.truncf %991 : vector<2x4x2xf32> to vector<2x4x2xbf16>
    "tpu.trace_start"() <{level = 10 : i32, message = "noc,ncl->nol"}> : () -> ()
    %cst_264 = arith.constant dense<0.000000e+00> : vector<2x4x2xf32>
    %1011 = tpu.matmul %1009, %1010, %cst_264 {dimension_numbers = #tpu.dot_dimension_numbers<[2], [1], [1], [2], [0, 0, 0, 1, 1, 2], [0], [0]>} : vector<2x4x4xbf16>, vector<2x4x2xbf16>, vector<2x4x2xf32> -> vector<2x4x2xf32>
    "tpu.trace_stop"() : () -> ()
    %1012 = arith.addf %1003, %1011 : vector<2x4x2xf32>
    %cst_265 = arith.constant 0.000000e+00 : f32
    %1013 = vector.broadcast %cst_265 : f32 to vector<2x4x1xf32>
    %1014 = vector.extract_strided_slice %991 {offsets = [0, 0, 1], sizes = [2, 4, 1], strides = [1, 1, 1]} : vector<2x4x2xf32> to vector<2x4x1xf32>
    %1015 = tpu.concatenate %1014, %1013 in 2 : vector<2x4x1xf32>, vector<2x4x1xf32> -> vector<2x4x2xf32>
    %1016 = vector.extract_strided_slice %992 {offsets = [2, 0, 0], sizes = [1, 4, 4], strides = [1, 1, 1]} : vector<3x4x4xf32> to vector<1x4x4xf32>
    %1017 = vector.shape_cast %1016 : vector<1x4x4xf32> to vector<4x4xf32>
    %1018 = arith.truncf %1017 : vector<4x4xf32> to vector<4x4xbf16>
    %1019 = vector.shape_cast %1018 : vector<4x4xbf16> to vector<1x4x4xbf16>
    %1020 = vector.shape_cast %1019 : vector<1x4x4xbf16> to vector<1x4x4xbf16>
    %1021 = vector.broadcast %1020 : vector<1x4x4xbf16> to vector<2x4x4xbf16>
    %1022 = arith.truncf %1015 : vector<2x4x2xf32> to vector<2x4x2xbf16>
    "tpu.trace_start"() <{level = 10 : i32, message = "noc,ncl->nol"}> : () -> ()
    %cst_266 = arith.constant dense<0.000000e+00> : vector<2x4x2xf32>
    %1023 = tpu.matmul %1021, %1022, %cst_266 {dimension_numbers = #tpu.dot_dimension_numbers<[2], [1], [1], [2], [0, 0, 0, 1, 1, 2], [0], [0]>} : vector<2x4x4xbf16>, vector<2x4x2xbf16>, vector<2x4x2xf32> -> vector<2x4x2xf32>
    "tpu.trace_stop"() : () -> ()
    %1024 = arith.addf %1012, %1023 : vector<2x4x2xf32>
    %1025 = arith.truncf %902 : vector<4x4xf32> to vector<4x4xbf16>
    %1026 = vector.shape_cast %1025 : vector<4x4xbf16> to vector<1x4x4xbf16>
    %1027 = vector.shape_cast %1026 : vector<1x4x4xbf16> to vector<1x4x4xbf16>
    %1028 = vector.broadcast %1027 : vector<1x4x4xbf16> to vector<2x4x4xbf16>
    %1029 = arith.truncf %893 : vector<2x4x2xf32> to vector<2x4x2xbf16>
    "tpu.trace_start"() <{level = 10 : i32, message = "noc,ncl->nol"}> : () -> ()
    %cst_267 = arith.constant dense<0.000000e+00> : vector<2x4x2xf32>
    %1030 = tpu.matmul %1028, %1029, %cst_267 {dimension_numbers = #tpu.dot_dimension_numbers<[2], [1], [1], [2], [0, 0, 0, 1, 1, 2], [0], [0]>} : vector<2x4x4xbf16>, vector<2x4x2xbf16>, vector<2x4x2xf32> -> vector<2x4x2xf32>
    "tpu.trace_stop"() : () -> ()
    %1031 = arith.addf %1024, %1030 : vector<2x4x2xf32>
    %c1_i32_268 = arith.constant 1 : i32
    %1032 = tpu.iota {dimensions = array<i32: 0>} : vector<2x4xi32>
    %1033 = tpu.iota {dimensions = array<i32: 1>} : vector<2x4xi32>
    %c4_i32_269 = arith.constant 4 : i32
    %1034 = vector.broadcast %c4_i32_269 : i32 to vector<2x4xi32>
    %1035 = arith.muli %1032, %1034 : vector<2x4xi32>
    %c2_i32_270 = arith.constant 2 : i32
    %1036 = vector.broadcast %c2_i32_270 : i32 to vector<2x4xi32>
    %1037 = arith.muli %1033, %1036 : vector<2x4xi32>
    %1038 = arith.cmpi sle, %1035, %1037 : vector<2x4xi32>
    %c2_i32_271 = arith.constant 2 : i32
    %1039 = vector.broadcast %c2_i32_271 : i32 to vector<2x4xi32>
    %1040 = arith.muli %1033, %1039 : vector<2x4xi32>
    %c1_i32_272 = arith.constant 1 : i32
    %1041 = vector.broadcast %c1_i32_272 : i32 to vector<2x4xi32>
    %1042 = arith.addi %1032, %1041 : vector<2x4xi32>
    %c4_i32_273 = arith.constant 4 : i32
    %1043 = vector.broadcast %c4_i32_273 : i32 to vector<2x4xi32>
    %1044 = arith.muli %1042, %1043 : vector<2x4xi32>
    %1045 = arith.cmpi slt, %1040, %1044 : vector<2x4xi32>
    %1046 = arith.andi %1038, %1045 : vector<2x4xi1>
    %1047 = arith.extui %1046 : vector<2x4xi1> to vector<2x4xi32>
    %1048 = arith.sitofp %1047 : vector<2x4xi32> to vector<2x4xf32>
    %1049 = vector.shape_cast %1048 : vector<2x4xf32> to vector<1x2x4xf32>
    %1050 = vector.shape_cast %1049 : vector<1x2x4xf32> to vector<1x2x4xf32>
    %1051 = vector.broadcast %1050 : vector<1x2x4xf32> to vector<2x2x4xf32>
    "tpu.trace_start"() <{level = 10 : i32, message = "ncl,nlo->nco"}> : () -> ()
    %cst_274 = arith.constant dense<0.000000e+00> : vector<2x4x4xf32>
    %1052 = tpu.matmul %1031, %1051, %cst_274 {dimension_numbers = #tpu.dot_dimension_numbers<[2], [1], [1], [2], [0, 0, 0, 1, 1, 2], [0], [0]>, precision = #tpu.contract_precision<fp32>} : vector<2x4x2xf32>, vector<2x2x4xf32>, vector<2x4x4xf32> -> vector<2x4x4xf32>
    "tpu.trace_stop"() : () -> ()
    %1053 = arith.addf %1052, %734 : vector<2x4x4xf32>
    %c7_i32_275 = arith.constant 7 : i32
    %1054 = arith.index_cast %c7_i32_275 : i32 to index
    %c0_276 = arith.constant 0 : index
    %c0_277 = arith.constant 0 : index
    %c0_278 = arith.constant 0 : index
    %1055 = vector.load %arg2[%1054, %c0_276, %c0_277, %c0_278] : memref<11x4x4x1xf32, #tpu.memory_space<vmem>>, vector<1x4x4x1xf32>
    %1056 = vector.shape_cast %1055 : vector<1x4x4x1xf32> to vector<4x4x1xf32>
    %1057 = arith.index_cast %c7_i32_275 : i32 to index
    %c0_279 = arith.constant 0 : index
    %c0_280 = arith.constant 0 : index
    %c0_281 = arith.constant 0 : index
    %1058 = vector.load %arg3[%1057, %c0_279, %c0_280, %c0_281] : memref<11x6x4x4xf32, #tpu.memory_space<vmem>>, vector<1x6x4x4xf32>
    %1059 = vector.shape_cast %1058 : vector<1x6x4x4xf32> to vector<6x4x4xf32>
    %1060 = arith.index_cast %c7_i32_275 : i32 to index
    %c0_282 = arith.constant 0 : index
    %c0_283 = arith.constant 0 : index
    %1061 = vector.load %arg4[%1060, %c0_282, %c0_283] : memref<11x4x4xf32, #tpu.memory_space<vmem>>, vector<1x4x4xf32>
    %1062 = vector.shape_cast %1061 : vector<1x4x4xf32> to vector<4x4xf32>
    %1063 = vector.extract_strided_slice %1056 {offsets = [0, 0, 0], sizes = [1, 4, 1], strides = [1, 1, 1]} : vector<4x4x1xf32> to vector<1x4x1xf32>
    %1064 = vector.extract_strided_slice %1056 {offsets = [1, 0, 0], sizes = [1, 4, 1], strides = [1, 1, 1]} : vector<4x4x1xf32> to vector<1x4x1xf32>
    %cst_284 = arith.constant dense<0.000000e+00> : vector<2x4xf32>
    %1065 = vector.multi_reduction <add>, %1053, %cst_284 [2] : vector<2x4x4xf32> to vector<2x4xf32>
    %1066 = vector.shape_cast %1065 : vector<2x4xf32> to vector<2x4x1xf32>
    %cst_285 = arith.constant dense<0.000000e+00> : vector<4x1xf32>
    %1067 = vector.multi_reduction <add>, %1066, %cst_285 [0] : vector<2x4x1xf32> to vector<4x1xf32>
    %1068 = vector.shape_cast %1067 : vector<4x1xf32> to vector<1x4x1xf32>
    %cst_286 = arith.constant 1.250000e-01 : f32
    %1069 = vector.broadcast %cst_286 : f32 to vector<1x4x1xf32>
    %1070 = arith.mulf %1068, %1069 : vector<1x4x1xf32>
    %1071 = vector.broadcast %1070 : vector<1x4x1xf32> to vector<2x4x4xf32>
    %1072 = arith.subf %1053, %1071 : vector<2x4x4xf32>
    %1073 = arith.mulf %1072, %1072 : vector<2x4x4xf32>
    %cst_287 = arith.constant dense<0.000000e+00> : vector<2x4xf32>
    %1074 = vector.multi_reduction <add>, %1073, %cst_287 [2] : vector<2x4x4xf32> to vector<2x4xf32>
    %1075 = vector.shape_cast %1074 : vector<2x4xf32> to vector<2x4x1xf32>
    %cst_288 = arith.constant dense<0.000000e+00> : vector<4x1xf32>
    %1076 = vector.multi_reduction <add>, %1075, %cst_288 [0] : vector<2x4x1xf32> to vector<4x1xf32>
    %1077 = vector.shape_cast %1076 : vector<4x1xf32> to vector<1x4x1xf32>
    %cst_289 = arith.constant 1.250000e-01 : f32
    %1078 = vector.broadcast %cst_289 : f32 to vector<1x4x1xf32>
    %1079 = arith.mulf %1077, %1078 : vector<1x4x1xf32>
    %cst_290 = arith.constant 9.99999974E-6 : f32
    %1080 = vector.broadcast %cst_290 : f32 to vector<1x4x1xf32>
    %1081 = arith.addf %1079, %1080 : vector<1x4x1xf32>
    %1082 = math.rsqrt %1081 : vector<1x4x1xf32>
    %1083 = vector.broadcast %1082 : vector<1x4x1xf32> to vector<2x4x4xf32>
    %1084 = arith.mulf %1072, %1083 : vector<2x4x4xf32>
    %1085 = vector.broadcast %1063 : vector<1x4x1xf32> to vector<2x4x4xf32>
    %1086 = arith.mulf %1084, %1085 : vector<2x4x4xf32>
    %1087 = vector.broadcast %1064 : vector<1x4x1xf32> to vector<2x4x4xf32>
    %1088 = arith.addf %1086, %1087 : vector<2x4x4xf32>
    %cst_291 = arith.constant 0.000000e+00 : f32
    %1089 = vector.broadcast %cst_291 : f32 to vector<2x4x4xf32>
    %1090 = arith.maximumf %1088, %1089 : vector<2x4x4xf32>
    %1091 = vector.extract_strided_slice %1059 {offsets = [0, 0, 0], sizes = [3, 4, 4], strides = [1, 1, 1]} : vector<6x4x4xf32> to vector<3x4x4xf32>
    %cst_292 = arith.constant 0.000000e+00 : f32
    %1092 = vector.broadcast %cst_292 : f32 to vector<2x4x1xf32>
    %1093 = vector.extract_strided_slice %1090 {offsets = [0, 0, 0], sizes = [2, 4, 3], strides = [1, 1, 1]} : vector<2x4x4xf32> to vector<2x4x3xf32>
    %1094 = tpu.concatenate %1092, %1093 in 2 : vector<2x4x1xf32>, vector<2x4x3xf32> -> vector<2x4x4xf32>
    %1095 = vector.extract_strided_slice %1091 {offsets = [0, 0, 0], sizes = [1, 4, 4], strides = [1, 1, 1]} : vector<3x4x4xf32> to vector<1x4x4xf32>
    %1096 = vector.shape_cast %1095 : vector<1x4x4xf32> to vector<4x4xf32>
    %1097 = arith.truncf %1096 : vector<4x4xf32> to vector<4x4xbf16>
    %1098 = vector.shape_cast %1097 : vector<4x4xbf16> to vector<1x4x4xbf16>
    %1099 = vector.shape_cast %1098 : vector<1x4x4xbf16> to vector<1x4x4xbf16>
    %1100 = vector.broadcast %1099 : vector<1x4x4xbf16> to vector<2x4x4xbf16>
    %1101 = arith.truncf %1094 : vector<2x4x4xf32> to vector<2x4x4xbf16>
    "tpu.trace_start"() <{level = 10 : i32, message = "noc,ncl->nol"}> : () -> ()
    %cst_293 = arith.constant dense<0.000000e+00> : vector<2x4x4xf32>
    %1102 = tpu.matmul %1100, %1101, %cst_293 {dimension_numbers = #tpu.dot_dimension_numbers<[2], [1], [1], [2], [0, 0, 0, 1, 1, 2], [0], [0]>} : vector<2x4x4xbf16>, vector<2x4x4xbf16>, vector<2x4x4xf32> -> vector<2x4x4xf32>
    "tpu.trace_stop"() : () -> ()
    %1103 = vector.extract_strided_slice %1091 {offsets = [1, 0, 0], sizes = [1, 4, 4], strides = [1, 1, 1]} : vector<3x4x4xf32> to vector<1x4x4xf32>
    %1104 = vector.shape_cast %1103 : vector<1x4x4xf32> to vector<4x4xf32>
    %1105 = arith.truncf %1104 : vector<4x4xf32> to vector<4x4xbf16>
    %1106 = vector.shape_cast %1105 : vector<4x4xbf16> to vector<1x4x4xbf16>
    %1107 = vector.shape_cast %1106 : vector<1x4x4xbf16> to vector<1x4x4xbf16>
    %1108 = vector.broadcast %1107 : vector<1x4x4xbf16> to vector<2x4x4xbf16>
    %1109 = arith.truncf %1090 : vector<2x4x4xf32> to vector<2x4x4xbf16>
    "tpu.trace_start"() <{level = 10 : i32, message = "noc,ncl->nol"}> : () -> ()
    %cst_294 = arith.constant dense<0.000000e+00> : vector<2x4x4xf32>
    %1110 = tpu.matmul %1108, %1109, %cst_294 {dimension_numbers = #tpu.dot_dimension_numbers<[2], [1], [1], [2], [0, 0, 0, 1, 1, 2], [0], [0]>} : vector<2x4x4xbf16>, vector<2x4x4xbf16>, vector<2x4x4xf32> -> vector<2x4x4xf32>
    "tpu.trace_stop"() : () -> ()
    %1111 = arith.addf %1102, %1110 : vector<2x4x4xf32>
    %cst_295 = arith.constant 0.000000e+00 : f32
    %1112 = vector.broadcast %cst_295 : f32 to vector<2x4x1xf32>
    %1113 = vector.extract_strided_slice %1090 {offsets = [0, 0, 1], sizes = [2, 4, 3], strides = [1, 1, 1]} : vector<2x4x4xf32> to vector<2x4x3xf32>
    %1114 = tpu.concatenate %1113, %1112 in 2 : vector<2x4x3xf32>, vector<2x4x1xf32> -> vector<2x4x4xf32>
    %1115 = vector.extract_strided_slice %1091 {offsets = [2, 0, 0], sizes = [1, 4, 4], strides = [1, 1, 1]} : vector<3x4x4xf32> to vector<1x4x4xf32>
    %1116 = vector.shape_cast %1115 : vector<1x4x4xf32> to vector<4x4xf32>
    %1117 = arith.truncf %1116 : vector<4x4xf32> to vector<4x4xbf16>
    %1118 = vector.shape_cast %1117 : vector<4x4xbf16> to vector<1x4x4xbf16>
    %1119 = vector.shape_cast %1118 : vector<1x4x4xbf16> to vector<1x4x4xbf16>
    %1120 = vector.broadcast %1119 : vector<1x4x4xbf16> to vector<2x4x4xbf16>
    %1121 = arith.truncf %1114 : vector<2x4x4xf32> to vector<2x4x4xbf16>
    "tpu.trace_start"() <{level = 10 : i32, message = "noc,ncl->nol"}> : () -> ()
    %cst_296 = arith.constant dense<0.000000e+00> : vector<2x4x4xf32>
    %1122 = tpu.matmul %1120, %1121, %cst_296 {dimension_numbers = #tpu.dot_dimension_numbers<[2], [1], [1], [2], [0, 0, 0, 1, 1, 2], [0], [0]>} : vector<2x4x4xbf16>, vector<2x4x4xbf16>, vector<2x4x4xf32> -> vector<2x4x4xf32>
    "tpu.trace_stop"() : () -> ()
    %1123 = arith.addf %1111, %1122 : vector<2x4x4xf32>
    %1124 = vector.extract_strided_slice %1056 {offsets = [2, 0, 0], sizes = [1, 4, 1], strides = [1, 1, 1]} : vector<4x4x1xf32> to vector<1x4x1xf32>
    %1125 = vector.extract_strided_slice %1056 {offsets = [3, 0, 0], sizes = [1, 4, 1], strides = [1, 1, 1]} : vector<4x4x1xf32> to vector<1x4x1xf32>
    %cst_297 = arith.constant dense<0.000000e+00> : vector<2x4xf32>
    %1126 = vector.multi_reduction <add>, %1123, %cst_297 [2] : vector<2x4x4xf32> to vector<2x4xf32>
    %1127 = vector.shape_cast %1126 : vector<2x4xf32> to vector<2x4x1xf32>
    %cst_298 = arith.constant dense<0.000000e+00> : vector<4x1xf32>
    %1128 = vector.multi_reduction <add>, %1127, %cst_298 [0] : vector<2x4x1xf32> to vector<4x1xf32>
    %1129 = vector.shape_cast %1128 : vector<4x1xf32> to vector<1x4x1xf32>
    %cst_299 = arith.constant 1.250000e-01 : f32
    %1130 = vector.broadcast %cst_299 : f32 to vector<1x4x1xf32>
    %1131 = arith.mulf %1129, %1130 : vector<1x4x1xf32>
    %1132 = vector.broadcast %1131 : vector<1x4x1xf32> to vector<2x4x4xf32>
    %1133 = arith.subf %1123, %1132 : vector<2x4x4xf32>
    %1134 = arith.mulf %1133, %1133 : vector<2x4x4xf32>
    %cst_300 = arith.constant dense<0.000000e+00> : vector<2x4xf32>
    %1135 = vector.multi_reduction <add>, %1134, %cst_300 [2] : vector<2x4x4xf32> to vector<2x4xf32>
    %1136 = vector.shape_cast %1135 : vector<2x4xf32> to vector<2x4x1xf32>
    %cst_301 = arith.constant dense<0.000000e+00> : vector<4x1xf32>
    %1137 = vector.multi_reduction <add>, %1136, %cst_301 [0] : vector<2x4x1xf32> to vector<4x1xf32>
    %1138 = vector.shape_cast %1137 : vector<4x1xf32> to vector<1x4x1xf32>
    %cst_302 = arith.constant 1.250000e-01 : f32
    %1139 = vector.broadcast %cst_302 : f32 to vector<1x4x1xf32>
    %1140 = arith.mulf %1138, %1139 : vector<1x4x1xf32>
    %cst_303 = arith.constant 9.99999974E-6 : f32
    %1141 = vector.broadcast %cst_303 : f32 to vector<1x4x1xf32>
    %1142 = arith.addf %1140, %1141 : vector<1x4x1xf32>
    %1143 = math.rsqrt %1142 : vector<1x4x1xf32>
    %1144 = vector.broadcast %1143 : vector<1x4x1xf32> to vector<2x4x4xf32>
    %1145 = arith.mulf %1133, %1144 : vector<2x4x4xf32>
    %1146 = vector.broadcast %1124 : vector<1x4x1xf32> to vector<2x4x4xf32>
    %1147 = arith.mulf %1145, %1146 : vector<2x4x4xf32>
    %1148 = vector.broadcast %1125 : vector<1x4x1xf32> to vector<2x4x4xf32>
    %1149 = arith.addf %1147, %1148 : vector<2x4x4xf32>
    %cst_304 = arith.constant 0.000000e+00 : f32
    %1150 = vector.broadcast %cst_304 : f32 to vector<2x4x4xf32>
    %1151 = arith.maximumf %1149, %1150 : vector<2x4x4xf32>
    %1152 = vector.extract_strided_slice %1059 {offsets = [3, 0, 0], sizes = [3, 4, 4], strides = [1, 1, 1]} : vector<6x4x4xf32> to vector<3x4x4xf32>
    %cst_305 = arith.constant 0.000000e+00 : f32
    %1153 = vector.broadcast %cst_305 : f32 to vector<2x4x1xf32>
    %1154 = vector.extract_strided_slice %1151 {offsets = [0, 0, 0], sizes = [2, 4, 3], strides = [1, 1, 1]} : vector<2x4x4xf32> to vector<2x4x3xf32>
    %1155 = tpu.concatenate %1153, %1154 in 2 : vector<2x4x1xf32>, vector<2x4x3xf32> -> vector<2x4x4xf32>
    %1156 = vector.extract_strided_slice %1152 {offsets = [0, 0, 0], sizes = [1, 4, 4], strides = [1, 1, 1]} : vector<3x4x4xf32> to vector<1x4x4xf32>
    %1157 = vector.shape_cast %1156 : vector<1x4x4xf32> to vector<4x4xf32>
    %1158 = arith.truncf %1157 : vector<4x4xf32> to vector<4x4xbf16>
    %1159 = vector.shape_cast %1158 : vector<4x4xbf16> to vector<1x4x4xbf16>
    %1160 = vector.shape_cast %1159 : vector<1x4x4xbf16> to vector<1x4x4xbf16>
    %1161 = vector.broadcast %1160 : vector<1x4x4xbf16> to vector<2x4x4xbf16>
    %1162 = arith.truncf %1155 : vector<2x4x4xf32> to vector<2x4x4xbf16>
    "tpu.trace_start"() <{level = 10 : i32, message = "noc,ncl->nol"}> : () -> ()
    %cst_306 = arith.constant dense<0.000000e+00> : vector<2x4x4xf32>
    %1163 = tpu.matmul %1161, %1162, %cst_306 {dimension_numbers = #tpu.dot_dimension_numbers<[2], [1], [1], [2], [0, 0, 0, 1, 1, 2], [0], [0]>} : vector<2x4x4xbf16>, vector<2x4x4xbf16>, vector<2x4x4xf32> -> vector<2x4x4xf32>
    "tpu.trace_stop"() : () -> ()
    %1164 = vector.extract_strided_slice %1152 {offsets = [1, 0, 0], sizes = [1, 4, 4], strides = [1, 1, 1]} : vector<3x4x4xf32> to vector<1x4x4xf32>
    %1165 = vector.shape_cast %1164 : vector<1x4x4xf32> to vector<4x4xf32>
    %1166 = arith.truncf %1165 : vector<4x4xf32> to vector<4x4xbf16>
    %1167 = vector.shape_cast %1166 : vector<4x4xbf16> to vector<1x4x4xbf16>
    %1168 = vector.shape_cast %1167 : vector<1x4x4xbf16> to vector<1x4x4xbf16>
    %1169 = vector.broadcast %1168 : vector<1x4x4xbf16> to vector<2x4x4xbf16>
    %1170 = arith.truncf %1151 : vector<2x4x4xf32> to vector<2x4x4xbf16>
    "tpu.trace_start"() <{level = 10 : i32, message = "noc,ncl->nol"}> : () -> ()
    %cst_307 = arith.constant dense<0.000000e+00> : vector<2x4x4xf32>
    %1171 = tpu.matmul %1169, %1170, %cst_307 {dimension_numbers = #tpu.dot_dimension_numbers<[2], [1], [1], [2], [0, 0, 0, 1, 1, 2], [0], [0]>} : vector<2x4x4xbf16>, vector<2x4x4xbf16>, vector<2x4x4xf32> -> vector<2x4x4xf32>
    "tpu.trace_stop"() : () -> ()
    %1172 = arith.addf %1163, %1171 : vector<2x4x4xf32>
    %cst_308 = arith.constant 0.000000e+00 : f32
    %1173 = vector.broadcast %cst_308 : f32 to vector<2x4x1xf32>
    %1174 = vector.extract_strided_slice %1151 {offsets = [0, 0, 1], sizes = [2, 4, 3], strides = [1, 1, 1]} : vector<2x4x4xf32> to vector<2x4x3xf32>
    %1175 = tpu.concatenate %1174, %1173 in 2 : vector<2x4x3xf32>, vector<2x4x1xf32> -> vector<2x4x4xf32>
    %1176 = vector.extract_strided_slice %1152 {offsets = [2, 0, 0], sizes = [1, 4, 4], strides = [1, 1, 1]} : vector<3x4x4xf32> to vector<1x4x4xf32>
    %1177 = vector.shape_cast %1176 : vector<1x4x4xf32> to vector<4x4xf32>
    %1178 = arith.truncf %1177 : vector<4x4xf32> to vector<4x4xbf16>
    %1179 = vector.shape_cast %1178 : vector<4x4xbf16> to vector<1x4x4xbf16>
    %1180 = vector.shape_cast %1179 : vector<1x4x4xbf16> to vector<1x4x4xbf16>
    %1181 = vector.broadcast %1180 : vector<1x4x4xbf16> to vector<2x4x4xbf16>
    %1182 = arith.truncf %1175 : vector<2x4x4xf32> to vector<2x4x4xbf16>
    "tpu.trace_start"() <{level = 10 : i32, message = "noc,ncl->nol"}> : () -> ()
    %cst_309 = arith.constant dense<0.000000e+00> : vector<2x4x4xf32>
    %1183 = tpu.matmul %1181, %1182, %cst_309 {dimension_numbers = #tpu.dot_dimension_numbers<[2], [1], [1], [2], [0, 0, 0, 1, 1, 2], [0], [0]>} : vector<2x4x4xbf16>, vector<2x4x4xbf16>, vector<2x4x4xf32> -> vector<2x4x4xf32>
    "tpu.trace_stop"() : () -> ()
    %1184 = arith.addf %1172, %1183 : vector<2x4x4xf32>
    %1185 = arith.truncf %1062 : vector<4x4xf32> to vector<4x4xbf16>
    %1186 = vector.shape_cast %1185 : vector<4x4xbf16> to vector<1x4x4xbf16>
    %1187 = vector.shape_cast %1186 : vector<1x4x4xbf16> to vector<1x4x4xbf16>
    %1188 = vector.broadcast %1187 : vector<1x4x4xbf16> to vector<2x4x4xbf16>
    %1189 = arith.truncf %1053 : vector<2x4x4xf32> to vector<2x4x4xbf16>
    "tpu.trace_start"() <{level = 10 : i32, message = "noc,ncl->nol"}> : () -> ()
    %cst_310 = arith.constant dense<0.000000e+00> : vector<2x4x4xf32>
    %1190 = tpu.matmul %1188, %1189, %cst_310 {dimension_numbers = #tpu.dot_dimension_numbers<[2], [1], [1], [2], [0, 0, 0, 1, 1, 2], [0], [0]>} : vector<2x4x4xbf16>, vector<2x4x4xbf16>, vector<2x4x4xf32> -> vector<2x4x4xf32>
    "tpu.trace_stop"() : () -> ()
    %1191 = arith.addf %1184, %1190 : vector<2x4x4xf32>
    %c1_i32_311 = arith.constant 1 : i32
    %1192 = tpu.iota {dimensions = array<i32: 0>} : vector<4x8xi32>
    %1193 = tpu.iota {dimensions = array<i32: 1>} : vector<4x8xi32>
    %c8_i32 = arith.constant 8 : i32
    %1194 = vector.broadcast %c8_i32 : i32 to vector<4x8xi32>
    %1195 = arith.muli %1192, %1194 : vector<4x8xi32>
    %c4_i32_312 = arith.constant 4 : i32
    %1196 = vector.broadcast %c4_i32_312 : i32 to vector<4x8xi32>
    %1197 = arith.muli %1193, %1196 : vector<4x8xi32>
    %1198 = arith.cmpi sle, %1195, %1197 : vector<4x8xi32>
    %c4_i32_313 = arith.constant 4 : i32
    %1199 = vector.broadcast %c4_i32_313 : i32 to vector<4x8xi32>
    %1200 = arith.muli %1193, %1199 : vector<4x8xi32>
    %c1_i32_314 = arith.constant 1 : i32
    %1201 = vector.broadcast %c1_i32_314 : i32 to vector<4x8xi32>
    %1202 = arith.addi %1192, %1201 : vector<4x8xi32>
    %c8_i32_315 = arith.constant 8 : i32
    %1203 = vector.broadcast %c8_i32_315 : i32 to vector<4x8xi32>
    %1204 = arith.muli %1202, %1203 : vector<4x8xi32>
    %1205 = arith.cmpi slt, %1200, %1204 : vector<4x8xi32>
    %1206 = arith.andi %1198, %1205 : vector<4x8xi1>
    %1207 = arith.extui %1206 : vector<4x8xi1> to vector<4x8xi32>
    %1208 = arith.sitofp %1207 : vector<4x8xi32> to vector<4x8xf32>
    %1209 = vector.shape_cast %1208 : vector<4x8xf32> to vector<1x4x8xf32>
    %1210 = vector.shape_cast %1209 : vector<1x4x8xf32> to vector<1x4x8xf32>
    %1211 = vector.broadcast %1210 : vector<1x4x8xf32> to vector<2x4x8xf32>
    "tpu.trace_start"() <{level = 10 : i32, message = "ncl,nlo->nco"}> : () -> ()
    %cst_316 = arith.constant dense<0.000000e+00> : vector<2x4x8xf32>
    %1212 = tpu.matmul %1191, %1211, %cst_316 {dimension_numbers = #tpu.dot_dimension_numbers<[2], [1], [1], [2], [0, 0, 0, 1, 1, 2], [0], [0]>, precision = #tpu.contract_precision<fp32>} : vector<2x4x4xf32>, vector<2x4x8xf32>, vector<2x4x8xf32> -> vector<2x4x8xf32>
    "tpu.trace_stop"() : () -> ()
    %1213 = arith.addf %1212, %437 : vector<2x4x8xf32>
    %c8_i32_317 = arith.constant 8 : i32
    %1214 = arith.index_cast %c8_i32_317 : i32 to index
    %c0_318 = arith.constant 0 : index
    %c0_319 = arith.constant 0 : index
    %c0_320 = arith.constant 0 : index
    %1215 = vector.load %arg2[%1214, %c0_318, %c0_319, %c0_320] : memref<11x4x4x1xf32, #tpu.memory_space<vmem>>, vector<1x4x4x1xf32>
    %1216 = vector.shape_cast %1215 : vector<1x4x4x1xf32> to vector<4x4x1xf32>
    %1217 = arith.index_cast %c8_i32_317 : i32 to index
    %c0_321 = arith.constant 0 : index
    %c0_322 = arith.constant 0 : index
    %c0_323 = arith.constant 0 : index
    %1218 = vector.load %arg3[%1217, %c0_321, %c0_322, %c0_323] : memref<11x6x4x4xf32, #tpu.memory_space<vmem>>, vector<1x6x4x4xf32>
    %1219 = vector.shape_cast %1218 : vector<1x6x4x4xf32> to vector<6x4x4xf32>
    %1220 = arith.index_cast %c8_i32_317 : i32 to index
    %c0_324 = arith.constant 0 : index
    %c0_325 = arith.constant 0 : index
    %1221 = vector.load %arg4[%1220, %c0_324, %c0_325] : memref<11x4x4xf32, #tpu.memory_space<vmem>>, vector<1x4x4xf32>
    %1222 = vector.shape_cast %1221 : vector<1x4x4xf32> to vector<4x4xf32>
    %1223 = vector.extract_strided_slice %1216 {offsets = [0, 0, 0], sizes = [1, 4, 1], strides = [1, 1, 1]} : vector<4x4x1xf32> to vector<1x4x1xf32>
    %1224 = vector.extract_strided_slice %1216 {offsets = [1, 0, 0], sizes = [1, 4, 1], strides = [1, 1, 1]} : vector<4x4x1xf32> to vector<1x4x1xf32>
    %cst_326 = arith.constant dense<0.000000e+00> : vector<2x4xf32>
    %1225 = vector.multi_reduction <add>, %1213, %cst_326 [2] : vector<2x4x8xf32> to vector<2x4xf32>
    %1226 = vector.shape_cast %1225 : vector<2x4xf32> to vector<2x4x1xf32>
    %cst_327 = arith.constant dense<0.000000e+00> : vector<4x1xf32>
    %1227 = vector.multi_reduction <add>, %1226, %cst_327 [0] : vector<2x4x1xf32> to vector<4x1xf32>
    %1228 = vector.shape_cast %1227 : vector<4x1xf32> to vector<1x4x1xf32>
    %cst_328 = arith.constant 6.250000e-02 : f32
    %1229 = vector.broadcast %cst_328 : f32 to vector<1x4x1xf32>
    %1230 = arith.mulf %1228, %1229 : vector<1x4x1xf32>
    %1231 = vector.broadcast %1230 : vector<1x4x1xf32> to vector<2x4x8xf32>
    %1232 = arith.subf %1213, %1231 : vector<2x4x8xf32>
    %1233 = arith.mulf %1232, %1232 : vector<2x4x8xf32>
    %cst_329 = arith.constant dense<0.000000e+00> : vector<2x4xf32>
    %1234 = vector.multi_reduction <add>, %1233, %cst_329 [2] : vector<2x4x8xf32> to vector<2x4xf32>
    %1235 = vector.shape_cast %1234 : vector<2x4xf32> to vector<2x4x1xf32>
    %cst_330 = arith.constant dense<0.000000e+00> : vector<4x1xf32>
    %1236 = vector.multi_reduction <add>, %1235, %cst_330 [0] : vector<2x4x1xf32> to vector<4x1xf32>
    %1237 = vector.shape_cast %1236 : vector<4x1xf32> to vector<1x4x1xf32>
    %cst_331 = arith.constant 6.250000e-02 : f32
    %1238 = vector.broadcast %cst_331 : f32 to vector<1x4x1xf32>
    %1239 = arith.mulf %1237, %1238 : vector<1x4x1xf32>
    %cst_332 = arith.constant 9.99999974E-6 : f32
    %1240 = vector.broadcast %cst_332 : f32 to vector<1x4x1xf32>
    %1241 = arith.addf %1239, %1240 : vector<1x4x1xf32>
    %1242 = math.rsqrt %1241 : vector<1x4x1xf32>
    %1243 = vector.broadcast %1242 : vector<1x4x1xf32> to vector<2x4x8xf32>
    %1244 = arith.mulf %1232, %1243 : vector<2x4x8xf32>
    %1245 = vector.broadcast %1223 : vector<1x4x1xf32> to vector<2x4x8xf32>
    %1246 = arith.mulf %1244, %1245 : vector<2x4x8xf32>
    %1247 = vector.broadcast %1224 : vector<1x4x1xf32> to vector<2x4x8xf32>
    %1248 = arith.addf %1246, %1247 : vector<2x4x8xf32>
    %cst_333 = arith.constant 0.000000e+00 : f32
    %1249 = vector.broadcast %cst_333 : f32 to vector<2x4x8xf32>
    %1250 = arith.maximumf %1248, %1249 : vector<2x4x8xf32>
    %1251 = vector.extract_strided_slice %1219 {offsets = [0, 0, 0], sizes = [3, 4, 4], strides = [1, 1, 1]} : vector<6x4x4xf32> to vector<3x4x4xf32>
    %cst_334 = arith.constant 0.000000e+00 : f32
    %1252 = vector.broadcast %cst_334 : f32 to vector<2x4x1xf32>
    %1253 = vector.extract_strided_slice %1250 {offsets = [0, 0, 0], sizes = [2, 4, 7], strides = [1, 1, 1]} : vector<2x4x8xf32> to vector<2x4x7xf32>
    %1254 = tpu.concatenate %1252, %1253 in 2 : vector<2x4x1xf32>, vector<2x4x7xf32> -> vector<2x4x8xf32>
    %1255 = vector.extract_strided_slice %1251 {offsets = [0, 0, 0], sizes = [1, 4, 4], strides = [1, 1, 1]} : vector<3x4x4xf32> to vector<1x4x4xf32>
    %1256 = vector.shape_cast %1255 : vector<1x4x4xf32> to vector<4x4xf32>
    %1257 = arith.truncf %1256 : vector<4x4xf32> to vector<4x4xbf16>
    %1258 = vector.shape_cast %1257 : vector<4x4xbf16> to vector<1x4x4xbf16>
    %1259 = vector.shape_cast %1258 : vector<1x4x4xbf16> to vector<1x4x4xbf16>
    %1260 = vector.broadcast %1259 : vector<1x4x4xbf16> to vector<2x4x4xbf16>
    %1261 = arith.truncf %1254 : vector<2x4x8xf32> to vector<2x4x8xbf16>
    "tpu.trace_start"() <{level = 10 : i32, message = "noc,ncl->nol"}> : () -> ()
    %cst_335 = arith.constant dense<0.000000e+00> : vector<2x4x8xf32>
    %1262 = tpu.matmul %1260, %1261, %cst_335 {dimension_numbers = #tpu.dot_dimension_numbers<[2], [1], [1], [2], [0, 0, 0, 1, 1, 2], [0], [0]>} : vector<2x4x4xbf16>, vector<2x4x8xbf16>, vector<2x4x8xf32> -> vector<2x4x8xf32>
    "tpu.trace_stop"() : () -> ()
    %1263 = vector.extract_strided_slice %1251 {offsets = [1, 0, 0], sizes = [1, 4, 4], strides = [1, 1, 1]} : vector<3x4x4xf32> to vector<1x4x4xf32>
    %1264 = vector.shape_cast %1263 : vector<1x4x4xf32> to vector<4x4xf32>
    %1265 = arith.truncf %1264 : vector<4x4xf32> to vector<4x4xbf16>
    %1266 = vector.shape_cast %1265 : vector<4x4xbf16> to vector<1x4x4xbf16>
    %1267 = vector.shape_cast %1266 : vector<1x4x4xbf16> to vector<1x4x4xbf16>
    %1268 = vector.broadcast %1267 : vector<1x4x4xbf16> to vector<2x4x4xbf16>
    %1269 = arith.truncf %1250 : vector<2x4x8xf32> to vector<2x4x8xbf16>
    "tpu.trace_start"() <{level = 10 : i32, message = "noc,ncl->nol"}> : () -> ()
    %cst_336 = arith.constant dense<0.000000e+00> : vector<2x4x8xf32>
    %1270 = tpu.matmul %1268, %1269, %cst_336 {dimension_numbers = #tpu.dot_dimension_numbers<[2], [1], [1], [2], [0, 0, 0, 1, 1, 2], [0], [0]>} : vector<2x4x4xbf16>, vector<2x4x8xbf16>, vector<2x4x8xf32> -> vector<2x4x8xf32>
    "tpu.trace_stop"() : () -> ()
    %1271 = arith.addf %1262, %1270 : vector<2x4x8xf32>
    %cst_337 = arith.constant 0.000000e+00 : f32
    %1272 = vector.broadcast %cst_337 : f32 to vector<2x4x1xf32>
    %1273 = vector.extract_strided_slice %1250 {offsets = [0, 0, 1], sizes = [2, 4, 7], strides = [1, 1, 1]} : vector<2x4x8xf32> to vector<2x4x7xf32>
    %1274 = tpu.concatenate %1273, %1272 in 2 : vector<2x4x7xf32>, vector<2x4x1xf32> -> vector<2x4x8xf32>
    %1275 = vector.extract_strided_slice %1251 {offsets = [2, 0, 0], sizes = [1, 4, 4], strides = [1, 1, 1]} : vector<3x4x4xf32> to vector<1x4x4xf32>
    %1276 = vector.shape_cast %1275 : vector<1x4x4xf32> to vector<4x4xf32>
    %1277 = arith.truncf %1276 : vector<4x4xf32> to vector<4x4xbf16>
    %1278 = vector.shape_cast %1277 : vector<4x4xbf16> to vector<1x4x4xbf16>
    %1279 = vector.shape_cast %1278 : vector<1x4x4xbf16> to vector<1x4x4xbf16>
    %1280 = vector.broadcast %1279 : vector<1x4x4xbf16> to vector<2x4x4xbf16>
    %1281 = arith.truncf %1274 : vector<2x4x8xf32> to vector<2x4x8xbf16>
    "tpu.trace_start"() <{level = 10 : i32, message = "noc,ncl->nol"}> : () -> ()
    %cst_338 = arith.constant dense<0.000000e+00> : vector<2x4x8xf32>
    %1282 = tpu.matmul %1280, %1281, %cst_338 {dimension_numbers = #tpu.dot_dimension_numbers<[2], [1], [1], [2], [0, 0, 0, 1, 1, 2], [0], [0]>} : vector<2x4x4xbf16>, vector<2x4x8xbf16>, vector<2x4x8xf32> -> vector<2x4x8xf32>
    "tpu.trace_stop"() : () -> ()
    %1283 = arith.addf %1271, %1282 : vector<2x4x8xf32>
    %1284 = vector.extract_strided_slice %1216 {offsets = [2, 0, 0], sizes = [1, 4, 1], strides = [1, 1, 1]} : vector<4x4x1xf32> to vector<1x4x1xf32>
    %1285 = vector.extract_strided_slice %1216 {offsets = [3, 0, 0], sizes = [1, 4, 1], strides = [1, 1, 1]} : vector<4x4x1xf32> to vector<1x4x1xf32>
    %cst_339 = arith.constant dense<0.000000e+00> : vector<2x4xf32>
    %1286 = vector.multi_reduction <add>, %1283, %cst_339 [2] : vector<2x4x8xf32> to vector<2x4xf32>
    %1287 = vector.shape_cast %1286 : vector<2x4xf32> to vector<2x4x1xf32>
    %cst_340 = arith.constant dense<0.000000e+00> : vector<4x1xf32>
    %1288 = vector.multi_reduction <add>, %1287, %cst_340 [0] : vector<2x4x1xf32> to vector<4x1xf32>
    %1289 = vector.shape_cast %1288 : vector<4x1xf32> to vector<1x4x1xf32>
    %cst_341 = arith.constant 6.250000e-02 : f32
    %1290 = vector.broadcast %cst_341 : f32 to vector<1x4x1xf32>
    %1291 = arith.mulf %1289, %1290 : vector<1x4x1xf32>
    %1292 = vector.broadcast %1291 : vector<1x4x1xf32> to vector<2x4x8xf32>
    %1293 = arith.subf %1283, %1292 : vector<2x4x8xf32>
    %1294 = arith.mulf %1293, %1293 : vector<2x4x8xf32>
    %cst_342 = arith.constant dense<0.000000e+00> : vector<2x4xf32>
    %1295 = vector.multi_reduction <add>, %1294, %cst_342 [2] : vector<2x4x8xf32> to vector<2x4xf32>
    %1296 = vector.shape_cast %1295 : vector<2x4xf32> to vector<2x4x1xf32>
    %cst_343 = arith.constant dense<0.000000e+00> : vector<4x1xf32>
    %1297 = vector.multi_reduction <add>, %1296, %cst_343 [0] : vector<2x4x1xf32> to vector<4x1xf32>
    %1298 = vector.shape_cast %1297 : vector<4x1xf32> to vector<1x4x1xf32>
    %cst_344 = arith.constant 6.250000e-02 : f32
    %1299 = vector.broadcast %cst_344 : f32 to vector<1x4x1xf32>
    %1300 = arith.mulf %1298, %1299 : vector<1x4x1xf32>
    %cst_345 = arith.constant 9.99999974E-6 : f32
    %1301 = vector.broadcast %cst_345 : f32 to vector<1x4x1xf32>
    %1302 = arith.addf %1300, %1301 : vector<1x4x1xf32>
    %1303 = math.rsqrt %1302 : vector<1x4x1xf32>
    %1304 = vector.broadcast %1303 : vector<1x4x1xf32> to vector<2x4x8xf32>
    %1305 = arith.mulf %1293, %1304 : vector<2x4x8xf32>
    %1306 = vector.broadcast %1284 : vector<1x4x1xf32> to vector<2x4x8xf32>
    %1307 = arith.mulf %1305, %1306 : vector<2x4x8xf32>
    %1308 = vector.broadcast %1285 : vector<1x4x1xf32> to vector<2x4x8xf32>
    %1309 = arith.addf %1307, %1308 : vector<2x4x8xf32>
    %cst_346 = arith.constant 0.000000e+00 : f32
    %1310 = vector.broadcast %cst_346 : f32 to vector<2x4x8xf32>
    %1311 = arith.maximumf %1309, %1310 : vector<2x4x8xf32>
    %1312 = vector.extract_strided_slice %1219 {offsets = [3, 0, 0], sizes = [3, 4, 4], strides = [1, 1, 1]} : vector<6x4x4xf32> to vector<3x4x4xf32>
    %cst_347 = arith.constant 0.000000e+00 : f32
    %1313 = vector.broadcast %cst_347 : f32 to vector<2x4x1xf32>
    %1314 = vector.extract_strided_slice %1311 {offsets = [0, 0, 0], sizes = [2, 4, 7], strides = [1, 1, 1]} : vector<2x4x8xf32> to vector<2x4x7xf32>
    %1315 = tpu.concatenate %1313, %1314 in 2 : vector<2x4x1xf32>, vector<2x4x7xf32> -> vector<2x4x8xf32>
    %1316 = vector.extract_strided_slice %1312 {offsets = [0, 0, 0], sizes = [1, 4, 4], strides = [1, 1, 1]} : vector<3x4x4xf32> to vector<1x4x4xf32>
    %1317 = vector.shape_cast %1316 : vector<1x4x4xf32> to vector<4x4xf32>
    %1318 = arith.truncf %1317 : vector<4x4xf32> to vector<4x4xbf16>
    %1319 = vector.shape_cast %1318 : vector<4x4xbf16> to vector<1x4x4xbf16>
    %1320 = vector.shape_cast %1319 : vector<1x4x4xbf16> to vector<1x4x4xbf16>
    %1321 = vector.broadcast %1320 : vector<1x4x4xbf16> to vector<2x4x4xbf16>
    %1322 = arith.truncf %1315 : vector<2x4x8xf32> to vector<2x4x8xbf16>
    "tpu.trace_start"() <{level = 10 : i32, message = "noc,ncl->nol"}> : () -> ()
    %cst_348 = arith.constant dense<0.000000e+00> : vector<2x4x8xf32>
    %1323 = tpu.matmul %1321, %1322, %cst_348 {dimension_numbers = #tpu.dot_dimension_numbers<[2], [1], [1], [2], [0, 0, 0, 1, 1, 2], [0], [0]>} : vector<2x4x4xbf16>, vector<2x4x8xbf16>, vector<2x4x8xf32> -> vector<2x4x8xf32>
    "tpu.trace_stop"() : () -> ()
    %1324 = vector.extract_strided_slice %1312 {offsets = [1, 0, 0], sizes = [1, 4, 4], strides = [1, 1, 1]} : vector<3x4x4xf32> to vector<1x4x4xf32>
    %1325 = vector.shape_cast %1324 : vector<1x4x4xf32> to vector<4x4xf32>
    %1326 = arith.truncf %1325 : vector<4x4xf32> to vector<4x4xbf16>
    %1327 = vector.shape_cast %1326 : vector<4x4xbf16> to vector<1x4x4xbf16>
    %1328 = vector.shape_cast %1327 : vector<1x4x4xbf16> to vector<1x4x4xbf16>
    %1329 = vector.broadcast %1328 : vector<1x4x4xbf16> to vector<2x4x4xbf16>
    %1330 = arith.truncf %1311 : vector<2x4x8xf32> to vector<2x4x8xbf16>
    "tpu.trace_start"() <{level = 10 : i32, message = "noc,ncl->nol"}> : () -> ()
    %cst_349 = arith.constant dense<0.000000e+00> : vector<2x4x8xf32>
    %1331 = tpu.matmul %1329, %1330, %cst_349 {dimension_numbers = #tpu.dot_dimension_numbers<[2], [1], [1], [2], [0, 0, 0, 1, 1, 2], [0], [0]>} : vector<2x4x4xbf16>, vector<2x4x8xbf16>, vector<2x4x8xf32> -> vector<2x4x8xf32>
    "tpu.trace_stop"() : () -> ()
    %1332 = arith.addf %1323, %1331 : vector<2x4x8xf32>
    %cst_350 = arith.constant 0.000000e+00 : f32
    %1333 = vector.broadcast %cst_350 : f32 to vector<2x4x1xf32>
    %1334 = vector.extract_strided_slice %1311 {offsets = [0, 0, 1], sizes = [2, 4, 7], strides = [1, 1, 1]} : vector<2x4x8xf32> to vector<2x4x7xf32>
    %1335 = tpu.concatenate %1334, %1333 in 2 : vector<2x4x7xf32>, vector<2x4x1xf32> -> vector<2x4x8xf32>
    %1336 = vector.extract_strided_slice %1312 {offsets = [2, 0, 0], sizes = [1, 4, 4], strides = [1, 1, 1]} : vector<3x4x4xf32> to vector<1x4x4xf32>
    %1337 = vector.shape_cast %1336 : vector<1x4x4xf32> to vector<4x4xf32>
    %1338 = arith.truncf %1337 : vector<4x4xf32> to vector<4x4xbf16>
    %1339 = vector.shape_cast %1338 : vector<4x4xbf16> to vector<1x4x4xbf16>
    %1340 = vector.shape_cast %1339 : vector<1x4x4xbf16> to vector<1x4x4xbf16>
    %1341 = vector.broadcast %1340 : vector<1x4x4xbf16> to vector<2x4x4xbf16>
    %1342 = arith.truncf %1335 : vector<2x4x8xf32> to vector<2x4x8xbf16>
    "tpu.trace_start"() <{level = 10 : i32, message = "noc,ncl->nol"}> : () -> ()
    %cst_351 = arith.constant dense<0.000000e+00> : vector<2x4x8xf32>
    %1343 = tpu.matmul %1341, %1342, %cst_351 {dimension_numbers = #tpu.dot_dimension_numbers<[2], [1], [1], [2], [0, 0, 0, 1, 1, 2], [0], [0]>} : vector<2x4x4xbf16>, vector<2x4x8xbf16>, vector<2x4x8xf32> -> vector<2x4x8xf32>
    "tpu.trace_stop"() : () -> ()
    %1344 = arith.addf %1332, %1343 : vector<2x4x8xf32>
    %1345 = arith.truncf %1222 : vector<4x4xf32> to vector<4x4xbf16>
    %1346 = vector.shape_cast %1345 : vector<4x4xbf16> to vector<1x4x4xbf16>
    %1347 = vector.shape_cast %1346 : vector<1x4x4xbf16> to vector<1x4x4xbf16>
    %1348 = vector.broadcast %1347 : vector<1x4x4xbf16> to vector<2x4x4xbf16>
    %1349 = arith.truncf %1213 : vector<2x4x8xf32> to vector<2x4x8xbf16>
    "tpu.trace_start"() <{level = 10 : i32, message = "noc,ncl->nol"}> : () -> ()
    %cst_352 = arith.constant dense<0.000000e+00> : vector<2x4x8xf32>
    %1350 = tpu.matmul %1348, %1349, %cst_352 {dimension_numbers = #tpu.dot_dimension_numbers<[2], [1], [1], [2], [0, 0, 0, 1, 1, 2], [0], [0]>} : vector<2x4x4xbf16>, vector<2x4x8xbf16>, vector<2x4x8xf32> -> vector<2x4x8xf32>
    "tpu.trace_stop"() : () -> ()
    %1351 = arith.addf %1344, %1350 : vector<2x4x8xf32>
    %c1_i32_353 = arith.constant 1 : i32
    %1352 = tpu.iota {dimensions = array<i32: 0>} : vector<8x16xi32>
    %1353 = tpu.iota {dimensions = array<i32: 1>} : vector<8x16xi32>
    %c16_i32 = arith.constant 16 : i32
    %1354 = vector.broadcast %c16_i32 : i32 to vector<8x16xi32>
    %1355 = arith.muli %1352, %1354 : vector<8x16xi32>
    %c8_i32_354 = arith.constant 8 : i32
    %1356 = vector.broadcast %c8_i32_354 : i32 to vector<8x16xi32>
    %1357 = arith.muli %1353, %1356 : vector<8x16xi32>
    %1358 = arith.cmpi sle, %1355, %1357 : vector<8x16xi32>
    %c8_i32_355 = arith.constant 8 : i32
    %1359 = vector.broadcast %c8_i32_355 : i32 to vector<8x16xi32>
    %1360 = arith.muli %1353, %1359 : vector<8x16xi32>
    %c1_i32_356 = arith.constant 1 : i32
    %1361 = vector.broadcast %c1_i32_356 : i32 to vector<8x16xi32>
    %1362 = arith.addi %1352, %1361 : vector<8x16xi32>
    %c16_i32_357 = arith.constant 16 : i32
    %1363 = vector.broadcast %c16_i32_357 : i32 to vector<8x16xi32>
    %1364 = arith.muli %1362, %1363 : vector<8x16xi32>
    %1365 = arith.cmpi slt, %1360, %1364 : vector<8x16xi32>
    %1366 = arith.andi %1358, %1365 : vector<8x16xi1>
    %1367 = arith.extui %1366 : vector<8x16xi1> to vector<8x16xi32>
    %1368 = arith.sitofp %1367 : vector<8x16xi32> to vector<8x16xf32>
    %1369 = vector.shape_cast %1368 : vector<8x16xf32> to vector<1x8x16xf32>
    %1370 = vector.shape_cast %1369 : vector<1x8x16xf32> to vector<1x8x16xf32>
    %1371 = vector.broadcast %1370 : vector<1x8x16xf32> to vector<2x8x16xf32>
    "tpu.trace_start"() <{level = 10 : i32, message = "ncl,nlo->nco"}> : () -> ()
    %cst_358 = arith.constant dense<0.000000e+00> : vector<2x4x16xf32>
    %1372 = tpu.matmul %1351, %1371, %cst_358 {dimension_numbers = #tpu.dot_dimension_numbers<[2], [1], [1], [2], [0, 0, 0, 1, 1, 2], [0], [0]>, precision = #tpu.contract_precision<fp32>} : vector<2x4x8xf32>, vector<2x8x16xf32>, vector<2x4x16xf32> -> vector<2x4x16xf32>
    "tpu.trace_stop"() : () -> ()
    %c0_359 = arith.constant 0 : index
    %c0_360 = arith.constant 0 : index
    %c0_361 = arith.constant 0 : index
    %c0_362 = arith.constant 0 : index
    %1373 = vector.load %arg5[%c0_359, %c0_360, %c0_361, %c0_362] : memref<2x2x4x1xf32, #tpu.memory_space<vmem>>, vector<1x2x4x1xf32>
    %1374 = vector.shape_cast %1373 : vector<1x2x4x1xf32> to vector<2x4x1xf32>
    %1375 = vector.extract_strided_slice %1374 {offsets = [0, 0, 0], sizes = [1, 4, 1], strides = [1, 1, 1]} : vector<2x4x1xf32> to vector<1x4x1xf32>
    %1376 = vector.extract_strided_slice %1374 {offsets = [1, 0, 0], sizes = [1, 4, 1], strides = [1, 1, 1]} : vector<2x4x1xf32> to vector<1x4x1xf32>
    %cst_363 = arith.constant dense<0.000000e+00> : vector<2x4xf32>
    %1377 = vector.multi_reduction <add>, %1372, %cst_363 [2] : vector<2x4x16xf32> to vector<2x4xf32>
    %1378 = vector.shape_cast %1377 : vector<2x4xf32> to vector<2x4x1xf32>
    %cst_364 = arith.constant dense<0.000000e+00> : vector<4x1xf32>
    %1379 = vector.multi_reduction <add>, %1378, %cst_364 [0] : vector<2x4x1xf32> to vector<4x1xf32>
    %1380 = vector.shape_cast %1379 : vector<4x1xf32> to vector<1x4x1xf32>
    %cst_365 = arith.constant 3.125000e-02 : f32
    %1381 = vector.broadcast %cst_365 : f32 to vector<1x4x1xf32>
    %1382 = arith.mulf %1380, %1381 : vector<1x4x1xf32>
    %1383 = vector.broadcast %1382 : vector<1x4x1xf32> to vector<2x4x16xf32>
    %1384 = arith.subf %1372, %1383 : vector<2x4x16xf32>
    %1385 = arith.mulf %1384, %1384 : vector<2x4x16xf32>
    %cst_366 = arith.constant dense<0.000000e+00> : vector<2x4xf32>
    %1386 = vector.multi_reduction <add>, %1385, %cst_366 [2] : vector<2x4x16xf32> to vector<2x4xf32>
    %1387 = vector.shape_cast %1386 : vector<2x4xf32> to vector<2x4x1xf32>
    %cst_367 = arith.constant dense<0.000000e+00> : vector<4x1xf32>
    %1388 = vector.multi_reduction <add>, %1387, %cst_367 [0] : vector<2x4x1xf32> to vector<4x1xf32>
    %1389 = vector.shape_cast %1388 : vector<4x1xf32> to vector<1x4x1xf32>
    %cst_368 = arith.constant 3.125000e-02 : f32
    %1390 = vector.broadcast %cst_368 : f32 to vector<1x4x1xf32>
    %1391 = arith.mulf %1389, %1390 : vector<1x4x1xf32>
    %cst_369 = arith.constant 9.99999974E-6 : f32
    %1392 = vector.broadcast %cst_369 : f32 to vector<1x4x1xf32>
    %1393 = arith.addf %1391, %1392 : vector<1x4x1xf32>
    %1394 = math.rsqrt %1393 : vector<1x4x1xf32>
    %1395 = vector.broadcast %1394 : vector<1x4x1xf32> to vector<2x4x16xf32>
    %1396 = arith.mulf %1384, %1395 : vector<2x4x16xf32>
    %1397 = vector.broadcast %1375 : vector<1x4x1xf32> to vector<2x4x16xf32>
    %1398 = arith.mulf %1396, %1397 : vector<2x4x16xf32>
    %1399 = vector.broadcast %1376 : vector<1x4x1xf32> to vector<2x4x16xf32>
    %1400 = arith.addf %1398, %1399 : vector<2x4x16xf32>
    %cst_370 = arith.constant 0.000000e+00 : f32
    %1401 = vector.broadcast %cst_370 : f32 to vector<2x4x16xf32>
    %1402 = arith.maximumf %1400, %1401 : vector<2x4x16xf32>
    %c0_371 = arith.constant 0 : index
    %c0_372 = arith.constant 0 : index
    %c0_373 = arith.constant 0 : index
    %1403 = vector.load %arg6[%c0_371, %c0_372, %c0_373] : memref<2x4x4xf32, #tpu.memory_space<vmem>>, vector<1x4x4xf32>
    %1404 = vector.shape_cast %1403 : vector<1x4x4xf32> to vector<4x4xf32>
    %1405 = arith.truncf %1404 : vector<4x4xf32> to vector<4x4xbf16>
    %1406 = vector.shape_cast %1405 : vector<4x4xbf16> to vector<1x4x4xbf16>
    %1407 = vector.shape_cast %1406 : vector<1x4x4xbf16> to vector<1x4x4xbf16>
    %1408 = vector.broadcast %1407 : vector<1x4x4xbf16> to vector<2x4x4xbf16>
    %1409 = arith.truncf %1402 : vector<2x4x16xf32> to vector<2x4x16xbf16>
    "tpu.trace_start"() <{level = 10 : i32, message = "noc,ncl->nol"}> : () -> ()
    %cst_374 = arith.constant dense<0.000000e+00> : vector<2x4x16xf32>
    %1410 = tpu.matmul %1408, %1409, %cst_374 {dimension_numbers = #tpu.dot_dimension_numbers<[2], [1], [1], [2], [0, 0, 0, 1, 1, 2], [0], [0]>} : vector<2x4x4xbf16>, vector<2x4x16xbf16>, vector<2x4x16xf32> -> vector<2x4x16xf32>
    "tpu.trace_stop"() : () -> ()
    %c0_375 = arith.constant 0 : index
    %c0_376 = arith.constant 0 : index
    %c0_377 = arith.constant 0 : index
    %1411 = vector.load %arg7[%c0_375, %c0_376, %c0_377] : memref<2x4x1xf32, #tpu.memory_space<vmem>>, vector<1x4x1xf32>
    %1412 = vector.shape_cast %1411 : vector<1x4x1xf32> to vector<4x1xf32>
    %1413 = vector.shape_cast %1412 : vector<4x1xf32> to vector<1x4x1xf32>
    %1414 = vector.broadcast %1413 : vector<1x4x1xf32> to vector<2x4x16xf32>
    %1415 = arith.addf %1410, %1414 : vector<2x4x16xf32>
    %c1 = arith.constant 1 : index
    %c0_378 = arith.constant 0 : index
    %c0_379 = arith.constant 0 : index
    %c0_380 = arith.constant 0 : index
    %1416 = vector.load %arg5[%c1, %c0_378, %c0_379, %c0_380] : memref<2x2x4x1xf32, #tpu.memory_space<vmem>>, vector<1x2x4x1xf32>
    %1417 = vector.shape_cast %1416 : vector<1x2x4x1xf32> to vector<2x4x1xf32>
    %1418 = vector.extract_strided_slice %1417 {offsets = [0, 0, 0], sizes = [1, 4, 1], strides = [1, 1, 1]} : vector<2x4x1xf32> to vector<1x4x1xf32>
    %1419 = vector.extract_strided_slice %1417 {offsets = [1, 0, 0], sizes = [1, 4, 1], strides = [1, 1, 1]} : vector<2x4x1xf32> to vector<1x4x1xf32>
    %cst_381 = arith.constant dense<0.000000e+00> : vector<2x4xf32>
    %1420 = vector.multi_reduction <add>, %1415, %cst_381 [2] : vector<2x4x16xf32> to vector<2x4xf32>
    %1421 = vector.shape_cast %1420 : vector<2x4xf32> to vector<2x4x1xf32>
    %cst_382 = arith.constant dense<0.000000e+00> : vector<4x1xf32>
    %1422 = vector.multi_reduction <add>, %1421, %cst_382 [0] : vector<2x4x1xf32> to vector<4x1xf32>
    %1423 = vector.shape_cast %1422 : vector<4x1xf32> to vector<1x4x1xf32>
    %cst_383 = arith.constant 3.125000e-02 : f32
    %1424 = vector.broadcast %cst_383 : f32 to vector<1x4x1xf32>
    %1425 = arith.mulf %1423, %1424 : vector<1x4x1xf32>
    %1426 = vector.broadcast %1425 : vector<1x4x1xf32> to vector<2x4x16xf32>
    %1427 = arith.subf %1415, %1426 : vector<2x4x16xf32>
    %1428 = arith.mulf %1427, %1427 : vector<2x4x16xf32>
    %cst_384 = arith.constant dense<0.000000e+00> : vector<2x4xf32>
    %1429 = vector.multi_reduction <add>, %1428, %cst_384 [2] : vector<2x4x16xf32> to vector<2x4xf32>
    %1430 = vector.shape_cast %1429 : vector<2x4xf32> to vector<2x4x1xf32>
    %cst_385 = arith.constant dense<0.000000e+00> : vector<4x1xf32>
    %1431 = vector.multi_reduction <add>, %1430, %cst_385 [0] : vector<2x4x1xf32> to vector<4x1xf32>
    %1432 = vector.shape_cast %1431 : vector<4x1xf32> to vector<1x4x1xf32>
    %cst_386 = arith.constant 3.125000e-02 : f32
    %1433 = vector.broadcast %cst_386 : f32 to vector<1x4x1xf32>
    %1434 = arith.mulf %1432, %1433 : vector<1x4x1xf32>
    %cst_387 = arith.constant 9.99999974E-6 : f32
    %1435 = vector.broadcast %cst_387 : f32 to vector<1x4x1xf32>
    %1436 = arith.addf %1434, %1435 : vector<1x4x1xf32>
    %1437 = math.rsqrt %1436 : vector<1x4x1xf32>
    %1438 = vector.broadcast %1437 : vector<1x4x1xf32> to vector<2x4x16xf32>
    %1439 = arith.mulf %1427, %1438 : vector<2x4x16xf32>
    %1440 = vector.broadcast %1418 : vector<1x4x1xf32> to vector<2x4x16xf32>
    %1441 = arith.mulf %1439, %1440 : vector<2x4x16xf32>
    %1442 = vector.broadcast %1419 : vector<1x4x1xf32> to vector<2x4x16xf32>
    %1443 = arith.addf %1441, %1442 : vector<2x4x16xf32>
    %cst_388 = arith.constant 0.000000e+00 : f32
    %1444 = vector.broadcast %cst_388 : f32 to vector<2x4x16xf32>
    %1445 = arith.maximumf %1443, %1444 : vector<2x4x16xf32>
    %c1_389 = arith.constant 1 : index
    %c0_390 = arith.constant 0 : index
    %c0_391 = arith.constant 0 : index
    %1446 = vector.load %arg6[%c1_389, %c0_390, %c0_391] : memref<2x4x4xf32, #tpu.memory_space<vmem>>, vector<1x4x4xf32>
    %1447 = vector.shape_cast %1446 : vector<1x4x4xf32> to vector<4x4xf32>
    %1448 = arith.truncf %1447 : vector<4x4xf32> to vector<4x4xbf16>
    %1449 = vector.shape_cast %1448 : vector<4x4xbf16> to vector<1x4x4xbf16>
    %1450 = vector.shape_cast %1449 : vector<1x4x4xbf16> to vector<1x4x4xbf16>
    %1451 = vector.broadcast %1450 : vector<1x4x4xbf16> to vector<2x4x4xbf16>
    %1452 = arith.truncf %1445 : vector<2x4x16xf32> to vector<2x4x16xbf16>
    "tpu.trace_start"() <{level = 10 : i32, message = "noc,ncl->nol"}> : () -> ()
    %cst_392 = arith.constant dense<0.000000e+00> : vector<2x4x16xf32>
    %1453 = tpu.matmul %1451, %1452, %cst_392 {dimension_numbers = #tpu.dot_dimension_numbers<[2], [1], [1], [2], [0, 0, 0, 1, 1, 2], [0], [0]>} : vector<2x4x4xbf16>, vector<2x4x16xbf16>, vector<2x4x16xf32> -> vector<2x4x16xf32>
    "tpu.trace_stop"() : () -> ()
    %c1_393 = arith.constant 1 : index
    %c0_394 = arith.constant 0 : index
    %c0_395 = arith.constant 0 : index
    %1454 = vector.load %arg7[%c1_393, %c0_394, %c0_395] : memref<2x4x1xf32, #tpu.memory_space<vmem>>, vector<1x4x1xf32>
    %1455 = vector.shape_cast %1454 : vector<1x4x1xf32> to vector<4x1xf32>
    %1456 = vector.shape_cast %1455 : vector<4x1xf32> to vector<1x4x1xf32>
    %1457 = vector.broadcast %1456 : vector<1x4x1xf32> to vector<2x4x16xf32>
    %1458 = arith.addf %1453, %1457 : vector<2x4x16xf32>
    %1459 = arith.negf %1458 : vector<2x4x16xf32>
    %1460 = math.exp %1459 : vector<2x4x16xf32>
    %cst_396 = arith.constant 1.000000e+00 : f32
    %1461 = vector.broadcast %cst_396 : f32 to vector<2x4x16xf32>
    %1462 = arith.addf %1461, %1460 : vector<2x4x16xf32>
    %1463 = arith.divf %1461, %1462 : vector<2x4x16xf32>
    %cst_397 = arith.constant 1.000000e+00 : f32
    %1464 = vector.broadcast %cst_397 : f32 to vector<2x4x16xf32>
    %1465 = arith.addf %1464, %1463 : vector<2x4x16xf32>
    %1466 = arith.mulf %1465, %140 : vector<2x4x16xf32>
    %c10_i32 = arith.constant 10 : i32
    %1467 = arith.index_cast %c10_i32 : i32 to index
    %c0_398 = arith.constant 0 : index
    %c0_399 = arith.constant 0 : index
    %c0_400 = arith.constant 0 : index
    %1468 = vector.load %arg2[%1467, %c0_398, %c0_399, %c0_400] : memref<11x4x4x1xf32, #tpu.memory_space<vmem>>, vector<1x4x4x1xf32>
    %1469 = vector.shape_cast %1468 : vector<1x4x4x1xf32> to vector<4x4x1xf32>
    %1470 = arith.index_cast %c10_i32 : i32 to index
    %c0_401 = arith.constant 0 : index
    %c0_402 = arith.constant 0 : index
    %c0_403 = arith.constant 0 : index
    %1471 = vector.load %arg3[%1470, %c0_401, %c0_402, %c0_403] : memref<11x6x4x4xf32, #tpu.memory_space<vmem>>, vector<1x6x4x4xf32>
    %1472 = vector.shape_cast %1471 : vector<1x6x4x4xf32> to vector<6x4x4xf32>
    %1473 = arith.index_cast %c10_i32 : i32 to index
    %c0_404 = arith.constant 0 : index
    %c0_405 = arith.constant 0 : index
    %1474 = vector.load %arg4[%1473, %c0_404, %c0_405] : memref<11x4x4xf32, #tpu.memory_space<vmem>>, vector<1x4x4xf32>
    %1475 = vector.shape_cast %1474 : vector<1x4x4xf32> to vector<4x4xf32>
    %1476 = vector.extract_strided_slice %1469 {offsets = [0, 0, 0], sizes = [1, 4, 1], strides = [1, 1, 1]} : vector<4x4x1xf32> to vector<1x4x1xf32>
    %1477 = vector.extract_strided_slice %1469 {offsets = [1, 0, 0], sizes = [1, 4, 1], strides = [1, 1, 1]} : vector<4x4x1xf32> to vector<1x4x1xf32>
    %cst_406 = arith.constant dense<0.000000e+00> : vector<2x4xf32>
    %1478 = vector.multi_reduction <add>, %1466, %cst_406 [2] : vector<2x4x16xf32> to vector<2x4xf32>
    %1479 = vector.shape_cast %1478 : vector<2x4xf32> to vector<2x4x1xf32>
    %cst_407 = arith.constant dense<0.000000e+00> : vector<4x1xf32>
    %1480 = vector.multi_reduction <add>, %1479, %cst_407 [0] : vector<2x4x1xf32> to vector<4x1xf32>
    %1481 = vector.shape_cast %1480 : vector<4x1xf32> to vector<1x4x1xf32>
    %cst_408 = arith.constant 3.125000e-02 : f32
    %1482 = vector.broadcast %cst_408 : f32 to vector<1x4x1xf32>
    %1483 = arith.mulf %1481, %1482 : vector<1x4x1xf32>
    %1484 = vector.broadcast %1483 : vector<1x4x1xf32> to vector<2x4x16xf32>
    %1485 = arith.subf %1466, %1484 : vector<2x4x16xf32>
    %1486 = arith.mulf %1485, %1485 : vector<2x4x16xf32>
    %cst_409 = arith.constant dense<0.000000e+00> : vector<2x4xf32>
    %1487 = vector.multi_reduction <add>, %1486, %cst_409 [2] : vector<2x4x16xf32> to vector<2x4xf32>
    %1488 = vector.shape_cast %1487 : vector<2x4xf32> to vector<2x4x1xf32>
    %cst_410 = arith.constant dense<0.000000e+00> : vector<4x1xf32>
    %1489 = vector.multi_reduction <add>, %1488, %cst_410 [0] : vector<2x4x1xf32> to vector<4x1xf32>
    %1490 = vector.shape_cast %1489 : vector<4x1xf32> to vector<1x4x1xf32>
    %cst_411 = arith.constant 3.125000e-02 : f32
    %1491 = vector.broadcast %cst_411 : f32 to vector<1x4x1xf32>
    %1492 = arith.mulf %1490, %1491 : vector<1x4x1xf32>
    %cst_412 = arith.constant 9.99999974E-6 : f32
    %1493 = vector.broadcast %cst_412 : f32 to vector<1x4x1xf32>
    %1494 = arith.addf %1492, %1493 : vector<1x4x1xf32>
    %1495 = math.rsqrt %1494 : vector<1x4x1xf32>
    %1496 = vector.broadcast %1495 : vector<1x4x1xf32> to vector<2x4x16xf32>
    %1497 = arith.mulf %1485, %1496 : vector<2x4x16xf32>
    %1498 = vector.broadcast %1476 : vector<1x4x1xf32> to vector<2x4x16xf32>
    %1499 = arith.mulf %1497, %1498 : vector<2x4x16xf32>
    %1500 = vector.broadcast %1477 : vector<1x4x1xf32> to vector<2x4x16xf32>
    %1501 = arith.addf %1499, %1500 : vector<2x4x16xf32>
    %cst_413 = arith.constant 0.000000e+00 : f32
    %1502 = vector.broadcast %cst_413 : f32 to vector<2x4x16xf32>
    %1503 = arith.maximumf %1501, %1502 : vector<2x4x16xf32>
    %1504 = vector.extract_strided_slice %1472 {offsets = [0, 0, 0], sizes = [3, 4, 4], strides = [1, 1, 1]} : vector<6x4x4xf32> to vector<3x4x4xf32>
    %cst_414 = arith.constant 0.000000e+00 : f32
    %1505 = vector.broadcast %cst_414 : f32 to vector<2x4x1xf32>
    %1506 = vector.extract_strided_slice %1503 {offsets = [0, 0, 0], sizes = [2, 4, 15], strides = [1, 1, 1]} : vector<2x4x16xf32> to vector<2x4x15xf32>
    %1507 = tpu.concatenate %1505, %1506 in 2 : vector<2x4x1xf32>, vector<2x4x15xf32> -> vector<2x4x16xf32>
    %1508 = vector.extract_strided_slice %1504 {offsets = [0, 0, 0], sizes = [1, 4, 4], strides = [1, 1, 1]} : vector<3x4x4xf32> to vector<1x4x4xf32>
    %1509 = vector.shape_cast %1508 : vector<1x4x4xf32> to vector<4x4xf32>
    %1510 = arith.truncf %1509 : vector<4x4xf32> to vector<4x4xbf16>
    %1511 = vector.shape_cast %1510 : vector<4x4xbf16> to vector<1x4x4xbf16>
    %1512 = vector.shape_cast %1511 : vector<1x4x4xbf16> to vector<1x4x4xbf16>
    %1513 = vector.broadcast %1512 : vector<1x4x4xbf16> to vector<2x4x4xbf16>
    %1514 = arith.truncf %1507 : vector<2x4x16xf32> to vector<2x4x16xbf16>
    "tpu.trace_start"() <{level = 10 : i32, message = "noc,ncl->nol"}> : () -> ()
    %cst_415 = arith.constant dense<0.000000e+00> : vector<2x4x16xf32>
    %1515 = tpu.matmul %1513, %1514, %cst_415 {dimension_numbers = #tpu.dot_dimension_numbers<[2], [1], [1], [2], [0, 0, 0, 1, 1, 2], [0], [0]>} : vector<2x4x4xbf16>, vector<2x4x16xbf16>, vector<2x4x16xf32> -> vector<2x4x16xf32>
    "tpu.trace_stop"() : () -> ()
    %1516 = vector.extract_strided_slice %1504 {offsets = [1, 0, 0], sizes = [1, 4, 4], strides = [1, 1, 1]} : vector<3x4x4xf32> to vector<1x4x4xf32>
    %1517 = vector.shape_cast %1516 : vector<1x4x4xf32> to vector<4x4xf32>
    %1518 = arith.truncf %1517 : vector<4x4xf32> to vector<4x4xbf16>
    %1519 = vector.shape_cast %1518 : vector<4x4xbf16> to vector<1x4x4xbf16>
    %1520 = vector.shape_cast %1519 : vector<1x4x4xbf16> to vector<1x4x4xbf16>
    %1521 = vector.broadcast %1520 : vector<1x4x4xbf16> to vector<2x4x4xbf16>
    %1522 = arith.truncf %1503 : vector<2x4x16xf32> to vector<2x4x16xbf16>
    "tpu.trace_start"() <{level = 10 : i32, message = "noc,ncl->nol"}> : () -> ()
    %cst_416 = arith.constant dense<0.000000e+00> : vector<2x4x16xf32>
    %1523 = tpu.matmul %1521, %1522, %cst_416 {dimension_numbers = #tpu.dot_dimension_numbers<[2], [1], [1], [2], [0, 0, 0, 1, 1, 2], [0], [0]>} : vector<2x4x4xbf16>, vector<2x4x16xbf16>, vector<2x4x16xf32> -> vector<2x4x16xf32>
    "tpu.trace_stop"() : () -> ()
    %1524 = arith.addf %1515, %1523 : vector<2x4x16xf32>
    %cst_417 = arith.constant 0.000000e+00 : f32
    %1525 = vector.broadcast %cst_417 : f32 to vector<2x4x1xf32>
    %1526 = vector.extract_strided_slice %1503 {offsets = [0, 0, 1], sizes = [2, 4, 15], strides = [1, 1, 1]} : vector<2x4x16xf32> to vector<2x4x15xf32>
    %1527 = tpu.concatenate %1526, %1525 in 2 : vector<2x4x15xf32>, vector<2x4x1xf32> -> vector<2x4x16xf32>
    %1528 = vector.extract_strided_slice %1504 {offsets = [2, 0, 0], sizes = [1, 4, 4], strides = [1, 1, 1]} : vector<3x4x4xf32> to vector<1x4x4xf32>
    %1529 = vector.shape_cast %1528 : vector<1x4x4xf32> to vector<4x4xf32>
    %1530 = arith.truncf %1529 : vector<4x4xf32> to vector<4x4xbf16>
    %1531 = vector.shape_cast %1530 : vector<4x4xbf16> to vector<1x4x4xbf16>
    %1532 = vector.shape_cast %1531 : vector<1x4x4xbf16> to vector<1x4x4xbf16>
    %1533 = vector.broadcast %1532 : vector<1x4x4xbf16> to vector<2x4x4xbf16>
    %1534 = arith.truncf %1527 : vector<2x4x16xf32> to vector<2x4x16xbf16>
    "tpu.trace_start"() <{level = 10 : i32, message = "noc,ncl->nol"}> : () -> ()
    %cst_418 = arith.constant dense<0.000000e+00> : vector<2x4x16xf32>
    %1535 = tpu.matmul %1533, %1534, %cst_418 {dimension_numbers = #tpu.dot_dimension_numbers<[2], [1], [1], [2], [0, 0, 0, 1, 1, 2], [0], [0]>} : vector<2x4x4xbf16>, vector<2x4x16xbf16>, vector<2x4x16xf32> -> vector<2x4x16xf32>
    "tpu.trace_stop"() : () -> ()
    %1536 = arith.addf %1524, %1535 : vector<2x4x16xf32>
    %1537 = vector.extract_strided_slice %1469 {offsets = [2, 0, 0], sizes = [1, 4, 1], strides = [1, 1, 1]} : vector<4x4x1xf32> to vector<1x4x1xf32>
    %1538 = vector.extract_strided_slice %1469 {offsets = [3, 0, 0], sizes = [1, 4, 1], strides = [1, 1, 1]} : vector<4x4x1xf32> to vector<1x4x1xf32>
    %cst_419 = arith.constant dense<0.000000e+00> : vector<2x4xf32>
    %1539 = vector.multi_reduction <add>, %1536, %cst_419 [2] : vector<2x4x16xf32> to vector<2x4xf32>
    %1540 = vector.shape_cast %1539 : vector<2x4xf32> to vector<2x4x1xf32>
    %cst_420 = arith.constant dense<0.000000e+00> : vector<4x1xf32>
    %1541 = vector.multi_reduction <add>, %1540, %cst_420 [0] : vector<2x4x1xf32> to vector<4x1xf32>
    %1542 = vector.shape_cast %1541 : vector<4x1xf32> to vector<1x4x1xf32>
    %cst_421 = arith.constant 3.125000e-02 : f32
    %1543 = vector.broadcast %cst_421 : f32 to vector<1x4x1xf32>
    %1544 = arith.mulf %1542, %1543 : vector<1x4x1xf32>
    %1545 = vector.broadcast %1544 : vector<1x4x1xf32> to vector<2x4x16xf32>
    %1546 = arith.subf %1536, %1545 : vector<2x4x16xf32>
    %1547 = arith.mulf %1546, %1546 : vector<2x4x16xf32>
    %cst_422 = arith.constant dense<0.000000e+00> : vector<2x4xf32>
    %1548 = vector.multi_reduction <add>, %1547, %cst_422 [2] : vector<2x4x16xf32> to vector<2x4xf32>
    %1549 = vector.shape_cast %1548 : vector<2x4xf32> to vector<2x4x1xf32>
    %cst_423 = arith.constant dense<0.000000e+00> : vector<4x1xf32>
    %1550 = vector.multi_reduction <add>, %1549, %cst_423 [0] : vector<2x4x1xf32> to vector<4x1xf32>
    %1551 = vector.shape_cast %1550 : vector<4x1xf32> to vector<1x4x1xf32>
    %cst_424 = arith.constant 3.125000e-02 : f32
    %1552 = vector.broadcast %cst_424 : f32 to vector<1x4x1xf32>
    %1553 = arith.mulf %1551, %1552 : vector<1x4x1xf32>
    %cst_425 = arith.constant 9.99999974E-6 : f32
    %1554 = vector.broadcast %cst_425 : f32 to vector<1x4x1xf32>
    %1555 = arith.addf %1553, %1554 : vector<1x4x1xf32>
    %1556 = math.rsqrt %1555 : vector<1x4x1xf32>
    %1557 = vector.broadcast %1556 : vector<1x4x1xf32> to vector<2x4x16xf32>
    %1558 = arith.mulf %1546, %1557 : vector<2x4x16xf32>
    %1559 = vector.broadcast %1537 : vector<1x4x1xf32> to vector<2x4x16xf32>
    %1560 = arith.mulf %1558, %1559 : vector<2x4x16xf32>
    %1561 = vector.broadcast %1538 : vector<1x4x1xf32> to vector<2x4x16xf32>
    %1562 = arith.addf %1560, %1561 : vector<2x4x16xf32>
    %cst_426 = arith.constant 0.000000e+00 : f32
    %1563 = vector.broadcast %cst_426 : f32 to vector<2x4x16xf32>
    %1564 = arith.maximumf %1562, %1563 : vector<2x4x16xf32>
    %1565 = vector.extract_strided_slice %1472 {offsets = [3, 0, 0], sizes = [3, 4, 4], strides = [1, 1, 1]} : vector<6x4x4xf32> to vector<3x4x4xf32>
    %cst_427 = arith.constant 0.000000e+00 : f32
    %1566 = vector.broadcast %cst_427 : f32 to vector<2x4x1xf32>
    %1567 = vector.extract_strided_slice %1564 {offsets = [0, 0, 0], sizes = [2, 4, 15], strides = [1, 1, 1]} : vector<2x4x16xf32> to vector<2x4x15xf32>
    %1568 = tpu.concatenate %1566, %1567 in 2 : vector<2x4x1xf32>, vector<2x4x15xf32> -> vector<2x4x16xf32>
    %1569 = vector.extract_strided_slice %1565 {offsets = [0, 0, 0], sizes = [1, 4, 4], strides = [1, 1, 1]} : vector<3x4x4xf32> to vector<1x4x4xf32>
    %1570 = vector.shape_cast %1569 : vector<1x4x4xf32> to vector<4x4xf32>
    %1571 = arith.truncf %1570 : vector<4x4xf32> to vector<4x4xbf16>
    %1572 = vector.shape_cast %1571 : vector<4x4xbf16> to vector<1x4x4xbf16>
    %1573 = vector.shape_cast %1572 : vector<1x4x4xbf16> to vector<1x4x4xbf16>
    %1574 = vector.broadcast %1573 : vector<1x4x4xbf16> to vector<2x4x4xbf16>
    %1575 = arith.truncf %1568 : vector<2x4x16xf32> to vector<2x4x16xbf16>
    "tpu.trace_start"() <{level = 10 : i32, message = "noc,ncl->nol"}> : () -> ()
    %cst_428 = arith.constant dense<0.000000e+00> : vector<2x4x16xf32>
    %1576 = tpu.matmul %1574, %1575, %cst_428 {dimension_numbers = #tpu.dot_dimension_numbers<[2], [1], [1], [2], [0, 0, 0, 1, 1, 2], [0], [0]>} : vector<2x4x4xbf16>, vector<2x4x16xbf16>, vector<2x4x16xf32> -> vector<2x4x16xf32>
    "tpu.trace_stop"() : () -> ()
    %1577 = vector.extract_strided_slice %1565 {offsets = [1, 0, 0], sizes = [1, 4, 4], strides = [1, 1, 1]} : vector<3x4x4xf32> to vector<1x4x4xf32>
    %1578 = vector.shape_cast %1577 : vector<1x4x4xf32> to vector<4x4xf32>
    %1579 = arith.truncf %1578 : vector<4x4xf32> to vector<4x4xbf16>
    %1580 = vector.shape_cast %1579 : vector<4x4xbf16> to vector<1x4x4xbf16>
    %1581 = vector.shape_cast %1580 : vector<1x4x4xbf16> to vector<1x4x4xbf16>
    %1582 = vector.broadcast %1581 : vector<1x4x4xbf16> to vector<2x4x4xbf16>
    %1583 = arith.truncf %1564 : vector<2x4x16xf32> to vector<2x4x16xbf16>
    "tpu.trace_start"() <{level = 10 : i32, message = "noc,ncl->nol"}> : () -> ()
    %cst_429 = arith.constant dense<0.000000e+00> : vector<2x4x16xf32>
    %1584 = tpu.matmul %1582, %1583, %cst_429 {dimension_numbers = #tpu.dot_dimension_numbers<[2], [1], [1], [2], [0, 0, 0, 1, 1, 2], [0], [0]>} : vector<2x4x4xbf16>, vector<2x4x16xbf16>, vector<2x4x16xf32> -> vector<2x4x16xf32>
    "tpu.trace_stop"() : () -> ()
    %1585 = arith.addf %1576, %1584 : vector<2x4x16xf32>
    %cst_430 = arith.constant 0.000000e+00 : f32
    %1586 = vector.broadcast %cst_430 : f32 to vector<2x4x1xf32>
    %1587 = vector.extract_strided_slice %1564 {offsets = [0, 0, 1], sizes = [2, 4, 15], strides = [1, 1, 1]} : vector<2x4x16xf32> to vector<2x4x15xf32>
    %1588 = tpu.concatenate %1587, %1586 in 2 : vector<2x4x15xf32>, vector<2x4x1xf32> -> vector<2x4x16xf32>
    %1589 = vector.extract_strided_slice %1565 {offsets = [2, 0, 0], sizes = [1, 4, 4], strides = [1, 1, 1]} : vector<3x4x4xf32> to vector<1x4x4xf32>
    %1590 = vector.shape_cast %1589 : vector<1x4x4xf32> to vector<4x4xf32>
    %1591 = arith.truncf %1590 : vector<4x4xf32> to vector<4x4xbf16>
    %1592 = vector.shape_cast %1591 : vector<4x4xbf16> to vector<1x4x4xbf16>
    %1593 = vector.shape_cast %1592 : vector<1x4x4xbf16> to vector<1x4x4xbf16>
    %1594 = vector.broadcast %1593 : vector<1x4x4xbf16> to vector<2x4x4xbf16>
    %1595 = arith.truncf %1588 : vector<2x4x16xf32> to vector<2x4x16xbf16>
    "tpu.trace_start"() <{level = 10 : i32, message = "noc,ncl->nol"}> : () -> ()
    %cst_431 = arith.constant dense<0.000000e+00> : vector<2x4x16xf32>
    %1596 = tpu.matmul %1594, %1595, %cst_431 {dimension_numbers = #tpu.dot_dimension_numbers<[2], [1], [1], [2], [0, 0, 0, 1, 1, 2], [0], [0]>} : vector<2x4x4xbf16>, vector<2x4x16xbf16>, vector<2x4x16xf32> -> vector<2x4x16xf32>
    "tpu.trace_stop"() : () -> ()
    %1597 = arith.addf %1585, %1596 : vector<2x4x16xf32>
    %1598 = arith.truncf %1475 : vector<4x4xf32> to vector<4x4xbf16>
    %1599 = vector.shape_cast %1598 : vector<4x4xbf16> to vector<1x4x4xbf16>
    %1600 = vector.shape_cast %1599 : vector<1x4x4xbf16> to vector<1x4x4xbf16>
    %1601 = vector.broadcast %1600 : vector<1x4x4xbf16> to vector<2x4x4xbf16>
    %1602 = arith.truncf %1466 : vector<2x4x16xf32> to vector<2x4x16xbf16>
    "tpu.trace_start"() <{level = 10 : i32, message = "noc,ncl->nol"}> : () -> ()
    %cst_432 = arith.constant dense<0.000000e+00> : vector<2x4x16xf32>
    %1603 = tpu.matmul %1601, %1602, %cst_432 {dimension_numbers = #tpu.dot_dimension_numbers<[2], [1], [1], [2], [0, 0, 0, 1, 1, 2], [0], [0]>} : vector<2x4x4xbf16>, vector<2x4x16xbf16>, vector<2x4x16xf32> -> vector<2x4x16xf32>
    "tpu.trace_stop"() : () -> ()
    %1604 = arith.addf %1597, %1603 : vector<2x4x16xf32>
    %c1_i32_433 = arith.constant 1 : i32
    %c0_434 = arith.constant 0 : index
    %c0_435 = arith.constant 0 : index
    %c0_436 = arith.constant 0 : index
    %1605 = vector.load %arg8[%c0_434, %c0_435, %c0_436] : memref<2x4x16xf32, #tpu.memory_space<vmem>>, vector<2x4x16xf32>
    tpu.vector_store %arg8[%c0_434, %c0_435, %c0_436], %1604 {strides = array<i32>} : memref<2x4x16xf32, #tpu.memory_space<vmem>>, vector<2x4x16xf32>,
    return
  }
  func.func @transform_0(%arg0: i32) -> (i32, i32, i32) {
    %c0_i32 = arith.constant 0 : i32
    %c0_i32_0 = arith.constant 0 : i32
    %c0_i32_1 = arith.constant 0 : i32
    %c0_i32_2 = arith.constant 0 : i32
    return %c0_i32, %c0_i32_0, %c0_i32_1 : i32, i32, i32
  }
  func.func @transform_1(%arg0: i32) -> (i32, i32, i32, i32) {
    %c0_i32 = arith.constant 0 : i32
    %c0_i32_0 = arith.constant 0 : i32
    %c0_i32_1 = arith.constant 0 : i32
    %c0_i32_2 = arith.constant 0 : i32
    %c0_i32_3 = arith.constant 0 : i32
    return %c0_i32, %c0_i32_0, %c0_i32_1, %c0_i32_2 : i32, i32, i32, i32
  }
  func.func @transform_2(%arg0: i32) -> (i32, i32, i32, i32) {
    %c0_i32 = arith.constant 0 : i32
    %c0_i32_0 = arith.constant 0 : i32
    %c0_i32_1 = arith.constant 0 : i32
    %c0_i32_2 = arith.constant 0 : i32
    %c0_i32_3 = arith.constant 0 : i32
    return %c0_i32, %c0_i32_0, %c0_i32_1, %c0_i32_2 : i32, i32, i32, i32
  }
  func.func @transform_3(%arg0: i32) -> (i32, i32, i32) {
    %c0_i32 = arith.constant 0 : i32
    %c0_i32_0 = arith.constant 0 : i32
    %c0_i32_1 = arith.constant 0 : i32
    %c0_i32_2 = arith.constant 0 : i32
    return %c0_i32, %c0_i32_0, %c0_i32_1 : i32, i32, i32
  }
  func.func @transform_4(%arg0: i32) -> (i32, i32, i32, i32) {
    %c0_i32 = arith.constant 0 : i32
    %c0_i32_0 = arith.constant 0 : i32
    %c0_i32_1 = arith.constant 0 : i32
    %c0_i32_2 = arith.constant 0 : i32
    %c0_i32_3 = arith.constant 0 : i32
    return %c0_i32, %c0_i32_0, %c0_i32_1, %c0_i32_2 : i32, i32, i32, i32
  }
  func.func @transform_5(%arg0: i32) -> (i32, i32, i32) {
    %c0_i32 = arith.constant 0 : i32
    %c0_i32_0 = arith.constant 0 : i32
    %c0_i32_1 = arith.constant 0 : i32
    %c0_i32_2 = arith.constant 0 : i32
    return %c0_i32, %c0_i32_0, %c0_i32_1 : i32, i32, i32
  }
  func.func @transform_6(%arg0: i32) -> (i32, i32, i32) {
    %c0_i32 = arith.constant 0 : i32
    %c0_i32_0 = arith.constant 0 : i32
    %c0_i32_1 = arith.constant 0 : i32
    %c0_i32_2 = arith.constant 0 : i32
    return %c0_i32, %c0_i32_0, %c0_i32_1 : i32, i32, i32
  }
  func.func @transform_7(%arg0: i32) -> (i32, i32, i32) {
    %c0_i32 = arith.constant 0 : i32
    %c0_i32_0 = arith.constant 0 : i32
    %c0_i32_1 = arith.constant 0 : i32
    %c0_i32_2 = arith.constant 0 : i32
    return %c0_i32, %c0_i32_0, %c0_i32_1 : i32, i32, i32
  }
}

</mosaic_0001>

<bundles_post_ra>
// kernel: attention_module1_forward.1
= control target key start
LH: loop header
LB: loop body
LE: loop exit
PB: predicated region body
PF: predicated region fallthrough
CT: control target
= control target key end

     0   :  { %vm41_vm0 = vcmask 125952   ;;  %s19868_s0 = inlined_call_operand.vmem [shape: f32[2,4,16], index: 0, kind: input, shape index: {}]   ;;  %s19869_s1 = inlined_call_operand.vmem [shape: f32[11,4,4,1], index: 1, kind: input, shape index: {}]   ;;  %s19870_s2 = inlined_call_operand.vmem [shape: f32[11,6,4,4], index: 2, kind: input, shape index: {}]   ;;  %s19871_s3 = inlined_call_operand.vmem [shape: f32[11,4,4], index: 3, kind: input, shape index: {}]   ;;  %s19872_s4 = inlined_call_operand.vmem [shape: f32[2,2,4,1], index: 4, kind: input, shape index: {}]   ;;  %s19873_s5 = inlined_call_operand.vmem [shape: f32[2,4,4], index: 5, kind: input, shape index: {}]   ;;  %s19874_s6 = inlined_call_operand.vmem [shape: f32[2,4,1], index: 6, kind: input, shape index: {}]   ;;  %s19875_s7 = inlined_call_operand.hbm [shape: f32[2,4,16], index: 7, kind: output, shape index: {}]  }
   0x1   :  { %v17726_v0 = vld [vmem:[%s19868_s0] sm:$0xf]  ;;  %v17731_v1 = vld [vmem:[%s19868_s0 + $0x4] sm:$0xf] }
   0x2   :  { %v42_v2 = vsel %vm41_vm0, %v17726_v0, 0.0 }
   0x3   :  { %12 = vsyncpa [#allocation3], 0  ;;  %43 = vadd.xlane.f32.xlu0 %v42_v2  ;;  %v45_v3 = vsel %vm41_vm0, %v17731_v1, 0.0  ;;  %v30_v4 = vld [vmem:[%s19869_s1] sm:$0xf]  ;;  %v17667_v5 = vmov 0  }
   0x4   :  { %17347 = vset.pattern.permute.xlu0 %v17667_v5  ;;  %17348 = vset.pattern.permute.xlu1 %v17667_v5  ;;  %vm48_vm1 = vcmask 1043456   ;;  %v31_v18 = vld [vmem:[%s19869_s1 + $0x4] sm:$0xf]  ;;  %v17668_v19 = vmov 0.0   ;;  %vm17669_vm2 = vmmov 0   ;;  %vm108_vm3 = vcmask 1041408  }
   0x5   :  { %15384 = vmatprep.subr.bf16.mxu0 %v17668_v19  ;;  %15390 = vmatprep.subr.bf16.mxu1 %v17668_v19  ;;  %v35_v38 = vld [vmem:[%s19870_s2 + $0x4] sm:$0xf]  ;;  %s17670_s10 = smov 1   ;;  %vm104_vm4 = vcmask 31744   ;;  %s17671_s11 = smov 127   ;;  %vm95_vm5 = vcmask 7168  }
   0x6   :  { %15386 = vmatprep.mubr.msk.bf16.mxu0 %vm17669_vm2, %v17668_v19  ;;  %15392 = vmatprep.mubr.msk.bf16.mxu1 %vm17669_vm2, %v17668_v19  ;;  %v101_v44 = vpack.c.bf16 %v35_v38, %v35_v38  ;;  %v34_v50 = vld [vmem:[%s19870_s2] sm:$0xf]  ;;  %vm290_vm6 = vcmask 121856   ;;  %s17884_s28 = smov 1  }
   0x7   :  { %46 = vadd.xlane.f32.xlu0 %v45_v3  ;;  %v98_v58 = vpack.c.bf16 %v34_v50, %v34_v50  ;;  %v36_v3 = vld [vmem:[%s19870_s2 + $0x8] sm:$0xf] }
  0x1d   :  { %73 = vperm.xlu0 %17347, %v30_v4   ;;  %v293_v4 = vpack.c.bf16 %v36_v3, %v36_v3 }
  0x90   :  { %v44_v6 = vpop.xlane.xlu0 %43 }
  0x91   :  { %v49_v8 = vsel %vm48_vm1, %v44_v6, 0.0 }
  0x94   :  { %v47_v7 = vpop.xlane.xlu0 %46 }
  0x95   :  { %v50_v9 = vsel %vm48_vm1, %v47_v7, 0.0 }
  0x96   :  { %v51_v10 = vadd.f32 %v50_v9, %v49_v8 }
  0x98   :  { %v52_v11 = vmul.f32 0.03125, %v51_v10 }
  0x9a   :  { %v54_v12 = vsub.f32 %v17731_v1, %v52_v11  ;;  %v53_v13 = vsub.f32 %v17726_v0, %v52_v11 }
  0x9c   :  { %v55_v14 = vmul.f32 %v53_v13, %v53_v13  ;;  %v56_v16 = vmul.f32 %v54_v12, %v54_v12  ;;  %v74_v28 = vpop.permute.xlu0 %73 }
  0x9e   :  { %v57_v15 = vsel %vm41_vm0, %v55_v14, 0.0  ;;  %v60_v17 = vsel %vm41_vm0, %v56_v16, 0.0  ;;  %v33_v16 = vld [vmem:[%s19869_s1 + $0xc] sm:$0xf] }
  0x9f   :  { %58 = vadd.xlane.f32.xlu1 %v57_v15 }
  0xa3   :  { %61 = vadd.xlane.f32.xlu1 %v60_v17 }
  0xb4   :  { %80 = vperm.xlu1 %17348, %v31_v18  }
 0x12c   :  { %v59_v20 = vpop.xlane.xlu1 %58 }
 0x12d   :  { %v63_v22 = vsel %vm48_vm1, %v59_v20, 0.0 }
 0x130   :  { %v62_v21 = vpop.xlane.xlu1 %61 }
 0x131   :  { %v64_v23 = vsel %vm48_vm1, %v62_v21, 0.0 }
 0x132   :  { %v65_v24 = vadd.f32 %v64_v23, %v63_v22 }
 0x134   :  { %v66_v25 = vmul.f32 0.03125, %v65_v24  ;;  %v81_v31 = vpop.permute.xlu1 %80 }
 0x136   :  { %v67_v26 = vadd.f32 1e-05, %v66_v25 }
 0x138   :  { %17369 = vrsqrt.f32 %v67_v26 }
 0x142   :  { %v17370_v27 = vpop.eup %17369 }
 0x143   :  { %v69_v29 = vmul.f32 %v17370_v27, %v53_v13  ;;  %v70_v30 = vmul.f32 %v17370_v27, %v54_v12 }
 0x145   :  { %v76_v32 = vmul.f32 %v74_v28, %v69_v29  ;;  %v77_v33 = vmul.f32 %v74_v28, %v70_v30  ;;  %v32_v30 = vld [vmem:[%s19869_s1 + $0x8] sm:$0xf] }
 0x147   :  { %v83_v34 = vadd.f32 %v81_v31, %v76_v32  ;;  %v84_v35 = vadd.f32 %v81_v31, %v77_v33 }
 0x149   :  { %v85_v36 = vmax.f32 %v83_v34, 0.0  ;;  %v86_v37 = vmax.f32 %v84_v35, 0.0 }
 0x14b   :  { %v17349_v39 = vpack.i.bf16 %v86_v37, %v85_v36  ;;  %v102_v40 = vpack.c.bf16 %v85_v36, %v85_v36  ;;  %v103_v41 = vpack.c.bf16 %v86_v37, %v86_v37 }
 0x14d   :  { %17350 = vrot.lane.b32.xlu1 %v17349_v39, %s17670_s10  ;;  %v110_v42 = vsel %vm108_vm3, %v102_v40, 0  ;;  %v153_v43 = vsel %vm108_vm3, %v103_v41, 0 }
 0x14e   :  { %15385 = vmatpush3.bf16.msra.mxu0 %v110_v42  ;;  %15391 = vmatpush3.bf16.msra.mxu1 %v153_v43 }
 0x14f   :  { %15396 = vmatprep.subr.bf16.mxu0 %v17668_v19  ;;  %15402 = vmatprep.subr.bf16.mxu1 %v17668_v19 }
 0x151   :  { %17355 = vrot.lane.b32.xlu1 %v17349_v39, %s17671_s11  ;;  %15387 = vmatmul.mubr.msk.bf16.vlgmr.msra.gmra.mrb[0].mxu0 %vm104_vm4, %v101_v44 }
 0x152   :  { %15393 = vmatmul.mubr.msk.bf16.vlgmr.msra.gmra.mrb[0].mxu1 %vm104_vm4, %v101_v44  ;;  %15398 = vmatprep.mubr.msk.bf16.mxu0 %vm17669_vm2, %v17668_v19 }
 0x153   :  { %15404 = vmatprep.mubr.msk.bf16.mxu1 %vm17669_vm2, %v17668_v19 }
 0x1bf   :  { %v17351_v45 = vpop.permute.xlu1 %17350 }
 0x1c0   :  { %v17353_v46 = vunpack.i.h.bf16 %v17351_v45  ;;  %v17352_v47 = vunpack.i.l.bf16 %v17351_v45 }
 0x1c2   :  { %v97_v48 = vsel %vm95_vm5, 0.0, %v17353_v46  ;;  %v96_v49 = vsel %vm95_vm5, 0.0, %v17352_v47 }
 0x1c3   :  { %v100_v51 = vpack.c.bf16 %v97_v48, %v97_v48  ;;  %v99_v52 = vpack.c.bf16 %v96_v49, %v96_v49  ;;  %v17356_v53 = vpop.permute.xlu1 %17355  ;;  %v38_v49 = vld [vmem:[%s19870_s2 + $0x10] sm:$0xf] }
 0x1c4   :  { %v17358_v54 = vunpack.i.h.bf16 %v17356_v53  ;;  %v17357_v55 = vunpack.i.l.bf16 %v17356_v53 }
 0x1c5   :  { %v199_v56 = vsel %vm108_vm3, %v99_v52, 0  ;;  %v242_v57 = vsel %vm108_vm3, %v100_v51, 0 }
 0x1c6   :  { %v292_v59 = vsel %vm290_vm6, %v17358_v54, 0.0  ;;  %v291_v60 = vsel %vm290_vm6, %v17357_v55, 0.0  ;;  %15397 = vmatpush3.bf16.msra.mxu0 %v199_v56  ;;  %15403 = vmatpush3.bf16.msra.mxu1 %v242_v57  ;;  %v444_v55 = vpack.c.bf16 %v38_v49, %v38_v49 }
 0x1c7   :  { %v295_v61 = vpack.c.bf16 %v292_v59, %v292_v59  ;;  %v294_v62 = vpack.c.bf16 %v291_v60, %v291_v60  ;;  %15408 = vmatprep.subr.bf16.mxu0 %v17668_v19  ;;  %15414 = vmatprep.subr.bf16.mxu1 %v17668_v19 }
 0x1c9   :  { %15399 = vmatmul.mubr.msk.bf16.vlgmr.msra.gmra.mrb[0].mxu0 %vm104_vm4, %v98_v58  ;;  %15405 = vmatmul.mubr.msk.bf16.vlgmr.msra.gmra.mrb[0].mxu1 %vm104_vm4, %v98_v58  ;;  %v300_v63 = vsel %vm108_vm3, %v294_v62, 0  ;;  %v343_v2 = vsel %vm108_vm3, %v295_v61, 0  ;;  %v37_v61 = vld [vmem:[%s19870_s2 + $0xc] sm:$0xf] }
 0x1ca   :  { %15409 = vmatpush3.bf16.msra.mxu0 %v300_v63  ;;  %15415 = vmatpush3.bf16.msra.mxu1 %v343_v2 }
 0x1cb   :  { %15410 = vmatprep.mubr.msk.bf16.mxu0 %vm17669_vm2, %v17668_v19  ;;  %15416 = vmatprep.mubr.msk.bf16.mxu1 %vm17669_vm2, %v17668_v19 }
 0x1cc   :  { %15420 = vmatprep.subr.bf16.mxu0 %v17668_v19  ;;  %15426 = vmatprep.subr.bf16.mxu1 %v17668_v19 }
 0x1d5   :  { %15411 = vmatmul.mubr.msk.bf16.vlgmr.msra.gmra.mrb[0].mxu0 %vm104_vm4, %v293_v4  ;;  %15417 = vmatmul.mubr.msk.bf16.vlgmr.msra.gmra.mrb[0].mxu1 %vm104_vm4, %v293_v4 }
 0x1d6   :  { %15422 = vmatprep.mubr.msk.bf16.mxu0 %vm17669_vm2, %v17668_v19  ;;  %15428 = vmatprep.mubr.msk.bf16.mxu1 %vm17669_vm2, %v17668_v19 }
 0x2a8   :  { %v336_v6 = vpop.f32.mrb[0].mxu0  ;;  %v379_v7 = vpop.f32.mrb[0].mxu1 }
 0x2a9   :  { %v15412_v8 = vpop.f32.mrb[1].mxu0  ;;  %v15418_v9 = vpop.f32.mrb[1].mxu1  ;;  %v390_v10 = vsel %vm41_vm0, %v379_v7, 0.0  ;;  %v387_v11 = vsel %vm41_vm0, %v336_v6, 0.0 }
 0x2aa   :  { %391 = vadd.xlane.f32.xlu0 %v390_v10  ;;  %v382_v12 = vpop.f32.mrb[2].mxu1  ;;  %388 = vadd.xlane.f32.xlu1 %v387_v11  ;;  %v339_v13 = vpop.f32.mrb[2].mxu0  ;;  %v441_v8 = vpack.c.bf16 %v37_v61, %v37_v61 }
 0x2ab   :  { %v15413_v14 = vpop.f32.mrb[3].mxu0  ;;  %v15419_v15 = vpop.f32.mrb[3].mxu1 }
 0x2ac   :  { %v39_v15 = vld [vmem:[%s19870_s2 + $0x14] sm:$0xf] }
 0x2c0   :  { %424 = vperm.xlu0 %17347, %v33_v16   ;;  %v728_v16 = vpack.c.bf16 %v17726_v0, %v17726_v0  ;;  %v40_v0 = vld [vmem:[%s19871_s3] sm:$0xf] }
 0x337   :  { %v392_v17 = vpop.xlane.xlu0 %391  ;;  %v389_v18 = vpop.xlane.xlu1 %388 }
 0x338   :  { %v394_v20 = vsel %vm48_vm1, %v392_v17, 0.0  ;;  %v393_v21 = vsel %vm48_vm1, %v389_v18, 0.0  ;;  %v729_v17 = vpack.c.bf16 %v17731_v1, %v17731_v1  ;;  %v633_v18 = vpack.c.bf16 %v39_v15, %v39_v15 }
 0x339   :  { %v395_v22 = vadd.f32 %v394_v20, %v393_v21  ;;  %v734_v20 = vsel %vm108_vm3, %v728_v16, 0  ;;  %v727_v1 = vpack.c.bf16 %v40_v0, %v40_v0 }
 0x33a   :  { %v777_v21 = vsel %vm108_vm3, %v729_v17, 0 }
 0x33b   :  { %v396_v23 = vmul.f32 0.03125, %v395_v22 }
 0x33d   :  { %v397_v24 = vsub.f32 %v336_v6, %v396_v23  ;;  %v398_v25 = vsub.f32 %v379_v7, %v396_v23 }
 0x33f   :  { %v399_v26 = vmul.f32 %v397_v24, %v397_v24  ;;  %v400_v28 = vmul.f32 %v398_v25, %v398_v25  ;;  %v425_v44 = vpop.permute.xlu0 %424 }
 0x341   :  { %v401_v27 = vsel %vm41_vm0, %v399_v26, 0.0  ;;  %v404_v29 = vsel %vm41_vm0, %v400_v28, 0.0 }
 0x342   :  { %402 = vadd.xlane.f32.xlu1 %v401_v27 }
 0x346   :  { %405 = vadd.xlane.f32.xlu1 %v404_v29 }
 0x357   :  { %417 = vperm.xlu1 %17348, %v32_v30  }
 0x3cf   :  { %v403_v31 = vpop.xlane.xlu1 %402 }
 0x3d0   :  { %v407_v33 = vsel %vm48_vm1, %v403_v31, 0.0 }
 0x3d3   :  { %v406_v32 = vpop.xlane.xlu1 %405 }
 0x3d4   :  { %v408_v34 = vsel %vm48_vm1, %v406_v32, 0.0 }
 0x3d5   :  { %v409_v35 = vadd.f32 %v408_v34, %v407_v33 }
 0x3d7   :  { %v410_v36 = vmul.f32 0.03125, %v409_v35  ;;  %v418_v41 = vpop.permute.xlu1 %417 }
 0x3d9   :  { %v411_v37 = vadd.f32 1e-05, %v410_v36 }
 0x3db   :  { %17371 = vrsqrt.f32 %v411_v37 }
 0x3e5   :  { %v17372_v38 = vpop.eup %17371 }
 0x3e6   :  { %v413_v39 = vmul.f32 %v17372_v38, %v397_v24  ;;  %v414_v40 = vmul.f32 %v17372_v38, %v398_v25 }
 0x3e8   :  { %v420_v42 = vmul.f32 %v418_v41, %v413_v39  ;;  %v421_v43 = vmul.f32 %v418_v41, %v414_v40 }
 0x3ea   :  { %v427_v45 = vadd.f32 %v425_v44, %v420_v42  ;;  %v428_v46 = vadd.f32 %v425_v44, %v421_v43 }
 0x3ec   :  { %v429_v47 = vmax.f32 %v427_v45, 0.0  ;;  %v430_v48 = vmax.f32 %v428_v46, 0.0 }
 0x3ee   :  { %v17359_v50 = vpack.i.bf16 %v430_v48, %v429_v47  ;;  %v445_v51 = vpack.c.bf16 %v429_v47, %v429_v47  ;;  %v446_v52 = vpack.c.bf16 %v430_v48, %v430_v48 }
 0x3f0   :  { %17360 = vrot.lane.b32.xlu1 %v17359_v50, %s17670_s10  ;;  %v451_v53 = vsel %vm108_vm3, %v445_v51, 0  ;;  %v494_v54 = vsel %vm108_vm3, %v446_v52, 0 }
 0x3f1   :  { %15421 = vmatpush3.bf16.msra.mxu0 %v451_v53  ;;  %15427 = vmatpush3.bf16.msra.mxu1 %v494_v54 }
 0x3f2   :  { %15432 = vmatprep.subr.bf16.mxu0 %v17668_v19  ;;  %15438 = vmatprep.subr.bf16.mxu1 %v17668_v19 }
 0x3f4   :  { %17365 = vrot.lane.b32.xlu1 %v17359_v50, %s17671_s11  ;;  %15423 = vmatmul.mubr.msk.bf16.vlgmr.msra.gmra.mrb[4].mxu0 %vm104_vm4, %v444_v55 }
 0x3f5   :  { %15429 = vmatmul.mubr.msk.bf16.vlgmr.msra.gmra.mrb[4].mxu1 %vm104_vm4, %v444_v55  ;;  %15434 = vmatprep.mubr.msk.bf16.mxu0 %vm17669_vm2, %v17668_v19 }
 0x3f6   :  { %15440 = vmatprep.mubr.msk.bf16.mxu1 %vm17669_vm2, %v17668_v19 }
 0x462   :  { %v17361_v56 = vpop.permute.xlu1 %17360 }
 0x463   :  { %v17363_v57 = vunpack.i.h.bf16 %v17361_v56  ;;  %v17362_v58 = vunpack.i.l.bf16 %v17361_v56 }
 0x465   :  { %v440_v59 = vsel %vm95_vm5, 0.0, %v17363_v57  ;;  %v439_v60 = vsel %vm95_vm5, 0.0, %v17362_v58 }
 0x466   :  { %v443_v62 = vpack.c.bf16 %v440_v59, %v440_v59  ;;  %v442_v63 = vpack.c.bf16 %v439_v60, %v439_v60  ;;  %v17366_v2 = vpop.permute.xlu1 %17365 }
 0x467   :  { %v17368_v3 = vunpack.i.h.bf16 %v17366_v2  ;;  %v17367_v4 = vunpack.i.l.bf16 %v17366_v2 }
 0x468   :  { %v540_v6 = vsel %vm108_vm3, %v442_v63, 0  ;;  %v583_v7 = vsel %vm108_vm3, %v443_v62, 0 }
 0x469   :  { %v632_v9 = vsel %vm290_vm6, %v17368_v3, 0.0  ;;  %v631_v10 = vsel %vm290_vm6, %v17367_v4, 0.0  ;;  %15433 = vmatpush3.bf16.msra.mxu0 %v540_v6  ;;  %15439 = vmatpush3.bf16.msra.mxu1 %v583_v7 }
 0x46a   :  { %v635_v11 = vpack.c.bf16 %v632_v9, %v632_v9  ;;  %v634_v12 = vpack.c.bf16 %v631_v10, %v631_v10  ;;  %15444 = vmatprep.subr.bf16.mxu0 %v17668_v19  ;;  %15450 = vmatprep.subr.bf16.mxu1 %v17668_v19 }
 0x46c   :  { %15435 = vmatmul.mubr.msk.bf16.vlgmr.msra.gmra.mrb[4].mxu0 %vm104_vm4, %v441_v8  ;;  %15441 = vmatmul.mubr.msk.bf16.vlgmr.msra.gmra.mrb[4].mxu1 %vm104_vm4, %v441_v8  ;;  %v640_v13 = vsel %vm108_vm3, %v634_v12, 0  ;;  %v683_v14 = vsel %vm108_vm3, %v635_v11, 0 }
 0x46d   :  { %15445 = vmatpush3.bf16.msra.mxu0 %v640_v13  ;;  %15451 = vmatpush3.bf16.msra.mxu1 %v683_v14 }
 0x46e   :  { %15446 = vmatprep.mubr.msk.bf16.mxu0 %vm17669_vm2, %v17668_v19  ;;  %15452 = vmatprep.mubr.msk.bf16.mxu1 %vm17669_vm2, %v17668_v19 }
 0x46f   :  { %15456 = vmatprep.subr.bf16.mxu0 %v17668_v19  ;;  %15462 = vmatprep.subr.bf16.mxu1 %v17668_v19 }
 0x478   :  { %15447 = vmatmul.mubr.msk.bf16.vlgmr.msra.gmra.mrb[4].mxu0 %vm104_vm4, %v633_v18  ;;  %15453 = vmatmul.mubr.msk.bf16.vlgmr.msra.gmra.mrb[4].mxu1 %vm104_vm4, %v633_v18 }
 0x479   :  { %15457 = vmatpush3.bf16.msra.mxu0 %v734_v20  ;;  %15463 = vmatpush3.bf16.msra.mxu1 %v777_v21 }
 0x47a   :  { %15458 = vmatprep.mubr.msk.bf16.mxu0 %vm17669_vm2, %v17668_v19  ;;  %15464 = vmatprep.mubr.msk.bf16.mxu1 %vm17669_vm2, %v17668_v19 }
 0x484   :  { %15459 = vmatmul.mubr.msk.bf16.vlgmr.msra.gmra.mrb[4].mxu0 %vm104_vm4, %v727_v1  ;;  %15465 = vmatmul.mubr.msk.bf16.vlgmr.msra.gmra.mrb[4].mxu1 %vm104_vm4, %v727_v1 }
 0x557   :  { %v17874_v22 = vpop.f32.mrb[4].mxu0   ;;  %v17876_v23 = vpop.f32.mrb[4].mxu1  }
 0x558   :  { %v15460_v24 = vpop.f32.mrb[5].mxu0  ;;  %v15466_v25 = vpop.f32.mrb[5].mxu1  ;;  %v19876_v30 = vmov %v17876_v23  ;;  %v19877_v31 = vmov %v17874_v22 }
 0x559   :  { %v773_v26 = vpop.f32.mrb[6].mxu0  ;;  %v816_v27 = vpop.f32.mrb[6].mxu1 }
 0x55a   :  { %v15461_v28 = vpop.f32.mrb[7].mxu0  ;;  %v15467_v29 = vpop.f32.mrb[7].mxu1 }
 0x55b LB: > { %v846_v32 = vsel %vm41_vm0, %v17661_v31, 0.0  ;;  %v849_v33 = vsel %vm41_vm0, %v17657_v30, 0.0  ;;  %v17672_v34 = vmov 0   ;;  %s14612_s29 = sshll.u32 %s17665_s28, 4  ;;  %v17673_v49 = vmov 0.0   ;;  %s835_s9 = smul.u32 24, %s17665_s28  ;;  %s17665_s28 = sphi %s17884_s28, %s826_s28   ;;  %v17661_v31 = vphi %v19877_v31, %v19881_v31   ;;  %v17657_v30 = vphi %v19876_v30, %v19880_v30  }
 0x55c   : > { %847 = vadd.xlane.f32.xlu0 %v846_v32  ;;  %17374 = vset.pattern.permute.xlu1 %v17672_v34  ;;  %s17903_s8 = scalar_lea.vmem %s19869_s1, %s14612_s29  ;;  %vm17674_vm7 = vmmov 0   ;;  %s17675_s15 = smov 1  }
 0x55d   : > { %17373 = vset.pattern.permute.xlu0 %v17672_v34  ;;  %v831_v35 = vld [vmem:[%s17903_s8] sm:$0xf]  ;;  %v832_v48 = vld [vmem:[%s17903_s8 + $0x4] sm:$0xf]  ;;  %15468 = vmatprep.subr.bf16.mxu0 %v17673_v49  ;;  %s17925_s14 = scalar_lea.vmem %s19870_s2, %s835_s9  ;;  %s17676_s16 = smov 127  }
 0x55e   : > { %15474 = vmatprep.subr.bf16.mxu1 %v17673_v49  ;;  %15470 = vmatprep.mubr.msk.bf16.mxu0 %vm17674_vm7, %v17673_v49  ;;  %v838_v7 = vld [vmem:[%s17925_s14 + $0x4] sm:$0xf]  ;;  %v837_v20 = vld [vmem:[%s17925_s14] sm:$0xf]  ;;  %s14613_s17 = sshll.u32 %s17665_s28, 2  ;;  %s826_s28 = sadd.s32 1, %s17665_s28  }
 0x55f   : > { %15476 = vmatprep.mubr.msk.bf16.mxu1 %vm17674_vm7, %v17673_v49  ;;  %v903_v13 = vpack.c.bf16 %v838_v7, %v838_v7  ;;  %v900_v28 = vpack.c.bf16 %v837_v20, %v837_v20  ;;  %s844_s20 = scalar_lea.vmem %s19871_s3, %s14613_s17  ;;  %p823_p0 = scmp.ge.s32.totalorder %s826_s28, 3  }
 0x560   : > { %850 = vadd.xlane.f32.xlu0 %v849_v33  ;;  %vm1656_vm12 = vcmask (%p823_p0), 130048   ;;  %vm2595_vm13 = vcmask (%p823_p0), 60416   ;;  %vm2840_vm14 = vcmask (%p823_p0), 56320   ;;  %s17680_s0 = smov (%p823_p0), [#allocation2]  }
 0x561   :  { %s14570_s30 = sshll.u32 (%p823_p0), %s17680_s0, 4  ;;  %s14571_s30 = int_to_ptr.vmem [resolvable:$true] %s14570_s30 }
 0x562   :  { %p17624_p2 = scmp.lt.s32.totalorder (%p823_p0), %s14571_s30, %s14571_s30 }
 0x576   : > { %876 = vperm.xlu0 %17373, %v831_v35  }
 0x5e9   : > { %v848_v36 = vpop.xlane.xlu0 %847 }
 0x5ea   : > { %v852_v38 = vsel %vm48_vm1, %v848_v36, 0.0 }
 0x5ed   : > { %v851_v37 = vpop.xlane.xlu0 %850 }
 0x5ee   : > { %v853_v39 = vsel %vm48_vm1, %v851_v37, 0.0  ;;  %v839_v37 = vld [vmem:[%s17925_s14 + $0x8] sm:$0xf] }
 0x5ef   : > { %v854_v40 = vadd.f32 %v853_v39, %v852_v38  ;;  %v1092_v38 = vpack.c.bf16 %v839_v37, %v839_v37 }
 0x5f1   : > { %v855_v41 = vmul.f32 0.03125, %v854_v40 }
 0x5f3   : > { %v856_v42 = vsub.f32 %v17661_v31, %v855_v41  ;;  %v857_v43 = vsub.f32 %v17657_v30, %v855_v41 }
 0x5f5   : > { %v858_v44 = vmul.f32 %v856_v42, %v856_v42  ;;  %v859_v46 = vmul.f32 %v857_v43, %v857_v43  ;;  %v877_v58 = vpop.permute.xlu0 %876 }
 0x5f7   : > { %v860_v45 = vsel %vm41_vm0, %v858_v44, 0.0  ;;  %v863_v47 = vsel %vm41_vm0, %v859_v46, 0.0 }
 0x5f8   : > { %861 = vadd.xlane.f32.xlu1 %v860_v45 }
 0x5fc   : > { %864 = vadd.xlane.f32.xlu1 %v863_v47 }
 0x60d   : > { %883 = vperm.xlu1 %17374, %v832_v48  }
 0x685   : > { %v862_v50 = vpop.xlane.xlu1 %861 }
 0x686   : > { %v866_v52 = vsel %vm48_vm1, %v862_v50, 0.0  ;;  %v834_v50 = vld [vmem:[%s17903_s8 + $0xc] sm:$0xf] }
 0x689   : > { %v865_v51 = vpop.xlane.xlu1 %864 }
 0x68a   : > { %v867_v53 = vsel %vm48_vm1, %v865_v51, 0.0 }
 0x68b   : > { %v868_v54 = vadd.f32 %v867_v53, %v866_v52 }
 0x68d   : > { %v869_v55 = vmul.f32 0.03125, %v868_v54  ;;  %v884_v61 = vpop.permute.xlu1 %883 }
 0x68f   : > { %v870_v56 = vadd.f32 1e-05, %v869_v55 }
 0x691   : > { %17395 = vrsqrt.f32 %v870_v56 }
 0x69b   : > { %v17396_v57 = vpop.eup %17395 }
 0x69c   : > { %v872_v59 = vmul.f32 %v17396_v57, %v856_v42  ;;  %v873_v60 = vmul.f32 %v17396_v57, %v857_v43 }
 0x69e   : > { %v879_v62 = vmul.f32 %v877_v58, %v872_v59  ;;  %v880_v63 = vmul.f32 %v877_v58, %v873_v60 }
 0x6a0   : > { %v886_v2 = vadd.f32 %v884_v61, %v879_v62  ;;  %v887_v3 = vadd.f32 %v884_v61, %v880_v63  ;;  %v833_v63 = vld [vmem:[%s17903_s8 + $0x8] sm:$0xf]  ;;  %s17619_s8 = scalar_lea.vmem (%p823_p0), %s14571_s30, 128 }
 0x6a1   :  { %p17620_p1 = scmp.ne.s32.totalorder (%p823_p0), %s14571_s30, %s17619_s8  ;;  %p17625_p3 = scmp.lt.s32.totalorder (%p823_p0), %s17619_s8, %s17619_s8 }
 0x6a2   : > { %v888_v4 = vmax.f32 %v886_v2, 0.0  ;;  %v889_v6 = vmax.f32 %v887_v3, 0.0 }
 0x6a3   :  { %p17626_p4 = por (%p823_p0), %p17625_p3, %p17624_p2 }
 0x6a4   : > { %v17375_v8 = vpack.i.bf16 %v889_v6, %v888_v4  ;;  %v904_v9 = vpack.c.bf16 %v888_v4, %v888_v4  ;;  %v905_v10 = vpack.c.bf16 %v889_v6, %v889_v6 }
 0x6a5   :  { %p17627_p5 = pnand (%p823_p0), %p17626_p4, %p17620_p1 }
 0x6a6   : > { %17376 = vrot.lane.b32.xlu1 %v17375_v8, %s17675_s15  ;;  %v910_v11 = vsel %vm108_vm3, %v904_v9, 0  ;;  %v953_v12 = vsel %vm108_vm3, %v905_v10, 0 }
 0x6a7   : > { %15469 = vmatpush3.bf16.msra.mxu0 %v910_v11  ;;  %15475 = vmatpush3.bf16.msra.mxu1 %v953_v12 }
 0x6a8   : > { %15480 = vmatprep.subr.bf16.mxu0 %v17673_v49  ;;  %15486 = vmatprep.subr.bf16.mxu1 %v17673_v49 }
 0x6aa   : > { %17381 = vrot.lane.b32.xlu1 %v17375_v8, %s17676_s16  ;;  %15471 = vmatmul.mubr.msk.bf16.vlgmr.msra.gmra.mrb[0].mxu0 %vm104_vm4, %v903_v13 }
 0x6ab   : > { %15477 = vmatmul.mubr.msk.bf16.vlgmr.msra.gmra.mrb[0].mxu1 %vm104_vm4, %v903_v13  ;;  %15482 = vmatprep.mubr.msk.bf16.mxu0 %vm17674_vm7, %v17673_v49 }
 0x6ac   : > { %15488 = vmatprep.mubr.msk.bf16.mxu1 %vm17674_vm7, %v17673_v49 }
 0x718   : > { %v17377_v14 = vpop.permute.xlu1 %17376 }
 0x719   : > { %v17379_v15 = vunpack.i.h.bf16 %v17377_v14  ;;  %v17378_v16 = vunpack.i.l.bf16 %v17377_v14 }
 0x71b   : > { %v899_v17 = vsel %vm95_vm5, 0.0, %v17379_v15  ;;  %v898_v18 = vsel %vm95_vm5, 0.0, %v17378_v16 }
 0x71c   : > { %v902_v21 = vpack.c.bf16 %v899_v17, %v899_v17  ;;  %v901_v0 = vpack.c.bf16 %v898_v18, %v898_v18  ;;  %v17382_v1 = vpop.permute.xlu1 %17381 }
 0x71d   : > { %v17384_v24 = vunpack.i.h.bf16 %v17382_v1  ;;  %v17383_v25 = vunpack.i.l.bf16 %v17382_v1 }
 0x71e   : > { %v1042_v26 = vsel %vm108_vm3, %v902_v21, 0  ;;  %v999_v27 = vsel %vm108_vm3, %v901_v0, 0  ;;  %v841_v0 = vld [vmem:[%s17925_s14 + $0x10] sm:$0xf] }
 0x71f   : > { %v1091_v29 = vsel %vm290_vm6, %v17384_v24, 0.0  ;;  %v1090_v32 = vsel %vm290_vm6, %v17383_v25, 0.0  ;;  %15481 = vmatpush3.bf16.msra.mxu0 %v999_v27  ;;  %15487 = vmatpush3.bf16.msra.mxu1 %v1042_v26 }
 0x720   : > { %v1094_v33 = vpack.c.bf16 %v1091_v29, %v1091_v29  ;;  %v1093_v34 = vpack.c.bf16 %v1090_v32, %v1090_v32  ;;  %15492 = vmatprep.subr.bf16.mxu0 %v17673_v49  ;;  %15498 = vmatprep.subr.bf16.mxu1 %v17673_v49 }
 0x722   : > { %v1142_v35 = vsel %vm108_vm3, %v1094_v33, 0  ;;  %v1099_v36 = vsel %vm108_vm3, %v1093_v34, 0  ;;  %15483 = vmatmul.mubr.msk.bf16.vlgmr.msra.gmra.mrb[0].mxu0 %vm104_vm4, %v900_v28  ;;  %15489 = vmatmul.mubr.msk.bf16.vlgmr.msra.gmra.mrb[0].mxu1 %vm104_vm4, %v900_v28  ;;  %v1243_v28 = vpack.c.bf16 %v841_v0, %v841_v0 }
 0x723   : > { %15493 = vmatpush3.bf16.msra.mxu0 %v1099_v36  ;;  %15499 = vmatpush3.bf16.msra.mxu1 %v1142_v35  ;;  %v840_v36 = vld [vmem:[%s17925_s14 + $0xc] sm:$0xf] }
 0x724   : > { %15494 = vmatprep.mubr.msk.bf16.mxu0 %vm17674_vm7, %v17673_v49  ;;  %15500 = vmatprep.mubr.msk.bf16.mxu1 %vm17674_vm7, %v17673_v49 }
 0x725   : > { %15504 = vmatprep.subr.bf16.mxu0 %v17673_v49  ;;  %15510 = vmatprep.subr.bf16.mxu1 %v17673_v49 }
 0x72e   : > { %15495 = vmatmul.mubr.msk.bf16.vlgmr.msra.gmra.mrb[0].mxu0 %vm104_vm4, %v1092_v38  ;;  %15501 = vmatmul.mubr.msk.bf16.vlgmr.msra.gmra.mrb[0].mxu1 %vm104_vm4, %v1092_v38 }
 0x72f   : > { %15506 = vmatprep.mubr.msk.bf16.mxu0 %vm17674_vm7, %v17673_v49  ;;  %15512 = vmatprep.mubr.msk.bf16.mxu1 %vm17674_vm7, %v17673_v49 }
 0x801   : > { %v1135_v39 = vpop.f32.mrb[0].mxu0  ;;  %v1178_v40 = vpop.f32.mrb[0].mxu1 }
 0x802   : > { %v15496_v41 = vpop.f32.mrb[1].mxu0  ;;  %v15502_v42 = vpop.f32.mrb[1].mxu1  ;;  %v1189_v43 = vsel %vm41_vm0, %v1178_v40, 0.0  ;;  %v1186_v44 = vsel %vm41_vm0, %v1135_v39, 0.0 }
 0x803   : > { %1190 = vadd.xlane.f32.xlu0 %v1189_v43  ;;  %v1181_v45 = vpop.f32.mrb[2].mxu1  ;;  %1187 = vadd.xlane.f32.xlu1 %v1186_v44  ;;  %v1138_v46 = vpop.f32.mrb[2].mxu0  ;;  %v1240_v44 = vpack.c.bf16 %v840_v36, %v840_v36 }
 0x804   : > { %v15497_v47 = vpop.f32.mrb[3].mxu0  ;;  %v15503_v48 = vpop.f32.mrb[3].mxu1 }
 0x819   : > { %1223 = vperm.xlu0 %17373, %v834_v50  }
 0x81d   :  { %1622 = vrot.lane.b32.xlu0 (%p823_p0), %v17874_v22, %s17670_s10 }
 0x81e   :  { %17400 = vset.pattern.permute.xlu0 (%p823_p0), %v17667_v5 }
 0x821   :  { %1632 = vrot.lane.b32.xlu0 (%p823_p0), %v17874_v22, %s17671_s11 }
 0x890   : > { %v1191_v51 = vpop.xlane.xlu0 %1190  ;;  %v1188_v52 = vpop.xlane.xlu1 %1187 }
 0x891   : > { %v1193_v53 = vsel %vm48_vm1, %v1191_v51, 0.0  ;;  %v1192_v54 = vsel %vm48_vm1, %v1188_v52, 0.0  ;;  %v842_v52 = vld [vmem:[%s17925_s14 + $0x14] sm:$0xf] }
 0x892   : > { %v1194_v55 = vadd.f32 %v1193_v53, %v1192_v54  ;;  %v1527_v53 = vpack.c.bf16 %v17661_v31, %v17661_v31  ;;  %v1528_v54 = vpack.c.bf16 %v17657_v30, %v17657_v30  ;;  %v845_v30 = vld [vmem:[%s844_s20] sm:$0xf] }
 0x893   : > { %v1526_v31 = vpack.c.bf16 %v845_v30, %v845_v30 }
 0x894   : > { %v1195_v56 = vmul.f32 0.03125, %v1194_v55  ;;  %v1432_v55 = vpack.c.bf16 %v842_v52, %v842_v52 }
 0x896   : > { %v1196_v57 = vsub.f32 %v1135_v39, %v1195_v56  ;;  %v1197_v58 = vsub.f32 %v1178_v40, %v1195_v56  ;;  %v1533_v56 = vsel %vm108_vm3, %v1527_v53, 0 }
 0x898   : > { %v1198_v59 = vmul.f32 %v1196_v57, %v1196_v57  ;;  %v1199_v61 = vmul.f32 %v1197_v58, %v1197_v58  ;;  %v1224_v16 = vpop.permute.xlu0 %1223 }
 0x89a   : > { %v1200_v60 = vsel %vm41_vm0, %v1198_v59, 0.0  ;;  %v1203_v62 = vsel %vm41_vm0, %v1199_v61, 0.0 }
 0x89b   : > { %1201 = vadd.xlane.f32.xlu1 %v1200_v60 }
 0x89f   : > { %1204 = vadd.xlane.f32.xlu1 %v1203_v62 }
 0x8b0   : > { %1216 = vperm.xlu1 %17374, %v833_v63  }
 0x8b4   :  { %17399 = vset.pattern.permute.xlu1 (%p823_p0), %v17667_v5 }
 0x928   : > { %v1202_v2 = vpop.xlane.xlu1 %1201 }
 0x929   : > { %v1206_v4 = vsel %vm48_vm1, %v1202_v2, 0.0 }
 0x92c   : > { %v1205_v3 = vpop.xlane.xlu1 %1204 }
 0x92d   : > { %v1207_v6 = vsel %vm48_vm1, %v1205_v3, 0.0  ;;  %v1642_v3 = vlaneseq (%p823_p0) }
 0x92e   : > { %v1208_v7 = vadd.f32 %v1207_v6, %v1206_v4  ;;  %v17677_v4 = vmov (%p823_p0), 0.0|0.0  }
 0x92f   :  { %v18047_v6 = vshrl.u32 (%p823_p0), %v1642_v3, 7 }
 0x930   : > { %v1209_v8 = vmul.f32 0.03125, %v1208_v7  ;;  %v1217_v13 = vpop.permute.xlu1 %1216  ;;  %v18049_v7 = vand.u32 (%p823_p0), 127, %v1642_v3 }
 0x932   : > { %v1210_v9 = vadd.f32 1e-05, %v1209_v8  ;;  %v1644_v8 = vadd.s32 (%p823_p0), 8, %v18047_v6 }
 0x934   : > { %17397 = vrsqrt.f32 %v1210_v9  ;;  %v18062_v9 = vmul.u32 (%p823_p0), 2, %v18049_v7 }
 0x936   :  { %vm1648_vm8 = vcmp.lt.s32.totalorder (%p823_p0), %v18062_v9, 15  ;;  %vm4181_vm15 = vcmp.lt.s32.totalorder (%p823_p0), %v18062_v9, 7 }
 0x93e   : > { %v17398_v10 = vpop.eup %17397 }
 0x93f   : > { %v1212_v11 = vmul.f32 %v17398_v10, %v1196_v57  ;;  %v1213_v12 = vmul.f32 %v17398_v10, %v1197_v58  ;;  %v1576_v57 = vsel %vm108_vm3, %v1528_v54, 0  ;;  %v1649_v10 = vsel (%p823_p0), %vm1648_vm8, %v18062_v9, 15 }
 0x940   :  { %vm1650_vm9 = vcmp.eq.s32.totalorder (%p823_p0), %v18047_v6, %v1649_v10  ;;  %vm1651_vm10 = vcmp.eq.s32.totalorder (%p823_p0), %v1644_v8, %v1649_v10 }
 0x941   : > { %v1219_v14 = vmul.f32 %v1217_v13, %v1212_v11  ;;  %v1220_v15 = vmul.f32 %v1217_v13, %v1213_v12  ;;  %v14628_v5 = vsel (%p823_p0), %vm1650_vm9, 1.0, %v17668_v19  ;;  %v14629_v11 = vsel (%p823_p0), %vm1651_vm10, 1.0, %v17668_v19  ;;  %vm18069_vm11 = vmpackc.low (%p823_p0), %vm1651_vm10, %vm1650_vm9 }
 0x942   :  { %v1739_v13 = vsub.f32 (%p823_p0), %v14628_v5, %v14628_v5  ;;  %vm5099_vm9 = vcmask (%p823_p0), 27648   ;;  %vm5344_vm10 = vcmask (%p823_p0), 23552  }
 0x943   : > { %v1226_v17 = vadd.f32 %v1224_v16, %v1219_v14  ;;  %v1227_v18 = vadd.f32 %v1224_v16, %v1220_v15  ;;  %v1746_v14 = vsub.f32 (%p823_p0), %v14629_v11, %v14629_v11  ;;  %v17678_v15 = vmov (%p823_p0), 1.0|1.0  }
 0x944   :  { %v1740_v16 = vand.u32 (%p823_p0), 4294901760, %v1739_v13 }
 0x945   : > { %v1228_v20 = vmax.f32 %v1226_v17, 0.0  ;;  %v1229_v21 = vmax.f32 %v1227_v18, 0.0  ;;  %v1747_v17 = vand.u32 (%p823_p0), 4294901760, %v1746_v14  ;;  %v16723_v18 = vpack.c.bf16 (%p823_p0), %v1746_v14, %v1739_v13 }
 0x947   : > { %v17385_v1 = vpack.i.bf16 %v1229_v21, %v1228_v20  ;;  %v1244_v24 = vpack.c.bf16 %v1228_v20, %v1228_v20  ;;  %v1245_v25 = vpack.c.bf16 %v1229_v21, %v1229_v21  ;;  %v1741_v20 = vsub.f32 (%p823_p0), %v1739_v13, %v1740_v16  ;;  %v14643_v13 = vld [vmem:[%s19869_s1 + $0x34] sm:$0xf] (%p823_p0) }
 0x948   :  { %v1748_v21 = vsub.f32 (%p823_p0), %v1746_v14, %v1747_v17 }
 0x949   : > { %17386 = vrot.lane.b32.xlu1 %v17385_v1, %s17675_s15  ;;  %v1250_v26 = vsel %vm108_vm3, %v1244_v24, 0  ;;  %v1293_v27 = vsel %vm108_vm3, %v1245_v25, 0  ;;  %v1742_v0 = vand.u32 (%p823_p0), 4294901760, %v1741_v20  ;;  %v18077_v24 = vpack.c.bf16 (%p823_p0), %v1747_v17, %v1740_v16 }
 0x94a   : > { %15505 = vmatpush3.bf16.msra.mxu0 %v1250_v26  ;;  %15511 = vmatpush3.bf16.msra.mxu1 %v1293_v27  ;;  %v1623_v27 = vpop.permute.xlu0 (%p823_p0), %1622 }
 0x94b   : > { %15516 = vmatprep.subr.bf16.mxu0 %v17673_v49  ;;  %15522 = vmatprep.subr.bf16.mxu1 %v17673_v49 }
 0x94d   : > { %17391 = vrot.lane.b32.xlu1 %v17385_v1, %s17676_s16  ;;  %15507 = vmatmul.mubr.msk.bf16.vlgmr.msra.gmra.mrb[4].mxu0 %vm104_vm4, %v1243_v28  ;;  %v1749_v1 = vand.u32 (%p823_p0), 4294901760, %v1748_v21 }
 0x94e   : > { %15513 = vmatmul.mubr.msk.bf16.vlgmr.msra.gmra.mrb[4].mxu1 %vm104_vm4, %v1243_v28  ;;  %15518 = vmatprep.mubr.msk.bf16.mxu0 %vm17674_vm7, %v17673_v49 }
 0x94f   : > { %15524 = vmatprep.mubr.msk.bf16.mxu1 %vm17674_vm7, %v17673_v49  ;;  %v16720_v25 = vpack.c.bf16 (%p823_p0), %v1749_v1, %v1742_v0 }
 0x951   :  { %1624 = vrot.lane.b32.xlu1 (%p823_p0), %v17876_v23, %s17670_s10 }
 0x955   :  { %1634 = vrot.lane.b32.xlu1 (%p823_p0), %v17876_v23, %s17671_s11 }
 0x9bb   : > { %v17387_v29 = vpop.permute.xlu1 %17386 }
 0x9bc   : > { %v17389_v32 = vunpack.i.h.bf16 %v17387_v29  ;;  %v17388_v33 = vunpack.i.l.bf16 %v17387_v29  ;;  %v1628_v29 = vsel (%p823_p0), %vm95_vm5, -3e+38, %v1623_v27 }
 0x9be   : > { %v1239_v34 = vsel %vm95_vm5, 0.0, %v17389_v32  ;;  %v1238_v35 = vsel %vm95_vm5, 0.0, %v17388_v33  ;;  %v1630_v33 = vmax.f32 (%p823_p0), %v1628_v29, %v17874_v22 }
 0x9bf   : > { %v1242_v37 = vpack.c.bf16 %v1239_v34, %v1239_v34  ;;  %v1241_v38 = vpack.c.bf16 %v1238_v35, %v1238_v35  ;;  %v17392_v39 = vpop.permute.xlu1 %17391  ;;  %v1633_v35 = vpop.permute.xlu0 (%p823_p0), %1632 }
 0x9c0   : > { %v17394_v40 = vunpack.i.h.bf16 %v17392_v39  ;;  %v17393_v41 = vunpack.i.l.bf16 %v17392_v39 }
 0x9c1   : > { %v1382_v42 = vsel %vm108_vm3, %v1242_v37, 0  ;;  %v1339_v43 = vsel %vm108_vm3, %v1241_v38, 0  ;;  %v1638_v37 = vsel (%p823_p0), %vm290_vm6, %v1633_v35, -3e+38  ;;  %v14647_v35 = vld [vmem:[%s19870_s2 + $0x4c] sm:$0xf] (%p823_p0) }
 0x9c2   : > { %v1431_v45 = vsel %vm290_vm6, %v17394_v40, 0.0  ;;  %v1430_v46 = vsel %vm290_vm6, %v17393_v41, 0.0  ;;  %15517 = vmatpush3.bf16.msra.mxu0 %v1339_v43  ;;  %15523 = vmatpush3.bf16.msra.mxu1 %v1382_v42  ;;  %v1640_v39 = vmax.f32 (%p823_p0), %v1630_v33, %v1638_v37 }
 0x9c3   : > { %v1434_v47 = vpack.c.bf16 %v1431_v45, %v1431_v45  ;;  %v1433_v48 = vpack.c.bf16 %v1430_v46, %v1430_v46  ;;  %15528 = vmatprep.subr.bf16.mxu0 %v17673_v49  ;;  %15534 = vmatprep.subr.bf16.mxu1 %v17673_v49  ;;  %v1625_v26 = vpop.permute.xlu1 (%p823_p0), %1624 }
 0x9c4   :  { %v1629_v28 = vsel (%p823_p0), %vm95_vm5, -3e+38, %v1625_v26  ;;  %v1658_v41 = vsel (%p823_p0), %vm1656_vm12, %v1640_v39, 0 }
 0x9c5   : > { %v1482_v50 = vsel %vm108_vm3, %v1434_v47, 0  ;;  %v1439_v51 = vsel %vm108_vm3, %v1433_v48, 0  ;;  %15519 = vmatmul.mubr.msk.bf16.vlgmr.msra.gmra.mrb[4].mxu0 %vm104_vm4, %v1240_v44  ;;  %15525 = vmatmul.mubr.msk.bf16.vlgmr.msra.gmra.mrb[4].mxu1 %vm104_vm4, %v1240_v44  ;;  %v1631_v32 = vmax.f32 (%p823_p0), %v1629_v28, %v17876_v23  ;;  %v1727_v43 = vand.u32 (%p823_p0), 4294901760, %v1658_v41 }
 0x9c6   : > { %15529 = vmatpush3.bf16.msra.mxu0 %v1439_v51  ;;  %15535 = vmatpush3.bf16.msra.mxu1 %v1482_v50 }
 0x9c7   : > { %15530 = vmatprep.mubr.msk.bf16.mxu0 %vm17674_vm7, %v17673_v49  ;;  %15536 = vmatprep.mubr.msk.bf16.mxu1 %vm17674_vm7, %v17673_v49  ;;  %v1635_v34 = vpop.permute.xlu1 (%p823_p0), %1634  ;;  %v1728_v45 = vsub.f32 (%p823_p0), %v1658_v41, %v1727_v43  ;;  %v2653_v41 = vpack.c.bf16 (%p823_p0), %v14647_v35, %v14647_v35 }
 0x9c8   : > { %15540 = vmatprep.subr.bf16.mxu0 %v17673_v49  ;;  %15546 = vmatprep.subr.bf16.mxu1 %v17673_v49  ;;  %v1639_v36 = vsel (%p823_p0), %vm290_vm6, %v1635_v34, -3e+38 }
 0x9c9   :  { %v1641_v38 = vmax.f32 (%p823_p0), %v1631_v32, %v1639_v36  ;;  %v1729_v22 = vand.u32 (%p823_p0), 4294901760, %v1728_v45 }
 0x9cb   :  { %v2120_v40 = vsel (%p823_p0), %vm1656_vm12, %v1641_v38, 0  ;;  %v1730_v46 = vsub.f32 (%p823_p0), %v1728_v45, %v1729_v22 }
 0x9cc   :  { %v2189_v42 = vand.u32 (%p823_p0), 4294901760, %v2120_v40 }
 0x9cd   :  { %v1731_v47 = vand.u32 (%p823_p0), 4294901760, %v1730_v46 }
 0x9ce   :  { %v2190_v44 = vsub.f32 (%p823_p0), %v2120_v40, %v2189_v42 }
 0x9d0   :  { %v2191_v23 = vand.u32 (%p823_p0), 4294901760, %v2190_v44 }
 0x9d1   : > { %15531 = vmatmul.mubr.msk.bf16.vlgmr.msra.gmra.mrb[4].mxu0 %vm104_vm4, %v1432_v55  ;;  %15537 = vmatmul.mubr.msk.bf16.vlgmr.msra.gmra.mrb[4].mxu1 %vm104_vm4, %v1432_v55 }
 0x9d2   : > { %15541 = vmatpush3.bf16.msra.mxu0 %v1533_v56  ;;  %15547 = vmatpush3.bf16.msra.mxu1 %v1576_v57  ;;  %v2192_v48 = vsub.f32 (%p823_p0), %v2190_v44, %v2191_v23 }
 0x9d3   : > { %15542 = vmatprep.mubr.msk.bf16.mxu0 %vm17674_vm7, %v17673_v49  ;;  %15548 = vmatprep.mubr.msk.bf16.mxu1 %vm17674_vm7, %v17673_v49  ;;  %vm4186_vm7 = vcmask (%p823_p0), 64512  }
 0x9d4   :  { %16719 = vmatprep.subr.bf16.mxu0 (%p823_p0), %v17677_v4  ;;  %16716 = vmatprep.subr.bf16.mxu1 (%p823_p0), %v17677_v4  ;;  %v2193_v50 = vand.u32 (%p823_p0), 4294901760, %v2192_v48 }
 0x9dd   : > { %15543 = vmatmul.mubr.msk.bf16.vlgmr.msra.gmra.mrb[4].mxu0 %vm104_vm4, %v1526_v31  ;;  %15549 = vmatmul.mubr.msk.bf16.vlgmr.msra.gmra.mrb[4].mxu1 %vm104_vm4, %v1526_v31 }
 0x9de   :  { %15563 = vmatprep.mubr.msk.f32.mxu0 (%p823_p0), %vm17669_vm2, %v17668_v19  ;;  %15556 = vmatprep.mubr.msk.f32.mxu1 (%p823_p0), %vm17669_vm2, %v17668_v19 }
 0x9df   :  { %16718 = vmatpush3.bf16.msk.msra.mxu1 (%p823_p0), %vm18069_vm11, %v17678_v15  ;;  %16721 = vmatpush3.bf16.msra.mxu0 (%p823_p0), %v16720_v25 }
 0x9e0   :  { %16734 = vmatprep.subr.bf16.mxu1 (%p823_p0), %v17677_v4  ;;  %16722 = vmatprep.subr.bf16.mxu0 (%p823_p0), %v17677_v4 }
 0x9e5   :  { %15564 = vmatmul.mubr.f32.vlgmr.msra.gmra.mrb[0].mxu0 (%p823_p0), %v1727_v43  ;;  %15557 = vmatmul.mubr.f32.vlgmr.msra.gmra.mrb[0].mxu1 (%p823_p0), %v1731_v47 }
 0x9e6   :  { %16724 = vmatpush3.bf16.msra.mxu0 (%p823_p0), %v16723_v18  ;;  %15570 = vmatprep.mubr.msk.f32.mxu0 (%p823_p0), %vm17669_vm2, %v17668_v19 }
 0x9e7   :  { %16725 = vmatprep.subr.bf16.mxu0 (%p823_p0), %v17677_v4  ;;  %16736 = vmatpush3.bf16.msk.msra.mxu1 (%p823_p0), %vm18069_vm11, %v17678_v15 }
 0x9e8   :  { %15598 = vmatprep.mubr.msk.f32.mxu1 (%p823_p0), %vm17669_vm2, %v17668_v19  ;;  %16737 = vmatprep.subr.bf16.mxu1 (%p823_p0), %v17677_v4 }
 0x9ea   :  { %15599 = vmatmul.mubr.f32.vlgmr.msra.gmra.mrb[2].mxu1 (%p823_p0), %v2193_v50 }
 0x9eb   :  { %16739 = vmatpush3.bf16.msra.mxu1 (%p823_p0), %v16720_v25  ;;  %15605 = vmatprep.mubr.msk.f32.mxu1 (%p823_p0), %vm17669_vm2, %v17668_v19 }
 0x9ec   :  { %16740 = vmatprep.subr.bf16.mxu1 (%p823_p0), %v17677_v4 }
 0x9ed   :  { %15571 = vmatmul.mubr.f32.vlgmr.msra.gmra.mrb[0].mxu0 (%p823_p0), %v1728_v45 }
 0x9ee   :  { %16727 = vmatpush3.bf16.msk.msra.mxu0 (%p823_p0), %vm18069_vm11, %v17678_v15  ;;  %15577 = vmatprep.mubr.msk.f32.mxu0 (%p823_p0), %vm17669_vm2, %v17668_v19 }
 0x9ef   :  { %16728 = vmatprep.subr.bf16.mxu0 (%p823_p0), %v17677_v4 }
 0x9f2   :  { %15606 = vmatmul.mubr.f32.vlgmr.msra.gmra.mrb[2].mxu1 (%p823_p0), %v2189_v42 }
 0x9f3   :  { %16742 = vmatpush3.bf16.msra.mxu1 (%p823_p0), %v16723_v18  ;;  %15612 = vmatprep.mubr.msk.f32.mxu1 (%p823_p0), %vm17669_vm2, %v17668_v19 }
 0x9f4   :  { %16743 = vmatprep.subr.bf16.mxu1 (%p823_p0), %v17677_v4 }
 0x9f5   :  { %15578 = vmatmul.mubr.f32.vlgmr.msra.gmra.mrb[0].mxu0 (%p823_p0), %v1729_v22 }
 0x9f6   :  { %16730 = vmatpush3.bf16.msra.mxu0 (%p823_p0), %v18077_v24  ;;  %15584 = vmatprep.mubr.msk.f32.mxu0 (%p823_p0), %vm17669_vm2, %v17668_v19 }
 0x9f7   :  { %16731 = vmatprep.subr.bf16.mxu0 (%p823_p0), %v17677_v4 }
 0x9fa   :  { %15613 = vmatmul.mubr.f32.vlgmr.msra.gmra.mrb[2].mxu1 (%p823_p0), %v2190_v44 }
 0x9fb   :  { %16745 = vmatpush3.bf16.msk.msra.mxu1 (%p823_p0), %vm18069_vm11, %v17678_v15  ;;  %15619 = vmatprep.mubr.msk.f32.mxu1 (%p823_p0), %vm17669_vm2, %v17668_v19 }
 0x9fc   :  { %16746 = vmatprep.subr.bf16.mxu1 (%p823_p0), %v17677_v4 }
 0x9fd   :  { %15585 = vmatmul.mubr.f32.vlgmr.msra.gmra.mrb[0].mxu0 (%p823_p0), %v1727_v43 }
 0x9fe   :  { %16733 = vmatpush3.bf16.msk.msra.mxu0 (%p823_p0), %vm18069_vm11, %v17678_v15  ;;  %15591 = vmatprep.mubr.msk.f32.mxu0 (%p823_p0), %vm17669_vm2, %v17668_v19 }
 0x9ff   :  { %15636 = vmatprep.subr.bf16.mxu0 (%p823_p0), %v17668_v19 }
 0xa02   :  { %15620 = vmatmul.mubr.f32.vlgmr.msra.gmra.mrb[2].mxu1 (%p823_p0), %v2191_v23  ;;  %v14646_v23 = vld [vmem:[%s19870_s2 + $0x48] sm:$0xf] (%p823_p0) }
 0xa03   :  { %16748 = vmatpush3.bf16.msra.mxu1 (%p823_p0), %v18077_v24  ;;  %15626 = vmatprep.mubr.msk.f32.mxu1 (%p823_p0), %vm17669_vm2, %v17668_v19 }
 0xa04   :  { %16749 = vmatprep.subr.bf16.mxu1 (%p823_p0), %v17677_v4 }
 0xa05   :  { %15592 = vmatmul.mubr.f32.vlgmr.msra.gmra.mrb[0].mxu0 (%p823_p0), %v1727_v43 }
 0xa06   :  { %15638 = vmatprep.mubr.msk.bf16.mxu0 (%p823_p0), %vm17669_vm2, %v17668_v19 }
 0xa0a   :  { %15627 = vmatmul.mubr.f32.vlgmr.msra.gmra.mrb[2].mxu1 (%p823_p0), %v2189_v42 }
 0xa0b   :  { %16751 = vmatpush3.bf16.msk.msra.mxu1 (%p823_p0), %vm18069_vm11, %v17678_v15  ;;  %15633 = vmatprep.mubr.msk.f32.mxu1 (%p823_p0), %vm17669_vm2, %v17668_v19  ;;  %vm6685_vm11 = vcmp.lt.s32.totalorder (%p823_p0), %v18062_v9, 3 }
 0xa0c   :  { %15642 = vmatprep.subr.bf16.mxu1 (%p823_p0), %v17668_v19 }
 0xa12   :  { %15634 = vmatmul.mubr.f32.vlgmr.msra.gmra.mrb[2].mxu1 (%p823_p0), %v2189_v42 }
 0xa13   :  { %15644 = vmatprep.mubr.msk.bf16.mxu1 (%p823_p0), %vm17669_vm2, %v17668_v19 }
 0xaad   :  { %825 = sbr.rel (!%p823_p0) target bundleno = 1371 (0x55b), region = 85 }
 0xab0   : > { %v18027_v31 = vpop.f32.mrb[4].mxu0   ;;  %v18029_v30 = vpop.f32.mrb[4].mxu1  }
 0xab1   : > { %v19878_v58 = vmov %v18027_v31  ;;  %v19879_v59 = vmov %v18029_v30  ;;  %v15544_v60 = vpop.f32.mrb[5].mxu0  ;;  %v15550_v61 = vpop.f32.mrb[5].mxu1 }
 0xab2   : > { %v1572_v62 = vpop.f32.mrb[6].mxu0  ;;  %v1615_v63 = vpop.f32.mrb[6].mxu1  ;;  %v19880_v30 = vmov %v19879_v59  ;;  %v19881_v31 = vmov %v19878_v58  ;;  %v14642_v60 = vld [vmem:[%s19869_s1 + $0x30] sm:$0xf] (%p823_p0) }
 0xab3   : > { %v15545_v2 = vpop.f32.mrb[7].mxu0  ;;  %v15551_v49 = vpop.f32.mrb[7].mxu1 }
 0xab8   :  { %v1733_v51 = vpop.f32.mrb[0].mxu1 }
 0xab9   :  { %v15558_v52 = vpop.f32.mrb[1].mxu1 }
 0xad8   :  { %v2115_v53 = vpop.f32.mrb[0].mxu0 }
 0xad9   :  { %v18137_v54 = vadd.f32 %v2115_v53, %v1733_v51  ;;  %v15593_v55 = vpop.f32.mrb[1].mxu0 }
 0xada   :  { %v2650_v55 = vpack.c.bf16 %v14646_v23, %v14646_v23 }
 0xadb   :  { %v2596_v56 = vsel %vm2595_vm13, %v18137_v54, 0.0 }
 0xadc   :  { %2597 = vadd.xlane.f32.xlu0 %v2596_v56 }
 0xae5   :  { %v18141_v57 = vpop.f32.mrb[2].mxu1 }
 0xae6   :  { %v15635_v30 = vpop.f32.mrb[3].mxu1  ;;  %v2599_v31 = vsel %vm2595_vm13, %v18141_v57, 0.0 }
 0xae7   :  { %2600 = vadd.xlane.f32.xlu1 %v2599_v31 }
 0xaf8   :  { %2626 = vperm.xlu1 %17399, %v14642_v60  }
 0xb69   :  { %v2598_v61 = vpop.xlane.xlu0 %2597 }
 0xb6a   :  { %v2602_v63 = vsel %vm48_vm1, %v2598_v61, 0.0 }
 0xb74   :  { %v2601_v62 = vpop.xlane.xlu1 %2600 }
 0xb75   :  { %v2603_v2 = vsel %vm48_vm1, %v2601_v62, 0.0 }
 0xb76   :  { %v2604_v49 = vadd.f32 %v2603_v2, %v2602_v63  ;;  %v14648_v63 = vld [vmem:[%s19870_s2 + $0x50] sm:$0xf] }
 0xb77   :  { %v2843_v2 = vpack.c.bf16 %v14648_v63, %v14648_v63  ;;  %v14649_v63 = vld [vmem:[%s19870_s2 + $0x54] sm:$0xf] }
 0xb78   :  { %v2605_v3 = vmul.f32 0.0625, %v2604_v49  ;;  %v2627_v1 = vpop.permute.xlu1 %2626 }
 0xb7a   :  { %v2606_v4 = vsub.f32 %v18137_v54, %v2605_v3  ;;  %v2607_v8 = vsub.f32 %v18141_v57, %v2605_v3 }
 0xb7c   :  { %v2608_v10 = vmul.f32 %v2606_v4, %v2606_v4  ;;  %v2609_v11 = vmul.f32 %v2607_v8, %v2607_v8 }
 0xb7e   :  { %v2610_v5 = vsel %vm2595_vm13, %v2608_v10, 0.0  ;;  %v2613_v12 = vsel %vm2595_vm13, %v2609_v11, 0.0 }
 0xb7f   :  { %2611 = vadd.xlane.f32.xlu0 %v2610_v5 }
 0xb83   :  { %2614 = vadd.xlane.f32.xlu0 %v2613_v12 }
 0xb99   :  { %2633 = vperm.xlu0 %17400, %v14643_v13  }
 0xc0c   :  { %v2612_v14 = vpop.xlane.xlu0 %2611 }
 0xc0d   :  { %v2616_v16 = vsel %vm48_vm1, %v2612_v14, 0.0 }
 0xc10   :  { %v2615_v15 = vpop.xlane.xlu0 %2614 }
 0xc11   :  { %v2617_v17 = vsel %vm48_vm1, %v2615_v15, 0.0  ;;  %v14645_v15 = vld [vmem:[%s19869_s1 + $0x3c] sm:$0xf] }
 0xc12   :  { %v2618_v18 = vadd.f32 %v2617_v17, %v2616_v16 }
 0xc14   :  { %v2619_v20 = vmul.f32 0.0625, %v2618_v18 }
 0xc16   :  { %v2620_v21 = vadd.f32 1e-05, %v2619_v20 }
 0xc18   :  { %17571 = vrsqrt.f32 %v2620_v21  ;;  %v2634_v26 = vpop.permute.xlu0 %2633 }
 0xc22   :  { %v17572_v0 = vpop.eup %17571 }
 0xc23   :  { %v2622_v24 = vmul.f32 %v17572_v0, %v2606_v4  ;;  %v2623_v25 = vmul.f32 %v17572_v0, %v2607_v8 }
 0xc25   :  { %v2629_v27 = vmul.f32 %v2627_v1, %v2622_v24  ;;  %v2630_v28 = vmul.f32 %v2627_v1, %v2623_v25 }
 0xc27   :  { %v2636_v29 = vadd.f32 %v2634_v26, %v2629_v27  ;;  %v2637_v32 = vadd.f32 %v2634_v26, %v2630_v28 }
 0xc29   :  { %v2638_v33 = vmax.f32 %v2636_v29, 0.0  ;;  %v2639_v34 = vmax.f32 %v2637_v32, 0.0  ;;  %v14644_v29 = vld [vmem:[%s19869_s1 + $0x38] sm:$0xf] }
 0xc2b   :  { %v17401_v36 = vpack.i.bf16 %v2639_v34, %v2638_v33  ;;  %v2654_v37 = vpack.c.bf16 %v2638_v33, %v2638_v33  ;;  %v2655_v38 = vpack.c.bf16 %v2639_v34, %v2639_v34 }
 0xc2d   :  { %17402 = vrot.lane.b32.xlu1 %v17401_v36, %s17670_s10  ;;  %v2660_v39 = vsel %vm108_vm3, %v2654_v37, 0  ;;  %v2703_v40 = vsel %vm108_vm3, %v2655_v38, 0 }
 0xc2e   :  { %15637 = vmatpush3.bf16.msra.mxu0 %v2660_v39  ;;  %15643 = vmatpush3.bf16.msra.mxu1 %v2703_v40 }
 0xc2f   :  { %15648 = vmatprep.subr.bf16.mxu0 %v17668_v19  ;;  %15654 = vmatprep.subr.bf16.mxu1 %v17668_v19 }
 0xc31   :  { %17407 = vrot.lane.b32.xlu1 %v17401_v36, %s17671_s11  ;;  %15639 = vmatmul.mubr.msk.bf16.vlgmr.msra.gmra.mrb[4].mxu0 %vm104_vm4, %v2653_v41 }
 0xc32   :  { %15645 = vmatmul.mubr.msk.bf16.vlgmr.msra.gmra.mrb[4].mxu1 %vm104_vm4, %v2653_v41  ;;  %15650 = vmatprep.mubr.msk.bf16.mxu0 %vm17669_vm2, %v17668_v19 }
 0xc33   :  { %15656 = vmatprep.mubr.msk.bf16.mxu1 %vm17669_vm2, %v17668_v19 }
 0xc9f   :  { %v17403_v42 = vpop.permute.xlu1 %17402 }
 0xca0   :  { %v17405_v43 = vunpack.i.h.bf16 %v17403_v42  ;;  %v17404_v44 = vunpack.i.l.bf16 %v17403_v42 }
 0xca2   :  { %v2649_v45 = vsel %vm95_vm5, 0.0, %v17405_v43  ;;  %v2648_v22 = vsel %vm95_vm5, 0.0, %v17404_v44 }
 0xca3   :  { %v17408_v46 = vpop.permute.xlu1 %17407  ;;  %v2651_v47 = vpack.c.bf16 %v2648_v22, %v2648_v22  ;;  %v2652_v48 = vpack.c.bf16 %v2649_v45, %v2649_v45 }
 0xca4   :  { %v17410_v50 = vunpack.i.h.bf16 %v17408_v46  ;;  %v17409_v51 = vunpack.i.l.bf16 %v17408_v46 }
 0xca5   :  { %v2749_v52 = vsel %vm108_vm3, %v2651_v47, 0  ;;  %v2792_v53 = vsel %vm108_vm3, %v2652_v48, 0  ;;  %v14650_v48 = vld [vmem:[%s19870_s2 + $0x58] sm:$0xf] }
 0xca6   :  { %15649 = vmatpush3.bf16.msra.mxu0 %v2749_v52  ;;  %15655 = vmatpush3.bf16.msra.mxu1 %v2792_v53  ;;  %v2841_v56 = vsel %vm2840_vm14, %v17409_v51, 0.0  ;;  %v2842_v30 = vsel %vm2840_vm14, %v17410_v50, 0.0 }
 0xca7   :  { %15660 = vmatprep.subr.bf16.mxu0 %v17668_v19  ;;  %15666 = vmatprep.subr.bf16.mxu1 %v17668_v19  ;;  %v2844_v31 = vpack.c.bf16 %v2841_v56, %v2841_v56  ;;  %v2845_v60 = vpack.c.bf16 %v2842_v30, %v2842_v30  ;;  %v2994_v56 = vpack.c.bf16 %v14650_v48, %v14650_v48  ;;  %v14668_v48 = vld [vmem:[%s19869_s1 + $0x94] sm:$0xf] }
 0xca9   :  { %15651 = vmatmul.mubr.msk.bf16.vlgmr.msra.gmra.mrb[4].mxu0 %vm104_vm4, %v2650_v55  ;;  %15657 = vmatmul.mubr.msk.bf16.vlgmr.msra.gmra.mrb[4].mxu1 %vm104_vm4, %v2650_v55  ;;  %v2850_v61 = vsel %vm108_vm3, %v2844_v31, 0  ;;  %v2893_v62 = vsel %vm108_vm3, %v2845_v60, 0 }
 0xcaa   :  { %15661 = vmatpush3.bf16.msra.mxu0 %v2850_v61  ;;  %15667 = vmatpush3.bf16.msra.mxu1 %v2893_v62 }
 0xcab   :  { %15662 = vmatprep.mubr.msk.bf16.mxu0 %vm17669_vm2, %v17668_v19  ;;  %15668 = vmatprep.mubr.msk.bf16.mxu1 %vm17669_vm2, %v17668_v19 }
 0xcac   :  { %15672 = vmatprep.subr.bf16.mxu0 %v17668_v19  ;;  %15678 = vmatprep.subr.bf16.mxu1 %v17668_v19 }
 0xcb5   :  { %15663 = vmatmul.mubr.msk.bf16.vlgmr.msra.gmra.mrb[4].mxu0 %vm104_vm4, %v2843_v2  ;;  %15669 = vmatmul.mubr.msk.bf16.vlgmr.msra.gmra.mrb[4].mxu1 %vm104_vm4, %v2843_v2 }
 0xcb6   :  { %15674 = vmatprep.mubr.msk.bf16.mxu0 %vm17669_vm2, %v17668_v19  ;;  %15680 = vmatprep.mubr.msk.bf16.mxu1 %vm17669_vm2, %v17668_v19 }
 0xd88   :  { %v2886_v49 = vpop.f32.mrb[4].mxu0  ;;  %v2929_v3 = vpop.f32.mrb[4].mxu1 }
 0xd89   :  { %v15664_v4 = vpop.f32.mrb[5].mxu0  ;;  %v15670_v8 = vpop.f32.mrb[5].mxu1  ;;  %v2940_v10 = vsel %vm2595_vm13, %v2929_v3, 0.0  ;;  %v2937_v5 = vsel %vm2595_vm13, %v2886_v49, 0.0 }
 0xd8a   :  { %2941 = vadd.xlane.f32.xlu0 %v2940_v10  ;;  %v2932_v11 = vpop.f32.mrb[6].mxu1  ;;  %2938 = vadd.xlane.f32.xlu1 %v2937_v5  ;;  %v2889_v12 = vpop.f32.mrb[6].mxu0 }
 0xd8b   :  { %v15665_v13 = vpop.f32.mrb[7].mxu0  ;;  %v15671_v14 = vpop.f32.mrb[7].mxu1  ;;  %v2991_v11 = vpack.c.bf16 %v14649_v63, %v14649_v63 }
 0xda0   :  { %2974 = vperm.xlu0 %17400, %v14645_v15  }
 0xe17   :  { %v2942_v16 = vpop.xlane.xlu0 %2941  ;;  %v2939_v17 = vpop.xlane.xlu1 %2938 }
 0xe18   :  { %v2944_v18 = vsel %vm48_vm1, %v2942_v16, 0.0  ;;  %v2943_v20 = vsel %vm48_vm1, %v2939_v17, 0.0 }
 0xe19   :  { %v2945_v21 = vadd.f32 %v2944_v18, %v2943_v20  ;;  %v14651_v18 = vld [vmem:[%s19870_s2 + $0x5c] sm:$0xf]  ;;  %v3279_v20 = vpack.c.bf16 %v18141_v57, %v18141_v57 }
 0xe1b   :  { %v2946_v0 = vmul.f32 0.0625, %v2945_v21  ;;  %v3183_v21 = vpack.c.bf16 %v14651_v18, %v14651_v18 }
 0xe1d   :  { %v2947_v1 = vsub.f32 %v2886_v49, %v2946_v0  ;;  %v2948_v24 = vsub.f32 %v2929_v3, %v2946_v0  ;;  %v3278_v0 = vpack.c.bf16 %v18137_v54, %v18137_v54  ;;  %v14652_v54 = vld [vmem:[%s19871_s3 + $0xc] sm:$0xf] }
 0xe1e   :  { %v3277_v57 = vpack.c.bf16 %v14652_v54, %v14652_v54 }
 0xe1f   :  { %v2949_v25 = vmul.f32 %v2947_v1, %v2947_v1  ;;  %v2950_v27 = vmul.f32 %v2948_v24, %v2948_v24  ;;  %v2975_v45 = vpop.permute.xlu0 %2974 }
 0xe21   :  { %v2951_v26 = vsel %vm2595_vm13, %v2949_v25, 0.0  ;;  %v2954_v28 = vsel %vm2595_vm13, %v2950_v27, 0.0 }
 0xe22   :  { %2952 = vadd.xlane.f32.xlu1 %v2951_v26 }
 0xe26   :  { %2955 = vadd.xlane.f32.xlu1 %v2954_v28 }
 0xe37   :  { %2967 = vperm.xlu1 %17399, %v14644_v29  }
 0xeaf   :  { %v2953_v32 = vpop.xlane.xlu1 %2952 }
 0xeb0   :  { %v2957_v34 = vsel %vm48_vm1, %v2953_v32, 0.0 }
 0xeb3   :  { %v2956_v33 = vpop.xlane.xlu1 %2955 }
 0xeb4   :  { %v2958_v35 = vsel %vm48_vm1, %v2956_v33, 0.0 }
 0xeb5   :  { %v2959_v36 = vadd.f32 %v2958_v35, %v2957_v34 }
 0xeb7   :  { %v2960_v37 = vmul.f32 0.0625, %v2959_v36  ;;  %v2968_v42 = vpop.permute.xlu1 %2967 }
 0xeb9   :  { %v2961_v38 = vadd.f32 1e-05, %v2960_v37 }
 0xebb   :  { %17573 = vrsqrt.f32 %v2961_v38 }
 0xec5   :  { %v17574_v39 = vpop.eup %17573 }
 0xec6   :  { %v2963_v40 = vmul.f32 %v17574_v39, %v2947_v1  ;;  %v2964_v41 = vmul.f32 %v17574_v39, %v2948_v24  ;;  %v3284_v1 = vsel %vm108_vm3, %v3278_v0, 0  ;;  %v3327_v24 = vsel %vm108_vm3, %v3279_v20, 0 }
 0xec8   :  { %v2970_v43 = vmul.f32 %v2968_v42, %v2963_v40  ;;  %v2971_v44 = vmul.f32 %v2968_v42, %v2964_v41 }
 0xeca   :  { %v2977_v22 = vadd.f32 %v2975_v45, %v2970_v43  ;;  %v2978_v23 = vadd.f32 %v2975_v45, %v2971_v44 }
 0xecc   :  { %v2979_v46 = vmax.f32 %v2977_v22, 0.0  ;;  %v2980_v47 = vmax.f32 %v2978_v23, 0.0 }
 0xece   :  { %v17411_v50 = vpack.i.bf16 %v2980_v47, %v2979_v46  ;;  %v2995_v51 = vpack.c.bf16 %v2979_v46, %v2979_v46  ;;  %v2996_v52 = vpack.c.bf16 %v2980_v47, %v2980_v47  ;;  %v14667_v47 = vld [vmem:[%s19869_s1 + $0x90] sm:$0xf] }
 0xed0   :  { %17412 = vrot.lane.b32.xlu1 %v17411_v50, %s17670_s10  ;;  %v3001_v53 = vsel %vm108_vm3, %v2995_v51, 0  ;;  %v3044_v55 = vsel %vm108_vm3, %v2996_v52, 0 }
 0xed1   :  { %15673 = vmatpush3.bf16.msra.mxu0 %v3001_v53  ;;  %15679 = vmatpush3.bf16.msra.mxu1 %v3044_v55 }
 0xed2   :  { %15684 = vmatprep.subr.bf16.mxu0 %v17668_v19  ;;  %15690 = vmatprep.subr.bf16.mxu1 %v17668_v19 }
 0xed4   :  { %17417 = vrot.lane.b32.xlu1 %v17411_v50, %s17671_s11  ;;  %15675 = vmatmul.mubr.msk.bf16.vlgmr.msra.gmra.mrb[8].mxu0 %vm104_vm4, %v2994_v56 }
 0xed5   :  { %15681 = vmatmul.mubr.msk.bf16.vlgmr.msra.gmra.mrb[8].mxu1 %vm104_vm4, %v2994_v56  ;;  %15686 = vmatprep.mubr.msk.bf16.mxu0 %vm17669_vm2, %v17668_v19 }
 0xed6   :  { %15692 = vmatprep.mubr.msk.bf16.mxu1 %vm17669_vm2, %v17668_v19 }
 0xf42   :  { %v17413_v30 = vpop.permute.xlu1 %17412 }
 0xf43   :  { %v17415_v31 = vunpack.i.h.bf16 %v17413_v30  ;;  %v17414_v60 = vunpack.i.l.bf16 %v17413_v30 }
 0xf45   :  { %v2990_v61 = vsel %vm95_vm5, 0.0, %v17415_v31  ;;  %v2989_v62 = vsel %vm95_vm5, 0.0, %v17414_v60 }
 0xf46   :  { %v17418_v2 = vpop.permute.xlu1 %17417  ;;  %v2992_v49 = vpack.c.bf16 %v2989_v62, %v2989_v62  ;;  %v2993_v3 = vpack.c.bf16 %v2990_v61, %v2990_v61 }
 0xf47   :  { %v17420_v4 = vunpack.i.h.bf16 %v17418_v2  ;;  %v17419_v8 = vunpack.i.l.bf16 %v17418_v2 }
 0xf48   :  { %v3090_v10 = vsel %vm108_vm3, %v2992_v49, 0  ;;  %v3133_v5 = vsel %vm108_vm3, %v2993_v3, 0 }
 0xf49   :  { %15685 = vmatpush3.bf16.msra.mxu0 %v3090_v10  ;;  %15691 = vmatpush3.bf16.msra.mxu1 %v3133_v5  ;;  %v3181_v12 = vsel %vm2840_vm14, %v17419_v8, 0.0  ;;  %v3182_v13 = vsel %vm2840_vm14, %v17420_v4, 0.0  ;;  %v14672_v5 = vld [vmem:[%s19870_s2 + $0xdc] sm:$0xf] }
 0xf4a   :  { %15696 = vmatprep.subr.bf16.mxu0 %v17668_v19  ;;  %15702 = vmatprep.subr.bf16.mxu1 %v17668_v19  ;;  %v3184_v14 = vpack.c.bf16 %v3181_v12, %v3181_v12  ;;  %v3185_v15 = vpack.c.bf16 %v3182_v13, %v3182_v13 }
 0xf4c   :  { %15687 = vmatmul.mubr.msk.bf16.vlgmr.msra.gmra.mrb[8].mxu0 %vm104_vm4, %v2991_v11  ;;  %15693 = vmatmul.mubr.msk.bf16.vlgmr.msra.gmra.mrb[8].mxu1 %vm104_vm4, %v2991_v11  ;;  %v3190_v16 = vsel %vm108_vm3, %v3184_v14, 0  ;;  %v3233_v17 = vsel %vm108_vm3, %v3185_v15, 0 }
 0xf4d   :  { %15697 = vmatpush3.bf16.msra.mxu0 %v3190_v16  ;;  %15703 = vmatpush3.bf16.msra.mxu1 %v3233_v17  ;;  %v3442_v16 = vpack.c.bf16 %v14672_v5, %v14672_v5 }
 0xf4e   :  { %15698 = vmatprep.mubr.msk.bf16.mxu0 %vm17669_vm2, %v17668_v19  ;;  %15704 = vmatprep.mubr.msk.bf16.mxu1 %vm17669_vm2, %v17668_v19 }
 0xf4f   :  { %15708 = vmatprep.subr.bf16.mxu0 %v17668_v19  ;;  %15714 = vmatprep.subr.bf16.mxu1 %v17668_v19 }
 0xf58   :  { %15699 = vmatmul.mubr.msk.bf16.vlgmr.msra.gmra.mrb[8].mxu0 %vm104_vm4, %v3183_v21  ;;  %15705 = vmatmul.mubr.msk.bf16.vlgmr.msra.gmra.mrb[8].mxu1 %vm104_vm4, %v3183_v21 }
 0xf59   :  { %15709 = vmatpush3.bf16.msra.mxu0 %v3284_v1  ;;  %15715 = vmatpush3.bf16.msra.mxu1 %v3327_v24  ;;  %v14671_v1 = vld [vmem:[%s19870_s2 + $0xd8] sm:$0xf] }
 0xf5a   :  { %15710 = vmatprep.mubr.msk.bf16.mxu0 %vm17669_vm2, %v17668_v19  ;;  %15716 = vmatprep.mubr.msk.bf16.mxu1 %vm17669_vm2, %v17668_v19 }
 0xf5b   :  { %15720 = vmatprep.subr.bf16.mxu0 %v17668_v19  ;;  %15726 = vmatprep.subr.bf16.mxu1 %v17668_v19 }
 0xf64   :  { %15711 = vmatmul.mubr.msk.bf16.vlgmr.msra.gmra.mrb[8].mxu0 %vm104_vm4, %v3277_v57  ;;  %15717 = vmatmul.mubr.msk.bf16.vlgmr.msra.gmra.mrb[8].mxu1 %vm104_vm4, %v3277_v57 }
 0xf65   :  { %15722 = vmatprep.mubr.msk.bf16.mxu0 %vm17669_vm2, %v17668_v19  ;;  %15728 = vmatprep.mubr.msk.bf16.mxu1 %vm17669_vm2, %v17668_v19 }
0x1037   :  { %v18280_v25 = vpop.f32.mrb[8].mxu0  ;;  %v18282_v26 = vpop.f32.mrb[8].mxu1 }
0x1038   :  { %v15712_v27 = vpop.f32.mrb[9].mxu0  ;;  %v15718_v28 = vpop.f32.mrb[9].mxu1  ;;  %v3388_v29 = vsel %vm2595_vm13, %v18282_v26, 0.0  ;;  %v3385_v32 = vsel %vm2595_vm13, %v18280_v25, 0.0 }
0x1039   :  { %3389 = vadd.xlane.f32.xlu0 %v3388_v29  ;;  %v3366_v33 = vpop.f32.mrb[10].mxu1  ;;  %3386 = vadd.xlane.f32.xlu1 %v3385_v32  ;;  %v3323_v34 = vpop.f32.mrb[10].mxu0 }
0x103a   :  { %v15713_v35 = vpop.f32.mrb[11].mxu0  ;;  %v15719_v36 = vpop.f32.mrb[11].mxu1  ;;  %v3439_v33 = vpack.c.bf16 %v14671_v1, %v14671_v1 }
0x10c6   :  { %v3390_v37 = vpop.xlane.xlu0 %3389  ;;  %v3387_v38 = vpop.xlane.xlu1 %3386 }
0x10c7   :  { %v3392_v39 = vsel %vm48_vm1, %v3390_v37, 0.0  ;;  %v3391_v40 = vsel %vm48_vm1, %v3387_v38, 0.0 }
0x10c8   :  { %v3393_v41 = vadd.f32 %v3392_v39, %v3391_v40  ;;  %v14673_v40 = vld [vmem:[%s19870_s2 + $0xe0] sm:$0xf] }
0x10ca   :  { %v3394_v42 = vmul.f32 0.0625, %v3393_v41  ;;  %v3631_v41 = vpack.c.bf16 %v14673_v40, %v14673_v40  ;;  %v14674_v40 = vld [vmem:[%s19870_s2 + $0xe4] sm:$0xf] }
0x10cc   :  { %v3396_v43 = vsub.f32 %v18282_v26, %v3394_v42  ;;  %v3395_v44 = vsub.f32 %v18280_v25, %v3394_v42 }
0x10ce   :  { %v3398_v45 = vmul.f32 %v3396_v43, %v3396_v43  ;;  %v3397_v22 = vmul.f32 %v3395_v44, %v3395_v44 }
0x10d0   :  { %v3402_v23 = vsel %vm2595_vm13, %v3398_v45, 0.0  ;;  %v3399_v46 = vsel %vm2595_vm13, %v3397_v22, 0.0 }
0x10d1   :  { %3403 = vadd.xlane.f32.xlu0 %v3402_v23  ;;  %3400 = vadd.xlane.f32.xlu1 %v3399_v46 }
0x10e2   :  { %3415 = vperm.xlu1 %17399, %v14667_v47  }
0x10e7   :  { %3422 = vperm.xlu0 %17400, %v14668_v48  }
0x115e   :  { %v3404_v50 = vpop.xlane.xlu0 %3403  ;;  %v3401_v51 = vpop.xlane.xlu1 %3400 }
0x115f   :  { %v3406_v52 = vsel %vm48_vm1, %v3404_v50, 0.0  ;;  %v3405_v53 = vsel %vm48_vm1, %v3401_v51, 0.0  ;;  %v14669_v51 = vld [vmem:[%s19869_s1 + $0x98] sm:$0xf] }
0x1160   :  { %v3407_v55 = vadd.f32 %v3406_v52, %v3405_v53 }
0x1162   :  { %v3408_v56 = vmul.f32 0.0625, %v3407_v55  ;;  %v3416_v62 = vpop.permute.xlu1 %3415 }
0x1164   :  { %v3409_v30 = vadd.f32 1e-05, %v3408_v56 }
0x1166   :  { %17575 = vrsqrt.f32 %v3409_v30  ;;  %v3423_v49 = vpop.permute.xlu0 %3422 }
0x1170   :  { %v17576_v31 = vpop.eup %17575 }
0x1171   :  { %v3411_v60 = vmul.f32 %v17576_v31, %v3395_v44  ;;  %v3412_v61 = vmul.f32 %v17576_v31, %v3396_v43 }
0x1173   :  { %v3418_v63 = vmul.f32 %v3416_v62, %v3411_v60  ;;  %v3419_v2 = vmul.f32 %v3416_v62, %v3412_v61 }
0x1175   :  { %v3425_v3 = vadd.f32 %v3423_v49, %v3418_v63  ;;  %v3426_v4 = vadd.f32 %v3423_v49, %v3419_v2 }
0x1177   :  { %v3427_v8 = vmax.f32 %v3425_v3, 0.0  ;;  %v3428_v10 = vmax.f32 %v3426_v4, 0.0  ;;  %v14670_v3 = vld [vmem:[%s19869_s1 + $0x9c] sm:$0xf] }
0x1179   :  { %v17421_v11 = vpack.i.bf16 %v3428_v10, %v3427_v8  ;;  %v3443_v12 = vpack.c.bf16 %v3427_v8, %v3427_v8  ;;  %v3444_v13 = vpack.c.bf16 %v3428_v10, %v3428_v10 }
0x117b   :  { %17422 = vrot.lane.b32.xlu1 %v17421_v11, %s17670_s10  ;;  %v3449_v14 = vsel %vm108_vm3, %v3443_v12, 0  ;;  %v3492_v15 = vsel %vm108_vm3, %v3444_v13, 0 }
0x117c   :  { %15721 = vmatpush3.bf16.msra.mxu0 %v3449_v14  ;;  %15727 = vmatpush3.bf16.msra.mxu1 %v3492_v15 }
0x117d   :  { %15732 = vmatprep.subr.bf16.mxu0 %v17668_v19  ;;  %15738 = vmatprep.subr.bf16.mxu1 %v17668_v19 }
0x117f   :  { %17427 = vrot.lane.b32.xlu1 %v17421_v11, %s17671_s11  ;;  %15723 = vmatmul.mubr.msk.bf16.vlgmr.msra.gmra.mrb[12].mxu0 %vm104_vm4, %v3442_v16 }
0x1180   :  { %15729 = vmatmul.mubr.msk.bf16.vlgmr.msra.gmra.mrb[12].mxu1 %vm104_vm4, %v3442_v16  ;;  %15734 = vmatprep.mubr.msk.bf16.mxu0 %vm17669_vm2, %v17668_v19 }
0x1181   :  { %15740 = vmatprep.mubr.msk.bf16.mxu1 %vm17669_vm2, %v17668_v19 }
0x11ed   :  { %v17423_v17 = vpop.permute.xlu1 %17422 }
0x11ee   :  { %v17425_v18 = vunpack.i.h.bf16 %v17423_v17  ;;  %v17424_v20 = vunpack.i.l.bf16 %v17423_v17 }
0x11f0   :  { %v3438_v21 = vsel %vm95_vm5, 0.0, %v17425_v18  ;;  %v3437_v0 = vsel %vm95_vm5, 0.0, %v17424_v20 }
0x11f1   :  { %v17428_v24 = vpop.permute.xlu1 %17427  ;;  %v3440_v54 = vpack.c.bf16 %v3437_v0, %v3437_v0  ;;  %v3441_v57 = vpack.c.bf16 %v3438_v21, %v3438_v21 }
0x11f2   :  { %v17430_v27 = vunpack.i.h.bf16 %v17428_v24  ;;  %v17429_v28 = vunpack.i.l.bf16 %v17428_v24 }
0x11f3   :  { %v3538_v29 = vsel %vm108_vm3, %v3440_v54, 0  ;;  %v3581_v32 = vsel %vm108_vm3, %v3441_v57, 0  ;;  %v14675_v57 = vld [vmem:[%s19870_s2 + $0xe8] sm:$0xf] }
0x11f4   :  { %15733 = vmatpush3.bf16.msra.mxu0 %v3538_v29  ;;  %15739 = vmatpush3.bf16.msra.mxu1 %v3581_v32  ;;  %v3629_v34 = vsel %vm2840_vm14, %v17429_v28, 0.0  ;;  %v3630_v35 = vsel %vm2840_vm14, %v17430_v27, 0.0 }
0x11f5   :  { %15744 = vmatprep.subr.bf16.mxu0 %v17668_v19  ;;  %15750 = vmatprep.subr.bf16.mxu1 %v17668_v19  ;;  %v3632_v36 = vpack.c.bf16 %v3629_v34, %v3629_v34  ;;  %v3633_v37 = vpack.c.bf16 %v3630_v35, %v3630_v35  ;;  %v3782_v34 = vpack.c.bf16 %v14675_v57, %v14675_v57 }
0x11f7   :  { %15735 = vmatmul.mubr.msk.bf16.vlgmr.msra.gmra.mrb[12].mxu0 %vm104_vm4, %v3439_v33  ;;  %15741 = vmatmul.mubr.msk.bf16.vlgmr.msra.gmra.mrb[12].mxu1 %vm104_vm4, %v3439_v33  ;;  %v3638_v38 = vsel %vm108_vm3, %v3632_v36, 0  ;;  %v3681_v39 = vsel %vm108_vm3, %v3633_v37, 0 }
0x11f8   :  { %15745 = vmatpush3.bf16.msra.mxu0 %v3638_v38  ;;  %15751 = vmatpush3.bf16.msra.mxu1 %v3681_v39 }
0x11f9   :  { %15746 = vmatprep.mubr.msk.bf16.mxu0 %vm17669_vm2, %v17668_v19  ;;  %15752 = vmatprep.mubr.msk.bf16.mxu1 %vm17669_vm2, %v17668_v19 }
0x11fa   :  { %15756 = vmatprep.subr.bf16.mxu0 %v17668_v19  ;;  %15762 = vmatprep.subr.bf16.mxu1 %v17668_v19 }
0x1203   :  { %15747 = vmatmul.mubr.msk.bf16.vlgmr.msra.gmra.mrb[12].mxu0 %vm104_vm4, %v3631_v41  ;;  %15753 = vmatmul.mubr.msk.bf16.vlgmr.msra.gmra.mrb[12].mxu1 %vm104_vm4, %v3631_v41 }
0x1204   :  { %15758 = vmatprep.mubr.msk.bf16.mxu0 %vm17669_vm2, %v17668_v19  ;;  %15764 = vmatprep.mubr.msk.bf16.mxu1 %vm17669_vm2, %v17668_v19 }
0x12d6   :  { %v3674_v42 = vpop.f32.mrb[12].mxu0  ;;  %v3717_v43 = vpop.f32.mrb[12].mxu1 }
0x12d7   :  { %v15748_v44 = vpop.f32.mrb[13].mxu0  ;;  %v15754_v45 = vpop.f32.mrb[13].mxu1  ;;  %v3728_v22 = vsel %vm2595_vm13, %v3717_v43, 0.0  ;;  %v3725_v23 = vsel %vm2595_vm13, %v3674_v42, 0.0 }
0x12d8   :  { %3729 = vadd.xlane.f32.xlu1 %v3728_v22  ;;  %v3720_v46 = vpop.f32.mrb[14].mxu1  ;;  %3726 = vadd.xlane.f32.xlu0 %v3725_v23  ;;  %v3677_v47 = vpop.f32.mrb[14].mxu0 }
0x12d9   :  { %v15749_v48 = vpop.f32.mrb[15].mxu0  ;;  %v15755_v50 = vpop.f32.mrb[15].mxu1  ;;  %v3779_v47 = vpack.c.bf16 %v14674_v40, %v14674_v40 }
0x12e9   :  { %3755 = vperm.xlu1 %17399, %v14669_v51  }
0x1365   :  { %v3730_v52 = vpop.xlane.xlu1 %3729  ;;  %v3727_v53 = vpop.xlane.xlu0 %3726 }
0x1366   :  { %v3732_v55 = vsel %vm48_vm1, %v3730_v52, 0.0  ;;  %v3731_v56 = vsel %vm48_vm1, %v3727_v53, 0.0 }
0x1367   :  { %v3733_v30 = vadd.f32 %v3732_v55, %v3731_v56 }
0x1369   :  { %v3734_v31 = vmul.f32 0.0625, %v3733_v30  ;;  %v3756_v17 = vpop.permute.xlu1 %3755 }
0x136b   :  { %v3735_v60 = vsub.f32 %v3674_v42, %v3734_v31  ;;  %v3736_v61 = vsub.f32 %v3717_v43, %v3734_v31 }
0x136d   :  { %v3737_v62 = vmul.f32 %v3735_v60, %v3735_v60  ;;  %v3738_v2 = vmul.f32 %v3736_v61, %v3736_v61 }
0x136f   :  { %v3739_v63 = vsel %vm2595_vm13, %v3737_v62, 0.0  ;;  %v3742_v49 = vsel %vm2595_vm13, %v3738_v2, 0.0 }
0x1370   :  { %3740 = vadd.xlane.f32.xlu0 %v3739_v63 }
0x1374   :  { %3743 = vadd.xlane.f32.xlu0 %v3742_v49 }
0x138a   :  { %3762 = vperm.xlu0 %17400, %v14670_v3   ;;  %v14676_v3 = vld [vmem:[%s19870_s2 + $0xec] sm:$0xf] }
0x138e   :  { %4161 = vrot.lane.b32.xlu0 %v18280_v25, %s17670_s10 }
0x1392   :  { %4171 = vrot.lane.b32.xlu0 %v18280_v25, %s17671_s11 }
0x13fd   :  { %v3741_v4 = vpop.xlane.xlu0 %3740 }
0x13fe   :  { %v3745_v10 = vsel %vm48_vm1, %v3741_v4, 0.0 }
0x1401   :  { %v3744_v8 = vpop.xlane.xlu0 %3743 }
0x1402   :  { %v3746_v5 = vsel %vm48_vm1, %v3744_v8, 0.0 }
0x1403   :  { %v3747_v11 = vadd.f32 %v3746_v5, %v3745_v10  ;;  %v4066_v10 = vpack.c.bf16 %v18280_v25, %v18280_v25  ;;  %v3971_v5 = vpack.c.bf16 %v14676_v3, %v14676_v3 }
0x1405   :  { %v3748_v12 = vmul.f32 0.0625, %v3747_v11  ;;  %v4067_v11 = vpack.c.bf16 %v18282_v26, %v18282_v26 }
0x1407   :  { %v3749_v13 = vadd.f32 1e-05, %v3748_v12  ;;  %v4182_v12 = vsel %vm4181_vm15, %v18062_v9, 7  ;;  %vm7602_vm15 = vcmask 11264  }
0x1408   :  { %vm18423_vm8 = vcmp.eq.s32.totalorder %v18047_v6, %v4182_v12 }
0x1409   :  { %17577 = vrsqrt.f32 %v3749_v13  ;;  %v3763_v21 = vpop.permute.xlu0 %3762 }
0x140d   :  { %v4162_v44 = vpop.permute.xlu0 %4161 }
0x140e   :  { %v4167_v31 = vsel %vm95_vm5, -3e+38, %v4162_v44 }
0x140f   :  { %v4169_v2 = vmax.f32 %v4167_v31, %v18280_v25  ;;  %v4072_v25 = vsel %vm108_vm3, %v4066_v10, 0 }
0x1411   :  { %v4172_v30 = vpop.permute.xlu0 %4171 }
0x1412   :  { %v4177_v62 = vsel %vm2840_vm14, %v4172_v30, -3e+38 }
0x1413   :  { %v17578_v14 = vpop.eup %17577  ;;  %v4179_v4 = vmax.f32 %v4169_v2, %v4177_v62 }
0x1414   :  { %v3751_v15 = vmul.f32 %v17578_v14, %v3735_v60  ;;  %v3752_v16 = vmul.f32 %v17578_v14, %v3736_v61 }
0x1415   :  { %v4188_v13 = vsel %vm4186_vm7, %v4179_v4, 0 }
0x1416   :  { %v3758_v18 = vmul.f32 %v3756_v17, %v3751_v15  ;;  %v3759_v20 = vmul.f32 %v3756_v17, %v3752_v16  ;;  %v4115_v16 = vsel %vm108_vm3, %v4067_v11, 0 }
0x1418   :  { %v3765_v0 = vadd.f32 %v3763_v21, %v3758_v18  ;;  %v3766_v1 = vadd.f32 %v3763_v21, %v3759_v20  ;;  %v14692_v18 = vsel %vm18423_vm8, 1.0, %v17668_v19  ;;  %v14677_v20 = vld [vmem:[%s19871_s3 + $0x24] sm:$0xf] }
0x1419   :  { %v4268_v21 = vsub.f32 %v14692_v18, %v14692_v18 }
0x141a   :  { %v3767_v24 = vmax.f32 %v3765_v0, 0.0  ;;  %v3768_v54 = vmax.f32 %v3766_v1, 0.0 }
0x141c   :  { %v17431_v27 = vpack.i.bf16 %v3768_v54, %v3767_v24  ;;  %v3783_v28 = vpack.c.bf16 %v3767_v24, %v3767_v24  ;;  %v3784_v29 = vpack.c.bf16 %v3768_v54, %v3768_v54  ;;  %v4065_v24 = vpack.c.bf16 %v14677_v20, %v14677_v20 }
0x141d   :  { %v4269_v54 = vand.u32 4294901760, %v4268_v21 }
0x141e   :  { %17432 = vrot.lane.b32.xlu1 %v17431_v27, %s17670_s10  ;;  %v3789_v32 = vsel %vm108_vm3, %v3783_v28, 0  ;;  %v3832_v33 = vsel %vm108_vm3, %v3784_v29, 0  ;;  %v17679_v28 = vmov 1.0  }
0x141f   :  { %15757 = vmatpush3.bf16.msra.mxu0 %v3789_v32  ;;  %15763 = vmatpush3.bf16.msra.mxu1 %v3832_v33  ;;  %v4270_v29 = vsub.f32 %v4268_v21, %v4269_v54 }
0x1420   :  { %15768 = vmatprep.subr.bf16.mxu0 %v17668_v19  ;;  %15774 = vmatprep.subr.bf16.mxu1 %v17668_v19 }
0x1422   :  { %17437 = vrot.lane.b32.xlu1 %v17431_v27, %s17671_s11  ;;  %15759 = vmatmul.mubr.msk.bf16.vlgmr.msra.gmra.mrb[16].mxu0 %vm104_vm4, %v3782_v34 }
0x1423   :  { %15765 = vmatmul.mubr.msk.bf16.vlgmr.msra.gmra.mrb[16].mxu1 %vm104_vm4, %v3782_v34  ;;  %15770 = vmatprep.mubr.msk.bf16.mxu0 %vm17669_vm2, %v17668_v19  ;;  %v4271_v34 = vand.u32 4294901760, %v4270_v29 }
0x1424   :  { %15776 = vmatprep.mubr.msk.bf16.mxu1 %vm17669_vm2, %v17668_v19 }
0x1426   :  { %4163 = vrot.lane.b32.xlu1 %v18282_v26, %s17670_s10 }
0x142a   :  { %4173 = vrot.lane.b32.xlu1 %v18282_v26, %s17671_s11 }
0x1490   :  { %v17433_v35 = vpop.permute.xlu1 %17432 }
0x1491   :  { %v17435_v36 = vunpack.i.h.bf16 %v17433_v35  ;;  %v17434_v37 = vunpack.i.l.bf16 %v17433_v35 }
0x1493   :  { %v3778_v38 = vsel %vm95_vm5, 0.0, %v17435_v36  ;;  %v3777_v39 = vsel %vm95_vm5, 0.0, %v17434_v37 }
0x1494   :  { %v17438_v41 = vpop.permute.xlu1 %17437  ;;  %v3780_v42 = vpack.c.bf16 %v3777_v39, %v3777_v39  ;;  %v3781_v43 = vpack.c.bf16 %v3778_v38, %v3778_v38 }
0x1495   :  { %v17440_v45 = vunpack.i.h.bf16 %v17438_v41  ;;  %v17439_v22 = vunpack.i.l.bf16 %v17438_v41 }
0x1496   :  { %v3878_v23 = vsel %vm108_vm3, %v3780_v42, 0  ;;  %v3921_v46 = vsel %vm108_vm3, %v3781_v43, 0 }
0x1497   :  { %15769 = vmatpush3.bf16.msra.mxu0 %v3878_v23  ;;  %15775 = vmatpush3.bf16.msra.mxu1 %v3921_v46  ;;  %v3969_v48 = vsel %vm2840_vm14, %v17439_v22, 0.0  ;;  %v3970_v50 = vsel %vm2840_vm14, %v17440_v45, 0.0 }
0x1498   :  { %v4164_v51 = vpop.permute.xlu1 %4163  ;;  %15780 = vmatprep.subr.bf16.mxu0 %v17668_v19  ;;  %15786 = vmatprep.subr.bf16.mxu1 %v17668_v19  ;;  %v3972_v52 = vpack.c.bf16 %v3969_v48, %v3969_v48  ;;  %v3973_v53 = vpack.c.bf16 %v3970_v50, %v3970_v50  ;;  %v14699_v50 = vld [vmem:[%s19869_s1 + $0x40] sm:$0xf] }
0x1499   :  { %v4168_v60 = vsel %vm95_vm5, -3e+38, %v4164_v51 }
0x149a   :  { %15771 = vmatmul.mubr.msk.bf16.vlgmr.msra.gmra.mrb[16].mxu0 %vm104_vm4, %v3779_v47  ;;  %15777 = vmatmul.mubr.msk.bf16.vlgmr.msra.gmra.mrb[16].mxu1 %vm104_vm4, %v3779_v47  ;;  %v3978_v55 = vsel %vm108_vm3, %v3972_v52, 0  ;;  %v4021_v56 = vsel %vm108_vm3, %v3973_v53, 0  ;;  %v4170_v49 = vmax.f32 %v4168_v60, %v18282_v26  ;;  %v18431_v26 = vand.u32 4294901760, %v4188_v13 }
0x149b   :  { %15781 = vmatpush3.bf16.msra.mxu0 %v3978_v55  ;;  %15787 = vmatpush3.bf16.msra.mxu1 %v4021_v56 }
0x149c   :  { %v4174_v61 = vpop.permute.xlu1 %4173  ;;  %15782 = vmatprep.mubr.msk.bf16.mxu0 %vm17669_vm2, %v17668_v19  ;;  %15788 = vmatprep.mubr.msk.bf16.mxu1 %vm17669_vm2, %v17668_v19  ;;  %v4257_v0 = vsub.f32 %v4188_v13, %v18431_v26 }
0x149d   :  { %15792 = vmatprep.subr.bf16.mxu0 %v17668_v19  ;;  %15798 = vmatprep.subr.bf16.mxu1 %v17668_v19  ;;  %v4178_v63 = vsel %vm2840_vm14, %v4174_v61, -3e+38 }
0x149e   :  { %v4180_v8 = vmax.f32 %v4170_v49, %v4178_v63  ;;  %v4258_v57 = vand.u32 4294901760, %v4257_v0  ;;  %v14700_v49 = vld [vmem:[%s19869_s1 + $0x44] sm:$0xf] }
0x14a0   :  { %v4637_v14 = vsel %vm4186_vm7, %v4180_v8, 0  ;;  %v4259_v32 = vsub.f32 %v4257_v0, %v4258_v57 }
0x14a1   :  { %v18433_v17 = vand.u32 4294901760, %v4637_v14 }
0x14a2   :  { %v4260_v35 = vand.u32 4294901760, %v4259_v32 }
0x14a3   :  { %v4706_v1 = vsub.f32 %v4637_v14, %v18433_v17 }
0x14a5   :  { %v4707_v27 = vand.u32 4294901760, %v4706_v1 }
0x14a6   :  { %15783 = vmatmul.mubr.msk.bf16.vlgmr.msra.gmra.mrb[16].mxu0 %vm104_vm4, %v3971_v5  ;;  %15789 = vmatmul.mubr.msk.bf16.vlgmr.msra.gmra.mrb[16].mxu1 %vm104_vm4, %v3971_v5 }
0x14a7   :  { %15793 = vmatpush3.bf16.msra.mxu0 %v4072_v25  ;;  %15799 = vmatpush3.bf16.msra.mxu1 %v4115_v16  ;;  %v4708_v33 = vsub.f32 %v4706_v1, %v4707_v27 }
0x14a8   :  { %15794 = vmatprep.mubr.msk.bf16.mxu0 %vm17669_vm2, %v17668_v19  ;;  %15800 = vmatprep.mubr.msk.bf16.mxu1 %vm17669_vm2, %v17668_v19 }
0x14a9   :  { %15804 = vmatprep.subr.mxu0 %v17668_v19  ;;  %15834 = vmatprep.subr.mxu1 %v17668_v19  ;;  %v4709_v36 = vand.u32 4294901760, %v4708_v33 }
0x14b2   :  { %15795 = vmatmul.mubr.msk.bf16.vlgmr.msra.gmra.mrb[16].mxu0 %vm104_vm4, %v4065_v24  ;;  %15801 = vmatmul.mubr.msk.bf16.vlgmr.msra.gmra.mrb[16].mxu1 %vm104_vm4, %v4065_v24 }
0x14b3   :  { %15805 = vmatpush3.msk.msra.mxu0 %vm18423_vm8, %v17679_v28  ;;  %15806 = vmatprep.mubr.msk.f32.mxu0 %vm17669_vm2, %v17668_v19 }
0x14b4   :  { %15835 = vmatpush3.msk.msra.mxu1 %vm18423_vm8, %v17679_v28  ;;  %15836 = vmatprep.mubr.msk.f32.mxu1 %vm17669_vm2, %v17668_v19 }
0x14b5   :  { %15809 = vmatprep.subr.mxu0 %v17668_v19  ;;  %15839 = vmatprep.subr.mxu1 %v17668_v19 }
0x14ba   :  { %15807 = vmatmul.mubr.f32.vlgmr.msra.gmra.mrb[2].mxu0 %v4260_v35  ;;  %15837 = vmatmul.mubr.f32.vlgmr.msra.gmra.mrb[20].mxu1 %v4709_v36 }
0x14bb   :  { %15810 = vmatpush3.msra.mxu0 %v4271_v34  ;;  %15811 = vmatprep.mubr.msk.f32.mxu0 %vm17669_vm2, %v17668_v19 }
0x14bc   :  { %15840 = vmatpush3.msra.mxu1 %v4271_v34  ;;  %15841 = vmatprep.mubr.msk.f32.mxu1 %vm17669_vm2, %v17668_v19 }
0x14bd   :  { %15814 = vmatprep.subr.mxu0 %v17668_v19  ;;  %15844 = vmatprep.subr.mxu1 %v17668_v19 }
0x14c2   :  { %15812 = vmatmul.mubr.f32.vlgmr.msra.gmra.mrb[2].mxu0 %v18431_v26  ;;  %15842 = vmatmul.mubr.f32.vlgmr.msra.gmra.mrb[20].mxu1 %v18433_v17 }
0x14c3   :  { %15815 = vmatpush3.msra.mxu0 %v4268_v21  ;;  %15816 = vmatprep.mubr.msk.f32.mxu0 %vm17669_vm2, %v17668_v19 }
0x14c4   :  { %15845 = vmatpush3.msra.mxu1 %v4268_v21  ;;  %15846 = vmatprep.mubr.msk.f32.mxu1 %vm17669_vm2, %v17668_v19 }
0x14c5   :  { %15819 = vmatprep.subr.mxu0 %v17668_v19  ;;  %15849 = vmatprep.subr.mxu1 %v17668_v19 }
0x14ca   :  { %15817 = vmatmul.mubr.f32.vlgmr.msra.gmra.mrb[2].mxu0 %v4257_v0  ;;  %15847 = vmatmul.mubr.f32.vlgmr.msra.gmra.mrb[20].mxu1 %v4706_v1  ;;  %v14704_v1 = vld [vmem:[%s19870_s2 + $0x64] sm:$0xf] }
0x14cb   :  { %15820 = vmatpush3.msk.msra.mxu0 %vm18423_vm8, %v17679_v28  ;;  %15821 = vmatprep.mubr.msk.f32.mxu0 %vm17669_vm2, %v17668_v19  ;;  %v5157_v32 = vpack.c.bf16 %v14704_v1, %v14704_v1 }
0x14cc   :  { %15850 = vmatpush3.msk.msra.mxu1 %vm18423_vm8, %v17679_v28  ;;  %15851 = vmatprep.mubr.msk.f32.mxu1 %vm17669_vm2, %v17668_v19 }
0x14cd   :  { %15824 = vmatprep.subr.mxu0 %v17668_v19  ;;  %15854 = vmatprep.subr.mxu1 %v17668_v19 }
0x14d2   :  { %15822 = vmatmul.mubr.f32.vlgmr.msra.gmra.mrb[2].mxu0 %v4258_v57  ;;  %15852 = vmatmul.mubr.f32.vlgmr.msra.gmra.mrb[20].mxu1 %v4707_v27 }
0x14d3   :  { %15825 = vmatpush3.msra.mxu0 %v4269_v54  ;;  %15826 = vmatprep.mubr.msk.f32.mxu0 %vm17669_vm2, %v17668_v19 }
0x14d4   :  { %15855 = vmatpush3.msra.mxu1 %v4269_v54  ;;  %15856 = vmatprep.mubr.msk.f32.mxu1 %vm17669_vm2, %v17668_v19 }
0x14d5   :  { %15829 = vmatprep.subr.mxu0 %v17668_v19  ;;  %15859 = vmatprep.subr.mxu1 %v17668_v19 }
0x14da   :  { %15827 = vmatmul.mubr.f32.vlgmr.msra.gmra.mrb[2].mxu0 %v18431_v26  ;;  %15857 = vmatmul.mubr.f32.vlgmr.msra.gmra.mrb[20].mxu1 %v18433_v17 }
0x14db   :  { %15830 = vmatpush3.msk.msra.mxu0 %vm18423_vm8, %v17679_v28  ;;  %15831 = vmatprep.mubr.msk.f32.mxu0 %vm17669_vm2, %v17668_v19 }
0x14dc   :  { %15860 = vmatpush3.msk.msra.mxu1 %vm18423_vm8, %v17679_v28  ;;  %15861 = vmatprep.mubr.msk.f32.mxu1 %vm17669_vm2, %v17668_v19 }
0x14dd   :  { %15864 = vmatprep.subr.bf16.mxu0 %v17668_v19  ;;  %15870 = vmatprep.subr.bf16.mxu1 %v17668_v19 }
0x14e2   :  { %15832 = vmatmul.mubr.f32.vlgmr.msra.gmra.mrb[2].mxu0 %v18431_v26  ;;  %15862 = vmatmul.mubr.f32.vlgmr.msra.gmra.mrb[20].mxu1 %v18433_v17 }
0x14e3   :  { %15866 = vmatprep.mubr.msk.bf16.mxu0 %vm17669_vm2, %v17668_v19  ;;  %15872 = vmatprep.mubr.msk.bf16.mxu1 %vm17669_vm2, %v17668_v19 }
0x1585   :  { %v18515_v37 = vpop.f32.mrb[16].mxu0  ;;  %v18517_v38 = vpop.f32.mrb[16].mxu1 }
0x1586   :  { %v15796_v39 = vpop.f32.mrb[17].mxu0  ;;  %v15802_v40 = vpop.f32.mrb[17].mxu1 }
0x1587   :  { %v4111_v41 = vpop.f32.mrb[18].mxu0  ;;  %v4154_v42 = vpop.f32.mrb[18].mxu1  ;;  %v14703_v40 = vld [vmem:[%s19870_s2 + $0x60] sm:$0xf] }
0x1588   :  { %v15797_v43 = vpop.f32.mrb[19].mxu0  ;;  %v15803_v44 = vpop.f32.mrb[19].mxu1 }
0x15b5   :  { %v18519_v45 = vpop.f32.mrb[2].mxu0  ;;  %v18521_v22 = vpop.f32.mrb[20].mxu1 }
0x15b6   :  { %v15833_v23 = vpop.f32.mrb[3].mxu0  ;;  %v15863_v46 = vpop.f32.mrb[21].mxu1  ;;  %v5103_v47 = vsel %vm5099_vm9, %v18521_v22, 0.0  ;;  %v5100_v48 = vsel %vm5099_vm9, %v18519_v45, 0.0 }
0x15b7   :  { %5104 = vadd.xlane.f32.xlu1 %v5103_v47  ;;  %5101 = vadd.xlane.f32.xlu0 %v5100_v48  ;;  %v5154_v48 = vpack.c.bf16 %v14703_v40, %v14703_v40 }
0x15c8   :  { %5130 = vperm.xlu1 %17399, %v14699_v50  }
0x1644   :  { %v5105_v51 = vpop.xlane.xlu1 %5104  ;;  %v5102_v52 = vpop.xlane.xlu0 %5101 }
0x1645   :  { %v5107_v53 = vsel %vm48_vm1, %v5105_v51, 0.0  ;;  %v5106_v55 = vsel %vm48_vm1, %v5102_v52, 0.0 }
0x1646   :  { %v5108_v56 = vadd.f32 %v5107_v53, %v5106_v55 }
0x1648   :  { %v5109_v30 = vmul.f32 0.125, %v5108_v56  ;;  %v5131_v25 = vpop.permute.xlu1 %5130 }
0x164a   :  { %v5110_v31 = vsub.f32 %v18519_v45, %v5109_v30  ;;  %v5111_v60 = vsub.f32 %v18521_v22, %v5109_v30  ;;  %v14705_v30 = vld [vmem:[%s19870_s2 + $0x68] sm:$0xf] }
0x164c   :  { %v5112_v61 = vmul.f32 %v5110_v31, %v5110_v31  ;;  %v5113_v63 = vmul.f32 %v5111_v60, %v5111_v60 }
0x164e   :  { %v5114_v62 = vsel %vm5099_vm9, %v5112_v61, 0.0  ;;  %v5117_v2 = vsel %vm5099_vm9, %v5113_v63, 0.0 }
0x164f   :  { %5115 = vadd.xlane.f32.xlu0 %v5114_v62 }
0x1653   :  { %5118 = vadd.xlane.f32.xlu0 %v5117_v2 }
0x1669   :  { %5137 = vperm.xlu0 %17400, %v14700_v49  }
0x16dc   :  { %v5116_v3 = vpop.xlane.xlu0 %5115 }
0x16dd   :  { %v5120_v8 = vsel %vm48_vm1, %v5116_v3, 0.0 }
0x16e0   :  { %v5119_v4 = vpop.xlane.xlu0 %5118 }
0x16e1   :  { %v5121_v10 = vsel %vm48_vm1, %v5119_v4, 0.0 }
0x16e2   :  { %v5122_v5 = vadd.f32 %v5121_v10, %v5120_v8 }
0x16e4   :  { %v5123_v11 = vmul.f32 0.125, %v5122_v5  ;;  %v14701_v5 = vld [vmem:[%s19869_s1 + $0x48] sm:$0xf] }
0x16e6   :  { %v5124_v12 = vadd.f32 1e-05, %v5123_v11 }
0x16e8   :  { %17579 = vrsqrt.f32 %v5124_v12  ;;  %v5138_v17 = vpop.permute.xlu0 %5137 }
0x16f2   :  { %v17580_v13 = vpop.eup %17579 }
0x16f3   :  { %v5126_v14 = vmul.f32 %v17580_v13, %v5110_v31  ;;  %v5127_v15 = vmul.f32 %v17580_v13, %v5111_v60  ;;  %v5347_v31 = vpack.c.bf16 %v14705_v30, %v14705_v30 }
0x16f5   :  { %v5133_v16 = vmul.f32 %v5131_v25, %v5126_v14  ;;  %v5134_v26 = vmul.f32 %v5131_v25, %v5127_v15 }
0x16f7   :  { %v5140_v18 = vadd.f32 %v5138_v17, %v5133_v16  ;;  %v5141_v20 = vadd.f32 %v5138_v17, %v5134_v26 }
0x16f9   :  { %v5142_v21 = vmax.f32 %v5140_v18, 0.0  ;;  %v5143_v0 = vmax.f32 %v5141_v20, 0.0 }
0x16fb   :  { %v17441_v24 = vpack.i.bf16 %v5143_v0, %v5142_v21  ;;  %v5158_v54 = vpack.c.bf16 %v5142_v21, %v5142_v21  ;;  %v5159_v57 = vpack.c.bf16 %v5143_v0, %v5143_v0  ;;  %v14702_v0 = vld [vmem:[%s19869_s1 + $0x4c] sm:$0xf] }
0x16fd   :  { %17442 = vrot.lane.b32.xlu1 %v17441_v24, %s17670_s10  ;;  %v5164_v27 = vsel %vm108_vm3, %v5158_v54, 0  ;;  %v5207_v29 = vsel %vm108_vm3, %v5159_v57, 0 }
0x16fe   :  { %15865 = vmatpush3.bf16.msra.mxu0 %v5164_v27  ;;  %15871 = vmatpush3.bf16.msra.mxu1 %v5207_v29 }
0x16ff   :  { %15876 = vmatprep.subr.bf16.mxu0 %v17668_v19  ;;  %15882 = vmatprep.subr.bf16.mxu1 %v17668_v19 }
0x1701   :  { %17447 = vrot.lane.b32.xlu1 %v17441_v24, %s17671_s11  ;;  %15867 = vmatmul.mubr.msk.bf16.vlgmr.msra.gmra.mrb[20].mxu0 %vm104_vm4, %v5157_v32 }
0x1702   :  { %15873 = vmatmul.mubr.msk.bf16.vlgmr.msra.gmra.mrb[24].mxu1 %vm104_vm4, %v5157_v32  ;;  %15878 = vmatprep.mubr.msk.bf16.mxu0 %vm17669_vm2, %v17668_v19 }
0x1703   :  { %15884 = vmatprep.mubr.msk.bf16.mxu1 %vm17669_vm2, %v17668_v19 }
0x176f   :  { %v17443_v33 = vpop.permute.xlu1 %17442 }
0x1770   :  { %v17445_v34 = vunpack.i.h.bf16 %v17443_v33  ;;  %v17444_v35 = vunpack.i.l.bf16 %v17443_v33 }
0x1772   :  { %v5153_v36 = vsel %vm95_vm5, 0.0, %v17445_v34  ;;  %v5152_v39 = vsel %vm95_vm5, 0.0, %v17444_v35 }
0x1773   :  { %v17448_v41 = vpop.permute.xlu1 %17447  ;;  %v5155_v42 = vpack.c.bf16 %v5152_v39, %v5152_v39  ;;  %v5156_v43 = vpack.c.bf16 %v5153_v36, %v5153_v36 }
0x1774   :  { %v17450_v44 = vunpack.i.h.bf16 %v17448_v41  ;;  %v17449_v23 = vunpack.i.l.bf16 %v17448_v41 }
0x1775   :  { %v5253_v46 = vsel %vm108_vm3, %v5155_v42, 0  ;;  %v5296_v47 = vsel %vm108_vm3, %v5156_v43, 0 }
0x1776   :  { %15877 = vmatpush3.bf16.msra.mxu0 %v5253_v46  ;;  %15883 = vmatpush3.bf16.msra.mxu1 %v5296_v47  ;;  %v5345_v50 = vsel %vm5344_vm10, %v17449_v23, 0.0  ;;  %v5346_v51 = vsel %vm5344_vm10, %v17450_v44, 0.0  ;;  %v14707_v46 = vld [vmem:[%s19870_s2 + $0x70] sm:$0xf] }
0x1777   :  { %15888 = vmatprep.subr.bf16.mxu0 %v17668_v19  ;;  %15894 = vmatprep.subr.bf16.mxu1 %v17668_v19  ;;  %v5348_v52 = vpack.c.bf16 %v5345_v50, %v5345_v50  ;;  %v5349_v53 = vpack.c.bf16 %v5346_v51, %v5346_v51 }
0x1779   :  { %15879 = vmatmul.mubr.msk.bf16.vlgmr.msra.gmra.mrb[20].mxu0 %vm104_vm4, %v5154_v48  ;;  %15885 = vmatmul.mubr.msk.bf16.vlgmr.msra.gmra.mrb[24].mxu1 %vm104_vm4, %v5154_v48  ;;  %v5354_v55 = vsel %vm108_vm3, %v5348_v52, 0  ;;  %v5397_v56 = vsel %vm108_vm3, %v5349_v53, 0  ;;  %v5498_v53 = vpack.c.bf16 %v14707_v46, %v14707_v46 }
0x177a   :  { %15889 = vmatpush3.bf16.msra.mxu0 %v5354_v55  ;;  %15895 = vmatpush3.bf16.msra.mxu1 %v5397_v56 }
0x177b   :  { %15890 = vmatprep.mubr.msk.bf16.mxu0 %vm17669_vm2, %v17668_v19  ;;  %15896 = vmatprep.mubr.msk.bf16.mxu1 %vm17669_vm2, %v17668_v19 }
0x177c   :  { %15900 = vmatprep.subr.bf16.mxu0 %v17668_v19  ;;  %15906 = vmatprep.subr.bf16.mxu1 %v17668_v19 }
0x1785   :  { %15891 = vmatmul.mubr.msk.bf16.vlgmr.msra.gmra.mrb[20].mxu0 %vm104_vm4, %v5347_v31  ;;  %15897 = vmatmul.mubr.msk.bf16.vlgmr.msra.gmra.mrb[24].mxu1 %vm104_vm4, %v5347_v31 }
0x1786   :  { %15902 = vmatprep.mubr.msk.bf16.mxu0 %vm17669_vm2, %v17668_v19  ;;  %15908 = vmatprep.mubr.msk.bf16.mxu1 %vm17669_vm2, %v17668_v19 }
0x1858   :  { %v5390_v60 = vpop.f32.mrb[20].mxu0  ;;  %v5433_v61 = vpop.f32.mrb[24].mxu1 }
0x1859   :  { %v15892_v62 = vpop.f32.mrb[21].mxu0  ;;  %v15898_v63 = vpop.f32.mrb[25].mxu1  ;;  %v5444_v2 = vsel %vm5099_vm9, %v5433_v61, 0.0  ;;  %v5441_v49 = vsel %vm5099_vm9, %v5390_v60, 0.0 }
0x185a   :  { %5445 = vadd.xlane.f32.xlu1 %v5444_v2  ;;  %v5436_v3 = vpop.f32.mrb[26].mxu1  ;;  %5442 = vadd.xlane.f32.xlu0 %v5441_v49  ;;  %v5393_v4 = vpop.f32.mrb[22].mxu0 }
0x185b   :  { %v15893_v8 = vpop.f32.mrb[23].mxu0  ;;  %v15899_v10 = vpop.f32.mrb[27].mxu1 }
0x186b   :  { %5471 = vperm.xlu1 %17399, %v14701_v5  }
0x18e7   :  { %v5446_v11 = vpop.xlane.xlu1 %5445  ;;  %v5443_v12 = vpop.xlane.xlu0 %5442 }
0x18e8   :  { %v5448_v13 = vsel %vm48_vm1, %v5446_v11, 0.0  ;;  %v5447_v14 = vsel %vm48_vm1, %v5443_v12, 0.0 }
0x18e9   :  { %v5449_v15 = vadd.f32 %v5448_v13, %v5447_v14 }
0x18eb   :  { %v5450_v25 = vmul.f32 0.125, %v5449_v15  ;;  %v5472_v36 = vpop.permute.xlu1 %5471 }
0x18ed   :  { %v5451_v16 = vsub.f32 %v5390_v60, %v5450_v25  ;;  %v5452_v26 = vsub.f32 %v5433_v61, %v5450_v25  ;;  %v14706_v61 = vld [vmem:[%s19870_s2 + $0x6c] sm:$0xf]  ;;  %v14708_v25 = vld [vmem:[%s19870_s2 + $0x74] sm:$0xf] }
0x18ee   :  { %v5495_v10 = vpack.c.bf16 %v14706_v61, %v14706_v61 }
0x18ef   :  { %v5453_v17 = vmul.f32 %v5451_v16, %v5451_v16  ;;  %v5454_v20 = vmul.f32 %v5452_v26, %v5452_v26 }
0x18f1   :  { %v5455_v18 = vsel %vm5099_vm9, %v5453_v17, 0.0  ;;  %v5458_v21 = vsel %vm5099_vm9, %v5454_v20, 0.0  ;;  %v5687_v17 = vpack.c.bf16 %v14708_v25, %v14708_v25 }
0x18f2   :  { %5456 = vadd.xlane.f32.xlu0 %v5455_v18 }
0x18f6   :  { %5459 = vadd.xlane.f32.xlu0 %v5458_v21 }
0x190c   :  { %5478 = vperm.xlu0 %17400, %v14702_v0  }
0x197f   :  { %v5457_v1 = vpop.xlane.xlu0 %5456 }
0x1980   :  { %v5461_v54 = vsel %vm48_vm1, %v5457_v1, 0.0 }
0x1983   :  { %v5460_v24 = vpop.xlane.xlu0 %5459 }
0x1984   :  { %v5462_v57 = vsel %vm48_vm1, %v5460_v24, 0.0 }
0x1985   :  { %v5463_v27 = vadd.f32 %v5462_v57, %v5461_v54 }
0x1987   :  { %v5464_v29 = vmul.f32 0.125, %v5463_v27 }
0x1989   :  { %v5465_v32 = vadd.f32 1e-05, %v5464_v29 }
0x198b   :  { %17581 = vrsqrt.f32 %v5465_v32  ;;  %v5479_v41 = vpop.permute.xlu0 %5478 }
0x1995   :  { %v17582_v33 = vpop.eup %17581 }
0x1996   :  { %v5467_v34 = vmul.f32 %v17582_v33, %v5451_v16  ;;  %v5468_v35 = vmul.f32 %v17582_v33, %v5452_v26  ;;  %v5782_v16 = vpack.c.bf16 %v18519_v45, %v18519_v45  ;;  %v5783_v26 = vpack.c.bf16 %v18521_v22, %v18521_v22  ;;  %v14709_v45 = vld [vmem:[%s19871_s3 + $0x10] sm:$0xf] }
0x1997   :  { %v5781_v22 = vpack.c.bf16 %v14709_v45, %v14709_v45 }
0x1998   :  { %v5474_v39 = vmul.f32 %v5472_v36, %v5467_v34  ;;  %v5475_v40 = vmul.f32 %v5472_v36, %v5468_v35  ;;  %v5788_v18 = vsel %vm108_vm3, %v5782_v16, 0  ;;  %v5831_v20 = vsel %vm108_vm3, %v5783_v26, 0  ;;  %v14724_v34 = vld [vmem:[%s19869_s1 + $0x50] sm:$0xf] }
0x199a   :  { %v5481_v42 = vadd.f32 %v5479_v41, %v5474_v39  ;;  %v5482_v43 = vadd.f32 %v5479_v41, %v5475_v40 }
0x199c   :  { %v5483_v44 = vmax.f32 %v5481_v42, 0.0  ;;  %v5484_v23 = vmax.f32 %v5482_v43, 0.0 }
0x199e   :  { %v17451_v47 = vpack.i.bf16 %v5484_v23, %v5483_v44  ;;  %v5499_v48 = vpack.c.bf16 %v5483_v44, %v5483_v44  ;;  %v5500_v50 = vpack.c.bf16 %v5484_v23, %v5484_v23 }
0x19a0   :  { %17452 = vrot.lane.b32.xlu1 %v17451_v47, %s17670_s10  ;;  %v5505_v51 = vsel %vm108_vm3, %v5499_v48, 0  ;;  %v5548_v52 = vsel %vm108_vm3, %v5500_v50, 0  ;;  %v14725_v50 = vld [vmem:[%s19869_s1 + $0x54] sm:$0xf] }
0x19a1   :  { %15901 = vmatpush3.bf16.msra.mxu0 %v5505_v51  ;;  %15907 = vmatpush3.bf16.msra.mxu1 %v5548_v52 }
0x19a2   :  { %15912 = vmatprep.subr.bf16.mxu0 %v17668_v19  ;;  %15918 = vmatprep.subr.bf16.mxu1 %v17668_v19 }
0x19a4   :  { %17457 = vrot.lane.b32.xlu1 %v17451_v47, %s17671_s11  ;;  %15903 = vmatmul.mubr.msk.bf16.vlgmr.msra.gmra.mrb[24].mxu0 %vm104_vm4, %v5498_v53 }
0x19a5   :  { %15909 = vmatmul.mubr.msk.bf16.vlgmr.msra.gmra.mrb[28].mxu1 %vm104_vm4, %v5498_v53  ;;  %15914 = vmatprep.mubr.msk.bf16.mxu0 %vm17669_vm2, %v17668_v19 }
0x19a6   :  { %15920 = vmatprep.mubr.msk.bf16.mxu1 %vm17669_vm2, %v17668_v19 }
0x1a12   :  { %v17453_v55 = vpop.permute.xlu1 %17452 }
0x1a13   :  { %v17455_v56 = vunpack.i.h.bf16 %v17453_v55  ;;  %v17454_v30 = vunpack.i.l.bf16 %v17453_v55 }
0x1a15   :  { %v5494_v31 = vsel %vm95_vm5, 0.0, %v17455_v56  ;;  %v5493_v60 = vsel %vm95_vm5, 0.0, %v17454_v30 }
0x1a16   :  { %v17458_v62 = vpop.permute.xlu1 %17457  ;;  %v5496_v63 = vpack.c.bf16 %v5493_v60, %v5493_v60  ;;  %v5497_v2 = vpack.c.bf16 %v5494_v31, %v5494_v31 }
0x1a17   :  { %v17460_v49 = vunpack.i.h.bf16 %v17458_v62  ;;  %v17459_v3 = vunpack.i.l.bf16 %v17458_v62 }
0x1a18   :  { %v5594_v4 = vsel %vm108_vm3, %v5496_v63, 0  ;;  %v5637_v8 = vsel %vm108_vm3, %v5497_v2, 0 }
0x1a19   :  { %15913 = vmatpush3.bf16.msra.mxu0 %v5594_v4  ;;  %15919 = vmatpush3.bf16.msra.mxu1 %v5637_v8  ;;  %v5685_v5 = vsel %vm5344_vm10, %v17459_v3, 0.0  ;;  %v5686_v11 = vsel %vm5344_vm10, %v17460_v49, 0.0 }
0x1a1a   :  { %15924 = vmatprep.subr.bf16.mxu0 %v17668_v19  ;;  %15930 = vmatprep.subr.bf16.mxu1 %v17668_v19  ;;  %v5688_v12 = vpack.c.bf16 %v5685_v5, %v5685_v5  ;;  %v5689_v13 = vpack.c.bf16 %v5686_v11, %v5686_v11  ;;  %v14729_v11 = vld [vmem:[%s19870_s2 + $0x7c] sm:$0xf] }
0x1a1b   :  { %v5946_v16 = vpack.c.bf16 %v14729_v11, %v14729_v11 }
0x1a1c   :  { %15915 = vmatmul.mubr.msk.bf16.vlgmr.msra.gmra.mrb[24].mxu0 %vm104_vm4, %v5495_v10  ;;  %15921 = vmatmul.mubr.msk.bf16.vlgmr.msra.gmra.mrb[28].mxu1 %vm104_vm4, %v5495_v10  ;;  %v5694_v14 = vsel %vm108_vm3, %v5688_v12, 0  ;;  %v5737_v15 = vsel %vm108_vm3, %v5689_v13, 0 }
0x1a1d   :  { %15925 = vmatpush3.bf16.msra.mxu0 %v5694_v14  ;;  %15931 = vmatpush3.bf16.msra.mxu1 %v5737_v15 }
0x1a1e   :  { %15926 = vmatprep.mubr.msk.bf16.mxu0 %vm17669_vm2, %v17668_v19  ;;  %15932 = vmatprep.mubr.msk.bf16.mxu1 %vm17669_vm2, %v17668_v19 }
0x1a1f   :  { %15936 = vmatprep.subr.bf16.mxu0 %v17668_v19  ;;  %15942 = vmatprep.subr.bf16.mxu1 %v17668_v19 }
0x1a28   :  { %15927 = vmatmul.mubr.msk.bf16.vlgmr.msra.gmra.mrb[24].mxu0 %vm104_vm4, %v5687_v17  ;;  %15933 = vmatmul.mubr.msk.bf16.vlgmr.msra.gmra.mrb[28].mxu1 %vm104_vm4, %v5687_v17 }
0x1a29   :  { %15937 = vmatpush3.bf16.msra.mxu0 %v5788_v18  ;;  %15943 = vmatpush3.bf16.msra.mxu1 %v5831_v20 }
0x1a2a   :  { %15938 = vmatprep.mubr.msk.bf16.mxu0 %vm17669_vm2, %v17668_v19  ;;  %15944 = vmatprep.mubr.msk.bf16.mxu1 %vm17669_vm2, %v17668_v19 }
0x1a2b   :  { %15948 = vmatprep.subr.bf16.mxu0 %v17668_v19  ;;  %15954 = vmatprep.subr.bf16.mxu1 %v17668_v19 }
0x1a34   :  { %15939 = vmatmul.mubr.msk.bf16.vlgmr.msra.gmra.mrb[24].mxu0 %vm104_vm4, %v5781_v22  ;;  %15945 = vmatmul.mubr.msk.bf16.vlgmr.msra.gmra.mrb[28].mxu1 %vm104_vm4, %v5781_v22  ;;  %v14728_v22 = vld [vmem:[%s19870_s2 + $0x78] sm:$0xf] }
0x1a35   :  { %15950 = vmatprep.mubr.msk.bf16.mxu0 %vm17669_vm2, %v17668_v19  ;;  %15956 = vmatprep.mubr.msk.bf16.mxu1 %vm17669_vm2, %v17668_v19 }
0x1b07   :  { %v18662_v21 = vpop.f32.mrb[24].mxu0  ;;  %v18664_v0 = vpop.f32.mrb[28].mxu1 }
0x1b08   :  { %v15940_v1 = vpop.f32.mrb[25].mxu0  ;;  %v15946_v24 = vpop.f32.mrb[29].mxu1  ;;  %v5892_v54 = vsel %vm5099_vm9, %v18664_v0, 0.0  ;;  %v5889_v57 = vsel %vm5099_vm9, %v18662_v21, 0.0 }
0x1b09   :  { %5893 = vadd.xlane.f32.xlu1 %v5892_v54  ;;  %v5870_v27 = vpop.f32.mrb[30].mxu1  ;;  %5890 = vadd.xlane.f32.xlu0 %v5889_v57  ;;  %v5827_v29 = vpop.f32.mrb[26].mxu0 }
0x1b0a   :  { %v15941_v32 = vpop.f32.mrb[27].mxu0  ;;  %v15947_v33 = vpop.f32.mrb[31].mxu1 }
0x1b0b   :  { %v5943_v33 = vpack.c.bf16 %v14728_v22, %v14728_v22 }
0x1b1a   :  { %5919 = vperm.xlu1 %17399, %v14724_v34  }
0x1b96   :  { %v5894_v35 = vpop.xlane.xlu1 %5893  ;;  %v5891_v36 = vpop.xlane.xlu0 %5890 }
0x1b97   :  { %v5896_v39 = vsel %vm48_vm1, %v5894_v35, 0.0  ;;  %v5895_v40 = vsel %vm48_vm1, %v5891_v36, 0.0 }
0x1b98   :  { %v5897_v41 = vadd.f32 %v5896_v39, %v5895_v40 }
0x1b9a   :  { %v5898_v42 = vmul.f32 0.125, %v5897_v41  ;;  %v5920_v63 = vpop.permute.xlu1 %5919 }
0x1b9c   :  { %v5899_v43 = vsub.f32 %v18662_v21, %v5898_v42  ;;  %v5900_v44 = vsub.f32 %v18664_v0, %v5898_v42  ;;  %v14730_v42 = vld [vmem:[%s19870_s2 + $0x80] sm:$0xf] }
0x1b9e   :  { %v5901_v23 = vmul.f32 %v5899_v43, %v5899_v43  ;;  %v5902_v47 = vmul.f32 %v5900_v44, %v5900_v44 }
0x1ba0   :  { %v5903_v46 = vsel %vm5099_vm9, %v5901_v23, 0.0  ;;  %v5906_v48 = vsel %vm5099_vm9, %v5902_v47, 0.0 }
0x1ba1   :  { %5904 = vadd.xlane.f32.xlu0 %v5903_v46 }
0x1ba5   :  { %5907 = vadd.xlane.f32.xlu0 %v5906_v48 }
0x1bbb   :  { %5926 = vperm.xlu0 %17400, %v14725_v50  }
0x1c2e   :  { %v5905_v51 = vpop.xlane.xlu0 %5904 }
0x1c2f   :  { %v5909_v53 = vsel %vm48_vm1, %v5905_v51, 0.0 }
0x1c32   :  { %v5908_v52 = vpop.xlane.xlu0 %5907 }
0x1c33   :  { %v5910_v55 = vsel %vm48_vm1, %v5908_v52, 0.0 }
0x1c34   :  { %v5911_v56 = vadd.f32 %v5910_v55, %v5909_v53 }
0x1c36   :  { %v5912_v30 = vmul.f32 0.125, %v5911_v56  ;;  %v14726_v56 = vld [vmem:[%s19869_s1 + $0x58] sm:$0xf] }
0x1c38   :  { %v5913_v31 = vadd.f32 1e-05, %v5912_v30 }
0x1c3a   :  { %17583 = vrsqrt.f32 %v5913_v31  ;;  %v5927_v3 = vpop.permute.xlu0 %5926 }
0x1c44   :  { %v17584_v60 = vpop.eup %17583 }
0x1c45   :  { %v5915_v61 = vmul.f32 %v17584_v60, %v5899_v43  ;;  %v5916_v62 = vmul.f32 %v17584_v60, %v5900_v44  ;;  %v6135_v43 = vpack.c.bf16 %v14730_v42, %v14730_v42 }
0x1c47   :  { %v5922_v2 = vmul.f32 %v5920_v63, %v5915_v61  ;;  %v5923_v49 = vmul.f32 %v5920_v63, %v5916_v62 }
0x1c49   :  { %v5929_v4 = vadd.f32 %v5927_v3, %v5922_v2  ;;  %v5930_v8 = vadd.f32 %v5927_v3, %v5923_v49 }
0x1c4b   :  { %v5931_v10 = vmax.f32 %v5929_v4, 0.0  ;;  %v5932_v5 = vmax.f32 %v5930_v8, 0.0 }
0x1c4d   :  { %v17461_v12 = vpack.i.bf16 %v5932_v5, %v5931_v10  ;;  %v5947_v13 = vpack.c.bf16 %v5931_v10, %v5931_v10  ;;  %v5948_v14 = vpack.c.bf16 %v5932_v5, %v5932_v5  ;;  %v14727_v5 = vld [vmem:[%s19869_s1 + $0x5c] sm:$0xf] }
0x1c4f   :  { %17462 = vrot.lane.b32.xlu1 %v17461_v12, %s17670_s10  ;;  %v5953_v15 = vsel %vm108_vm3, %v5947_v13, 0  ;;  %v5996_v25 = vsel %vm108_vm3, %v5948_v14, 0 }
0x1c50   :  { %15949 = vmatpush3.bf16.msra.mxu0 %v5953_v15  ;;  %15955 = vmatpush3.bf16.msra.mxu1 %v5996_v25 }
0x1c51   :  { %15960 = vmatprep.subr.bf16.mxu0 %v17668_v19  ;;  %15966 = vmatprep.subr.bf16.mxu1 %v17668_v19 }
0x1c53   :  { %17467 = vrot.lane.b32.xlu1 %v17461_v12, %s17671_s11  ;;  %15951 = vmatmul.mubr.msk.bf16.vlgmr.msra.gmra.mrb[28].mxu0 %vm104_vm4, %v5946_v16 }
0x1c54   :  { %15957 = vmatmul.mubr.msk.bf16.vlgmr.msra.gmra.mrb[32].mxu1 %vm104_vm4, %v5946_v16  ;;  %15962 = vmatprep.mubr.msk.bf16.mxu0 %vm17669_vm2, %v17668_v19 }
0x1c55   :  { %15968 = vmatprep.mubr.msk.bf16.mxu1 %vm17669_vm2, %v17668_v19 }
0x1cc1   :  { %v17463_v26 = vpop.permute.xlu1 %17462 }
0x1cc2   :  { %v17465_v17 = vunpack.i.h.bf16 %v17463_v26  ;;  %v17464_v18 = vunpack.i.l.bf16 %v17463_v26 }
0x1cc4   :  { %v5942_v20 = vsel %vm95_vm5, 0.0, %v17465_v17  ;;  %v5941_v45 = vsel %vm95_vm5, 0.0, %v17464_v18 }
0x1cc5   :  { %v17468_v1 = vpop.permute.xlu1 %17467  ;;  %v5944_v24 = vpack.c.bf16 %v5941_v45, %v5941_v45  ;;  %v5945_v54 = vpack.c.bf16 %v5942_v20, %v5942_v20 }
0x1cc6   :  { %v17470_v57 = vunpack.i.h.bf16 %v17468_v1  ;;  %v17469_v27 = vunpack.i.l.bf16 %v17468_v1 }
0x1cc7   :  { %v6042_v29 = vsel %vm108_vm3, %v5944_v24, 0  ;;  %v6085_v32 = vsel %vm108_vm3, %v5945_v54, 0 }
0x1cc8   :  { %15961 = vmatpush3.bf16.msra.mxu0 %v6042_v29  ;;  %15967 = vmatpush3.bf16.msra.mxu1 %v6085_v32  ;;  %v6133_v34 = vsel %vm5344_vm10, %v17469_v27, 0.0  ;;  %v6134_v35 = vsel %vm5344_vm10, %v17470_v57, 0.0  ;;  %v14732_v29 = vld [vmem:[%s19870_s2 + $0x88] sm:$0xf] }
0x1cc9   :  { %15972 = vmatprep.subr.bf16.mxu0 %v17668_v19  ;;  %15978 = vmatprep.subr.bf16.mxu1 %v17668_v19  ;;  %v6136_v36 = vpack.c.bf16 %v6133_v34, %v6133_v34  ;;  %v6137_v39 = vpack.c.bf16 %v6134_v35, %v6134_v35 }
0x1ccb   :  { %15963 = vmatmul.mubr.msk.bf16.vlgmr.msra.gmra.mrb[28].mxu0 %vm104_vm4, %v5943_v33  ;;  %15969 = vmatmul.mubr.msk.bf16.vlgmr.msra.gmra.mrb[32].mxu1 %vm104_vm4, %v5943_v33  ;;  %v6142_v40 = vsel %vm108_vm3, %v6136_v36, 0  ;;  %v6185_v41 = vsel %vm108_vm3, %v6137_v39, 0  ;;  %v6286_v39 = vpack.c.bf16 %v14732_v29, %v14732_v29 }
0x1ccc   :  { %15973 = vmatpush3.bf16.msra.mxu0 %v6142_v40  ;;  %15979 = vmatpush3.bf16.msra.mxu1 %v6185_v41 }
0x1ccd   :  { %15974 = vmatprep.mubr.msk.bf16.mxu0 %vm17669_vm2, %v17668_v19  ;;  %15980 = vmatprep.mubr.msk.bf16.mxu1 %vm17669_vm2, %v17668_v19 }
0x1cce   :  { %15984 = vmatprep.subr.bf16.mxu0 %v17668_v19  ;;  %15990 = vmatprep.subr.bf16.mxu1 %v17668_v19 }
0x1cd7   :  { %15975 = vmatmul.mubr.msk.bf16.vlgmr.msra.gmra.mrb[28].mxu0 %vm104_vm4, %v6135_v43  ;;  %15981 = vmatmul.mubr.msk.bf16.vlgmr.msra.gmra.mrb[32].mxu1 %vm104_vm4, %v6135_v43 }
0x1cd8   :  { %15986 = vmatprep.mubr.msk.bf16.mxu0 %vm17669_vm2, %v17668_v19  ;;  %15992 = vmatprep.mubr.msk.bf16.mxu1 %vm17669_vm2, %v17668_v19 }
0x1daa   :  { %v6178_v44 = vpop.f32.mrb[28].mxu0  ;;  %v6221_v23 = vpop.f32.mrb[32].mxu1 }
0x1dab   :  { %v15976_v46 = vpop.f32.mrb[29].mxu0  ;;  %v15982_v47 = vpop.f32.mrb[33].mxu1  ;;  %v6232_v48 = vsel %vm5099_vm9, %v6221_v23, 0.0  ;;  %v6229_v50 = vsel %vm5099_vm9, %v6178_v44, 0.0 }
0x1dac   :  { %6233 = vadd.xlane.f32.xlu1 %v6232_v48  ;;  %v6224_v51 = vpop.f32.mrb[34].mxu1  ;;  %6230 = vadd.xlane.f32.xlu0 %v6229_v50  ;;  %v6181_v52 = vpop.f32.mrb[30].mxu0 }
0x1dad   :  { %v15977_v53 = vpop.f32.mrb[31].mxu0  ;;  %v15983_v55 = vpop.f32.mrb[35].mxu1 }
0x1dbd   :  { %6259 = vperm.xlu1 %17399, %v14726_v56  }
0x1e39   :  { %v6234_v30 = vpop.xlane.xlu1 %6233  ;;  %v6231_v31 = vpop.xlane.xlu0 %6230 }
0x1e3a   :  { %v6236_v60 = vsel %vm48_vm1, %v6234_v30, 0.0  ;;  %v6235_v61 = vsel %vm48_vm1, %v6231_v31, 0.0 }
0x1e3b   :  { %v6237_v62 = vadd.f32 %v6236_v60, %v6235_v61 }
0x1e3d   :  { %v6238_v63 = vmul.f32 0.125, %v6237_v62  ;;  %v6260_v20 = vpop.permute.xlu1 %6259 }
0x1e3f   :  { %v6239_v2 = vsub.f32 %v6178_v44, %v6238_v63  ;;  %v6240_v49 = vsub.f32 %v6221_v23, %v6238_v63  ;;  %v14731_v23 = vld [vmem:[%s19870_s2 + $0x84] sm:$0xf] }
0x1e40   :  { %v6283_v56 = vpack.c.bf16 %v14731_v23, %v14731_v23 }
0x1e41   :  { %v6241_v3 = vmul.f32 %v6239_v2, %v6239_v2  ;;  %v6242_v8 = vmul.f32 %v6240_v49, %v6240_v49 }
0x1e43   :  { %v6243_v4 = vsel %vm5099_vm9, %v6241_v3, 0.0  ;;  %v6246_v10 = vsel %vm5099_vm9, %v6242_v8, 0.0 }
0x1e44   :  { %6244 = vadd.xlane.f32.xlu0 %v6243_v4 }
0x1e48   :  { %6247 = vadd.xlane.f32.xlu0 %v6246_v10 }
0x1e5e   :  { %6266 = vperm.xlu0 %17400, %v14727_v5  }
0x1e62   :  { %6665 = vrot.lane.b32.xlu0 %v18662_v21, %s17670_s10 }
0x1e66   :  { %6675 = vrot.lane.b32.xlu0 %v18662_v21, %s17671_s11 }
0x1ed1   :  { %v6245_v11 = vpop.xlane.xlu0 %6244 }
0x1ed2   :  { %v6249_v13 = vsel %vm48_vm1, %v6245_v11, 0.0 }
0x1ed5   :  { %v6248_v12 = vpop.xlane.xlu0 %6247 }
0x1ed6   :  { %v6250_v14 = vsel %vm48_vm1, %v6248_v12, 0.0 }
0x1ed7   :  { %v6251_v15 = vadd.f32 %v6250_v14, %v6249_v13  ;;  %v14733_v13 = vld [vmem:[%s19870_s2 + $0x8c] sm:$0xf]  ;;  %v6686_v14 = vsel %vm6685_vm11, %v18062_v9, 3 }
0x1ed8   :  { %vm6687_vm12 = vcmp.eq.s32.totalorder %v18047_v6, %v6686_v14  ;;  %v14757_v14 = vld [vmem:[%s19869_s1 + $0x54] sm:$0xf] }
0x1ed9   :  { %v6252_v25 = vmul.f32 0.125, %v6251_v15 }
0x1edb   :  { %v6253_v16 = vadd.f32 1e-05, %v6252_v25 }
0x1edd   :  { %17585 = vrsqrt.f32 %v6253_v16  ;;  %v6267_v1 = vpop.permute.xlu0 %6266  ;;  %v6475_v16 = vpack.c.bf16 %v14733_v13, %v14733_v13 }
0x1ee1   :  { %v6666_v50 = vpop.permute.xlu0 %6665 }
0x1ee2   :  { %v6671_v3 = vsel %vm95_vm5, -3e+38, %v6666_v50 }
0x1ee3   :  { %v6673_v11 = vmax.f32 %v6671_v3, %v18662_v21 }
0x1ee7   :  { %v17586_v26 = vpop.eup %17585 }
0x1ee8   :  { %v6255_v17 = vmul.f32 %v17586_v26, %v6239_v2  ;;  %v6256_v18 = vmul.f32 %v17586_v26, %v6240_v49  ;;  %v6676_v49 = vpop.permute.xlu0 %6675  ;;  %v6570_v26 = vpack.c.bf16 %v18662_v21, %v18662_v21 }
0x1ee9   :  { %v6681_v10 = vsel %vm5344_vm10, %v6676_v49, -3e+38 }
0x1eea   :  { %v6262_v45 = vmul.f32 %v6260_v20, %v6255_v17  ;;  %v6263_v22 = vmul.f32 %v6260_v20, %v6256_v18  ;;  %v6683_v15 = vmax.f32 %v6673_v11, %v6681_v10  ;;  %v6571_v17 = vpack.c.bf16 %v18664_v0, %v18664_v0 }
0x1eec   :  { %v6269_v24 = vadd.f32 %v6267_v1, %v6262_v45  ;;  %v6270_v54 = vadd.f32 %v6267_v1, %v6263_v22  ;;  %v6691_v18 = vsel %vm104_vm4, %v6683_v15, 0  ;;  %v18806_v45 = vsel %vm6687_vm12, 1.0, %v17668_v19 }
0x1eed   :  { %v6576_v22 = vsel %vm108_vm3, %v6570_v26, 0  ;;  %v6619_v21 = vsel %vm108_vm3, %v6571_v17, 0 }
0x1eee   :  { %v6271_v57 = vmax.f32 %v6269_v24, 0.0  ;;  %v6272_v27 = vmax.f32 %v6270_v54, 0.0  ;;  %v6694_v24 = vsel %vm48_vm1, %v18806_v45, 0  ;;  %v14734_v54 = vld [vmem:[%s19871_s3 + $0x14] sm:$0xf] }
0x1ef0   :  { %v17471_v32 = vpack.i.bf16 %v6272_v27, %v6271_v57  ;;  %v6287_v33 = vpack.c.bf16 %v6271_v57, %v6271_v57  ;;  %v6288_v34 = vpack.c.bf16 %v6272_v27, %v6272_v27  ;;  %v6774_v57 = vsub.f32 %v6694_v24, %v6694_v24 }
0x1ef2   :  { %17472 = vrot.lane.b32.xlu1 %v17471_v32, %s17670_s10  ;;  %v6293_v35 = vsel %vm108_vm3, %v6287_v33, 0  ;;  %v6336_v36 = vsel %vm108_vm3, %v6288_v34, 0  ;;  %v6775_v33 = vand.u32 4294901760, %v6774_v57 }
0x1ef3   :  { %15985 = vmatpush3.bf16.msra.mxu0 %v6293_v35  ;;  %15991 = vmatpush3.bf16.msra.mxu1 %v6336_v36 }
0x1ef4   :  { %15996 = vmatprep.subr.bf16.mxu0 %v17668_v19  ;;  %16002 = vmatprep.subr.bf16.mxu1 %v17668_v19  ;;  %v6776_v36 = vsub.f32 %v6774_v57, %v6775_v33 }
0x1ef6   :  { %17477 = vrot.lane.b32.xlu1 %v17471_v32, %s17671_s11  ;;  %15987 = vmatmul.mubr.msk.bf16.vlgmr.msra.gmra.mrb[32].mxu0 %vm104_vm4, %v6286_v39  ;;  %v6569_v32 = vpack.c.bf16 %v14734_v54, %v14734_v54 }
0x1ef7   :  { %15993 = vmatmul.mubr.msk.bf16.vlgmr.msra.gmra.mrb[36].mxu1 %vm104_vm4, %v6286_v39  ;;  %15998 = vmatprep.mubr.msk.bf16.mxu0 %vm17669_vm2, %v17668_v19 }
0x1ef8   :  { %16004 = vmatprep.mubr.msk.bf16.mxu1 %vm17669_vm2, %v17668_v19 }
0x1efa   :  { %6667 = vrot.lane.b32.xlu1 %v18664_v0, %s17670_s10 }
0x1efe   :  { %6677 = vrot.lane.b32.xlu1 %v18664_v0, %s17671_s11 }
0x1f64   :  { %v17473_v40 = vpop.permute.xlu1 %17472 }
0x1f65   :  { %v17475_v41 = vunpack.i.h.bf16 %v17473_v40  ;;  %v17474_v42 = vunpack.i.l.bf16 %v17473_v40 }
0x1f67   :  { %v6282_v43 = vsel %vm95_vm5, 0.0, %v17475_v41  ;;  %v6281_v44 = vsel %vm95_vm5, 0.0, %v17474_v42  ;;  %v6777_v41 = vand.u32 4294901760, %v6776_v36 }
0x1f68   :  { %v17478_v46 = vpop.permute.xlu1 %17477  ;;  %v6284_v47 = vpack.c.bf16 %v6281_v44, %v6281_v44  ;;  %v6285_v48 = vpack.c.bf16 %v6282_v43, %v6282_v43 }
0x1f69   :  { %v17480_v51 = vunpack.i.h.bf16 %v17478_v46  ;;  %v17479_v52 = vunpack.i.l.bf16 %v17478_v46 }
0x1f6a   :  { %v6382_v53 = vsel %vm108_vm3, %v6284_v47, 0  ;;  %v6425_v55 = vsel %vm108_vm3, %v6285_v48, 0 }
0x1f6b   :  { %15997 = vmatpush3.bf16.msra.mxu0 %v6382_v53  ;;  %16003 = vmatpush3.bf16.msra.mxu1 %v6425_v55  ;;  %v6473_v30 = vsel %vm5344_vm10, %v17479_v52, 0.0  ;;  %v6474_v31 = vsel %vm5344_vm10, %v17480_v51, 0.0 }
0x1f6c   :  { %v6668_v60 = vpop.permute.xlu1 %6667  ;;  %16008 = vmatprep.subr.bf16.mxu0 %v17668_v19  ;;  %16014 = vmatprep.subr.bf16.mxu1 %v17668_v19  ;;  %v6476_v61 = vpack.c.bf16 %v6473_v30, %v6473_v30  ;;  %v6477_v62 = vpack.c.bf16 %v6474_v31, %v6474_v31 }
0x1f6d   :  { %v6672_v4 = vsel %vm95_vm5, -3e+38, %v6668_v60 }
0x1f6e   :  { %15999 = vmatmul.mubr.msk.bf16.vlgmr.msra.gmra.mrb[32].mxu0 %vm104_vm4, %v6283_v56  ;;  %16005 = vmatmul.mubr.msk.bf16.vlgmr.msra.gmra.mrb[36].mxu1 %vm104_vm4, %v6283_v56  ;;  %v6482_v63 = vsel %vm108_vm3, %v6476_v61, 0  ;;  %v6525_v2 = vsel %vm108_vm3, %v6477_v62, 0  ;;  %v6674_v12 = vmax.f32 %v6672_v4, %v18664_v0  ;;  %v18812_v0 = vand.u32 4294901760, %v6691_v18  ;;  %v14756_v61 = vld [vmem:[%s19869_s1 + $0x50] sm:$0xf] }
0x1f6f   :  { %16009 = vmatpush3.bf16.msra.mxu0 %v6482_v63  ;;  %16015 = vmatpush3.bf16.msra.mxu1 %v6525_v2 }
0x1f70   :  { %v6678_v8 = vpop.permute.xlu1 %6677  ;;  %16010 = vmatprep.mubr.msk.bf16.mxu0 %vm17669_vm2, %v17668_v19  ;;  %16016 = vmatprep.mubr.msk.bf16.mxu1 %vm17669_vm2, %v17668_v19  ;;  %v6763_v27 = vsub.f32 %v6691_v18, %v18812_v0 }
0x1f71   :  { %16020 = vmatprep.subr.bf16.mxu0 %v17668_v19  ;;  %16026 = vmatprep.subr.bf16.mxu1 %v17668_v19  ;;  %v6682_v5 = vsel %vm5344_vm10, %v6678_v8, -3e+38 }
0x1f72   :  { %v6684_v25 = vmax.f32 %v6674_v12, %v6682_v5  ;;  %v6764_v34 = vand.u32 4294901760, %v6763_v27 }
0x1f74   :  { %v7143_v20 = vsel %vm104_vm4, %v6684_v25, 0  ;;  %v6765_v39 = vsub.f32 %v6763_v27, %v6764_v34 }
0x1f75   :  { %v18814_v1 = vand.u32 4294901760, %v7143_v20 }
0x1f76   :  { %v6766_v42 = vand.u32 4294901760, %v6765_v39 }
0x1f77   :  { %v7212_v29 = vsub.f32 %v7143_v20, %v18814_v1 }
0x1f79   :  { %v7213_v35 = vand.u32 4294901760, %v7212_v29 }
0x1f7a   :  { %16011 = vmatmul.mubr.msk.bf16.vlgmr.msra.gmra.mrb[32].mxu0 %vm104_vm4, %v6475_v16  ;;  %16017 = vmatmul.mubr.msk.bf16.vlgmr.msra.gmra.mrb[36].mxu1 %vm104_vm4, %v6475_v16 }
0x1f7b   :  { %16021 = vmatpush3.bf16.msra.mxu0 %v6576_v22  ;;  %16027 = vmatpush3.bf16.msra.mxu1 %v6619_v21  ;;  %v7214_v40 = vsub.f32 %v7212_v29, %v7213_v35 }
0x1f7c   :  { %16022 = vmatprep.mubr.msk.bf16.mxu0 %vm17669_vm2, %v17668_v19  ;;  %16028 = vmatprep.mubr.msk.bf16.mxu1 %vm17669_vm2, %v17668_v19 }
0x1f7d   :  { %16032 = vmatprep.subr.mxu0 %v17668_v19  ;;  %16062 = vmatprep.subr.mxu1 %v17668_v19  ;;  %v7215_v43 = vand.u32 4294901760, %v7214_v40 }
0x1f86   :  { %16023 = vmatmul.mubr.msk.bf16.vlgmr.msra.gmra.mrb[32].mxu0 %vm104_vm4, %v6569_v32  ;;  %16029 = vmatmul.mubr.msk.bf16.vlgmr.msra.gmra.mrb[36].mxu1 %vm104_vm4, %v6569_v32 }
0x1f87   :  { %16033 = vmatpush3.msk.msra.mxu0 %vm48_vm1, %v18806_v45  ;;  %16034 = vmatprep.mubr.msk.f32.mxu0 %vm17669_vm2, %v17668_v19 }
0x1f88   :  { %16063 = vmatpush3.msk.msra.mxu1 %vm48_vm1, %v18806_v45  ;;  %16064 = vmatprep.mubr.msk.f32.mxu1 %vm17669_vm2, %v17668_v19 }
0x1f89   :  { %16037 = vmatprep.subr.mxu0 %v17668_v19  ;;  %16067 = vmatprep.subr.mxu1 %v17668_v19 }
0x1f8e   :  { %16035 = vmatmul.mubr.f32.vlgmr.msra.gmra.mrb[36].mxu0 %v6766_v42  ;;  %16065 = vmatmul.mubr.f32.vlgmr.msra.gmra.mrb[22].mxu1 %v7215_v43 }
0x1f8f   :  { %16038 = vmatpush3.msra.mxu0 %v6777_v41  ;;  %16039 = vmatprep.mubr.msk.f32.mxu0 %vm17669_vm2, %v17668_v19 }
0x1f90   :  { %16068 = vmatpush3.msra.mxu1 %v6777_v41  ;;  %16069 = vmatprep.mubr.msk.f32.mxu1 %vm17669_vm2, %v17668_v19 }
0x1f91   :  { %16042 = vmatprep.subr.mxu0 %v17668_v19  ;;  %16072 = vmatprep.subr.mxu1 %v17668_v19 }
0x1f96   :  { %16040 = vmatmul.mubr.f32.vlgmr.msra.gmra.mrb[36].mxu0 %v18812_v0  ;;  %16070 = vmatmul.mubr.f32.vlgmr.msra.gmra.mrb[22].mxu1 %v18814_v1 }
0x1f97   :  { %16043 = vmatpush3.msra.mxu0 %v6774_v57  ;;  %16044 = vmatprep.mubr.msk.f32.mxu0 %vm17669_vm2, %v17668_v19 }
0x1f98   :  { %16073 = vmatpush3.msra.mxu1 %v6774_v57  ;;  %16074 = vmatprep.mubr.msk.f32.mxu1 %vm17669_vm2, %v17668_v19 }
0x1f99   :  { %16047 = vmatprep.subr.mxu0 %v17668_v19  ;;  %16077 = vmatprep.subr.mxu1 %v17668_v19 }
0x1f9e   :  { %16045 = vmatmul.mubr.f32.vlgmr.msra.gmra.mrb[36].mxu0 %v6763_v27  ;;  %16075 = vmatmul.mubr.f32.vlgmr.msra.gmra.mrb[22].mxu1 %v7212_v29 }
0x1f9f   :  { %16048 = vmatpush3.msk.msra.mxu0 %vm48_vm1, %v18806_v45  ;;  %16049 = vmatprep.mubr.msk.f32.mxu0 %vm17669_vm2, %v17668_v19 }
0x1fa0   :  { %16078 = vmatpush3.msk.msra.mxu1 %vm48_vm1, %v18806_v45  ;;  %16079 = vmatprep.mubr.msk.f32.mxu1 %vm17669_vm2, %v17668_v19 }
0x1fa1   :  { %16052 = vmatprep.subr.mxu0 %v17668_v19  ;;  %16082 = vmatprep.subr.mxu1 %v17668_v19 }
0x1fa6   :  { %16050 = vmatmul.mubr.f32.vlgmr.msra.gmra.mrb[36].mxu0 %v6764_v34  ;;  %16080 = vmatmul.mubr.f32.vlgmr.msra.gmra.mrb[22].mxu1 %v7213_v35 }
0x1fa7   :  { %16053 = vmatpush3.msra.mxu0 %v6775_v33  ;;  %16054 = vmatprep.mubr.msk.f32.mxu0 %vm17669_vm2, %v17668_v19 }
0x1fa8   :  { %16083 = vmatpush3.msra.mxu1 %v6775_v33  ;;  %16084 = vmatprep.mubr.msk.f32.mxu1 %vm17669_vm2, %v17668_v19  ;;  %v14761_v33 = vld [vmem:[%s19870_s2 + $0x7c] sm:$0xf] }
0x1fa9   :  { %16057 = vmatprep.subr.mxu0 %v17668_v19  ;;  %16087 = vmatprep.subr.mxu1 %v17668_v19  ;;  %v7660_v41 = vpack.c.bf16 %v14761_v33, %v14761_v33 }
0x1fae   :  { %16055 = vmatmul.mubr.f32.vlgmr.msra.gmra.mrb[36].mxu0 %v18812_v0  ;;  %16085 = vmatmul.mubr.f32.vlgmr.msra.gmra.mrb[22].mxu1 %v18814_v1 }
0x1faf   :  { %16058 = vmatpush3.msk.msra.mxu0 %vm48_vm1, %v18806_v45  ;;  %16059 = vmatprep.mubr.msk.f32.mxu0 %vm17669_vm2, %v17668_v19 }
0x1fb0   :  { %16088 = vmatpush3.msk.msra.mxu1 %vm48_vm1, %v18806_v45  ;;  %16089 = vmatprep.mubr.msk.f32.mxu1 %vm17669_vm2, %v17668_v19 }
0x1fb1   :  { %16092 = vmatprep.subr.bf16.mxu0 %v17668_v19  ;;  %16098 = vmatprep.subr.bf16.mxu1 %v17668_v19 }
0x1fb6   :  { %16060 = vmatmul.mubr.f32.vlgmr.msra.gmra.mrb[36].mxu0 %v18812_v0  ;;  %16090 = vmatmul.mubr.f32.vlgmr.msra.gmra.mrb[22].mxu1 %v18814_v1 }
0x1fb7   :  { %16094 = vmatprep.mubr.msk.bf16.mxu0 %vm17669_vm2, %v17668_v19  ;;  %16100 = vmatprep.mubr.msk.bf16.mxu1 %vm17669_vm2, %v17668_v19 }
0x2059   :  { %v18889_v44 = vpop.f32.mrb[32].mxu0  ;;  %v18891_v23 = vpop.f32.mrb[36].mxu1 }
0x205a   :  { %v16024_v46 = vpop.f32.mrb[33].mxu0  ;;  %v16030_v47 = vpop.f32.mrb[37].mxu1 }
0x205b   :  { %v6615_v48 = vpop.f32.mrb[34].mxu0  ;;  %v6658_v50 = vpop.f32.mrb[38].mxu1 }
0x205c   :  { %v16025_v51 = vpop.f32.mrb[35].mxu0  ;;  %v16031_v52 = vpop.f32.mrb[39].mxu1  ;;  %v14760_v50 = vld [vmem:[%s19870_s2 + $0x78] sm:$0xf] }
0x2089   :  { %v18893_v53 = vpop.f32.mrb[36].mxu0  ;;  %v18895_v55 = vpop.f32.mrb[22].mxu1 }
0x208a   :  { %v16061_v56 = vpop.f32.mrb[37].mxu0  ;;  %v16091_v30 = vpop.f32.mrb[23].mxu1  ;;  %v7606_v31 = vsel %vm7602_vm15, %v18895_v55, 0.0  ;;  %v7603_v60 = vsel %vm7602_vm15, %v18893_v53, 0.0 }
0x208b   :  { %7607 = vadd.xlane.f32.xlu1 %v7606_v31  ;;  %7604 = vadd.xlane.f32.xlu0 %v7603_v60 }
0x209c   :  { %7633 = vperm.xlu1 %17399, %v14756_v61  }
0x2118   :  { %v7608_v62 = vpop.xlane.xlu1 %7607  ;;  %v7605_v63 = vpop.xlane.xlu0 %7604 }
0x2119   :  { %v7610_v2 = vsel %vm48_vm1, %v7608_v62, 0.0  ;;  %v7609_v49 = vsel %vm48_vm1, %v7605_v63, 0.0  ;;  %v7657_v62 = vpack.c.bf16 %v14760_v50, %v14760_v50 }
0x211a   :  { %v7611_v3 = vadd.f32 %v7610_v2, %v7609_v49 }
0x211c   :  { %v7612_v4 = vmul.f32 0.25, %v7611_v3  ;;  %v7634_v0 = vpop.permute.xlu1 %7633 }
0x211e   :  { %v7613_v8 = vsub.f32 %v18893_v53, %v7612_v4  ;;  %v7614_v10 = vsub.f32 %v18895_v55, %v7612_v4 }
0x2120   :  { %v7615_v5 = vmul.f32 %v7613_v8, %v7613_v8  ;;  %v7616_v12 = vmul.f32 %v7614_v10, %v7614_v10 }
0x2122   :  { %v7617_v11 = vsel %vm7602_vm15, %v7615_v5, 0.0  ;;  %v7620_v13 = vsel %vm7602_vm15, %v7616_v12, 0.0 }
0x2123   :  { %7618 = vadd.xlane.f32.xlu0 %v7617_v11 }
0x2127   :  { %7621 = vadd.xlane.f32.xlu0 %v7620_v13 }
0x213d   :  { %7640 = vperm.xlu0 %17400, %v14757_v14  }
0x21b0   :  { %v7619_v15 = vpop.xlane.xlu0 %7618 }
0x21b1   :  { %v7623_v16 = vsel %vm48_vm1, %v7619_v15, 0.0 }
0x21b4   :  { %v7622_v25 = vpop.xlane.xlu0 %7621 }
0x21b5   :  { %v7624_v26 = vsel %vm48_vm1, %v7622_v25, 0.0 }
0x21b6   :  { %v7625_v17 = vadd.f32 %v7624_v26, %v7623_v16 }
0x21b8   :  { %v7626_v18 = vmul.f32 0.25, %v7625_v17 }
0x21ba   :  { %v7627_v20 = vadd.f32 1e-05, %v7626_v18 }
0x21bc   :  { %17587 = vrsqrt.f32 %v7627_v20  ;;  %v7641_v54 = vpop.permute.xlu0 %7640  ;;  %v14758_v20 = vld [vmem:[%s19869_s1 + $0x58] sm:$0xf] }
0x21c6   :  { %v17588_v45 = vpop.eup %17587 }
0x21c7   :  { %v7629_v22 = vmul.f32 %v17588_v45, %v7613_v8  ;;  %v7630_v21 = vmul.f32 %v17588_v45, %v7614_v10  ;;  %v14762_v10 = vld [vmem:[%s19870_s2 + $0x80] sm:$0xf] }
0x21c8   :  { %v7849_v5 = vpack.c.bf16 %v14762_v10, %v14762_v10 }
0x21c9   :  { %v7636_v1 = vmul.f32 %v7634_v0, %v7629_v22  ;;  %v7637_v24 = vmul.f32 %v7634_v0, %v7630_v21 }
0x21cb   :  { %v7643_v57 = vadd.f32 %v7641_v54, %v7636_v1  ;;  %v7644_v27 = vadd.f32 %v7641_v54, %v7637_v24 }
0x21cd   :  { %v7645_v29 = vmax.f32 %v7643_v57, 0.0  ;;  %v7646_v32 = vmax.f32 %v7644_v27, 0.0 }
0x21cf   :  { %v17481_v34 = vpack.i.bf16 %v7646_v32, %v7645_v29  ;;  %v7661_v35 = vpack.c.bf16 %v7645_v29, %v7645_v29  ;;  %v7662_v36 = vpack.c.bf16 %v7646_v32, %v7646_v32 }
0x21d1   :  { %17482 = vrot.lane.b32.xlu1 %v17481_v34, %s17670_s10  ;;  %v7667_v39 = vsel %vm108_vm3, %v7661_v35, 0  ;;  %v7710_v40 = vsel %vm108_vm3, %v7662_v36, 0 }
0x21d2   :  { %16093 = vmatpush3.bf16.msra.mxu0 %v7667_v39  ;;  %16099 = vmatpush3.bf16.msra.mxu1 %v7710_v40 }
0x21d3   :  { %16104 = vmatprep.subr.bf16.mxu0 %v17668_v19  ;;  %16110 = vmatprep.subr.bf16.mxu1 %v17668_v19 }
0x21d5   :  { %17487 = vrot.lane.b32.xlu1 %v17481_v34, %s17671_s11  ;;  %16095 = vmatmul.mubr.msk.bf16.vlgmr.msra.gmra.mrb[40].mxu0 %vm104_vm4, %v7660_v41  ;;  %v14759_v34 = vld [vmem:[%s19869_s1 + $0x5c] sm:$0xf] }
0x21d6   :  { %16101 = vmatmul.mubr.msk.bf16.vlgmr.msra.gmra.mrb[40].mxu1 %vm104_vm4, %v7660_v41  ;;  %16106 = vmatprep.mubr.msk.bf16.mxu0 %vm17669_vm2, %v17668_v19 }
0x21d7   :  { %16112 = vmatprep.mubr.msk.bf16.mxu1 %vm17669_vm2, %v17668_v19 }
0x2243   :  { %v17483_v42 = vpop.permute.xlu1 %17482 }
0x2244   :  { %v17485_v43 = vunpack.i.h.bf16 %v17483_v42  ;;  %v17484_v46 = vunpack.i.l.bf16 %v17483_v42 }
0x2246   :  { %v7656_v47 = vsel %vm95_vm5, 0.0, %v17485_v43  ;;  %v7655_v48 = vsel %vm95_vm5, 0.0, %v17484_v46 }
0x2247   :  { %v7659_v51 = vpack.c.bf16 %v7656_v47, %v7656_v47  ;;  %v7658_v52 = vpack.c.bf16 %v7655_v48, %v7655_v48  ;;  %v17488_v56 = vpop.permute.xlu1 %17487 }
0x2248   :  { %v17490_v30 = vunpack.i.h.bf16 %v17488_v56  ;;  %v17489_v31 = vunpack.i.l.bf16 %v17488_v56 }
0x2249   :  { %v7799_v60 = vsel %vm108_vm3, %v7659_v51, 0  ;;  %v7756_v61 = vsel %vm108_vm3, %v7658_v52, 0 }
0x224a   :  { %v7848_v63 = vsel %vm95_vm5, %v17490_v30, 0.0  ;;  %v7847_v2 = vsel %vm95_vm5, %v17489_v31, 0.0  ;;  %16105 = vmatpush3.bf16.msra.mxu0 %v7756_v61  ;;  %16111 = vmatpush3.bf16.msra.mxu1 %v7799_v60 }
0x224b   :  { %v7851_v49 = vpack.c.bf16 %v7848_v63, %v7848_v63  ;;  %v7850_v3 = vpack.c.bf16 %v7847_v2, %v7847_v2  ;;  %16116 = vmatprep.subr.bf16.mxu0 %v17668_v19  ;;  %16122 = vmatprep.subr.bf16.mxu1 %v17668_v19 }
0x224d   :  { %v7899_v4 = vsel %vm108_vm3, %v7851_v49, 0  ;;  %v7856_v8 = vsel %vm108_vm3, %v7850_v3, 0  ;;  %16107 = vmatmul.mubr.msk.bf16.vlgmr.msra.gmra.mrb[40].mxu0 %vm104_vm4, %v7657_v62  ;;  %16113 = vmatmul.mubr.msk.bf16.vlgmr.msra.gmra.mrb[40].mxu1 %vm104_vm4, %v7657_v62  ;;  %v14764_v62 = vld [vmem:[%s19870_s2 + $0x88] sm:$0xf] }
0x224e   :  { %16117 = vmatpush3.bf16.msra.mxu0 %v7856_v8  ;;  %16123 = vmatpush3.bf16.msra.mxu1 %v7899_v4  ;;  %v8000_v8 = vpack.c.bf16 %v14764_v62, %v14764_v62 }
0x224f   :  { %16118 = vmatprep.mubr.msk.bf16.mxu0 %vm17669_vm2, %v17668_v19  ;;  %16124 = vmatprep.mubr.msk.bf16.mxu1 %vm17669_vm2, %v17668_v19 }
0x2250   :  { %16128 = vmatprep.subr.bf16.mxu0 %v17668_v19  ;;  %16134 = vmatprep.subr.bf16.mxu1 %v17668_v19 }
0x2259   :  { %16119 = vmatmul.mubr.msk.bf16.vlgmr.msra.gmra.mrb[40].mxu0 %vm104_vm4, %v7849_v5  ;;  %16125 = vmatmul.mubr.msk.bf16.vlgmr.msra.gmra.mrb[40].mxu1 %vm104_vm4, %v7849_v5 }
0x225a   :  { %16130 = vmatprep.mubr.msk.bf16.mxu0 %vm17669_vm2, %v17668_v19  ;;  %16136 = vmatprep.mubr.msk.bf16.mxu1 %vm17669_vm2, %v17668_v19 }
0x232c   :  { %v7892_v11 = vpop.f32.mrb[40].mxu0  ;;  %v7935_v12 = vpop.f32.mrb[40].mxu1 }
0x232d   :  { %v16120_v13 = vpop.f32.mrb[41].mxu0  ;;  %v16126_v14 = vpop.f32.mrb[41].mxu1  ;;  %v7946_v15 = vsel %vm7602_vm15, %v7935_v12, 0.0  ;;  %v7943_v25 = vsel %vm7602_vm15, %v7892_v11, 0.0 }
0x232e   :  { %7947 = vadd.xlane.f32.xlu1 %v7946_v15  ;;  %v7938_v16 = vpop.f32.mrb[42].mxu1  ;;  %7944 = vadd.xlane.f32.xlu0 %v7943_v25  ;;  %v7895_v26 = vpop.f32.mrb[42].mxu0  ;;  %v14763_v14 = vld [vmem:[%s19870_s2 + $0x84] sm:$0xf] }
0x232f   :  { %v16121_v17 = vpop.f32.mrb[43].mxu0  ;;  %v16127_v18 = vpop.f32.mrb[43].mxu1 }
0x233f   :  { %7973 = vperm.xlu1 %17399, %v14758_v20  }
0x23bb   :  { %v7948_v45 = vpop.xlane.xlu1 %7947  ;;  %v7945_v22 = vpop.xlane.xlu0 %7944 }
0x23bc   :  { %v7950_v21 = vsel %vm48_vm1, %v7948_v45, 0.0  ;;  %v7949_v0 = vsel %vm48_vm1, %v7945_v22, 0.0  ;;  %v7997_v45 = vpack.c.bf16 %v14763_v14, %v14763_v14 }
0x23bd   :  { %v7951_v1 = vadd.f32 %v7950_v21, %v7949_v0 }
0x23bf   :  { %v7952_v24 = vmul.f32 0.25, %v7951_v1  ;;  %v7974_v50 = vpop.permute.xlu1 %7973 }
0x23c1   :  { %v7953_v54 = vsub.f32 %v7892_v11, %v7952_v24  ;;  %v7954_v57 = vsub.f32 %v7935_v12, %v7952_v24 }
0x23c3   :  { %v7955_v27 = vmul.f32 %v7953_v54, %v7953_v54  ;;  %v7956_v32 = vmul.f32 %v7954_v57, %v7954_v57 }
0x23c5   :  { %v7957_v29 = vsel %vm7602_vm15, %v7955_v27, 0.0  ;;  %v7960_v33 = vsel %vm7602_vm15, %v7956_v32, 0.0  ;;  %v8284_v27 = vpack.c.bf16 %v18893_v53, %v18893_v53  ;;  %v14766_v53 = vld [vmem:[%s19871_s3 + $0x14] sm:$0xf] }
0x23c6   :  { %7958 = vadd.xlane.f32.xlu0 %v7957_v29  ;;  %v8285_v29 = vpack.c.bf16 %v18895_v55, %v18895_v55  ;;  %v8283_v55 = vpack.c.bf16 %v14766_v53, %v14766_v53 }
0x23ca   :  { %7961 = vadd.xlane.f32.xlu0 %v7960_v33  ;;  %v8290_v33 = vsel %vm108_vm3, %v8284_v27, 0 }
0x23e0   :  { %7980 = vperm.xlu0 %17400, %v14759_v34   ;;  %v8333_v34 = vsel %vm108_vm3, %v8285_v29, 0 }
0x2453   :  { %v7959_v35 = vpop.xlane.xlu0 %7958 }
0x2454   :  { %v7963_v39 = vsel %vm48_vm1, %v7959_v35, 0.0 }
0x2457   :  { %v7962_v36 = vpop.xlane.xlu0 %7961 }
0x2458   :  { %v7964_v40 = vsel %vm48_vm1, %v7962_v36, 0.0 }
0x2459   :  { %v7965_v41 = vadd.f32 %v7964_v40, %v7963_v39 }
0x245b   :  { %v7966_v42 = vmul.f32 0.25, %v7965_v41 }
0x245d   :  { %v7967_v43 = vadd.f32 1e-05, %v7966_v42 }
0x245f   :  { %17589 = vrsqrt.f32 %v7967_v43  ;;  %v7981_v56 = vpop.permute.xlu0 %7980 }
0x2469   :  { %v17590_v46 = vpop.eup %17589 }
0x246a   :  { %v7969_v47 = vmul.f32 %v17590_v46, %v7953_v54  ;;  %v7970_v48 = vmul.f32 %v17590_v46, %v7954_v57  ;;  %v14765_v57 = vld [vmem:[%s19870_s2 + $0x8c] sm:$0xf] }
0x246b   :  { %v8189_v32 = vpack.c.bf16 %v14765_v57, %v14765_v57 }
0x246c   :  { %v7976_v51 = vmul.f32 %v7974_v50, %v7969_v47  ;;  %v7977_v52 = vmul.f32 %v7974_v50, %v7970_v48  ;;  %v14781_v50 = vld [vmem:[%s19869_s1 + $0x60] sm:$0xf] }
0x246e   :  { %v7983_v30 = vadd.f32 %v7981_v56, %v7976_v51  ;;  %v7984_v31 = vadd.f32 %v7981_v56, %v7977_v52 }
0x2470   :  { %v7985_v60 = vmax.f32 %v7983_v30, 0.0  ;;  %v7986_v61 = vmax.f32 %v7984_v31, 0.0 }
0x2472   :  { %v17491_v63 = vpack.i.bf16 %v7986_v61, %v7985_v60  ;;  %v8001_v2 = vpack.c.bf16 %v7985_v60, %v7985_v60  ;;  %v8002_v49 = vpack.c.bf16 %v7986_v61, %v7986_v61 }
0x2474   :  { %17492 = vrot.lane.b32.xlu1 %v17491_v63, %s17670_s10  ;;  %v8007_v3 = vsel %vm108_vm3, %v8001_v2, 0  ;;  %v8050_v4 = vsel %vm108_vm3, %v8002_v49, 0 }
0x2475   :  { %16129 = vmatpush3.bf16.msra.mxu0 %v8007_v3  ;;  %16135 = vmatpush3.bf16.msra.mxu1 %v8050_v4  ;;  %v14782_v4 = vld [vmem:[%s19869_s1 + $0x64] sm:$0xf] }
0x2476   :  { %16140 = vmatprep.subr.bf16.mxu0 %v17668_v19  ;;  %16146 = vmatprep.subr.bf16.mxu1 %v17668_v19 }
0x2478   :  { %17497 = vrot.lane.b32.xlu1 %v17491_v63, %s17671_s11  ;;  %16131 = vmatmul.mubr.msk.bf16.vlgmr.msra.gmra.mrb[44].mxu0 %vm104_vm4, %v8000_v8 }
0x2479   :  { %16137 = vmatmul.mubr.msk.bf16.vlgmr.msra.gmra.mrb[44].mxu1 %vm104_vm4, %v8000_v8  ;;  %16142 = vmatprep.mubr.msk.bf16.mxu0 %vm17669_vm2, %v17668_v19 }
0x247a   :  { %16148 = vmatprep.mubr.msk.bf16.mxu1 %vm17669_vm2, %v17668_v19 }
0x24e6   :  { %v17493_v10 = vpop.permute.xlu1 %17492 }
0x24e7   :  { %v17495_v5 = vunpack.i.h.bf16 %v17493_v10  ;;  %v17494_v11 = vunpack.i.l.bf16 %v17493_v10 }
0x24e9   :  { %v7996_v12 = vsel %vm95_vm5, 0.0, %v17495_v5  ;;  %v7995_v13 = vsel %vm95_vm5, 0.0, %v17494_v11 }
0x24ea   :  { %v7999_v15 = vpack.c.bf16 %v7996_v12, %v7996_v12  ;;  %v7998_v25 = vpack.c.bf16 %v7995_v13, %v7995_v13  ;;  %v17498_v16 = vpop.permute.xlu1 %17497 }
0x24eb   :  { %v17500_v26 = vunpack.i.h.bf16 %v17498_v16  ;;  %v17499_v17 = vunpack.i.l.bf16 %v17498_v16 }
0x24ec   :  { %v8139_v18 = vsel %vm108_vm3, %v7999_v15, 0  ;;  %v8096_v20 = vsel %vm108_vm3, %v7998_v25, 0 }
0x24ed   :  { %v8188_v22 = vsel %vm95_vm5, %v17500_v26, 0.0  ;;  %v8187_v21 = vsel %vm95_vm5, %v17499_v17, 0.0  ;;  %16141 = vmatpush3.bf16.msra.mxu0 %v8096_v20  ;;  %16147 = vmatpush3.bf16.msra.mxu1 %v8139_v18 }
0x24ee   :  { %v8191_v0 = vpack.c.bf16 %v8188_v22, %v8188_v22  ;;  %v8190_v1 = vpack.c.bf16 %v8187_v21, %v8187_v21  ;;  %16152 = vmatprep.subr.bf16.mxu0 %v17668_v19  ;;  %16158 = vmatprep.subr.bf16.mxu1 %v17668_v19 }
0x24f0   :  { %v8239_v24 = vsel %vm108_vm3, %v8191_v0, 0  ;;  %v8196_v54 = vsel %vm108_vm3, %v8190_v1, 0  ;;  %16143 = vmatmul.mubr.msk.bf16.vlgmr.msra.gmra.mrb[44].mxu0 %vm104_vm4, %v7997_v45  ;;  %16149 = vmatmul.mubr.msk.bf16.vlgmr.msra.gmra.mrb[44].mxu1 %vm104_vm4, %v7997_v45  ;;  %v14786_v1 = vld [vmem:[%s19870_s2 + $0x94] sm:$0xf] }
0x24f1   :  { %16153 = vmatpush3.bf16.msra.mxu0 %v8196_v54  ;;  %16159 = vmatpush3.bf16.msra.mxu1 %v8239_v24 }
0x24f2   :  { %16154 = vmatprep.mubr.msk.bf16.mxu0 %vm17669_vm2, %v17668_v19  ;;  %16160 = vmatprep.mubr.msk.bf16.mxu1 %vm17669_vm2, %v17668_v19 }
0x24f3   :  { %16164 = vmatprep.subr.bf16.mxu0 %v17668_v19  ;;  %16170 = vmatprep.subr.bf16.mxu1 %v17668_v19 }
0x24fc   :  { %16155 = vmatmul.mubr.msk.bf16.vlgmr.msra.gmra.mrb[44].mxu0 %vm104_vm4, %v8189_v32  ;;  %16161 = vmatmul.mubr.msk.bf16.vlgmr.msra.gmra.mrb[44].mxu1 %vm104_vm4, %v8189_v32  ;;  %v8448_v32 = vpack.c.bf16 %v14786_v1, %v14786_v1 }
0x24fd   :  { %16165 = vmatpush3.bf16.msra.mxu0 %v8290_v33  ;;  %16171 = vmatpush3.bf16.msra.mxu1 %v8333_v34 }
0x24fe   :  { %16166 = vmatprep.mubr.msk.bf16.mxu0 %vm17669_vm2, %v17668_v19  ;;  %16172 = vmatprep.mubr.msk.bf16.mxu1 %vm17669_vm2, %v17668_v19 }
0x24ff   :  { %16176 = vmatprep.subr.bf16.mxu0 %v17668_v19  ;;  %16182 = vmatprep.subr.bf16.mxu1 %v17668_v19 }
0x2508   :  { %16167 = vmatmul.mubr.msk.bf16.vlgmr.msra.gmra.mrb[44].mxu0 %vm104_vm4, %v8283_v55  ;;  %16173 = vmatmul.mubr.msk.bf16.vlgmr.msra.gmra.mrb[44].mxu1 %vm104_vm4, %v8283_v55 }
0x2509   :  { %16178 = vmatprep.mubr.msk.bf16.mxu0 %vm17669_vm2, %v17668_v19  ;;  %16184 = vmatprep.mubr.msk.bf16.mxu1 %vm17669_vm2, %v17668_v19 }
0x25db   :  { %v19036_v35 = vpop.f32.mrb[44].mxu0  ;;  %v19038_v36 = vpop.f32.mrb[44].mxu1 }
0x25dc   :  { %v16168_v39 = vpop.f32.mrb[45].mxu0  ;;  %v16174_v40 = vpop.f32.mrb[45].mxu1  ;;  %v8394_v41 = vsel %vm7602_vm15, %v19038_v36, 0.0  ;;  %v8391_v42 = vsel %vm7602_vm15, %v19036_v35, 0.0 }
0x25dd   :  { %8395 = vadd.xlane.f32.xlu1 %v8394_v41  ;;  %v8372_v43 = vpop.f32.mrb[46].mxu1  ;;  %8392 = vadd.xlane.f32.xlu0 %v8391_v42  ;;  %v8329_v46 = vpop.f32.mrb[46].mxu0  ;;  %v14785_v40 = vld [vmem:[%s19870_s2 + $0x90] sm:$0xf] }
0x25de   :  { %v16169_v47 = vpop.f32.mrb[47].mxu0  ;;  %v16175_v48 = vpop.f32.mrb[47].mxu1 }
0x25ee   :  { %8421 = vperm.xlu1 %17399, %v14781_v50  }
0x266a   :  { %v8396_v51 = vpop.xlane.xlu1 %8395  ;;  %v8393_v52 = vpop.xlane.xlu0 %8392 }
0x266b   :  { %v8398_v56 = vsel %vm48_vm1, %v8396_v51, 0.0  ;;  %v8397_v30 = vsel %vm48_vm1, %v8393_v52, 0.0  ;;  %v8445_v51 = vpack.c.bf16 %v14785_v40, %v14785_v40 }
0x266c   :  { %v8399_v31 = vadd.f32 %v8398_v56, %v8397_v30 }
0x266e   :  { %v8400_v60 = vmul.f32 0.25, %v8399_v31  ;;  %v8422_v26 = vpop.permute.xlu1 %8421 }
0x2670   :  { %v8401_v61 = vsub.f32 %v19036_v35, %v8400_v60  ;;  %v8402_v62 = vsub.f32 %v19038_v36, %v8400_v60 }
0x2672   :  { %v8403_v63 = vmul.f32 %v8401_v61, %v8401_v61  ;;  %v8404_v49 = vmul.f32 %v8402_v62, %v8402_v62 }
0x2674   :  { %v8405_v2 = vsel %vm7602_vm15, %v8403_v63, 0.0  ;;  %v8408_v3 = vsel %vm7602_vm15, %v8404_v49, 0.0 }
0x2675   :  { %8406 = vadd.xlane.f32.xlu0 %v8405_v2 }
0x2679   :  { %8409 = vadd.xlane.f32.xlu0 %v8408_v3 }
0x268f   :  { %8428 = vperm.xlu0 %17400, %v14782_v4  }
0x2702   :  { %v8407_v8 = vpop.xlane.xlu0 %8406 }
0x2703   :  { %v8411_v5 = vsel %vm48_vm1, %v8407_v8, 0.0 }
0x2706   :  { %v8410_v10 = vpop.xlane.xlu0 %8409 }
0x2707   :  { %v8412_v11 = vsel %vm48_vm1, %v8410_v10, 0.0 }
0x2708   :  { %v8413_v12 = vadd.f32 %v8412_v11, %v8411_v5 }
0x270a   :  { %v8414_v13 = vmul.f32 0.25, %v8413_v12 }
0x270c   :  { %v8415_v14 = vadd.f32 1e-05, %v8414_v13 }
0x270e   :  { %17591 = vrsqrt.f32 %v8415_v14  ;;  %v8429_v20 = vpop.permute.xlu0 %8428  ;;  %v14783_v14 = vld [vmem:[%s19869_s1 + $0x68] sm:$0xf] }
0x2718   :  { %v17592_v15 = vpop.eup %17591 }
0x2719   :  { %v8417_v25 = vmul.f32 %v17592_v15, %v8401_v61  ;;  %v8418_v16 = vmul.f32 %v17592_v15, %v8402_v62  ;;  %v14787_v62 = vld [vmem:[%s19870_s2 + $0x98] sm:$0xf] }
0x271a   :  { %v8637_v63 = vpack.c.bf16 %v14787_v62, %v14787_v62 }
0x271b   :  { %v8424_v17 = vmul.f32 %v8422_v26, %v8417_v25  ;;  %v8425_v18 = vmul.f32 %v8422_v26, %v8418_v16 }
0x271d   :  { %v8431_v45 = vadd.f32 %v8429_v20, %v8424_v17  ;;  %v8432_v22 = vadd.f32 %v8429_v20, %v8425_v18 }
0x271f   :  { %v8433_v21 = vmax.f32 %v8431_v45, 0.0  ;;  %v8434_v0 = vmax.f32 %v8432_v22, 0.0 }
0x2721   :  { %v17501_v24 = vpack.i.bf16 %v8434_v0, %v8433_v21  ;;  %v8449_v54 = vpack.c.bf16 %v8433_v21, %v8433_v21  ;;  %v8450_v57 = vpack.c.bf16 %v8434_v0, %v8434_v0 }
0x2723   :  { %17502 = vrot.lane.b32.xlu1 %v17501_v24, %s17670_s10  ;;  %v8455_v27 = vsel %vm108_vm3, %v8449_v54, 0  ;;  %v8498_v29 = vsel %vm108_vm3, %v8450_v57, 0 }
0x2724   :  { %16177 = vmatpush3.bf16.msra.mxu0 %v8455_v27  ;;  %16183 = vmatpush3.bf16.msra.mxu1 %v8498_v29 }
0x2725   :  { %16188 = vmatprep.subr.bf16.mxu0 %v17668_v19  ;;  %16194 = vmatprep.subr.bf16.mxu1 %v17668_v19 }
0x2727   :  { %17507 = vrot.lane.b32.xlu1 %v17501_v24, %s17671_s11  ;;  %16179 = vmatmul.mubr.msk.bf16.vlgmr.msra.gmra.mrb[48].mxu0 %vm104_vm4, %v8448_v32  ;;  %v14784_v24 = vld [vmem:[%s19869_s1 + $0x6c] sm:$0xf] }
0x2728   :  { %16185 = vmatmul.mubr.msk.bf16.vlgmr.msra.gmra.mrb[48].mxu1 %vm104_vm4, %v8448_v32  ;;  %16190 = vmatprep.mubr.msk.bf16.mxu0 %vm17669_vm2, %v17668_v19 }
0x2729   :  { %16196 = vmatprep.mubr.msk.bf16.mxu1 %vm17669_vm2, %v17668_v19 }
0x2795   :  { %v17503_v33 = vpop.permute.xlu1 %17502 }
0x2796   :  { %v17505_v34 = vunpack.i.h.bf16 %v17503_v33  ;;  %v17504_v53 = vunpack.i.l.bf16 %v17503_v33 }
0x2798   :  { %v8444_v55 = vsel %vm95_vm5, 0.0, %v17505_v34  ;;  %v8443_v39 = vsel %vm95_vm5, 0.0, %v17504_v53 }
0x2799   :  { %v8447_v41 = vpack.c.bf16 %v8444_v55, %v8444_v55  ;;  %v8446_v42 = vpack.c.bf16 %v8443_v39, %v8443_v39  ;;  %v17508_v43 = vpop.permute.xlu1 %17507 }
0x279a   :  { %v17510_v46 = vunpack.i.h.bf16 %v17508_v43  ;;  %v17509_v47 = vunpack.i.l.bf16 %v17508_v43 }
0x279b   :  { %v8587_v48 = vsel %vm108_vm3, %v8447_v41, 0  ;;  %v8544_v50 = vsel %vm108_vm3, %v8446_v42, 0 }
0x279c   :  { %v8636_v52 = vsel %vm95_vm5, %v17510_v46, 0.0  ;;  %v8635_v56 = vsel %vm95_vm5, %v17509_v47, 0.0  ;;  %16189 = vmatpush3.bf16.msra.mxu0 %v8544_v50  ;;  %16195 = vmatpush3.bf16.msra.mxu1 %v8587_v48 }
0x279d   :  { %v8639_v30 = vpack.c.bf16 %v8636_v52, %v8636_v52  ;;  %v8638_v31 = vpack.c.bf16 %v8635_v56, %v8635_v56  ;;  %16200 = vmatprep.subr.bf16.mxu0 %v17668_v19  ;;  %16206 = vmatprep.subr.bf16.mxu1 %v17668_v19 }
0x279f   :  { %v8687_v60 = vsel %vm108_vm3, %v8639_v30, 0  ;;  %v8644_v61 = vsel %vm108_vm3, %v8638_v31, 0  ;;  %16191 = vmatmul.mubr.msk.bf16.vlgmr.msra.gmra.mrb[48].mxu0 %vm104_vm4, %v8445_v51  ;;  %16197 = vmatmul.mubr.msk.bf16.vlgmr.msra.gmra.mrb[48].mxu1 %vm104_vm4, %v8445_v51  ;;  %v14789_v51 = vld [vmem:[%s19870_s2 + $0xa0] sm:$0xf] }
0x27a0   :  { %16201 = vmatpush3.bf16.msra.mxu0 %v8644_v61  ;;  %16207 = vmatpush3.bf16.msra.mxu1 %v8687_v60  ;;  %v8788_v60 = vpack.c.bf16 %v14789_v51, %v14789_v51 }
0x27a1   :  { %16202 = vmatprep.mubr.msk.bf16.mxu0 %vm17669_vm2, %v17668_v19  ;;  %16208 = vmatprep.mubr.msk.bf16.mxu1 %vm17669_vm2, %v17668_v19 }
0x27a2   :  { %16212 = vmatprep.subr.bf16.mxu0 %v17668_v19  ;;  %16218 = vmatprep.subr.bf16.mxu1 %v17668_v19 }
0x27ab   :  { %16203 = vmatmul.mubr.msk.bf16.vlgmr.msra.gmra.mrb[48].mxu0 %vm104_vm4, %v8637_v63  ;;  %16209 = vmatmul.mubr.msk.bf16.vlgmr.msra.gmra.mrb[48].mxu1 %vm104_vm4, %v8637_v63 }
0x27ac   :  { %16214 = vmatprep.mubr.msk.bf16.mxu0 %vm17669_vm2, %v17668_v19  ;;  %16220 = vmatprep.mubr.msk.bf16.mxu1 %vm17669_vm2, %v17668_v19 }
0x287e   :  { %v8680_v2 = vpop.f32.mrb[48].mxu0  ;;  %v8723_v49 = vpop.f32.mrb[48].mxu1 }
0x287f   :  { %v16204_v3 = vpop.f32.mrb[49].mxu0  ;;  %v16210_v4 = vpop.f32.mrb[49].mxu1  ;;  %v8734_v8 = vsel %vm7602_vm15, %v8723_v49, 0.0  ;;  %v8731_v10 = vsel %vm7602_vm15, %v8680_v2, 0.0 }
0x2880   :  { %8735 = vadd.xlane.f32.xlu1 %v8734_v8  ;;  %v8726_v5 = vpop.f32.mrb[50].mxu1  ;;  %8732 = vadd.xlane.f32.xlu0 %v8731_v10  ;;  %v8683_v11 = vpop.f32.mrb[50].mxu0 }
0x2881   :  { %v16205_v12 = vpop.f32.mrb[51].mxu0  ;;  %v16211_v13 = vpop.f32.mrb[51].mxu1 }
0x2891   :  { %8761 = vperm.xlu1 %17399, %v14783_v14  }
0x290d   :  { %v8736_v15 = vpop.xlane.xlu1 %8735  ;;  %v8733_v25 = vpop.xlane.xlu0 %8732 }
0x290e   :  { %v8738_v16 = vsel %vm48_vm1, %v8736_v15, 0.0  ;;  %v8737_v26 = vsel %vm48_vm1, %v8733_v25, 0.0 }
0x290f   :  { %v8739_v17 = vadd.f32 %v8738_v16, %v8737_v26 }
0x2911   :  { %v8740_v18 = vmul.f32 0.25, %v8739_v17  ;;  %v8762_v40 = vpop.permute.xlu1 %8761  ;;  %v14790_v17 = vld [vmem:[%s19870_s2 + $0xa4] sm:$0xf] }
0x2913   :  { %v8741_v20 = vsub.f32 %v8680_v2, %v8740_v18  ;;  %v8742_v45 = vsub.f32 %v8723_v49, %v8740_v18  ;;  %v14788_v49 = vld [vmem:[%s19870_s2 + $0x9c] sm:$0xf]  ;;  %v9072_v18 = vpack.c.bf16 %v19036_v35, %v19036_v35  ;;  %v14791_v35 = vld [vmem:[%s19871_s3 + $0x18] sm:$0xf] }
0x2914   :  { %v8785_v5 = vpack.c.bf16 %v14788_v49, %v14788_v49 }
0x2915   :  { %v8743_v22 = vmul.f32 %v8741_v20, %v8741_v20  ;;  %v8744_v0 = vmul.f32 %v8742_v45, %v8742_v45 }
0x2917   :  { %v8745_v21 = vsel %vm7602_vm15, %v8743_v22, 0.0  ;;  %v8748_v1 = vsel %vm7602_vm15, %v8744_v0, 0.0  ;;  %v9078_v22 = vsel %vm108_vm3, %v9072_v18, 0  ;;  %v19182_v0 = vadd.s32 1, %v18047_v6 }
0x2918   :  { %8746 = vadd.xlane.f32.xlu0 %v8745_v21  ;;  %vm9173_vm15 = vcmask 15360  }
0x291c   :  { %8749 = vadd.xlane.f32.xlu0 %v8748_v1  ;;  %v9165_v1 = vmul.u32 4, %v18047_v6 }
0x291e   :  { %vm9166_vm8 = vcmp.le.s32.totalorder %v9165_v1, %v18062_v9  ;;  %v14814_v1 = vld [vmem:[%s19869_s1 + $0x74] sm:$0xf] }
0x2932   :  { %8768 = vperm.xlu0 %17400, %v14784_v24   ;;  %v9168_v24 = vmul.u32 4, %v19182_v0 }
0x2934   :  { %vm9169_vm11 = vcmp.lt.s32.totalorder %v18062_v9, %v9168_v24 }
0x2935   :  { %vm9170_vm12 = vmand %vm9166_vm8, %vm9169_vm11 }
0x29a5   :  { %v8747_v54 = vpop.xlane.xlu0 %8746 }
0x29a6   :  { %v8751_v27 = vsel %vm48_vm1, %v8747_v54, 0.0  ;;  %v19189_v54 = vsel %vm9170_vm12, 1.0, %v17668_v19 }
0x29a9   :  { %v8750_v57 = vpop.xlane.xlu0 %8749 }
0x29aa   :  { %v8752_v29 = vsel %vm48_vm1, %v8750_v57, 0.0  ;;  %v9178_v57 = vsel %vm108_vm3, %v19189_v54, 0 }
0x29ab   :  { %v8753_v32 = vadd.f32 %v8752_v29, %v8751_v27  ;;  %v9258_v27 = vsub.f32 %v9178_v57, %v9178_v57 }
0x29ad   :  { %v8754_v33 = vmul.f32 0.25, %v8753_v32  ;;  %v9259_v29 = vand.u32 4294901760, %v9258_v27 }
0x29af   :  { %v8755_v34 = vadd.f32 1e-05, %v8754_v33  ;;  %v9260_v32 = vsub.f32 %v9258_v27, %v9259_v29 }
0x29b1   :  { %17593 = vrsqrt.f32 %v8755_v34  ;;  %v8769_v43 = vpop.permute.xlu0 %8768  ;;  %v9261_v33 = vand.u32 4294901760, %v9260_v32 }
0x29bb   :  { %v17594_v53 = vpop.eup %17593 }
0x29bc   :  { %v8757_v55 = vmul.f32 %v17594_v53, %v8741_v20  ;;  %v8758_v39 = vmul.f32 %v17594_v53, %v8742_v45  ;;  %v8977_v20 = vpack.c.bf16 %v14790_v17, %v14790_v17  ;;  %v9073_v45 = vpack.c.bf16 %v19038_v36, %v19038_v36 }
0x29bd   :  { %v9071_v36 = vpack.c.bf16 %v14791_v35, %v14791_v35 }
0x29be   :  { %v8764_v41 = vmul.f32 %v8762_v40, %v8757_v55  ;;  %v8765_v42 = vmul.f32 %v8762_v40, %v8758_v39  ;;  %v9121_v21 = vsel %vm108_vm3, %v9073_v45, 0 }
0x29c0   :  { %v8771_v46 = vadd.f32 %v8769_v43, %v8764_v41  ;;  %v8772_v47 = vadd.f32 %v8769_v43, %v8765_v42 }
0x29c2   :  { %v8773_v48 = vmax.f32 %v8771_v46, 0.0  ;;  %v8774_v50 = vmax.f32 %v8772_v47, 0.0 }
0x29c4   :  { %8969 = vrot.lane.b32.xlu0 %v8773_v48, %s17671_s11  ;;  %8777 = vrot.lane.b32.xlu1 %v8773_v48, %s17670_s10  ;;  %v8789_v52 = vpack.c.bf16 %v8773_v48, %v8773_v48  ;;  %v8790_v56 = vpack.c.bf16 %v8774_v50, %v8774_v50 }
0x29c6   :  { %v8795_v30 = vsel %vm108_vm3, %v8789_v52, 0  ;;  %v8838_v31 = vsel %vm108_vm3, %v8790_v56, 0 }
0x29c7   :  { %16213 = vmatpush3.bf16.msra.mxu0 %v8795_v30  ;;  %16219 = vmatpush3.bf16.msra.mxu1 %v8838_v31 }
0x29c8   :  { %8779 = vrot.lane.b32.xlu1 %v8774_v50, %s17670_s10  ;;  %16224 = vmatprep.subr.bf16.mxu0 %v17668_v19 }
0x29c9   :  { %16230 = vmatprep.subr.bf16.mxu1 %v17668_v19 }
0x29ca   :  { %16215 = vmatmul.mubr.msk.bf16.vlgmr.msra.gmra.mrb[52].mxu0 %vm104_vm4, %v8788_v60  ;;  %16221 = vmatmul.mubr.msk.bf16.vlgmr.msra.gmra.mrb[52].mxu1 %vm104_vm4, %v8788_v60 }
0x29cb   :  { %16226 = vmatprep.mubr.msk.bf16.mxu0 %vm17669_vm2, %v17668_v19  ;;  %16232 = vmatprep.mubr.msk.bf16.mxu1 %vm17669_vm2, %v17668_v19 }
0x29cc   :  { %8971 = vrot.lane.b32.xlu1 %v8774_v50, %s17671_s11 }
0x2a36   :  { %v8970_v61 = vpop.permute.xlu0 %8969  ;;  %v8778_v62 = vpop.permute.xlu1 %8777 }
0x2a37   :  { %v8975_v63 = vsel %vm95_vm5, %v8970_v61, 0.0  ;;  %v8783_v2 = vsel %vm95_vm5, 0.0, %v8778_v62 }
0x2a38   :  { %v8786_v3 = vpack.c.bf16 %v8783_v2, %v8783_v2  ;;  %v8978_v4 = vpack.c.bf16 %v8975_v63, %v8975_v63 }
0x2a3a   :  { %v8884_v8 = vsel %vm108_vm3, %v8786_v3, 0  ;;  %v8780_v10 = vpop.permute.xlu1 %8779  ;;  %v8984_v13 = vsel %vm108_vm3, %v8978_v4, 0 }
0x2a3b   :  { %v8784_v11 = vsel %vm95_vm5, 0.0, %v8780_v10  ;;  %16225 = vmatpush3.bf16.msra.mxu0 %v8884_v8 }
0x2a3c   :  { %v8787_v12 = vpack.c.bf16 %v8784_v11, %v8784_v11  ;;  %16236 = vmatprep.subr.bf16.mxu0 %v17668_v19 }
0x2a3e   :  { %v8927_v14 = vsel %vm108_vm3, %v8787_v12, 0  ;;  %v8972_v15 = vpop.permute.xlu1 %8971  ;;  %16227 = vmatmul.mubr.msk.bf16.vlgmr.msra.gmra.mrb[52].mxu0 %vm104_vm4, %v8785_v5 }
0x2a3f   :  { %v8976_v25 = vsel %vm95_vm5, %v8972_v15, 0.0  ;;  %16231 = vmatpush3.bf16.msra.mxu1 %v8927_v14  ;;  %16237 = vmatpush3.bf16.msra.mxu0 %v8984_v13 }
0x2a40   :  { %v8979_v16 = vpack.c.bf16 %v8976_v25, %v8976_v25  ;;  %16242 = vmatprep.subr.bf16.mxu1 %v17668_v19  ;;  %16238 = vmatprep.mubr.msk.bf16.mxu0 %vm17669_vm2, %v17668_v19 }
0x2a41   :  { %16248 = vmatprep.subr.bf16.mxu0 %v17668_v19 }
0x2a42   :  { %v9027_v26 = vsel %vm108_vm3, %v8979_v16, 0  ;;  %16233 = vmatmul.mubr.msk.bf16.vlgmr.msra.gmra.mrb[52].mxu1 %vm104_vm4, %v8785_v5 }
0x2a43   :  { %16243 = vmatpush3.bf16.msra.mxu1 %v9027_v26  ;;  %16244 = vmatprep.mubr.msk.bf16.mxu1 %vm17669_vm2, %v17668_v19 }
0x2a44   :  { %16254 = vmatprep.subr.bf16.mxu1 %v17668_v19 }
0x2a4a   :  { %16239 = vmatmul.mubr.msk.bf16.vlgmr.msra.gmra.mrb[52].mxu0 %vm104_vm4, %v8977_v20 }
0x2a4b   :  { %16249 = vmatpush3.bf16.msra.mxu0 %v9078_v22  ;;  %16250 = vmatprep.mubr.msk.bf16.mxu0 %vm17669_vm2, %v17668_v19 }
0x2a4c   :  { %16260 = vmatprep.subr.mxu0 %v17668_v19 }
0x2a4e   :  { %16245 = vmatmul.mubr.msk.bf16.vlgmr.msra.gmra.mrb[52].mxu1 %vm104_vm4, %v8977_v20 }
0x2a4f   :  { %16255 = vmatpush3.bf16.msra.mxu1 %v9121_v21  ;;  %16256 = vmatprep.mubr.msk.bf16.mxu1 %vm17669_vm2, %v17668_v19 }
0x2a50   :  { %16265 = vmatprep.subr.mxu1 %v17668_v19 }
0x2a56   :  { %16251 = vmatmul.mubr.msk.bf16.vlgmr.msra.gmra.mrb[52].mxu0 %vm104_vm4, %v9071_v36 }
0x2a57   :  { %16262 = vmatprep.mubr.msk.f32.mxu0 %vm17669_vm2, %v17668_v19  ;;  %16261 = vmatpush3.msk.msra.mxu0 %vm108_vm3, %v19189_v54 }
0x2a58   :  { %16290 = vmatprep.subr.mxu0 %v17668_v19 }
0x2a5a   :  { %16257 = vmatmul.mubr.msk.bf16.vlgmr.msra.gmra.mrb[52].mxu1 %vm104_vm4, %v9071_v36 }
0x2a5b   :  { %16267 = vmatprep.mubr.msk.f32.mxu1 %vm17669_vm2, %v17668_v19  ;;  %16266 = vmatpush3.msra.mxu1 %v9261_v33 }
0x2a5c   :  { %16270 = vmatprep.subr.mxu1 %v17668_v19 }
0x2b29   :  { %v9114_v9 = vpop.f32.mrb[52].mxu0 }
0x2b2a   :  { %v9175_v34 = vsel %vm9173_vm15, %v9114_v9, 0  ;;  %v16252_v53 = vpop.f32.mrb[53].mxu0 }
0x2b2b   :  { %v9246_v55 = vand.u32 4294901760, %v9175_v34  ;;  %v9117_v39 = vpop.f32.mrb[54].mxu0 }
0x2b2c   :  { %v16253_v40 = vpop.f32.mrb[55].mxu0 }
0x2b2d   :  { %v9247_v41 = vsub.f32 %v9175_v34, %v9246_v55  ;;  %v9157_v42 = vpop.f32.mrb[52].mxu1  ;;  %16268 = vmatmul.mubr.f32.vlgmr.msra.gmra.mrb[56].mxu1 %v9246_v55 }
0x2b2e   :  { %v9627_v43 = vsel %vm9173_vm15, %v9157_v42, 0  ;;  %v16258_v46 = vpop.f32.mrb[53].mxu1  ;;  %16271 = vmatpush3.msra.mxu1 %v9258_v27  ;;  %16272 = vmatprep.mubr.msk.f32.mxu1 %vm17669_vm2, %v17668_v19 }
0x2b2f   :  { %v9248_v47 = vand.u32 4294901760, %v9247_v41  ;;  %v9695_v48 = vand.u32 4294901760, %v9627_v43  ;;  %v9160_v50 = vpop.f32.mrb[54].mxu1  ;;  %16275 = vmatprep.subr.mxu1 %v17668_v19 }
0x2b30   :  { %v16259_v51 = vpop.f32.mrb[55].mxu1 }
0x2b31   :  { %v9249_v52 = vsub.f32 %v9247_v41, %v9248_v47  ;;  %v9696_v56 = vsub.f32 %v9627_v43, %v9695_v48 }
0x2b33   :  { %v9250_v30 = vand.u32 4294901760, %v9249_v52  ;;  %v9697_v31 = vand.u32 4294901760, %v9696_v56 }
0x2b35   :  { %v9698_v60 = vsub.f32 %v9696_v56, %v9697_v31  ;;  %16263 = vmatmul.mubr.f32.vlgmr.msra.gmra.mrb[38].mxu0 %v9250_v30  ;;  %16273 = vmatmul.mubr.f32.vlgmr.msra.gmra.mrb[56].mxu1 %v9247_v41 }
0x2b36   :  { %16291 = vmatpush3.msk.msra.mxu0 %vm108_vm3, %v19189_v54  ;;  %16292 = vmatprep.mubr.msk.f32.mxu0 %vm17669_vm2, %v17668_v19 }
0x2b37   :  { %v9699_v61 = vand.u32 4294901760, %v9698_v60  ;;  %16295 = vmatprep.subr.mxu0 %v17668_v19  ;;  %16276 = vmatpush3.msk.msra.mxu1 %vm108_vm3, %v19189_v54 }
0x2b38   :  { %16277 = vmatprep.mubr.msk.f32.mxu1 %vm17669_vm2, %v17668_v19  ;;  %16280 = vmatprep.subr.mxu1 %v17668_v19 }
0x2b39   :  { %16293 = vmatmul.mubr.f32.vlgmr.msra.gmra.mrb[56].mxu0 %v9699_v61 }
0x2b3a   :  { %16296 = vmatpush3.msra.mxu0 %v9261_v33  ;;  %16297 = vmatprep.mubr.msk.f32.mxu0 %vm17669_vm2, %v17668_v19 }
0x2b3b   :  { %16300 = vmatprep.subr.mxu0 %v17668_v19 }
0x2b3d   :  { %16278 = vmatmul.mubr.f32.vlgmr.msra.gmra.mrb[56].mxu1 %v9248_v47  ;;  %16298 = vmatmul.mubr.f32.vlgmr.msra.gmra.mrb[58].mxu0 %v9695_v48 }
0x2b3e   :  { %16281 = vmatpush3.msra.mxu1 %v9259_v29  ;;  %16282 = vmatprep.mubr.msk.f32.mxu1 %vm17669_vm2, %v17668_v19 }
0x2b3f   :  { %16301 = vmatpush3.msra.mxu0 %v9258_v27  ;;  %16302 = vmatprep.mubr.msk.f32.mxu0 %vm17669_vm2, %v17668_v19 }
0x2b40   :  { %16285 = vmatprep.subr.mxu1 %v17668_v19  ;;  %16305 = vmatprep.subr.mxu0 %v17668_v19 }
0x2b45   :  { %16283 = vmatmul.mubr.f32.vlgmr.msra.gmra.mrb[56].mxu1 %v9246_v55  ;;  %16303 = vmatmul.mubr.f32.vlgmr.msra.gmra.mrb[58].mxu0 %v9696_v56 }
0x2b46   :  { %16286 = vmatpush3.msk.msra.mxu1 %vm108_vm3, %v19189_v54  ;;  %16287 = vmatprep.mubr.msk.f32.mxu1 %vm17669_vm2, %v17668_v19 }
0x2b47   :  { %16306 = vmatpush3.msk.msra.mxu0 %vm108_vm3, %v19189_v54  ;;  %16307 = vmatprep.mubr.msk.f32.mxu0 %vm17669_vm2, %v17668_v19 }
0x2b48   :  { %16310 = vmatprep.subr.mxu0 %v17668_v19  ;;  %16320 = vmatprep.subr.bf16.mxu1 %v17668_v19 }
0x2b4d   :  { %16288 = vmatmul.mubr.f32.vlgmr.msra.gmra.mrb[56].mxu1 %v9246_v55  ;;  %16308 = vmatmul.mubr.f32.vlgmr.msra.gmra.mrb[58].mxu0 %v9697_v31 }
0x2b4e   :  { %16311 = vmatpush3.msra.mxu0 %v9259_v29  ;;  %16312 = vmatprep.mubr.msk.f32.mxu0 %vm17669_vm2, %v17668_v19 }
0x2b4f   :  { %16315 = vmatprep.subr.mxu0 %v17668_v19  ;;  %16322 = vmatprep.mubr.msk.bf16.mxu1 %vm17669_vm2, %v17668_v19 }
0x2b55   :  { %16313 = vmatmul.mubr.f32.vlgmr.msra.gmra.mrb[58].mxu0 %v9695_v48 }
0x2b56   :  { %16316 = vmatpush3.msk.msra.mxu0 %vm108_vm3, %v19189_v54  ;;  %16317 = vmatprep.mubr.msk.f32.mxu0 %vm17669_vm2, %v17668_v19 }
0x2b57   :  { %16326 = vmatprep.subr.bf16.mxu0 %v17668_v19 }
0x2b5d   :  { %16318 = vmatmul.mubr.f32.vlgmr.msra.gmra.mrb[58].mxu0 %v9695_v48  ;;  %v14818_v48 = vld [vmem:[%s19870_s2 + $0xac] sm:$0xf] }
0x2b5e   :  { %16328 = vmatprep.mubr.msk.bf16.mxu0 %vm17669_vm2, %v17668_v19  ;;  %v10146_v31 = vpack.c.bf16 %v14818_v48, %v14818_v48 }
0x2c08   :  { %v9252_v62 = vpop.f32.mrb[38].mxu0 }
0x2c09   :  { %v9253_v63 = vadd.f32 %v9252_v62, %v18889_v44  ;;  %v16264_v2 = vpop.f32.mrb[39].mxu0 }
0x2c0c   :  { %v9701_v49 = vpop.f32.mrb[56].mxu0 }
0x2c0d   :  { %v9702_v3 = vadd.f32 %v9701_v49, %v18891_v23  ;;  %v16294_v4 = vpop.f32.mrb[57].mxu0  ;;  %v14813_v23 = vld [vmem:[%s19869_s1 + $0x70] sm:$0xf]  ;;  %v14817_v49 = vld [vmem:[%s19870_s2 + $0xa8] sm:$0xf] }
0x2c20   :  { %v9622_v8 = vpop.f32.mrb[56].mxu1 }
0x2c21   :  { %v19243_v10 = vadd.f32 %v9622_v8, %v9253_v63  ;;  %v16289_v5 = vpop.f32.mrb[57].mxu1 }
0x2c23   :  { %v10089_v11 = vsel %vm5099_vm9, %v19243_v10, 0.0 }
0x2c24   :  { %10090 = vadd.xlane.f32.xlu0 %v10089_v11 }
0x2c30   :  { %v10071_v12 = vpop.f32.mrb[58].mxu0 }
0x2c31   :  { %v19247_v13 = vadd.f32 %v10071_v12, %v9702_v3  ;;  %v16319_v14 = vpop.f32.mrb[59].mxu0 }
0x2c33   :  { %v10092_v44 = vsel %vm5099_vm9, %v19247_v13, 0.0 }
0x2c34   :  { %10093 = vadd.xlane.f32.xlu1 %v10092_v44  ;;  %v10143_v44 = vpack.c.bf16 %v14817_v49, %v14817_v49 }
0x2c45   :  { %10119 = vperm.xlu1 %17399, %v14813_v23  }
0x2cb1   :  { %v10091_v15 = vpop.xlane.xlu0 %10090 }
0x2cb2   :  { %v10095_v16 = vsel %vm48_vm1, %v10091_v15, 0.0 }
0x2cc1   :  { %v10094_v25 = vpop.xlane.xlu1 %10093 }
0x2cc2   :  { %v10096_v26 = vsel %vm48_vm1, %v10094_v25, 0.0 }
0x2cc3   :  { %v10097_v17 = vadd.f32 %v10096_v26, %v10095_v16 }
0x2cc5   :  { %v10098_v18 = vmul.f32 0.125, %v10097_v17  ;;  %v10120_v55 = vpop.permute.xlu1 %10119 }
0x2cc7   :  { %v10099_v20 = vsub.f32 %v19243_v10, %v10098_v18  ;;  %v10100_v45 = vsub.f32 %v19247_v13, %v10098_v18  ;;  %v14819_v18 = vld [vmem:[%s19870_s2 + $0xb0] sm:$0xf] }
0x2cc9   :  { %v10101_v22 = vmul.f32 %v10099_v20, %v10099_v20  ;;  %v10102_v35 = vmul.f32 %v10100_v45, %v10100_v45 }
0x2ccb   :  { %v10103_v21 = vsel %vm5099_vm9, %v10101_v22, 0.0  ;;  %v10106_v36 = vsel %vm5099_vm9, %v10102_v35, 0.0 }
0x2ccc   :  { %10104 = vadd.xlane.f32.xlu0 %v10103_v21 }
0x2cd0   :  { %10107 = vadd.xlane.f32.xlu0 %v10106_v36 }
0x2ce6   :  { %10126 = vperm.xlu0 %17400, %v14814_v1  }
0x2d59   :  { %v10105_v24 = vpop.xlane.xlu0 %10104 }
0x2d5a   :  { %v10109_v57 = vsel %vm48_vm1, %v10105_v24, 0.0 }
0x2d5d   :  { %v10108_v54 = vpop.xlane.xlu0 %10107 }
0x2d5e   :  { %v10110_v27 = vsel %vm48_vm1, %v10108_v54, 0.0 }
0x2d5f   :  { %v10111_v29 = vadd.f32 %v10110_v27, %v10109_v57 }
0x2d61   :  { %v10112_v32 = vmul.f32 0.125, %v10111_v29  ;;  %v14815_v29 = vld [vmem:[%s19869_s1 + $0x78] sm:$0xf] }
0x2d63   :  { %v10113_v33 = vadd.f32 1e-05, %v10112_v32 }
0x2d65   :  { %17595 = vrsqrt.f32 %v10113_v33  ;;  %v10127_v41 = vpop.permute.xlu0 %10126 }
0x2d6f   :  { %v17596_v9 = vpop.eup %17595 }
0x2d70   :  { %v10115_v34 = vmul.f32 %v17596_v9, %v10099_v20  ;;  %v10116_v53 = vmul.f32 %v17596_v9, %v10100_v45  ;;  %v10335_v20 = vpack.c.bf16 %v14819_v18, %v14819_v18 }
0x2d72   :  { %v10122_v39 = vmul.f32 %v10120_v55, %v10115_v34  ;;  %v10123_v40 = vmul.f32 %v10120_v55, %v10116_v53 }
0x2d74   :  { %v10129_v42 = vadd.f32 %v10127_v41, %v10122_v39  ;;  %v10130_v43 = vadd.f32 %v10127_v41, %v10123_v40 }
0x2d76   :  { %v10131_v46 = vmax.f32 %v10129_v42, 0.0  ;;  %v10132_v47 = vmax.f32 %v10130_v43, 0.0 }
0x2d78   :  { %v17511_v50 = vpack.i.bf16 %v10132_v47, %v10131_v46  ;;  %v10147_v51 = vpack.c.bf16 %v10131_v46, %v10131_v46  ;;  %v10148_v52 = vpack.c.bf16 %v10132_v47, %v10132_v47  ;;  %v14816_v47 = vld [vmem:[%s19869_s1 + $0x7c] sm:$0xf] }
0x2d7a   :  { %17512 = vrot.lane.b32.xlu1 %v17511_v50, %s17670_s10  ;;  %v10153_v56 = vsel %vm108_vm3, %v10147_v51, 0  ;;  %v10196_v30 = vsel %vm108_vm3, %v10148_v52, 0 }
0x2d7b   :  { %16321 = vmatpush3.bf16.msra.mxu1 %v10153_v56  ;;  %16327 = vmatpush3.bf16.msra.mxu0 %v10196_v30 }
0x2d7c   :  { %16332 = vmatprep.subr.bf16.mxu1 %v17668_v19  ;;  %16338 = vmatprep.subr.bf16.mxu0 %v17668_v19 }
0x2d7e   :  { %17517 = vrot.lane.b32.xlu1 %v17511_v50, %s17671_s11  ;;  %16323 = vmatmul.mubr.msk.bf16.vlgmr.msra.gmra.mrb[60].mxu1 %vm104_vm4, %v10146_v31 }
0x2d7f   :  { %16329 = vmatmul.mubr.msk.bf16.vlgmr.msra.gmra.mrb[60].mxu0 %vm104_vm4, %v10146_v31  ;;  %16334 = vmatprep.mubr.msk.bf16.mxu1 %vm17669_vm2, %v17668_v19 }
0x2d80   :  { %16340 = vmatprep.mubr.msk.bf16.mxu0 %vm17669_vm2, %v17668_v19 }
0x2dec   :  { %v17513_v60 = vpop.permute.xlu1 %17512 }
0x2ded   :  { %v17515_v61 = vunpack.i.h.bf16 %v17513_v60  ;;  %v17514_v62 = vunpack.i.l.bf16 %v17513_v60 }
0x2def   :  { %v10142_v63 = vsel %vm95_vm5, 0.0, %v17515_v61  ;;  %v10141_v2 = vsel %vm95_vm5, 0.0, %v17514_v62 }
0x2df0   :  { %v10145_v3 = vpack.c.bf16 %v10142_v63, %v10142_v63  ;;  %v10144_v4 = vpack.c.bf16 %v10141_v2, %v10141_v2  ;;  %v17518_v8 = vpop.permute.xlu1 %17517 }
0x2df1   :  { %v17520_v5 = vunpack.i.h.bf16 %v17518_v8  ;;  %v17519_v11 = vunpack.i.l.bf16 %v17518_v8 }
0x2df2   :  { %v10285_v12 = vsel %vm108_vm3, %v10145_v3, 0  ;;  %v10242_v14 = vsel %vm108_vm3, %v10144_v4, 0 }
0x2df3   :  { %v10334_v23 = vsel %vm5344_vm10, %v17520_v5, 0.0  ;;  %v10333_v15 = vsel %vm5344_vm10, %v17519_v11, 0.0  ;;  %16333 = vmatpush3.bf16.msra.mxu1 %v10242_v14  ;;  %16339 = vmatpush3.bf16.msra.mxu0 %v10285_v12  ;;  %v14821_v12 = vld [vmem:[%s19870_s2 + $0xb8] sm:$0xf] }
0x2df4   :  { %16344 = vmatprep.subr.bf16.mxu1 %v17668_v19  ;;  %16350 = vmatprep.subr.bf16.mxu0 %v17668_v19  ;;  %v10336_v25 = vpack.c.bf16 %v10333_v15, %v10333_v15  ;;  %v10337_v16 = vpack.c.bf16 %v10334_v23, %v10334_v23 }
0x2df6   :  { %16335 = vmatmul.mubr.msk.bf16.vlgmr.msra.gmra.mrb[60].mxu1 %vm104_vm4, %v10143_v44  ;;  %16341 = vmatmul.mubr.msk.bf16.vlgmr.msra.gmra.mrb[60].mxu0 %vm104_vm4, %v10143_v44  ;;  %v10342_v26 = vsel %vm108_vm3, %v10336_v25, 0  ;;  %v10385_v17 = vsel %vm108_vm3, %v10337_v16, 0  ;;  %v10486_v16 = vpack.c.bf16 %v14821_v12, %v14821_v12 }
0x2df7   :  { %16345 = vmatpush3.bf16.msra.mxu1 %v10342_v26  ;;  %16351 = vmatpush3.bf16.msra.mxu0 %v10385_v17 }
0x2df8   :  { %16346 = vmatprep.mubr.msk.bf16.mxu1 %vm17669_vm2, %v17668_v19  ;;  %16352 = vmatprep.mubr.msk.bf16.mxu0 %vm17669_vm2, %v17668_v19 }
0x2df9   :  { %16356 = vmatprep.subr.bf16.mxu1 %v17668_v19  ;;  %16362 = vmatprep.subr.bf16.mxu0 %v17668_v19 }
0x2e02   :  { %16347 = vmatmul.mubr.msk.bf16.vlgmr.msra.gmra.mrb[60].mxu1 %vm104_vm4, %v10335_v20  ;;  %16353 = vmatmul.mubr.msk.bf16.vlgmr.msra.gmra.mrb[60].mxu0 %vm104_vm4, %v10335_v20 }
0x2e03   :  { %16358 = vmatprep.mubr.msk.bf16.mxu1 %vm17669_vm2, %v17668_v19  ;;  %16364 = vmatprep.mubr.msk.bf16.mxu0 %vm17669_vm2, %v17668_v19 }
0x2ed5   :  { %v10378_v45 = vpop.f32.mrb[60].mxu1  ;;  %v10421_v22 = vpop.f32.mrb[60].mxu0 }
0x2ed6   :  { %v16348_v21 = vpop.f32.mrb[61].mxu1  ;;  %v16354_v35 = vpop.f32.mrb[61].mxu0  ;;  %v10429_v36 = vsel %vm5099_vm9, %v10378_v45, 0.0  ;;  %v10432_v1 = vsel %vm5099_vm9, %v10421_v22, 0.0 }
0x2ed7   :  { %10430 = vadd.xlane.f32.xlu0 %v10429_v36  ;;  %v10381_v24 = vpop.f32.mrb[62].mxu1  ;;  %10433 = vadd.xlane.f32.xlu1 %v10432_v1  ;;  %v10424_v54 = vpop.f32.mrb[62].mxu0 }
0x2ed8   :  { %v16349_v57 = vpop.f32.mrb[63].mxu1  ;;  %v16355_v27 = vpop.f32.mrb[63].mxu0 }
0x2ee8   :  { %10459 = vperm.xlu1 %17399, %v14815_v29  }
0x2f64   :  { %v10431_v32 = vpop.xlane.xlu0 %10430  ;;  %v10434_v33 = vpop.xlane.xlu1 %10433 }
0x2f65   :  { %v10435_v9 = vsel %vm48_vm1, %v10431_v32, 0.0  ;;  %v10436_v34 = vsel %vm48_vm1, %v10434_v33, 0.0 }
0x2f66   :  { %v10437_v53 = vadd.f32 %v10436_v34, %v10435_v9 }
0x2f68   :  { %v10438_v55 = vmul.f32 0.125, %v10437_v53  ;;  %v10460_v63 = vpop.permute.xlu1 %10459 }
0x2f6a   :  { %v10439_v39 = vsub.f32 %v10378_v45, %v10438_v55  ;;  %v10440_v40 = vsub.f32 %v10421_v22, %v10438_v55  ;;  %v14820_v22 = vld [vmem:[%s19870_s2 + $0xb4] sm:$0xf]  ;;  %v14822_v55 = vld [vmem:[%s19870_s2 + $0xbc] sm:$0xf] }
0x2f6b   :  { %v10483_v27 = vpack.c.bf16 %v14820_v22, %v14820_v22 }
0x2f6c   :  { %v10441_v41 = vmul.f32 %v10439_v39, %v10439_v39  ;;  %v10442_v43 = vmul.f32 %v10440_v40, %v10440_v40 }
0x2f6e   :  { %v10443_v42 = vsel %vm5099_vm9, %v10441_v41, 0.0  ;;  %v10446_v46 = vsel %vm5099_vm9, %v10442_v43, 0.0  ;;  %v10771_v41 = vpack.c.bf16 %v19247_v13, %v19247_v13 }
0x2f6f   :  { %10444 = vadd.xlane.f32.xlu0 %v10443_v42 }
0x2f70   :  { %v10819_v43 = vsel %vm108_vm3, %v10771_v41, 0 }
0x2f73   :  { %10447 = vadd.xlane.f32.xlu0 %v10446_v46  ;;  %v10863_v46 = vmul.u32 8, %v18047_v6 }
0x2f89   :  { %10466 = vperm.xlu0 %17400, %v14816_v47   ;;  %v10864_v47 = vmul.u32 4, %v18049_v7 }
0x2f8b   :  { %vm10865_vm9 = vcmp.le.s32.totalorder %v10863_v46, %v10864_v47 }
0x2ffc   :  { %v10445_v48 = vpop.xlane.xlu0 %10444 }
0x2ffd   :  { %v10449_v51 = vsel %vm48_vm1, %v10445_v48, 0.0  ;;  %v10866_v48 = vmul.u32 8, %v19182_v0 }
0x3000   :  { %v10448_v50 = vpop.xlane.xlu0 %10447 }
0x3001   :  { %v10450_v52 = vsel %vm48_vm1, %v10448_v50, 0.0 }
0x3002   :  { %v10451_v56 = vadd.f32 %v10450_v52, %v10449_v51 }
0x3004   :  { %v10452_v30 = vmul.f32 0.125, %v10451_v56 }
0x3006   :  { %v10453_v31 = vadd.f32 1e-05, %v10452_v30 }
0x3008   :  { %17597 = vrsqrt.f32 %v10453_v31  ;;  %v10467_v3 = vpop.permute.xlu0 %10466 }
0x3012   :  { %v17598_v60 = vpop.eup %17597 }
0x3013   :  { %v10455_v61 = vmul.f32 %v17598_v60, %v10439_v39  ;;  %v10456_v62 = vmul.f32 %v17598_v60, %v10440_v40  ;;  %v10675_v39 = vpack.c.bf16 %v14822_v55, %v14822_v55  ;;  %v10770_v40 = vpack.c.bf16 %v19243_v10, %v19243_v10  ;;  %v14823_v10 = vld [vmem:[%s19871_s3 + $0x1c] sm:$0xf] }
0x3014   :  { %v10769_v13 = vpack.c.bf16 %v14823_v10, %v14823_v10 }
0x3015   :  { %v10462_v2 = vmul.f32 %v10460_v63, %v10455_v61  ;;  %v10463_v49 = vmul.f32 %v10460_v63, %v10456_v62  ;;  %v10776_v42 = vsel %vm108_vm3, %v10770_v40, 0 }
0x3017   :  { %v10469_v4 = vadd.f32 %v10467_v3, %v10462_v2  ;;  %v10470_v8 = vadd.f32 %v10467_v3, %v10463_v49 }
0x3019   :  { %v10471_v5 = vmax.f32 %v10469_v4, 0.0  ;;  %v10472_v11 = vmax.f32 %v10470_v8, 0.0 }
0x301b   :  { %v17521_v14 = vpack.i.bf16 %v10472_v11, %v10471_v5  ;;  %v10487_v44 = vpack.c.bf16 %v10471_v5, %v10471_v5  ;;  %v10488_v23 = vpack.c.bf16 %v10472_v11, %v10472_v11 }
0x301d   :  { %17522 = vrot.lane.b32.xlu1 %v17521_v14, %s17670_s10  ;;  %v10493_v15 = vsel %vm108_vm3, %v10487_v44, 0  ;;  %v10536_v25 = vsel %vm108_vm3, %v10488_v23, 0 }
0x301e   :  { %16357 = vmatpush3.bf16.msra.mxu1 %v10493_v15  ;;  %16363 = vmatpush3.bf16.msra.mxu0 %v10536_v25 }
0x301f   :  { %16368 = vmatprep.subr.bf16.mxu1 %v17668_v19  ;;  %16374 = vmatprep.subr.bf16.mxu0 %v17668_v19 }
0x3021   :  { %17527 = vrot.lane.b32.xlu1 %v17521_v14, %s17671_s11  ;;  %16359 = vmatmul.mubr.msk.bf16.vlgmr.msra.gmra.mrb[64].mxu1 %vm104_vm4, %v10486_v16 }
0x3022   :  { %16365 = vmatmul.mubr.msk.bf16.vlgmr.msra.gmra.mrb[64].mxu0 %vm104_vm4, %v10486_v16  ;;  %16370 = vmatprep.mubr.msk.bf16.mxu1 %vm17669_vm2, %v17668_v19 }
0x3023   :  { %16376 = vmatprep.mubr.msk.bf16.mxu0 %vm17669_vm2, %v17668_v19 }
0x308f   :  { %v17523_v26 = vpop.permute.xlu1 %17522 }
0x3090   :  { %v17525_v17 = vunpack.i.h.bf16 %v17523_v26  ;;  %v17524_v18 = vunpack.i.l.bf16 %v17523_v26 }
0x3092   :  { %v10482_v20 = vsel %vm95_vm5, 0.0, %v17525_v17  ;;  %v10481_v45 = vsel %vm95_vm5, 0.0, %v17524_v18 }
0x3093   :  { %v10485_v21 = vpack.c.bf16 %v10482_v20, %v10482_v20  ;;  %v10484_v35 = vpack.c.bf16 %v10481_v45, %v10481_v45  ;;  %v17528_v36 = vpop.permute.xlu1 %17527 }
0x3094   :  { %v17530_v1 = vunpack.i.h.bf16 %v17528_v36  ;;  %v17529_v24 = vunpack.i.l.bf16 %v17528_v36 }
0x3095   :  { %v10625_v54 = vsel %vm108_vm3, %v10485_v21, 0  ;;  %v10582_v57 = vsel %vm108_vm3, %v10484_v35, 0 }
0x3096   :  { %v10674_v29 = vsel %vm5344_vm10, %v17530_v1, 0.0  ;;  %v10673_v32 = vsel %vm5344_vm10, %v17529_v24, 0.0  ;;  %16369 = vmatpush3.bf16.msra.mxu1 %v10582_v57  ;;  %16375 = vmatpush3.bf16.msra.mxu0 %v10625_v54  ;;  %vm10867_vm10 = vcmp.lt.s32.totalorder %v10864_v47, %v10866_v48 }
0x3097   :  { %16380 = vmatprep.subr.bf16.mxu1 %v17668_v19  ;;  %16386 = vmatprep.subr.bf16.mxu0 %v17668_v19  ;;  %v10676_v33 = vpack.c.bf16 %v10673_v32, %v10673_v32  ;;  %v10677_v9 = vpack.c.bf16 %v10674_v29, %v10674_v29  ;;  %vm10868_vm8 = vmand %vm10865_vm9, %vm10867_vm10 }
0x3098   :  { %v19390_v50 = vsel %vm10868_vm8, 1.0, %v17668_v19 }
0x3099   :  { %16371 = vmatmul.mubr.msk.bf16.vlgmr.msra.gmra.mrb[64].mxu1 %vm104_vm4, %v10483_v27  ;;  %16377 = vmatmul.mubr.msk.bf16.vlgmr.msra.gmra.mrb[64].mxu0 %vm104_vm4, %v10483_v27  ;;  %v10682_v34 = vsel %vm108_vm3, %v10676_v33, 0  ;;  %v10725_v53 = vsel %vm108_vm3, %v10677_v9, 0  ;;  %v10875_v51 = vsel %vm48_vm1, %v19390_v50, 0 }
0x309a   :  { %16381 = vmatpush3.bf16.msra.mxu1 %v10682_v34  ;;  %16387 = vmatpush3.bf16.msra.mxu0 %v10725_v53  ;;  %v10955_v52 = vsub.f32 %v10875_v51, %v10875_v51 }
0x309b   :  { %16382 = vmatprep.mubr.msk.bf16.mxu1 %vm17669_vm2, %v17668_v19  ;;  %16388 = vmatprep.mubr.msk.bf16.mxu0 %vm17669_vm2, %v17668_v19 }
0x309c   :  { %16392 = vmatprep.subr.bf16.mxu1 %v17668_v19  ;;  %16398 = vmatprep.subr.bf16.mxu0 %v17668_v19  ;;  %v10956_v63 = vand.u32 4294901760, %v10955_v52 }
0x309e   :  { %v10957_v14 = vsub.f32 %v10955_v52, %v10956_v63 }
0x30a0   :  { %v10958_v16 = vand.u32 4294901760, %v10957_v14 }
0x30a5   :  { %16383 = vmatmul.mubr.msk.bf16.vlgmr.msra.gmra.mrb[64].mxu1 %vm104_vm4, %v10675_v39  ;;  %16389 = vmatmul.mubr.msk.bf16.vlgmr.msra.gmra.mrb[64].mxu0 %vm104_vm4, %v10675_v39 }
0x30a6   :  { %16393 = vmatpush3.bf16.msra.mxu1 %v10776_v42  ;;  %16399 = vmatpush3.bf16.msra.mxu0 %v10819_v43 }
0x30a7   :  { %16394 = vmatprep.mubr.msk.bf16.mxu1 %vm17669_vm2, %v17668_v19  ;;  %16400 = vmatprep.mubr.msk.bf16.mxu0 %vm17669_vm2, %v17668_v19 }
0x30a8   :  { %16404 = vmatprep.subr.mxu1 %v17668_v19  ;;  %16434 = vmatprep.subr.mxu0 %v17668_v19 }
0x30b1   :  { %16395 = vmatmul.mubr.msk.bf16.vlgmr.msra.gmra.mrb[64].mxu1 %vm104_vm4, %v10769_v13  ;;  %16401 = vmatmul.mubr.msk.bf16.vlgmr.msra.gmra.mrb[64].mxu0 %vm104_vm4, %v10769_v13  ;;  %v14846_v13 = vld [vmem:[%s19869_s1 + $0x84] sm:$0xf] }
0x30b2   :  { %16406 = vmatprep.mubr.msk.f32.mxu1 %vm17669_vm2, %v17668_v19  ;;  %16436 = vmatprep.mubr.msk.f32.mxu0 %vm17669_vm2, %v17668_v19 }
0x30b3   :  { %16405 = vmatpush3.msk.msra.mxu1 %vm48_vm1, %v19390_v50  ;;  %16435 = vmatpush3.msk.msra.mxu0 %vm48_vm1, %v19390_v50 }
0x30b4   :  { %16409 = vmatprep.subr.mxu1 %v17668_v19  ;;  %16439 = vmatprep.subr.mxu0 %v17668_v19 }
0x3184   :  { %v10812_v56 = vpop.f32.mrb[64].mxu1  ;;  %v10855_v30 = vpop.f32.mrb[64].mxu0 }
0x3185   :  { %v10872_v31 = vsel %vm104_vm4, %v10812_v56, 0  ;;  %v11324_v60 = vsel %vm104_vm4, %v10855_v30, 0  ;;  %v16396_v61 = vpop.f32.mrb[65].mxu1  ;;  %v16402_v62 = vpop.f32.mrb[65].mxu0 }
0x3186   :  { %v10943_v2 = vand.u32 4294901760, %v10872_v31  ;;  %v11392_v49 = vand.u32 4294901760, %v11324_v60  ;;  %v10815_v3 = vpop.f32.mrb[66].mxu1  ;;  %v10858_v4 = vpop.f32.mrb[66].mxu0 }
0x3187   :  { %v16397_v8 = vpop.f32.mrb[67].mxu1  ;;  %v16403_v5 = vpop.f32.mrb[67].mxu0 }
0x3188   :  { %v10944_v11 = vsub.f32 %v10872_v31, %v10943_v2  ;;  %v11393_v12 = vsub.f32 %v11324_v60, %v11392_v49  ;;  %v14850_v5 = vld [vmem:[%s19870_s2 + $0xc4] sm:$0xf] }
0x318a   :  { %v10945_v44 = vand.u32 4294901760, %v10944_v11  ;;  %v11394_v23 = vand.u32 4294901760, %v11393_v12 }
0x318c   :  { %v10946_v15 = vsub.f32 %v10944_v11, %v10945_v44  ;;  %v11395_v25 = vsub.f32 %v11393_v12, %v11394_v23 }
0x318e   :  { %v10947_v26 = vand.u32 4294901760, %v10946_v15  ;;  %v11396_v17 = vand.u32 4294901760, %v11395_v25  ;;  %v11843_v15 = vpack.c.bf16 %v14850_v5, %v14850_v5 }
0x3190   :  { %16407 = vmatmul.mubr.f32.vlgmr.msra.gmra.mrb[58].mxu1 %v10947_v26  ;;  %16437 = vmatmul.mubr.f32.vlgmr.msra.gmra.mrb[68].mxu0 %v11396_v17 }
0x3191   :  { %16410 = vmatpush3.msra.mxu1 %v10958_v16  ;;  %16411 = vmatprep.mubr.msk.f32.mxu1 %vm17669_vm2, %v17668_v19 }
0x3192   :  { %16440 = vmatpush3.msra.mxu0 %v10958_v16  ;;  %16441 = vmatprep.mubr.msk.f32.mxu0 %vm17669_vm2, %v17668_v19 }
0x3193   :  { %16414 = vmatprep.subr.mxu1 %v17668_v19  ;;  %16444 = vmatprep.subr.mxu0 %v17668_v19 }
0x3194   :  { %16412 = vmatmul.mubr.f32.vlgmr.msra.gmra.mrb[68].mxu1 %v10943_v2  ;;  %16442 = vmatmul.mubr.f32.vlgmr.msra.gmra.mrb[70].mxu0 %v11392_v49 }
0x3195   :  { %16415 = vmatpush3.msra.mxu1 %v10955_v52  ;;  %16416 = vmatprep.mubr.msk.f32.mxu1 %vm17669_vm2, %v17668_v19 }
0x3196   :  { %16445 = vmatpush3.msra.mxu0 %v10955_v52  ;;  %16446 = vmatprep.mubr.msk.f32.mxu0 %vm17669_vm2, %v17668_v19 }
0x3197   :  { %16419 = vmatprep.subr.mxu1 %v17668_v19  ;;  %16449 = vmatprep.subr.mxu0 %v17668_v19 }
0x319c   :  { %16417 = vmatmul.mubr.f32.vlgmr.msra.gmra.mrb[68].mxu1 %v10944_v11  ;;  %16447 = vmatmul.mubr.f32.vlgmr.msra.gmra.mrb[70].mxu0 %v11393_v12 }
0x319d   :  { %16420 = vmatpush3.msk.msra.mxu1 %vm48_vm1, %v19390_v50  ;;  %16421 = vmatprep.mubr.msk.f32.mxu1 %vm17669_vm2, %v17668_v19 }
0x319e   :  { %16450 = vmatpush3.msk.msra.mxu0 %vm48_vm1, %v19390_v50  ;;  %16451 = vmatprep.mubr.msk.f32.mxu0 %vm17669_vm2, %v17668_v19 }
0x319f   :  { %16424 = vmatprep.subr.mxu1 %v17668_v19  ;;  %16454 = vmatprep.subr.mxu0 %v17668_v19 }
0x31a4   :  { %16422 = vmatmul.mubr.f32.vlgmr.msra.gmra.mrb[68].mxu1 %v10945_v44  ;;  %16452 = vmatmul.mubr.f32.vlgmr.msra.gmra.mrb[70].mxu0 %v11394_v23 }
0x31a5   :  { %16425 = vmatpush3.msra.mxu1 %v10956_v63  ;;  %16426 = vmatprep.mubr.msk.f32.mxu1 %vm17669_vm2, %v17668_v19 }
0x31a6   :  { %16455 = vmatpush3.msra.mxu0 %v10956_v63  ;;  %16456 = vmatprep.mubr.msk.f32.mxu0 %vm17669_vm2, %v17668_v19 }
0x31a7   :  { %16429 = vmatprep.subr.mxu1 %v17668_v19  ;;  %16459 = vmatprep.subr.mxu0 %v17668_v19 }
0x31ac   :  { %16427 = vmatmul.mubr.f32.vlgmr.msra.gmra.mrb[68].mxu1 %v10943_v2  ;;  %16457 = vmatmul.mubr.f32.vlgmr.msra.gmra.mrb[70].mxu0 %v11392_v49 }
0x31ad   :  { %16430 = vmatpush3.msk.msra.mxu1 %vm48_vm1, %v19390_v50  ;;  %16431 = vmatprep.mubr.msk.f32.mxu1 %vm17669_vm2, %v17668_v19 }
0x31ae   :  { %16460 = vmatpush3.msk.msra.mxu0 %vm48_vm1, %v19390_v50  ;;  %16461 = vmatprep.mubr.msk.f32.mxu0 %vm17669_vm2, %v17668_v19 }
0x31af   :  { %16464 = vmatprep.subr.bf16.mxu1 %v17668_v19  ;;  %16470 = vmatprep.subr.bf16.mxu0 %v17668_v19 }
0x31b4   :  { %16432 = vmatmul.mubr.f32.vlgmr.msra.gmra.mrb[68].mxu1 %v10943_v2  ;;  %16462 = vmatmul.mubr.f32.vlgmr.msra.gmra.mrb[70].mxu0 %v11392_v49 }
0x31b5   :  { %16466 = vmatprep.mubr.msk.bf16.mxu1 %vm17669_vm2, %v17668_v19  ;;  %16472 = vmatprep.mubr.msk.bf16.mxu0 %vm17669_vm2, %v17668_v19 }
0x3263   :  { %v10949_v18 = vpop.f32.mrb[58].mxu1  ;;  %v11398_v20 = vpop.f32.mrb[68].mxu0 }
0x3264   :  { %v10950_v45 = vadd.f32 %v10949_v18, %v18515_v37  ;;  %v11399_v22 = vadd.f32 %v11398_v20, %v18517_v38  ;;  %v16408_v21 = vpop.f32.mrb[59].mxu1  ;;  %v16438_v35 = vpop.f32.mrb[69].mxu0  ;;  %v14845_v37 = vld [vmem:[%s19869_s1 + $0x80] sm:$0xf] }
0x3265   :  { %v14849_v20 = vld [vmem:[%s19870_s2 + $0xc0] sm:$0xf] }
0x3287   :  { %v11319_v36 = vpop.f32.mrb[68].mxu1  ;;  %v11768_v1 = vpop.f32.mrb[70].mxu0 }
0x3288   :  { %v19446_v24 = vadd.f32 %v11319_v36, %v10950_v45  ;;  %v19448_v54 = vadd.f32 %v11768_v1, %v11399_v22  ;;  %v16433_v57 = vpop.f32.mrb[69].mxu1  ;;  %v16463_v27 = vpop.f32.mrb[71].mxu0 }
0x3289   :  { %v11840_v27 = vpack.c.bf16 %v14849_v20, %v14849_v20 }
0x328a   :  { %v11786_v29 = vsel %vm2595_vm13, %v19446_v24, 0.0  ;;  %v11789_v32 = vsel %vm2595_vm13, %v19448_v54, 0.0 }
0x328b   :  { %11787 = vadd.xlane.f32.xlu0 %v11786_v29  ;;  %11790 = vadd.xlane.f32.xlu1 %v11789_v32 }
0x329c   :  { %11816 = vperm.xlu1 %17399, %v14845_v37  }
0x3318   :  { %v11788_v38 = vpop.xlane.xlu0 %11787  ;;  %v11791_v33 = vpop.xlane.xlu1 %11790 }
0x3319   :  { %v11792_v9 = vsel %vm48_vm1, %v11788_v38, 0.0  ;;  %v11793_v34 = vsel %vm48_vm1, %v11791_v33, 0.0 }
0x331a   :  { %v11794_v53 = vadd.f32 %v11793_v34, %v11792_v9  ;;  %v14851_v34 = vld [vmem:[%s19870_s2 + $0xc8] sm:$0xf] }
0x331c   :  { %v11795_v55 = vmul.f32 0.0625, %v11794_v53  ;;  %v11817_v61 = vpop.permute.xlu1 %11816  ;;  %v12032_v53 = vpack.c.bf16 %v14851_v34, %v14851_v34 }
0x331e   :  { %v11796_v39 = vsub.f32 %v19446_v24, %v11795_v55  ;;  %v11797_v40 = vsub.f32 %v19448_v54, %v11795_v55 }
0x3320   :  { %v11798_v41 = vmul.f32 %v11796_v39, %v11796_v39  ;;  %v11799_v43 = vmul.f32 %v11797_v40, %v11797_v40 }
0x3322   :  { %v11800_v42 = vsel %vm2595_vm13, %v11798_v41, 0.0  ;;  %v11803_v10 = vsel %vm2595_vm13, %v11799_v43, 0.0 }
0x3323   :  { %11801 = vadd.xlane.f32.xlu0 %v11800_v42 }
0x3327   :  { %11804 = vadd.xlane.f32.xlu0 %v11803_v10 }
0x333d   :  { %11823 = vperm.xlu0 %17400, %v14846_v13  }
0x33b0   :  { %v11802_v46 = vpop.xlane.xlu0 %11801 }
0x33b1   :  { %v11806_v48 = vsel %vm48_vm1, %v11802_v46, 0.0 }
0x33b4   :  { %v11805_v47 = vpop.xlane.xlu0 %11804 }
0x33b5   :  { %v11807_v50 = vsel %vm48_vm1, %v11805_v47, 0.0 }
0x33b6   :  { %v11808_v51 = vadd.f32 %v11807_v50, %v11806_v48  ;;  %v14847_v48 = vld [vmem:[%s19869_s1 + $0x88] sm:$0xf] }
0x33b8   :  { %v11809_v52 = vmul.f32 0.0625, %v11808_v51 }
0x33ba   :  { %v11810_v56 = vadd.f32 1e-05, %v11809_v52 }
0x33bc   :  { %17599 = vrsqrt.f32 %v11810_v56  ;;  %v11824_v2 = vpop.permute.xlu0 %11823 }
0x33c6   :  { %v17600_v30 = vpop.eup %17599 }
0x33c7   :  { %v11812_v31 = vmul.f32 %v17600_v30, %v11796_v39  ;;  %v11813_v60 = vmul.f32 %v17600_v30, %v11797_v40 }
0x33c9   :  { %v11819_v62 = vmul.f32 %v11817_v61, %v11812_v31  ;;  %v11820_v63 = vmul.f32 %v11817_v61, %v11813_v60 }
0x33cb   :  { %v11826_v49 = vadd.f32 %v11824_v2, %v11819_v62  ;;  %v11827_v3 = vadd.f32 %v11824_v2, %v11820_v63 }
0x33cd   :  { %v11828_v4 = vmax.f32 %v11826_v49, 0.0  ;;  %v11829_v8 = vmax.f32 %v11827_v3, 0.0  ;;  %v14848_v3 = vld [vmem:[%s19869_s1 + $0x8c] sm:$0xf] }
0x33cf   :  { %v17531_v11 = vpack.i.bf16 %v11829_v8, %v11828_v4  ;;  %v11844_v12 = vpack.c.bf16 %v11828_v4, %v11828_v4  ;;  %v11845_v14 = vpack.c.bf16 %v11829_v8, %v11829_v8 }
0x33d1   :  { %17532 = vrot.lane.b32.xlu1 %v17531_v11, %s17670_s10  ;;  %v11850_v44 = vsel %vm108_vm3, %v11844_v12, 0  ;;  %v11893_v23 = vsel %vm108_vm3, %v11845_v14, 0 }
0x33d2   :  { %16465 = vmatpush3.bf16.msra.mxu1 %v11850_v44  ;;  %16471 = vmatpush3.bf16.msra.mxu0 %v11893_v23 }
0x33d3   :  { %16476 = vmatprep.subr.bf16.mxu1 %v17668_v19  ;;  %16482 = vmatprep.subr.bf16.mxu0 %v17668_v19 }
0x33d5   :  { %17537 = vrot.lane.b32.xlu1 %v17531_v11, %s17671_s11  ;;  %16467 = vmatmul.mubr.msk.bf16.vlgmr.msra.gmra.mrb[72].mxu1 %vm104_vm4, %v11843_v15 }
0x33d6   :  { %16473 = vmatmul.mubr.msk.bf16.vlgmr.msra.gmra.mrb[72].mxu0 %vm104_vm4, %v11843_v15  ;;  %16478 = vmatprep.mubr.msk.bf16.mxu1 %vm17669_vm2, %v17668_v19 }
0x33d7   :  { %16484 = vmatprep.mubr.msk.bf16.mxu0 %vm17669_vm2, %v17668_v19 }
0x3443   :  { %v17533_v25 = vpop.permute.xlu1 %17532 }
0x3444   :  { %v17535_v16 = vunpack.i.h.bf16 %v17533_v25  ;;  %v17534_v26 = vunpack.i.l.bf16 %v17533_v25 }
0x3446   :  { %v11839_v17 = vsel %vm95_vm5, 0.0, %v17535_v16  ;;  %v11838_v18 = vsel %vm95_vm5, 0.0, %v17534_v26 }
0x3447   :  { %v11842_v45 = vpack.c.bf16 %v11839_v17, %v11839_v17  ;;  %v11841_v22 = vpack.c.bf16 %v11838_v18, %v11838_v18  ;;  %v17538_v21 = vpop.permute.xlu1 %17537 }
0x3448   :  { %v17540_v35 = vunpack.i.h.bf16 %v17538_v21  ;;  %v17539_v36 = vunpack.i.l.bf16 %v17538_v21 }
0x3449   :  { %v11982_v1 = vsel %vm108_vm3, %v11842_v45, 0  ;;  %v11939_v57 = vsel %vm108_vm3, %v11841_v22, 0 }
0x344a   :  { %v12031_v29 = vsel %vm2840_vm14, %v17540_v35, 0.0  ;;  %v12030_v32 = vsel %vm2840_vm14, %v17539_v36, 0.0  ;;  %16477 = vmatpush3.bf16.msra.mxu1 %v11939_v57  ;;  %16483 = vmatpush3.bf16.msra.mxu0 %v11982_v1  ;;  %v14853_v35 = vld [vmem:[%s19870_s2 + $0xd0] sm:$0xf] }
0x344b   :  { %16488 = vmatprep.subr.bf16.mxu1 %v17668_v19  ;;  %16494 = vmatprep.subr.bf16.mxu0 %v17668_v19  ;;  %v12033_v37 = vpack.c.bf16 %v12030_v32, %v12030_v32  ;;  %v12034_v38 = vpack.c.bf16 %v12031_v29, %v12031_v29  ;;  %v12183_v32 = vpack.c.bf16 %v14853_v35, %v14853_v35 }
0x344d   :  { %16479 = vmatmul.mubr.msk.bf16.vlgmr.msra.gmra.mrb[72].mxu1 %vm104_vm4, %v11840_v27  ;;  %16485 = vmatmul.mubr.msk.bf16.vlgmr.msra.gmra.mrb[72].mxu0 %vm104_vm4, %v11840_v27  ;;  %v12039_v33 = vsel %vm108_vm3, %v12033_v37, 0  ;;  %v12082_v9 = vsel %vm108_vm3, %v12034_v38, 0 }
0x344e   :  { %16489 = vmatpush3.bf16.msra.mxu1 %v12039_v33  ;;  %16495 = vmatpush3.bf16.msra.mxu0 %v12082_v9 }
0x344f   :  { %16490 = vmatprep.mubr.msk.bf16.mxu1 %vm17669_vm2, %v17668_v19  ;;  %16496 = vmatprep.mubr.msk.bf16.mxu0 %vm17669_vm2, %v17668_v19 }
0x3450   :  { %16500 = vmatprep.subr.bf16.mxu1 %v17668_v19  ;;  %16506 = vmatprep.subr.bf16.mxu0 %v17668_v19 }
0x3459   :  { %16491 = vmatmul.mubr.msk.bf16.vlgmr.msra.gmra.mrb[72].mxu1 %vm104_vm4, %v12032_v53  ;;  %16497 = vmatmul.mubr.msk.bf16.vlgmr.msra.gmra.mrb[72].mxu0 %vm104_vm4, %v12032_v53  ;;  %v14852_v53 = vld [vmem:[%s19870_s2 + $0xcc] sm:$0xf] }
0x345a   :  { %16502 = vmatprep.mubr.msk.bf16.mxu1 %vm17669_vm2, %v17668_v19  ;;  %16508 = vmatprep.mubr.msk.bf16.mxu0 %vm17669_vm2, %v17668_v19 }
0x352c   :  { %v12075_v55 = vpop.f32.mrb[72].mxu1  ;;  %v12118_v39 = vpop.f32.mrb[72].mxu0 }
0x352d   :  { %v16492_v40 = vpop.f32.mrb[73].mxu1  ;;  %v16498_v41 = vpop.f32.mrb[73].mxu0  ;;  %v12126_v42 = vsel %vm2595_vm13, %v12075_v55, 0.0  ;;  %v12129_v43 = vsel %vm2595_vm13, %v12118_v39, 0.0 }
0x352e   :  { %12127 = vadd.xlane.f32.xlu0 %v12126_v42  ;;  %v12078_v10 = vpop.f32.mrb[74].mxu1  ;;  %12130 = vadd.xlane.f32.xlu1 %v12129_v43  ;;  %v12121_v13 = vpop.f32.mrb[74].mxu0 }
0x352f   :  { %v16493_v46 = vpop.f32.mrb[75].mxu1  ;;  %v16499_v47 = vpop.f32.mrb[75].mxu0  ;;  %v12180_v13 = vpack.c.bf16 %v14852_v53, %v14852_v53 }
0x353f   :  { %12156 = vperm.xlu1 %17399, %v14847_v48  }
0x35bb   :  { %v12128_v50 = vpop.xlane.xlu0 %12127  ;;  %v12131_v51 = vpop.xlane.xlu1 %12130 }
0x35bc   :  { %v12132_v52 = vsel %vm48_vm1, %v12128_v50, 0.0  ;;  %v12133_v56 = vsel %vm48_vm1, %v12131_v51, 0.0 }
0x35bd   :  { %v12134_v30 = vadd.f32 %v12133_v56, %v12132_v52  ;;  %v14854_v56 = vld [vmem:[%s19870_s2 + $0xd4] sm:$0xf] }
0x35bf   :  { %v12135_v31 = vmul.f32 0.0625, %v12134_v30  ;;  %v12157_v16 = vpop.permute.xlu1 %12156  ;;  %v12372_v30 = vpack.c.bf16 %v14854_v56, %v14854_v56 }
0x35c1   :  { %v12136_v60 = vsub.f32 %v12075_v55, %v12135_v31  ;;  %v12137_v61 = vsub.f32 %v12118_v39, %v12135_v31  ;;  %v12467_v31 = vpack.c.bf16 %v19446_v24, %v19446_v24  ;;  %v14855_v24 = vld [vmem:[%s19871_s3 + $0x20] sm:$0xf] }
0x35c3   :  { %v12138_v62 = vmul.f32 %v12136_v60, %v12136_v60  ;;  %v12139_v2 = vmul.f32 %v12137_v61, %v12137_v61 }
0x35c5   :  { %v12140_v63 = vsel %vm2595_vm13, %v12138_v62, 0.0  ;;  %v12143_v49 = vsel %vm2595_vm13, %v12139_v2, 0.0  ;;  %v12561_v2 = vmul.u32 8, %v18049_v7 }
0x35c6   :  { %12141 = vadd.xlane.f32.xlu0 %v12140_v63  ;;  %v12560_v63 = vmul.u32 16, %v18047_v6 }
0x35c8   :  { %vm12562_vm13 = vcmp.le.s32.totalorder %v12560_v63, %v12561_v2 }
0x35ca   :  { %12144 = vadd.xlane.f32.xlu0 %v12143_v49  ;;  %v12563_v49 = vmul.u32 16, %v19182_v0 }
0x35e0   :  { %12163 = vperm.xlu0 %17400, %v14848_v3  }
0x3653   :  { %v12142_v4 = vpop.xlane.xlu0 %12141 }
0x3654   :  { %v12146_v5 = vsel %vm48_vm1, %v12142_v4, 0.0 }
0x3657   :  { %v12145_v8 = vpop.xlane.xlu0 %12144 }
0x3658   :  { %v12147_v11 = vsel %vm48_vm1, %v12145_v8, 0.0 }
0x3659   :  { %v12148_v12 = vadd.f32 %v12147_v11, %v12146_v5 }
0x365b   :  { %v12149_v14 = vmul.f32 0.0625, %v12148_v12 }
0x365d   :  { %v12150_v44 = vadd.f32 1e-05, %v12149_v14 }
0x365f   :  { %17601 = vrsqrt.f32 %v12150_v44  ;;  %v12164_v18 = vpop.permute.xlu0 %12163 }
0x3669   :  { %v17602_v23 = vpop.eup %17601 }
0x366a   :  { %v12152_v15 = vmul.f32 %v17602_v23, %v12136_v60  ;;  %v12153_v25 = vmul.f32 %v17602_v23, %v12137_v61  ;;  %v12468_v60 = vpack.c.bf16 %v19448_v54, %v19448_v54  ;;  %v12473_v61 = vsel %vm108_vm3, %v12467_v31, 0 }
0x366b   :  { %v12466_v54 = vpack.c.bf16 %v14855_v24, %v14855_v24 }
0x366c   :  { %v12159_v26 = vmul.f32 %v12157_v16, %v12152_v15  ;;  %v12160_v17 = vmul.f32 %v12157_v16, %v12153_v25  ;;  %v12516_v62 = vsel %vm108_vm3, %v12468_v60, 0 }
0x366e   :  { %v12166_v20 = vadd.f32 %v12164_v18, %v12159_v26  ;;  %v12167_v45 = vadd.f32 %v12164_v18, %v12160_v17 }
0x3670   :  { %v12168_v22 = vmax.f32 %v12166_v20, 0.0  ;;  %v12169_v21 = vmax.f32 %v12167_v45, 0.0 }
0x3672   :  { %v17541_v36 = vpack.i.bf16 %v12169_v21, %v12168_v22  ;;  %v12184_v1 = vpack.c.bf16 %v12168_v22, %v12168_v22  ;;  %v12185_v57 = vpack.c.bf16 %v12169_v21, %v12169_v21 }
0x3674   :  { %17542 = vrot.lane.b32.xlu1 %v17541_v36, %s17670_s10  ;;  %v12190_v27 = vsel %vm108_vm3, %v12184_v1, 0  ;;  %v12233_v29 = vsel %vm108_vm3, %v12185_v57, 0 }
0x3675   :  { %16501 = vmatpush3.bf16.msra.mxu1 %v12190_v27  ;;  %16507 = vmatpush3.bf16.msra.mxu0 %v12233_v29 }
0x3676   :  { %16512 = vmatprep.subr.bf16.mxu1 %v17668_v19  ;;  %16518 = vmatprep.subr.bf16.mxu0 %v17668_v19 }
0x3678   :  { %17547 = vrot.lane.b32.xlu1 %v17541_v36, %s17671_s11  ;;  %16503 = vmatmul.mubr.msk.bf16.vlgmr.msra.gmra.mrb[76].mxu1 %vm104_vm4, %v12183_v32 }
0x3679   :  { %16509 = vmatmul.mubr.msk.bf16.vlgmr.msra.gmra.mrb[76].mxu0 %vm104_vm4, %v12183_v32  ;;  %16514 = vmatprep.mubr.msk.bf16.mxu1 %vm17669_vm2, %v17668_v19 }
0x367a   :  { %16520 = vmatprep.mubr.msk.bf16.mxu0 %vm17669_vm2, %v17668_v19 }
0x36e6   :  { %v17543_v37 = vpop.permute.xlu1 %17542 }
0x36e7   :  { %v17545_v38 = vunpack.i.h.bf16 %v17543_v37  ;;  %v17544_v33 = vunpack.i.l.bf16 %v17543_v37 }
0x36e9   :  { %v12179_v9 = vsel %vm95_vm5, 0.0, %v17545_v38  ;;  %v12178_v34 = vsel %vm95_vm5, 0.0, %v17544_v33  ;;  %v13466_v33 = vld [vmem:[%s19872_s4] sm:$0xf] }
0x36ea   :  { %v12182_v55 = vpack.c.bf16 %v12179_v9, %v12179_v9  ;;  %v12181_v39 = vpack.c.bf16 %v12178_v34, %v12178_v34  ;;  %v17548_v40 = vpop.permute.xlu1 %17547  ;;  %v13516_v9 = vld [vmem:[%s19874_s6] sm:$0xf] }
0x36eb   :  { %v17550_v41 = vunpack.i.h.bf16 %v17548_v40  ;;  %v17549_v42 = vunpack.i.l.bf16 %v17548_v40 }
0x36ec   :  { %v12322_v43 = vsel %vm108_vm3, %v12182_v55, 0  ;;  %v12279_v10 = vsel %vm108_vm3, %v12181_v39, 0 }
0x36ed   :  { %v12371_v46 = vsel %vm2840_vm14, %v17550_v41, 0.0  ;;  %v12370_v47 = vsel %vm2840_vm14, %v17549_v42, 0.0  ;;  %16513 = vmatpush3.bf16.msra.mxu1 %v12279_v10  ;;  %16519 = vmatpush3.bf16.msra.mxu0 %v12322_v43  ;;  %vm12564_vm14 = vcmp.lt.s32.totalorder %v12561_v2, %v12563_v49 }
0x36ee   :  { %16524 = vmatprep.subr.bf16.mxu1 %v17668_v19  ;;  %16530 = vmatprep.subr.bf16.mxu0 %v17668_v19  ;;  %v12373_v48 = vpack.c.bf16 %v12370_v47, %v12370_v47  ;;  %v12374_v50 = vpack.c.bf16 %v12371_v46, %v12371_v46  ;;  %vm19592_vm11 = vmand %vm12562_vm13, %vm12564_vm14 }
0x36ef   :  { %v14870_v6 = vsel %vm19592_vm11, 1.0, %v17668_v19 }
0x36f0   :  { %16515 = vmatmul.mubr.msk.bf16.vlgmr.msra.gmra.mrb[76].mxu1 %vm104_vm4, %v12180_v13  ;;  %16521 = vmatmul.mubr.msk.bf16.vlgmr.msra.gmra.mrb[76].mxu0 %vm104_vm4, %v12180_v13  ;;  %v12379_v51 = vsel %vm108_vm3, %v12373_v48, 0  ;;  %v12422_v52 = vsel %vm108_vm3, %v12374_v50, 0  ;;  %v12649_v7 = vsub.f32 %v14870_v6, %v14870_v6  ;;  %v13467_v48 = vld [vmem:[%s19872_s4 + $0x4] sm:$0xf] }
0x36f1   :  { %16525 = vmatpush3.bf16.msra.mxu1 %v12379_v51  ;;  %16531 = vmatpush3.bf16.msra.mxu0 %v12422_v52 }
0x36f2   :  { %16526 = vmatprep.mubr.msk.bf16.mxu1 %vm17669_vm2, %v17668_v19  ;;  %16532 = vmatprep.mubr.msk.bf16.mxu0 %vm17669_vm2, %v17668_v19  ;;  %v12650_v14 = vand.u32 4294901760, %v12649_v7 }
0x36f3   :  { %16536 = vmatprep.subr.bf16.mxu1 %v17668_v19  ;;  %16542 = vmatprep.subr.bf16.mxu0 %v17668_v19 }
0x36f4   :  { %v12651_v20 = vsub.f32 %v12649_v7, %v12650_v14 }
0x36f6   :  { %v12652_v36 = vand.u32 4294901760, %v12651_v20 }
0x36fc   :  { %16527 = vmatmul.mubr.msk.bf16.vlgmr.msra.gmra.mrb[76].mxu1 %vm104_vm4, %v12372_v30  ;;  %16533 = vmatmul.mubr.msk.bf16.vlgmr.msra.gmra.mrb[76].mxu0 %vm104_vm4, %v12372_v30 }
0x36fd   :  { %16537 = vmatpush3.bf16.msra.mxu1 %v12473_v61  ;;  %16543 = vmatpush3.bf16.msra.mxu0 %v12516_v62 }
0x36fe   :  { %16538 = vmatprep.mubr.msk.bf16.mxu1 %vm17669_vm2, %v17668_v19  ;;  %16544 = vmatprep.mubr.msk.bf16.mxu0 %vm17669_vm2, %v17668_v19 }
0x36ff   :  { %16548 = vmatprep.subr.mxu1 %v17668_v19  ;;  %16578 = vmatprep.subr.mxu0 %v17668_v19 }
0x3708   :  { %16539 = vmatmul.mubr.msk.bf16.vlgmr.msra.gmra.mrb[76].mxu1 %vm104_vm4, %v12466_v54  ;;  %16545 = vmatmul.mubr.msk.bf16.vlgmr.msra.gmra.mrb[76].mxu0 %vm104_vm4, %v12466_v54 }
0x3709   :  { %16550 = vmatprep.mubr.msk.f32.mxu1 %vm17669_vm2, %v17668_v19  ;;  %16580 = vmatprep.mubr.msk.f32.mxu0 %vm17669_vm2, %v17668_v19 }
0x370a   :  { %16549 = vmatpush3.msk.msra.mxu1 %vm19592_vm11, %v17679_v28  ;;  %16579 = vmatpush3.msk.msra.mxu0 %vm19592_vm11, %v17679_v28 }
0x370b   :  { %16553 = vmatprep.subr.mxu1 %v17668_v19  ;;  %16583 = vmatprep.subr.mxu0 %v17668_v19 }
0x37db   :  { %v12509_v0 = vpop.f32.mrb[76].mxu1  ;;  %v12552_v4 = vpop.f32.mrb[76].mxu0 }
0x37dc   :  { %v12569_v8 = vsel %vm4186_vm7, %v12509_v0, 0  ;;  %v13018_v5 = vsel %vm4186_vm7, %v12552_v4, 0  ;;  %v16540_v11 = vpop.f32.mrb[77].mxu1  ;;  %v16546_v12 = vpop.f32.mrb[77].mxu0  ;;  %v13512_v4 = vld [vmem:[%s19873_s5] sm:$0xf] }
0x37dd   :  { %v12637_v44 = vand.u32 4294901760, %v12569_v8  ;;  %v13086_v23 = vand.u32 4294901760, %v13018_v5  ;;  %v12512_v15 = vpop.f32.mrb[78].mxu1  ;;  %v12555_v25 = vpop.f32.mrb[78].mxu0 }
0x37de   :  { %v16541_v16 = vpop.f32.mrb[79].mxu1  ;;  %v16547_v26 = vpop.f32.mrb[79].mxu0 }
0x37df   :  { %v12638_v17 = vsub.f32 %v12569_v8, %v12637_v44  ;;  %v13087_v18 = vsub.f32 %v13018_v5, %v13086_v23 }
0x37e1   :  { %v12639_v45 = vand.u32 4294901760, %v12638_v17  ;;  %v13088_v22 = vand.u32 4294901760, %v13087_v18 }
0x37e3   :  { %v12640_v21 = vsub.f32 %v12638_v17, %v12639_v45  ;;  %v13089_v35 = vsub.f32 %v13087_v18, %v13088_v22 }
0x37e5   :  { %v12641_v1 = vand.u32 4294901760, %v12640_v21  ;;  %v13090_v57 = vand.u32 4294901760, %v13089_v35 }
0x37e7   :  { %16551 = vmatmul.mubr.f32.vlgmr.msra.gmra.mrb[70].mxu1 %v12641_v1  ;;  %16581 = vmatmul.mubr.f32.vlgmr.msra.gmra.mrb[80].mxu0 %v13090_v57 }
0x37e8   :  { %16554 = vmatpush3.msra.mxu1 %v12652_v36  ;;  %16555 = vmatprep.mubr.msk.f32.mxu1 %vm17669_vm2, %v17668_v19 }
0x37e9   :  { %16584 = vmatpush3.msra.mxu0 %v12652_v36  ;;  %16585 = vmatprep.mubr.msk.f32.mxu0 %vm17669_vm2, %v17668_v19 }
0x37ea   :  { %16558 = vmatprep.subr.mxu1 %v17668_v19  ;;  %16588 = vmatprep.subr.mxu0 %v17668_v19 }
0x37ef   :  { %16556 = vmatmul.mubr.f32.vlgmr.msra.gmra.mrb[70].mxu1 %v12637_v44  ;;  %16586 = vmatmul.mubr.f32.vlgmr.msra.gmra.mrb[80].mxu0 %v13086_v23 }
0x37f0   :  { %16559 = vmatpush3.msra.mxu1 %v12649_v7  ;;  %16560 = vmatprep.mubr.msk.f32.mxu1 %vm17669_vm2, %v17668_v19 }
0x37f1   :  { %16589 = vmatpush3.msra.mxu0 %v12649_v7  ;;  %16590 = vmatprep.mubr.msk.f32.mxu0 %vm17669_vm2, %v17668_v19 }
0x37f2   :  { %16563 = vmatprep.subr.mxu1 %v17668_v19  ;;  %16593 = vmatprep.subr.mxu0 %v17668_v19 }
0x37f7   :  { %16561 = vmatmul.mubr.f32.vlgmr.msra.gmra.mrb[70].mxu1 %v12638_v17  ;;  %16591 = vmatmul.mubr.f32.vlgmr.msra.gmra.mrb[80].mxu0 %v13087_v18 }
0x37f8   :  { %16564 = vmatpush3.msk.msra.mxu1 %vm19592_vm11, %v17679_v28  ;;  %16565 = vmatprep.mubr.msk.f32.mxu1 %vm17669_vm2, %v17668_v19 }
0x37f9   :  { %16594 = vmatpush3.msk.msra.mxu0 %vm19592_vm11, %v17679_v28  ;;  %16595 = vmatprep.mubr.msk.f32.mxu0 %vm17669_vm2, %v17668_v19 }
0x37fa   :  { %16568 = vmatprep.subr.mxu1 %v17668_v19  ;;  %16598 = vmatprep.subr.mxu0 %v17668_v19 }
0x37ff   :  { %16566 = vmatmul.mubr.f32.vlgmr.msra.gmra.mrb[70].mxu1 %v12639_v45  ;;  %16596 = vmatmul.mubr.f32.vlgmr.msra.gmra.mrb[80].mxu0 %v13088_v22 }
0x3800   :  { %16569 = vmatpush3.msra.mxu1 %v12650_v14  ;;  %16570 = vmatprep.mubr.msk.f32.mxu1 %vm17669_vm2, %v17668_v19 }
0x3801   :  { %16599 = vmatpush3.msra.mxu0 %v12650_v14  ;;  %16600 = vmatprep.mubr.msk.f32.mxu0 %vm17669_vm2, %v17668_v19  ;;  %v13513_v14 = vpack.c.bf16 %v13512_v4, %v13512_v4 }
0x3802   :  { %16573 = vmatprep.subr.mxu1 %v17668_v19  ;;  %16603 = vmatprep.subr.mxu0 %v17668_v19 }
0x3807   :  { %16571 = vmatmul.mubr.f32.vlgmr.msra.gmra.mrb[70].mxu1 %v12637_v44  ;;  %16601 = vmatmul.mubr.f32.vlgmr.msra.gmra.mrb[80].mxu0 %v13086_v23 }
0x3808   :  { %16574 = vmatpush3.msk.msra.mxu1 %vm19592_vm11, %v17679_v28  ;;  %16575 = vmatprep.mubr.msk.f32.mxu1 %vm17669_vm2, %v17668_v19 }
0x3809   :  { %16604 = vmatpush3.msk.msra.mxu0 %vm19592_vm11, %v17679_v28  ;;  %16605 = vmatprep.mubr.msk.f32.mxu0 %vm17669_vm2, %v17668_v19 }
0x380a   :  { %16608 = vmatprep.subr.bf16.mxu1 %v17668_v19  ;;  %16614 = vmatprep.subr.bf16.mxu0 %v17668_v19 }
0x380f   :  { %16576 = vmatmul.mubr.f32.vlgmr.msra.gmra.mrb[70].mxu1 %v12637_v44  ;;  %16606 = vmatmul.mubr.f32.vlgmr.msra.gmra.mrb[80].mxu0 %v13086_v23 }
0x3810   :  { %16610 = vmatprep.mubr.msk.bf16.mxu1 %vm17669_vm2, %v17668_v19  ;;  %16616 = vmatprep.mubr.msk.bf16.mxu0 %vm17669_vm2, %v17668_v19 }
0x38e2   :  { %v13013_v27 = vpop.f32.mrb[70].mxu1  ;;  %v13462_v29 = vpop.f32.mrb[80].mxu0 }
0x38e3   :  { %v16577_v32 = vpop.f32.mrb[71].mxu1  ;;  %v16607_v37 = vpop.f32.mrb[81].mxu0  ;;  %v13468_v28 = vsel %vm41_vm0, %v13013_v27, 0.0  ;;  %v13471_v38 = vsel %vm41_vm0, %v13462_v29, 0.0 }
0x38e4   :  { %13469 = vadd.xlane.f32.xlu0 %v13468_v28  ;;  %13472 = vadd.xlane.f32.xlu1 %v13471_v38 }
0x38f5   :  { %13498 = vperm.xlu1 %17399, %v13466_v33  }
0x38f9   :  { %13519 = vperm.xlu1 %17399, %v13516_v9  }
0x3971   :  { %v13470_v34 = vpop.xlane.xlu0 %13469  ;;  %v13473_v53 = vpop.xlane.xlu1 %13472 }
0x3972   :  { %v13474_v55 = vsel %vm48_vm1, %v13470_v34, 0.0  ;;  %v13475_v39 = vsel %vm48_vm1, %v13473_v53, 0.0  ;;  %v14880_v53 = vld [vmem:[%s19872_s4 + $0xc] sm:$0xf] }
0x3973   :  { %v13476_v40 = vadd.f32 %v13475_v39, %v13474_v55  ;;  %v14882_v55 = vld [vmem:[%s19874_s6 + $0x4] sm:$0xf]  ;;  %v14879_v39 = vld [vmem:[%s19872_s4 + $0x8] sm:$0xf] }
0x3975   :  { %v13477_v41 = vmul.f32 0.03125, %v13476_v40  ;;  %v13499_v54 = vpop.permute.xlu1 %13498 }
0x3977   :  { %v13478_v42 = vsub.f32 %v13013_v27, %v13477_v41  ;;  %v13479_v43 = vsub.f32 %v13462_v29, %v13477_v41 }
0x3979   :  { %v13480_v10 = vmul.f32 %v13478_v42, %v13478_v42  ;;  %v13481_v46 = vmul.f32 %v13479_v43, %v13479_v43  ;;  %v13520_v44 = vpop.permute.xlu1 %13519 }
0x397b   :  { %v13482_v13 = vsel %vm41_vm0, %v13480_v10, 0.0  ;;  %v13485_v47 = vsel %vm41_vm0, %v13481_v46, 0.0 }
0x397c   :  { %13483 = vadd.xlane.f32.xlu0 %v13482_v13 }
0x3980   :  { %13486 = vadd.xlane.f32.xlu0 %v13485_v47 }
0x3996   :  { %13505 = vperm.xlu0 %17400, %v13467_v48  }
0x3a09   :  { %v13484_v50 = vpop.xlane.xlu0 %13483 }
0x3a0a   :  { %v13488_v52 = vsel %vm48_vm1, %v13484_v50, 0.0 }
0x3a0d   :  { %v13487_v51 = vpop.xlane.xlu0 %13486 }
0x3a0e   :  { %v13489_v56 = vsel %vm48_vm1, %v13487_v51, 0.0 }
0x3a0f   :  { %v13490_v30 = vadd.f32 %v13489_v56, %v13488_v52 }
0x3a11   :  { %v13491_v31 = vmul.f32 0.03125, %v13490_v30 }
0x3a13   :  { %v13492_v60 = vadd.f32 1e-05, %v13491_v31 }
0x3a15   :  { %17603 = vrsqrt.f32 %v13492_v60  ;;  %v13506_v49 = vpop.permute.xlu0 %13505 }
0x3a1f   :  { %v17604_v61 = vpop.eup %17603 }
0x3a20   :  { %v13494_v62 = vmul.f32 %v17604_v61, %v13478_v42  ;;  %v13495_v24 = vmul.f32 %v17604_v61, %v13479_v43 }
0x3a22   :  { %v13501_v63 = vmul.f32 %v13499_v54, %v13494_v62  ;;  %v13502_v2 = vmul.f32 %v13499_v54, %v13495_v24  ;;  %v14881_v24 = vld [vmem:[%s19873_s5 + $0x4] sm:$0xf] }
0x3a24   :  { %v13508_v3 = vadd.f32 %v13506_v49, %v13501_v63  ;;  %v13509_v6 = vadd.f32 %v13506_v49, %v13502_v2 }
0x3a26   :  { %v13510_v7 = vmax.f32 %v13508_v3, 0.0  ;;  %v13511_v0 = vmax.f32 %v13509_v6, 0.0  ;;  %v13660_v3 = vpack.c.bf16 %v14881_v24, %v14881_v24  ;;  %v14892_v24 = vld [vmem:[%s19870_s2 + $0xf4] sm:$0xf] }
0x3a28   :  { %v13514_v8 = vpack.c.bf16 %v13510_v7, %v13510_v7  ;;  %v13515_v5 = vpack.c.bf16 %v13511_v0, %v13511_v0 }
0x3a2a   :  { %v13526_v11 = vsel %vm108_vm3, %v13514_v8, 0  ;;  %v13569_v12 = vsel %vm108_vm3, %v13515_v5, 0 }
0x3a2b   :  { %16609 = vmatpush3.bf16.msra.mxu1 %v13526_v11  ;;  %16615 = vmatpush3.bf16.msra.mxu0 %v13569_v12 }
0x3a2c   :  { %16620 = vmatprep.subr.bf16.mxu1 %v17668_v19  ;;  %16626 = vmatprep.subr.bf16.mxu0 %v17668_v19 }
0x3a2e   :  { %16611 = vmatmul.mubr.msk.bf16.vlgmr.msra.gmra.mrb[80].mxu1 %vm104_vm4, %v13513_v14  ;;  %16617 = vmatmul.mubr.msk.bf16.vlgmr.msra.gmra.mrb[84].mxu0 %vm104_vm4, %v13513_v14 }
0x3a2f   :  { %16622 = vmatprep.mubr.msk.bf16.mxu1 %vm17669_vm2, %v17668_v19  ;;  %16628 = vmatprep.mubr.msk.bf16.mxu0 %vm17669_vm2, %v17668_v19 }
0x3b01   :  { %v13562_v23 = vpop.f32.mrb[80].mxu1  ;;  %v13605_v15 = vpop.f32.mrb[84].mxu0 }
0x3b02   :  { %v13563_v25 = vadd.f32 %v13562_v23, %v13520_v44  ;;  %v13606_v16 = vadd.f32 %v13605_v15, %v13520_v44  ;;  %v16612_v26 = vpop.f32.mrb[81].mxu1  ;;  %v16618_v17 = vpop.f32.mrb[85].mxu0 }
0x3b03   :  { %v13565_v18 = vpop.f32.mrb[82].mxu1  ;;  %v13608_v20 = vpop.f32.mrb[86].mxu0 }
0x3b04   :  { %v16613_v45 = vpop.f32.mrb[83].mxu1  ;;  %v16619_v22 = vpop.f32.mrb[87].mxu0  ;;  %v13614_v21 = vsel %vm41_vm0, %v13563_v25, 0.0  ;;  %v13617_v35 = vsel %vm41_vm0, %v13606_v16, 0.0 }
0x3b05   :  { %13615 = vadd.xlane.f32.xlu1 %v13614_v21  ;;  %13618 = vadd.xlane.f32.xlu0 %v13617_v35 }
0x3b92   :  { %v13616_v36 = vpop.xlane.xlu1 %13615  ;;  %v13619_v1 = vpop.xlane.xlu0 %13618 }
0x3b93   :  { %v13620_v57 = vsel %vm48_vm1, %v13616_v36, 0.0  ;;  %v13621_v27 = vsel %vm48_vm1, %v13619_v1, 0.0 }
0x3b94   :  { %v13622_v29 = vadd.f32 %v13621_v27, %v13620_v57  ;;  %v14887_v27 = vld [vmem:[%s19869_s1 + $0xa0] sm:$0xf] }
0x3b96   :  { %v13623_v32 = vmul.f32 0.03125, %v13622_v29 }
0x3b98   :  { %v13624_v37 = vsub.f32 %v13563_v25, %v13623_v32  ;;  %v13625_v28 = vsub.f32 %v13606_v16, %v13623_v32 }
0x3b9a   :  { %v13627_v38 = vmul.f32 %v13625_v28, %v13625_v28  ;;  %v13626_v33 = vmul.f32 %v13624_v37, %v13624_v37 }
0x3b9c   :  { %v13631_v9 = vsel %vm41_vm0, %v13627_v38, 0.0  ;;  %v13628_v34 = vsel %vm41_vm0, %v13626_v33, 0.0 }
0x3b9d   :  { %13632 = vadd.xlane.f32.xlu1 %v13631_v9  ;;  %13629 = vadd.xlane.f32.xlu0 %v13628_v34 }
0x3bae   :  { %13651 = vperm.xlu1 %17399, %v14880_v53  }
0x3bb2   :  { %13667 = vperm.xlu1 %17399, %v14882_v55  }
0x3bb3   :  { %13644 = vperm.xlu0 %17400, %v14879_v39   ;;  %v14888_v39 = vld [vmem:[%s19869_s1 + $0xa4] sm:$0xf] }
0x3c2a   :  { %v13633_v40 = vpop.xlane.xlu1 %13632  ;;  %v13630_v41 = vpop.xlane.xlu0 %13629 }
0x3c2b   :  { %v13635_v42 = vsel %vm48_vm1, %v13633_v40, 0.0  ;;  %v13634_v43 = vsel %vm48_vm1, %v13630_v41, 0.0 }
0x3c2c   :  { %v13636_v10 = vadd.f32 %v13635_v42, %v13634_v43 }
0x3c2e   :  { %v13637_v13 = vmul.f32 0.03125, %v13636_v10  ;;  %v13652_v30 = vpop.permute.xlu1 %13651 }
0x3c30   :  { %v13638_v46 = vadd.f32 1e-05, %v13637_v13 }
0x3c32   :  { %17605 = vrsqrt.f32 %v13638_v46  ;;  %v13645_v51 = vpop.permute.xlu0 %13644  ;;  %v13668_v6 = vpop.permute.xlu1 %13667 }
0x3c3c   :  { %v17606_v47 = vpop.eup %17605 }
0x3c3d   :  { %v13640_v48 = vmul.f32 %v17606_v47, %v13624_v37  ;;  %v13641_v50 = vmul.f32 %v17606_v47, %v13625_v28 }
0x3c3f   :  { %v13647_v52 = vmul.f32 %v13645_v51, %v13640_v48  ;;  %v13648_v56 = vmul.f32 %v13645_v51, %v13641_v50 }
0x3c41   :  { %v13654_v31 = vadd.f32 %v13652_v30, %v13647_v52  ;;  %v13655_v60 = vadd.f32 %v13652_v30, %v13648_v56 }
0x3c43   :  { %v13656_v61 = vmax.f32 %v13654_v31, 0.0  ;;  %v13657_v62 = vmax.f32 %v13655_v60, 0.0 }
0x3c45   :  { %v13661_v54 = vpack.c.bf16 %v13656_v61, %v13656_v61  ;;  %v13662_v63 = vpack.c.bf16 %v13657_v62, %v13657_v62 }
0x3c47   :  { %v13674_v2 = vsel %vm108_vm3, %v13661_v54, 0  ;;  %v13717_v49 = vsel %vm108_vm3, %v13662_v63, 0 }
0x3c48   :  { %16621 = vmatpush3.bf16.msra.mxu1 %v13674_v2  ;;  %16627 = vmatpush3.bf16.msra.mxu0 %v13717_v49 }
0x3c49   :  { %16632 = vmatprep.subr.bf16.mxu1 %v17668_v19  ;;  %16638 = vmatprep.subr.bf16.mxu0 %v17668_v19 }
0x3c4b   :  { %16623 = vmatmul.mubr.msk.bf16.vlgmr.msra.gmra.mrb[84].mxu1 %vm104_vm4, %v13660_v3  ;;  %16629 = vmatmul.mubr.msk.bf16.vlgmr.msra.gmra.mrb[88].mxu0 %vm104_vm4, %v13660_v3 }
0x3c4c   :  { %16634 = vmatprep.mubr.msk.bf16.mxu1 %vm17669_vm2, %v17668_v19  ;;  %16640 = vmatprep.mubr.msk.bf16.mxu0 %vm17669_vm2, %v17668_v19 }
0x3d1e   :  { %v13710_v7 = vpop.f32.mrb[84].mxu1  ;;  %v13753_v0 = vpop.f32.mrb[88].mxu0 }
0x3d1f   :  { %v13711_v4 = vadd.f32 %v13710_v7, %v13668_v6  ;;  %v13754_v8 = vadd.f32 %v13753_v0, %v13668_v6  ;;  %v16624_v5 = vpop.f32.mrb[85].mxu1  ;;  %v16630_v11 = vpop.f32.mrb[89].mxu0  ;;  %v13846_v6 = vpack.c.bf16 %v14892_v24, %v14892_v24 }
0x3d20   :  { %v13713_v12 = vpop.f32.mrb[86].mxu1  ;;  %v13756_v14 = vpop.f32.mrb[90].mxu0  ;;  %v14891_v11 = vld [vmem:[%s19870_s2 + $0xf0] sm:$0xf] }
0x3d21   :  { %v14885_v44 = vmul.f32 -1.442695, %v13711_v4  ;;  %v14886_v23 = vmul.f32 -1.442695, %v13754_v8  ;;  %v16625_v15 = vpop.f32.mrb[87].mxu1  ;;  %v16631_v25 = vpop.f32.mrb[91].mxu0 }
0x3d23   :  { %17607 = vpow2.f32 %v14885_v44 }
0x3d24   :  { %17609 = vpow2.f32 %v14886_v23 }
0x3d2d   :  { %v17608_v16 = vpop.eup %17607 }
0x3d2e   :  { %v17610_v26 = vpop.eup %17609  ;;  %v13765_v17 = vadd.f32 1.0, %v17608_v16 }
0x3d2f   :  { %v13766_v18 = vadd.f32 1.0, %v17610_v26  ;;  %v13843_v26 = vpack.c.bf16 %v14891_v11, %v14891_v11 }
0x3d30   :  { %17611 = vrcp.f32 %v13765_v17 }
0x3d31   :  { %17613 = vrcp.f32 %v13766_v18 }
0x3d3a   :  { %v17612_v20 = vpop.eup %17611 }
0x3d3b   :  { %v17614_v45 = vpop.eup %17613  ;;  %v13771_v22 = vadd.f32 1.0, %v17612_v20 }
0x3d3c   :  { %v13772_v21 = vadd.f32 1.0, %v17614_v45 }
0x3d3d   :  { %v19716_v35 = vmul.f32 %v13771_v22, %v19878_v58 }
0x3d3e   :  { %v19719_v36 = vmul.f32 %v13772_v21, %v19879_v59 }
0x3d3f   :  { %v13789_v1 = vsel %vm41_vm0, %v19716_v35, 0.0 }
0x3d40   :  { %13790 = vadd.xlane.f32.xlu0 %v13789_v1  ;;  %v13792_v57 = vsel %vm41_vm0, %v19719_v36, 0.0  ;;  %v14893_v1 = vld [vmem:[%s19870_s2 + $0xf8] sm:$0xf] }
0x3d41   :  { %13793 = vadd.xlane.f32.xlu1 %v13792_v57  ;;  %v14035_v57 = vpack.c.bf16 %v14893_v1, %v14893_v1 }
0x3d52   :  { %13819 = vperm.xlu1 %17399, %v14887_v27  }
0x3dcd   :  { %v13791_v29 = vpop.xlane.xlu0 %13790 }
0x3dce   :  { %v13795_v58 = vsel %vm48_vm1, %v13791_v29, 0.0  ;;  %v13794_v32 = vpop.xlane.xlu1 %13793 }
0x3dcf   :  { %v13796_v59 = vsel %vm48_vm1, %v13794_v32, 0.0 }
0x3dd0   :  { %v13797_v37 = vadd.f32 %v13796_v59, %v13795_v58 }
0x3dd2   :  { %v13798_v28 = vmul.f32 0.03125, %v13797_v37  ;;  %v13820_v51 = vpop.permute.xlu1 %13819 }
0x3dd4   :  { %v13799_v38 = vsub.f32 %v19716_v35, %v13798_v28  ;;  %v13800_v33 = vsub.f32 %v19719_v36, %v13798_v28 }
0x3dd6   :  { %v13801_v9 = vmul.f32 %v13799_v38, %v13799_v38  ;;  %v13802_v53 = vmul.f32 %v13800_v33, %v13800_v33 }
0x3dd8   :  { %v13803_v34 = vsel %vm41_vm0, %v13801_v9, 0.0  ;;  %v13806_v55 = vsel %vm41_vm0, %v13802_v53, 0.0 }
0x3dd9   :  { %13804 = vadd.xlane.f32.xlu0 %v13803_v34  ;;  %v14889_v34 = vld [vmem:[%s19869_s1 + $0xa8] sm:$0xf] }
0x3ddd   :  { %13807 = vadd.xlane.f32.xlu0 %v13806_v55 }
0x3df3   :  { %13826 = vperm.xlu0 %17400, %v14888_v39  }
0x3e66   :  { %v13805_v40 = vpop.xlane.xlu0 %13804 }
0x3e67   :  { %v13809_v42 = vsel %vm48_vm1, %v13805_v40, 0.0 }
0x3e6a   :  { %v13808_v41 = vpop.xlane.xlu0 %13807 }
0x3e6b   :  { %v13810_v43 = vsel %vm48_vm1, %v13808_v41, 0.0 }
0x3e6c   :  { %v13811_v10 = vadd.f32 %v13810_v43, %v13809_v42 }
0x3e6e   :  { %v13812_v13 = vmul.f32 0.03125, %v13811_v10 }
0x3e70   :  { %v13813_v46 = vadd.f32 1e-05, %v13812_v13 }
0x3e72   :  { %17615 = vrsqrt.f32 %v13813_v46  ;;  %v13827_v30 = vpop.permute.xlu0 %13826 }
0x3e7c   :  { %v17616_v47 = vpop.eup %17615 }
0x3e7d   :  { %v13815_v48 = vmul.f32 %v17616_v47, %v13799_v38  ;;  %v13816_v50 = vmul.f32 %v17616_v47, %v13800_v33 }
0x3e7f   :  { %v13822_v52 = vmul.f32 %v13820_v51, %v13815_v48  ;;  %v13823_v56 = vmul.f32 %v13820_v51, %v13816_v50  ;;  %v14890_v50 = vld [vmem:[%s19869_s1 + $0xac] sm:$0xf] }
0x3e81   :  { %v13829_v31 = vadd.f32 %v13827_v30, %v13822_v52  ;;  %v13830_v60 = vadd.f32 %v13827_v30, %v13823_v56 }
0x3e83   :  { %v13831_v61 = vmax.f32 %v13829_v31, 0.0  ;;  %v13832_v62 = vmax.f32 %v13830_v60, 0.0 }
0x3e85   :  { %v17551_v54 = vpack.i.bf16 %v13832_v62, %v13831_v61  ;;  %v13847_v63 = vpack.c.bf16 %v13831_v61, %v13831_v61  ;;  %v13848_v2 = vpack.c.bf16 %v13832_v62, %v13832_v62 }
0x3e87   :  { %17552 = vrot.lane.b32.xlu1 %v17551_v54, %s17670_s10  ;;  %v13853_v49 = vsel %vm108_vm3, %v13847_v63, 0  ;;  %v13896_v3 = vsel %vm108_vm3, %v13848_v2, 0 }
0x3e88   :  { %16633 = vmatpush3.bf16.msra.mxu1 %v13853_v49  ;;  %16639 = vmatpush3.bf16.msra.mxu0 %v13896_v3 }
0x3e89   :  { %16644 = vmatprep.subr.bf16.mxu1 %v17668_v19  ;;  %16650 = vmatprep.subr.bf16.mxu0 %v17668_v19 }
0x3e8b   :  { %17557 = vrot.lane.b32.xlu1 %v17551_v54, %s17671_s11  ;;  %16635 = vmatmul.mubr.msk.bf16.vlgmr.msra.gmra.mrb[88].mxu1 %vm104_vm4, %v13846_v6 }
0x3e8c   :  { %16641 = vmatmul.mubr.msk.bf16.vlgmr.msra.gmra.mrb[92].mxu0 %vm104_vm4, %v13846_v6  ;;  %16646 = vmatprep.mubr.msk.bf16.mxu1 %vm17669_vm2, %v17668_v19 }
0x3e8d   :  { %16652 = vmatprep.mubr.msk.bf16.mxu0 %vm17669_vm2, %v17668_v19 }
0x3ef9   :  { %v17553_v7 = vpop.permute.xlu1 %17552 }
0x3efa   :  { %v17555_v0 = vunpack.i.h.bf16 %v17553_v7  ;;  %v17554_v4 = vunpack.i.l.bf16 %v17553_v7 }
0x3efc   :  { %v13842_v8 = vsel %vm95_vm5, 0.0, %v17555_v0  ;;  %v13841_v5 = vsel %vm95_vm5, 0.0, %v17554_v4 }
0x3efd   :  { %v13845_v12 = vpack.c.bf16 %v13842_v8, %v13842_v8  ;;  %v13844_v14 = vpack.c.bf16 %v13841_v5, %v13841_v5  ;;  %v17558_v44 = vpop.permute.xlu1 %17557  ;;  %v14895_v8 = vld [vmem:[%s19870_s2 + $0x100] sm:$0xf] }
0x3efe   :  { %v17560_v23 = vunpack.i.h.bf16 %v17558_v44  ;;  %v17559_v15 = vunpack.i.l.bf16 %v17558_v44 }
0x3eff   :  { %v13985_v25 = vsel %vm108_vm3, %v13845_v12, 0  ;;  %v13942_v16 = vsel %vm108_vm3, %v13844_v14, 0 }
0x3f00   :  { %v14034_v17 = vsel %vm290_vm6, %v17560_v23, 0.0  ;;  %v14033_v18 = vsel %vm290_vm6, %v17559_v15, 0.0  ;;  %16645 = vmatpush3.bf16.msra.mxu1 %v13942_v16  ;;  %16651 = vmatpush3.bf16.msra.mxu0 %v13985_v25  ;;  %v14186_v23 = vpack.c.bf16 %v14895_v8, %v14895_v8 }
0x3f01   :  { %v14037_v20 = vpack.c.bf16 %v14034_v17, %v14034_v17  ;;  %v14036_v45 = vpack.c.bf16 %v14033_v18, %v14033_v18  ;;  %16656 = vmatprep.subr.bf16.mxu1 %v17668_v19  ;;  %16662 = vmatprep.subr.bf16.mxu0 %v17668_v19  ;;  %v14894_v18 = vld [vmem:[%s19870_s2 + $0xfc] sm:$0xf] }
0x3f03   :  { %v14085_v22 = vsel %vm108_vm3, %v14037_v20, 0  ;;  %v14042_v21 = vsel %vm108_vm3, %v14036_v45, 0  ;;  %16647 = vmatmul.mubr.msk.bf16.vlgmr.msra.gmra.mrb[88].mxu1 %vm104_vm4, %v13843_v26  ;;  %16653 = vmatmul.mubr.msk.bf16.vlgmr.msra.gmra.mrb[92].mxu0 %vm104_vm4, %v13843_v26 }
0x3f04   :  { %16657 = vmatpush3.bf16.msra.mxu1 %v14042_v21  ;;  %16663 = vmatpush3.bf16.msra.mxu0 %v14085_v22 }
0x3f05   :  { %16658 = vmatprep.mubr.msk.bf16.mxu1 %vm17669_vm2, %v17668_v19  ;;  %16664 = vmatprep.mubr.msk.bf16.mxu0 %vm17669_vm2, %v17668_v19 }
0x3f06   :  { %16668 = vmatprep.subr.bf16.mxu1 %v17668_v19  ;;  %16674 = vmatprep.subr.bf16.mxu0 %v17668_v19 }
0x3f0f   :  { %16659 = vmatmul.mubr.msk.bf16.vlgmr.msra.gmra.mrb[88].mxu1 %vm104_vm4, %v14035_v57  ;;  %16665 = vmatmul.mubr.msk.bf16.vlgmr.msra.gmra.mrb[92].mxu0 %vm104_vm4, %v14035_v57 }
0x3f10   :  { %16670 = vmatprep.mubr.msk.bf16.mxu1 %vm17669_vm2, %v17668_v19  ;;  %16676 = vmatprep.mubr.msk.bf16.mxu0 %vm17669_vm2, %v17668_v19 }
0x3fe2   :  { %v14078_v27 = vpop.f32.mrb[88].mxu1  ;;  %v14121_v29 = vpop.f32.mrb[92].mxu0 }
0x3fe3   :  { %v16660_v58 = vpop.f32.mrb[89].mxu1  ;;  %v16666_v32 = vpop.f32.mrb[93].mxu0  ;;  %v14129_v59 = vsel %vm41_vm0, %v14078_v27, 0.0  ;;  %v14132_v37 = vsel %vm41_vm0, %v14121_v29, 0.0 }
0x3fe4   :  { %14130 = vadd.xlane.f32.xlu0 %v14129_v59  ;;  %v14081_v28 = vpop.f32.mrb[90].mxu1  ;;  %14133 = vadd.xlane.f32.xlu1 %v14132_v37  ;;  %v14124_v38 = vpop.f32.mrb[94].mxu0 }
0x3fe5   :  { %v16661_v33 = vpop.f32.mrb[91].mxu1  ;;  %v16667_v9 = vpop.f32.mrb[95].mxu0 }
0x3fe6   :  { %v14896_v33 = vld [vmem:[%s19870_s2 + $0x104] sm:$0xf] }
0x3fe7   :  { %v14375_v9 = vpack.c.bf16 %v14896_v33, %v14896_v33 }
0x3ff5   :  { %14159 = vperm.xlu1 %17399, %v14889_v34   ;;  %v14470_v34 = vpack.c.bf16 %v19716_v35, %v19716_v35  ;;  %v14897_v35 = vld [vmem:[%s19871_s3 + $0x28] sm:$0xf] }
0x4071   :  { %v14131_v53 = vpop.xlane.xlu0 %14130  ;;  %v14134_v55 = vpop.xlane.xlu1 %14133 }
0x4072   :  { %v14135_v39 = vsel %vm48_vm1, %v14131_v53, 0.0  ;;  %v14136_v40 = vsel %vm48_vm1, %v14134_v55, 0.0  ;;  %v14471_v53 = vpack.c.bf16 %v19719_v36, %v19719_v36  ;;  %v14476_v55 = vsel %vm108_vm3, %v14470_v34, 0 }
0x4073   :  { %v14137_v41 = vadd.f32 %v14136_v40, %v14135_v39  ;;  %v14469_v36 = vpack.c.bf16 %v14897_v35, %v14897_v35 }
0x4074   :  { %v14519_v39 = vsel %vm108_vm3, %v14471_v53, 0 }
0x4075   :  { %v14138_v42 = vmul.f32 0.03125, %v14137_v41  ;;  %v14160_v63 = vpop.permute.xlu1 %14159 }
0x4077   :  { %v14139_v43 = vsub.f32 %v14078_v27, %v14138_v42  ;;  %v14140_v10 = vsub.f32 %v14121_v29, %v14138_v42  ;;  %v14183_v29 = vpack.c.bf16 %v14894_v18, %v14894_v18 }
0x4079   :  { %v14141_v13 = vmul.f32 %v14139_v43, %v14139_v43  ;;  %v14142_v47 = vmul.f32 %v14140_v10, %v14140_v10 }
0x407b   :  { %v14143_v46 = vsel %vm41_vm0, %v14141_v13, 0.0  ;;  %v14146_v48 = vsel %vm41_vm0, %v14142_v47, 0.0 }
0x407c   :  { %14144 = vadd.xlane.f32.xlu0 %v14143_v46 }
0x4080   :  { %14147 = vadd.xlane.f32.xlu0 %v14146_v48 }
0x4096   :  { %14166 = vperm.xlu0 %17400, %v14890_v50  }
0x4109   :  { %v14145_v51 = vpop.xlane.xlu0 %14144 }
0x410a   :  { %v14149_v56 = vsel %vm48_vm1, %v14145_v51, 0.0 }
0x410d   :  { %v14148_v52 = vpop.xlane.xlu0 %14147 }
0x410e   :  { %v14150_v30 = vsel %vm48_vm1, %v14148_v52, 0.0 }
0x410f   :  { %v14151_v31 = vadd.f32 %v14150_v30, %v14149_v56 }
0x4111   :  { %v14152_v60 = vmul.f32 0.03125, %v14151_v31 }
0x4113   :  { %v14153_v61 = vadd.f32 1e-05, %v14152_v60 }
0x4115   :  { %17617 = vrsqrt.f32 %v14153_v61  ;;  %v14167_v3 = vpop.permute.xlu0 %14166 }
0x411f   :  { %v17618_v62 = vpop.eup %17617 }
0x4120   :  { %v14155_v24 = vmul.f32 %v17618_v62, %v14139_v43  ;;  %v14156_v54 = vmul.f32 %v17618_v62, %v14140_v10 }
0x4122   :  { %v14162_v2 = vmul.f32 %v14160_v63, %v14155_v24  ;;  %v14163_v49 = vmul.f32 %v14160_v63, %v14156_v54 }
0x4124   :  { %v14169_v6 = vadd.f32 %v14167_v3, %v14162_v2  ;;  %v14170_v7 = vadd.f32 %v14167_v3, %v14163_v49 }
0x4126   :  { %v14171_v0 = vmax.f32 %v14169_v6, 0.0  ;;  %v14172_v4 = vmax.f32 %v14170_v7, 0.0 }
0x4128   :  { %v17561_v5 = vpack.i.bf16 %v14172_v4, %v14171_v0  ;;  %v14187_v11 = vpack.c.bf16 %v14171_v0, %v14171_v0  ;;  %v14188_v12 = vpack.c.bf16 %v14172_v4, %v14172_v4 }
0x412a   :  { %17562 = vrot.lane.b32.xlu1 %v17561_v5, %s17670_s10  ;;  %v14193_v14 = vsel %vm108_vm3, %v14187_v11, 0  ;;  %v14236_v44 = vsel %vm108_vm3, %v14188_v12, 0 }
0x412b   :  { %16669 = vmatpush3.bf16.msra.mxu1 %v14193_v14  ;;  %16675 = vmatpush3.bf16.msra.mxu0 %v14236_v44 }
0x412c   :  { %16680 = vmatprep.subr.bf16.mxu1 %v17668_v19  ;;  %16686 = vmatprep.subr.bf16.mxu0 %v17668_v19 }
0x412e   :  { %17567 = vrot.lane.b32.xlu1 %v17561_v5, %s17671_s11  ;;  %16671 = vmatmul.mubr.msk.bf16.vlgmr.msra.gmra.mrb[92].mxu1 %vm104_vm4, %v14186_v23 }
0x412f   :  { %16677 = vmatmul.mubr.msk.bf16.vlgmr.msra.gmra.mrb[96].mxu0 %vm104_vm4, %v14186_v23  ;;  %16682 = vmatprep.mubr.msk.bf16.mxu1 %vm17669_vm2, %v17668_v19 }
0x4130   :  { %16688 = vmatprep.mubr.msk.bf16.mxu0 %vm17669_vm2, %v17668_v19 }
0x419c   :  { %v17563_v15 = vpop.permute.xlu1 %17562 }
0x419d   :  { %v17565_v25 = vunpack.i.h.bf16 %v17563_v15  ;;  %v17564_v16 = vunpack.i.l.bf16 %v17563_v15 }
0x419f   :  { %v14182_v26 = vsel %vm95_vm5, 0.0, %v17565_v25  ;;  %v14181_v17 = vsel %vm95_vm5, 0.0, %v17564_v16 }
0x41a0   :  { %v14185_v20 = vpack.c.bf16 %v14182_v26, %v14182_v26  ;;  %v14184_v45 = vpack.c.bf16 %v14181_v17, %v14181_v17  ;;  %v17568_v22 = vpop.permute.xlu1 %17567 }
0x41a1   :  { %v17570_v21 = vunpack.i.h.bf16 %v17568_v22  ;;  %v17569_v1 = vunpack.i.l.bf16 %v17568_v22 }
0x41a2   :  { %v14325_v57 = vsel %vm108_vm3, %v14185_v20, 0  ;;  %v14282_v27 = vsel %vm108_vm3, %v14184_v45, 0 }
0x41a3   :  { %v14374_v58 = vsel %vm290_vm6, %v17570_v21, 0.0  ;;  %v14373_v32 = vsel %vm290_vm6, %v17569_v1, 0.0  ;;  %16681 = vmatpush3.bf16.msra.mxu1 %v14282_v27  ;;  %16687 = vmatpush3.bf16.msra.mxu0 %v14325_v57 }
0x41a4   :  { %v14377_v59 = vpack.c.bf16 %v14374_v58, %v14374_v58  ;;  %v14376_v37 = vpack.c.bf16 %v14373_v32, %v14373_v32  ;;  %16692 = vmatprep.subr.bf16.mxu1 %v17668_v19  ;;  %16698 = vmatprep.subr.bf16.mxu0 %v17668_v19 }
0x41a6   :  { %v14425_v28 = vsel %vm108_vm3, %v14377_v59, 0  ;;  %v14382_v38 = vsel %vm108_vm3, %v14376_v37, 0  ;;  %16683 = vmatmul.mubr.msk.bf16.vlgmr.msra.gmra.mrb[92].mxu1 %vm104_vm4, %v14183_v29  ;;  %16689 = vmatmul.mubr.msk.bf16.vlgmr.msra.gmra.mrb[96].mxu0 %vm104_vm4, %v14183_v29 }
0x41a7   :  { %16693 = vmatpush3.bf16.msra.mxu1 %v14382_v38  ;;  %16699 = vmatpush3.bf16.msra.mxu0 %v14425_v28 }
0x41a8   :  { %16694 = vmatprep.mubr.msk.bf16.mxu1 %vm17669_vm2, %v17668_v19  ;;  %16700 = vmatprep.mubr.msk.bf16.mxu0 %vm17669_vm2, %v17668_v19 }
0x41a9   :  { %16704 = vmatprep.subr.bf16.mxu1 %v17668_v19  ;;  %16710 = vmatprep.subr.bf16.mxu0 %v17668_v19 }
0x41b2   :  { %16695 = vmatmul.mubr.msk.bf16.vlgmr.msra.gmra.mrb[92].mxu1 %vm104_vm4, %v14375_v9  ;;  %16701 = vmatmul.mubr.msk.bf16.vlgmr.msra.gmra.mrb[96].mxu0 %vm104_vm4, %v14375_v9 }
0x41b3   :  { %16705 = vmatpush3.bf16.msra.mxu1 %v14476_v55  ;;  %16711 = vmatpush3.bf16.msra.mxu0 %v14519_v39 }
0x41b4   :  { %16706 = vmatprep.mubr.msk.bf16.mxu1 %vm17669_vm2, %v17668_v19  ;;  %16712 = vmatprep.mubr.msk.bf16.mxu0 %vm17669_vm2, %v17668_v19 }
0x41be   :  { %16707 = vmatmul.mubr.msk.bf16.vlgmr.msra.gmra.mrb[92].mxu1 %vm104_vm4, %v14469_v36  ;;  %16713 = vmatmul.mubr.msk.bf16.vlgmr.msra.gmra.mrb[96].mxu0 %vm104_vm4, %v14469_v36 }
0x4291   :  { %v14512_v40 = vpop.f32.mrb[92].mxu1  ;;  %v14555_v41 = vpop.f32.mrb[96].mxu0 }
0x4292   :  { %14563 = vst.msk [vmem:[#allocation2] sm:$0xf] %vm41_vm0, %v14512_v40  ;;  %14564 = vst.msk [vmem:[#allocation2 + $0x4] sm:$0xf] %vm41_vm0, %v14555_v41  ;;  %v16708_v42 = vpop.f32.mrb[93].mxu1  ;;  %v16714_v19 = vpop.f32.mrb[97].mxu0 }
0x4293   :  { %v14515_v43 = vpop.f32.mrb[94].mxu1  ;;  %v14558_v10 = vpop.f32.mrb[98].mxu0 }
0x4294   :  { %17630 = shalt.err (!%p17627_p5)
}
0x4295   :  { %s17631_s12 = scalar_lea.hbm %s19875_s7, 128 }
0x4296   :  { %p17632_p6 = scmp.ne.s32.totalorder %s19875_s7, %s17631_s12  ;;  %p17635_p7 = scmp.lt.u32.totalorder %s17631_s12, %s19875_s7 }
0x4298   :  { %p17637_p8 = pnand %p17635_p7, %p17632_p6 }
0x429a   :  { %17640 = shalt.err (!%p17637_p8)
}
0x429b   :  { %s17681_s14 = smov 64   ;;  %s17682_s15 = smov 4   ;;  %v16709_v13 = vpop.f32.mrb[95].mxu1  ;;  %v16715_v46 = vpop.f32.mrb[99].mxu0 }
0x429c   :  { %14576 = dma.vmem_to_hbm [thread:$0]  %s14571_s30, 128, %s19875_s7, [#allocation3], %s17681_s14, %s17681_s14, %s17682_s15  }
0x429d   :  { %17653 = dma.done.wait [#allocation3], 128  }
0x429e   :  { %17654 = vsyncadd [#allocation3], 4294967168 }
0x429f   :  { %14580 = vsyncpa [#allocation3], 1 }

</bundles_post_ra>
